<compile_context>
chip_gen: v5e
topology: v5e:2x2
jax: 0.10.0
libtpu: 0.0.40
codegen_flags: <defaults>
</compile_context>

<pallas_src>
from functools import partial

import jax
import jax.numpy as jnp
from jax.experimental import pallas as pl
from jax.experimental.pallas import tpu as pltpu


def relu_conv3x3_kernel(x_ref, w_ref, o_ref, *, Hb, W, Wp, Cout):
    # x_ref: (1, 1, (Hb+2)*Wp + 8, Cin) bf16 -- halo'd, zero-padded row block, rows flattened
    # w_ref: (3, Cin, 3*Cout) bf16           -- per-kh weight; columns grouped by kw
    # o_ref: (1, Hb, W*Cout) f32             -- lane-dense output block
    L = Hb * Wp          # flat output rows in this block (padded-width geometry)
    Lp = L + 8           # matmul M (extra zero rows cover the +1/+2 kw-shifted slices)

    xb = jnp.maximum(x_ref[0, 0], 0)      # fused ReLU; relu(0)=0 commutes with zero padding

    # Three wide MXU matmuls, one per kh. The kh shift is a statically *aligned* row offset
    # of the LHS (Wp is a multiple of 8), so no post-matmul kh combination is needed.
    ysum = jnp.dot(xb[0:Lp], w_ref[0], preferred_element_type=jnp.float32)
    ysum = ysum + jnp.dot(xb[Wp:Wp + Lp], w_ref[1], preferred_element_type=jnp.float32)
    ysum = ysum + jnp.dot(xb[2 * Wp:2 * Wp + Lp], w_ref[2], preferred_element_type=jnp.float32)

    # kw combination: 3 slabs of width Cout, shifted by 0/1/2 flat rows. The shifted rows that
    # spill past a row boundary land in junk (padding) columns, which are dropped below.
    acc = (ysum[0:L, 0:Cout]                       # acc initialized from the first tap slab
           + ysum[1:L + 1, Cout:2 * Cout]
           + ysum[2:L + 2, 2 * Cout:3 * Cout])

    # Drop the padded junk columns, store lane-dense (W*Cout lanes).
    out = acc.reshape(Hb, Wp, Cout)[:, :W, :].reshape(1, Hb, W * Cout)
    o_ref[...] = out.astype(o_ref.dtype)


def relu_conv2d(x_nchw, w_oihw, *, block_h=8):
    """Conv2d(Cin, Cout, 3, stride=1, padding=1, bias=False)(ReLU(x)). NCHW in/out.

    bf16 MXU compute with f32 accumulation (intentional).
    """
    N, Cin, H, W = x_nchw.shape
    Cout = w_oihw.shape[0]

    Hb = H if H <= block_h else block_h            # row-block height (block_h kept a multiple of 8)
    num_h = -(-H // Hb)
    H_pad = num_h * Hb                             # pad ragged H instead of falling back to Hb=H
    Wp = -(-(W + 2) // 8) * 8                      # padded row width, multiple of 8 (aligned kh shifts)
    R = (Hb + 2) * Wp + 8                          # halo'd flat rows per block (+8 zero rows)

    # --- host-side glue, fused into one pass: NHWC, zero-pad, bf16 cast, halo'd row blocks ---
    xp = jnp.pad(jnp.transpose(x_nchw, (0, 2, 3, 1)).astype(jnp.bfloat16),
                 ((0, 0), (1, 1 + (H_pad - H)), (1, Wp - (W + 1)), (0, 0)))   # (N, H_pad+2, Wp, Cin)
    ridx = jnp.arange(num_h)[:, None] * Hb + jnp.arange(Hb + 2)[None, :]       # overlapping halo rows
    x_blk = xp[:, ridx].reshape(N, num_h, (Hb + 2) * Wp, Cin)
    x_blk = jnp.pad(x_blk, ((0, 0), (0, 0), (0, 8), (0, 0)))                   # (N, num_h, R, Cin)

    # OIHW -> (3, Cin, 3*Cout): w_k[kh][ci, kw*Cout + co] = w[co, ci, kh, kw]
    w_k = jnp.transpose(w_oihw, (2, 1, 3, 0)).reshape(3, Cin, 3 * Cout).astype(jnp.bfloat16)

    out = pl.pallas_call(
        partial(relu_conv3x3_kernel, Hb=Hb, W=W, Wp=Wp, Cout=Cout),
        out_shape=jax.ShapeDtypeStruct((N, H_pad, W * Cout), jnp.float32),
        grid_spec=pltpu.PrefetchScalarGridSpec(
            num_scalar_prefetch=0,
            grid=(N, num_h),
            in_specs=[
                pl.BlockSpec((1, 1, R, Cin), lambda n, h: (n, h, 0, 0)),    # only this step's halo'd slice
                pl.BlockSpec((3, Cin, 3 * Cout), lambda n, h: (0, 0, 0)),   # weights (166 KB) resident
            ],
            out_specs=pl.BlockSpec((1, Hb, W * Cout), lambda n, h: (n, h, 0)),
        ),
        compiler_params=pltpu.CompilerParams(
            dimension_semantics=("parallel", "parallel")),
    )(x_blk, w_k)

    # (N, H_pad, W*Cout) -> (N, H, W, Cout) -> NCHW
    out = out[:, :H, :].reshape(N, H, W, Cout)
    return jnp.transpose(out, (0, 3, 1, 2))


if __name__ == "__main__":
    # Shapes implied by the module: x37 = (1, 192, 56, 56), Conv2d(192 -> 48, 3x3, pad=1).
    N, Cin, Cout, H, W = 1, 192, 48, 56, 56

    kx, kw_key = jax.random.split(jax.random.PRNGKey(0))
    x37 = jax.random.normal(kx, (N, Cin, H, W), dtype=jnp.float32)
    w = jax.random.normal(kw_key, (Cout, Cin, 3, 3), dtype=jnp.float32) * 0.05

    y = jax.jit(relu_conv2d)(x37, w)
    y = jax.block_until_ready(y)

    # Reference: exact conv of relu(x), fed the same bf16-rounded operands the kernel gives
    # the MXU (both sides accumulate in f32), so tolerances can stay tight.
    xr = jnp.maximum(x37, 0.0).astype(jnp.bfloat16).astype(jnp.float32)
    wr = w.astype(jnp.bfloat16).astype(jnp.float32)
    ref = jax.lax.conv_general_dilated(
        xr, wr, window_strides=(1, 1), padding=((1, 1), (1, 1)),
        dimension_numbers=("NCHW", "OIHW", "NCHW"),
        precision=jax.lax.Precision.HIGHEST)

    assert y.shape == (N, Cout, H, W)
    assert jnp.allclose(y, ref, rtol=1e-3, atol=1e-3), "mismatch vs reference conv"

    print("KERNEL_OK")
</pallas_src>

<mosaic_0001>
module attributes {stable_mosaic.version = 11 : i64} {
  func.func @relu_conv3x3_kernel(%arg0: i32, %arg1: i32, %arg2: memref<1x1x648x192xbf16, #tpu.memory_space<vmem>>, %arg3: memref<3x192x144xbf16, #tpu.memory_space<vmem>>, %arg4: memref<1x8x2688xf32, #tpu.memory_space<vmem>>) attributes {dimension_semantics = [#tpu.dimension_semantics<parallel>, #tpu.dimension_semantics<parallel>], iteration_bounds = array<i64: 1, 7>, scalar_prefetch = 0 : i64, scratch_operands = 0 : i64, tpu.core_type = #tpu.core_type<tc>, window_params = [{transform_indices = @transform_0, window_bounds = array<i64: 1, 1, 648, 192>}, {pipeline_mode = #tpu.pipeline_mode<synchronous>, transform_indices = @transform_1, window_bounds = array<i64: 3, 192, 144>}, {transform_indices = @transform_2, window_bounds = array<i64: 1, 8, 2688>}]} {
    %c0 = arith.constant 0 : index
    %c0_0 = arith.constant 0 : index
    %c0_1 = arith.constant 0 : index
    %c0_2 = arith.constant 0 : index
    %0 = vector.load %arg2[%c0, %c0_0, %c0_1, %c0_2] : memref<1x1x648x192xbf16, #tpu.memory_space<vmem>>, vector<1x1x648x192xbf16>
    %1 = vector.shape_cast %0 : vector<1x1x648x192xbf16> to vector<648x192xbf16>
    %cst = arith.constant 0.000000e+00 : bf16
    %2 = vector.broadcast %cst : bf16 to vector<648x192xbf16>
    %3 = arith.maximumf %1, %2 : vector<648x192xbf16>
    %4 = vector.extract_strided_slice %3 {offsets = [0, 0], sizes = [520, 192], strides = [1, 1]} : vector<648x192xbf16> to vector<520x192xbf16>
    %c0_3 = arith.constant 0 : index
    %c0_4 = arith.constant 0 : index
    %c0_5 = arith.constant 0 : index
    %5 = vector.load %arg3[%c0_3, %c0_4, %c0_5] : memref<3x192x144xbf16, #tpu.memory_space<vmem>>, vector<1x192x144xbf16>
    %6 = vector.shape_cast %5 : vector<1x192x144xbf16> to vector<192x144xbf16>
    %cst_6 = arith.constant dense<0.000000e+00> : vector<520x144xf32>
    %7 = tpu.matmul %4, %6, %cst_6 {dimension_numbers = #tpu.dot_dimension_numbers<[1], [0], [0], [1], [0, 0, 1, 1], [], []>} : vector<520x192xbf16>, vector<192x144xbf16>, vector<520x144xf32> -> vector<520x144xf32>
    %8 = vector.extract_strided_slice %3 {offsets = [64, 0], sizes = [520, 192], strides = [1, 1]} : vector<648x192xbf16> to vector<520x192xbf16>
    %c1 = arith.constant 1 : index
    %c0_7 = arith.constant 0 : index
    %c0_8 = arith.constant 0 : index
    %9 = vector.load %arg3[%c1, %c0_7, %c0_8] : memref<3x192x144xbf16, #tpu.memory_space<vmem>>, vector<1x192x144xbf16>
    %10 = vector.shape_cast %9 : vector<1x192x144xbf16> to vector<192x144xbf16>
    %cst_9 = arith.constant dense<0.000000e+00> : vector<520x144xf32>
    %11 = tpu.matmul %8, %10, %cst_9 {dimension_numbers = #tpu.dot_dimension_numbers<[1], [0], [0], [1], [0, 0, 1, 1], [], []>} : vector<520x192xbf16>, vector<192x144xbf16>, vector<520x144xf32> -> vector<520x144xf32>
    %12 = arith.addf %7, %11 : vector<520x144xf32>
    %13 = vector.extract_strided_slice %3 {offsets = [128, 0], sizes = [520, 192], strides = [1, 1]} : vector<648x192xbf16> to vector<520x192xbf16>
    %c2 = arith.constant 2 : index
    %c0_10 = arith.constant 0 : index
    %c0_11 = arith.constant 0 : index
    %14 = vector.load %arg3[%c2, %c0_10, %c0_11] : memref<3x192x144xbf16, #tpu.memory_space<vmem>>, vector<1x192x144xbf16>
    %15 = vector.shape_cast %14 : vector<1x192x144xbf16> to vector<192x144xbf16>
    %cst_12 = arith.constant dense<0.000000e+00> : vector<520x144xf32>
    %16 = tpu.matmul %13, %15, %cst_12 {dimension_numbers = #tpu.dot_dimension_numbers<[1], [0], [0], [1], [0, 0, 1, 1], [], []>} : vector<520x192xbf16>, vector<192x144xbf16>, vector<520x144xf32> -> vector<520x144xf32>
    %17 = arith.addf %12, %16 : vector<520x144xf32>
    %18 = vector.extract_strided_slice %17 {offsets = [0, 0], sizes = [512, 48], strides = [1, 1]} : vector<520x144xf32> to vector<512x48xf32>
    %19 = vector.extract_strided_slice %17 {offsets = [1, 48], sizes = [512, 48], strides = [1, 1]} : vector<520x144xf32> to vector<512x48xf32>
    %20 = arith.addf %18, %19 : vector<512x48xf32>
    %21 = vector.extract_strided_slice %17 {offsets = [2, 96], sizes = [512, 48], strides = [1, 1]} : vector<520x144xf32> to vector<512x48xf32>
    %22 = arith.addf %20, %21 : vector<512x48xf32>
    %23 = vector.shape_cast %22 : vector<512x48xf32> to vector<8x64x48xf32>
    %24 = vector.extract_strided_slice %23 {offsets = [0, 0, 0], sizes = [8, 56, 48], strides = [1, 1, 1]} : vector<8x64x48xf32> to vector<8x56x48xf32>
    %25 = vector.shape_cast %24 : vector<8x56x48xf32> to vector<1x8x2688xf32>
    %c0_13 = arith.constant 0 : index
    %c0_14 = arith.constant 0 : index
    %c0_15 = arith.constant 0 : index
    %26 = vector.load %arg4[%c0_13, %c0_14, %c0_15] : memref<1x8x2688xf32, #tpu.memory_space<vmem>>, vector<1x8x2688xf32>
    tpu.vector_store %arg4[%c0_13, %c0_14, %c0_15], %25 {strides = array<i32>} : memref<1x8x2688xf32, #tpu.memory_space<vmem>>, vector<1x8x2688xf32>,
    return
  }
  func.func @transform_0(%arg0: i32, %arg1: i32) -> (i32, i32, i32, i32) {
    %c0_i32 = arith.constant 0 : i32
    %c0_i32_0 = arith.constant 0 : i32
    %c0_i32_1 = arith.constant 0 : i32
    return %arg0, %arg1, %c0_i32, %c0_i32_0 : i32, i32, i32, i32
  }
  func.func @transform_1(%arg0: i32, %arg1: i32) -> (i32, i32, i32) {
    %c0_i32 = arith.constant 0 : i32
    %c0_i32_0 = arith.constant 0 : i32
    %c0_i32_1 = arith.constant 0 : i32
    %c0_i32_2 = arith.constant 0 : i32
    return %c0_i32, %c0_i32_0, %c0_i32_1 : i32, i32, i32
  }
  func.func @transform_2(%arg0: i32, %arg1: i32) -> (i32, i32, i32) {
    %c0_i32 = arith.constant 0 : i32
    %c0_i32_0 = arith.constant 0 : i32
    return %arg0, %arg1, %c0_i32 : i32, i32, i32
  }
}

</mosaic_0001>

<bundles_post_ra>
// kernel: relu_conv2d.1
= control target key start
LH: loop header
LB: loop body
LE: loop exit
PB: predicated region body
PF: predicated region fallthrough
CT: control target
= control target key end

     0   :  { %s6748_s9 = smov 0   ;;  %s6750_s10 = smov 0   ;;  %s10734_s0 = inlined_call_operand.vmem [shape: bf16[1,7,648,192], index: 0, kind: input, shape index: {}]   ;;  %s10735_s1 = inlined_call_operand.vmem [shape: bf16[3,192,144], index: 1, kind: input, shape index: {}]   ;;  %s10736_s2 = inlined_call_operand.vmem [shape: f32[1,56,2688], index: 2, kind: output, shape index: {}]  }
   0x1   :  { %s6752_s11 = smov 0  }
   0x2 LB: > { %s21_s12 = sadd.s32 1, %s6718_s10  ;;  %p6054_p0 = scmp.ge.s32.totalorder %s6722_s11, 1  ;;  %s6722_s11 = sphi %s6752_s11, %s12_s11   ;;  %s6718_s10 = sphi %s6750_s10, %s11713_s10   ;;  %s6714_s9 = sphi %s6748_s9, %s11712_s9  }
   0x3   : > { %p22_p1 = scmp.ge.s32.totalorder %s21_s12, 7  ;;  %p132_p2 = scmp.lt.s32.totalorder %s6722_s11, 8 }
   0x5   : > { %s11715_s12 = smov (%p22_p1, %s21_s12), 0  ;;  %p133_p3 = pnand %p6054_p0, %p132_p2 }
   0x7   : > { %136 = sbr.rel (%p133_p3) target bundleno = 2073 (0x819), region = 28 }
   0xc   : > { %v6139_v0 = vld [vmem:[%s10735_s1 + $0x130] sm:$0xf]  ;;  %v6632_v1 = vld [vmem:[%s10735_s1 + $0x134] sm:$0xf0]  ;;  %v6631_v5 = vld [vmem:[%s10735_s1 + $0x134] sm:$0xf] }
   0xd   : > { %v6171_v2 = vld [vmem:[%s10735_s1 + $0x170] sm:$0xf]  ;;  %v6140_v3 = vor.u32 %v6632_v1, %v6139_v0  ;;  %v6640_v4 = vld [vmem:[%s10735_s1 + $0x174] sm:$0xf0]  ;;  %v6141_v6 = vld [vmem:[%s10735_s1 + $0x138] sm:$0xf0] }
   0xe   : > { %v6172_v7 = vor.u32 %v6640_v4, %v6171_v2  ;;  %v6144_v8 = vor.u32 %v6631_v5, %v6141_v6  ;;  %v6639_v9 = vld [vmem:[%s10735_s1 + $0x174] sm:$0xf]  ;;  %v6173_v10 = vld [vmem:[%s10735_s1 + $0x178] sm:$0xf0]  ;;  %v6131_v11 = vld [vmem:[%s10735_s1 + $0x120] sm:$0xf] }
   0xf   : > { %1230 = vmatpush.bf16.msra.mxu0 %v6140_v3  ;;  %v6176_v12 = vor.u32 %v6639_v9, %v6173_v10  ;;  %v6630_v13 = vld [vmem:[%s10735_s1 + $0x124] sm:$0xf0]  ;;  %v6163_v14 = vld [vmem:[%s10735_s1 + $0x160] sm:$0xf]  ;;  %v6629_v18 = vld [vmem:[%s10735_s1 + $0x124] sm:$0xf] }
  0x10   : > { %v6638_v15 = vld [vmem:[%s10735_s1 + $0x164] sm:$0xf0]  ;;  %1406 = vmatpush.bf16.msra.mxu1 %v6172_v7  ;;  %1574 = vmatpush.bf16.msra.mxu2 %v6144_v8  ;;  %v6132_v16 = vor.u32 %v6630_v13, %v6131_v11  ;;  %v6133_v19 = vld [vmem:[%s10735_s1 + $0x128] sm:$0xf0]  ;;  %v6637_v20 = vld [vmem:[%s10735_s1 + $0x164] sm:$0xf] }
  0x11   : > { %v6164_v17 = vor.u32 %v6638_v15, %v6163_v14  ;;  %1750 = vmatpush.bf16.msra.mxu3 %v6176_v12  ;;  %v6136_v21 = vor.u32 %v6629_v18, %v6133_v19  ;;  %v6165_v22 = vld [vmem:[%s10735_s1 + $0x168] sm:$0xf0]  ;;  %v6123_v23 = vld [vmem:[%s10735_s1 + $0x110] sm:$0xf]  ;;  %v6628_v24 = vld [vmem:[%s10735_s1 + $0x114] sm:$0xf0] }
  0x12   : > { %v6168_v25 = vor.u32 %v6637_v20, %v6165_v22  ;;  %v6155_v26 = vld [vmem:[%s10735_s1 + $0x150] sm:$0xf]  ;;  %v6636_v27 = vld [vmem:[%s10735_s1 + $0x154] sm:$0xf0]  ;;  %v6627_v28 = vld [vmem:[%s10735_s1 + $0x114] sm:$0xf]  ;;  %v6124_v29 = vor.u32 %v6628_v24, %v6123_v23 }
  0x13   : > { %1231 = vmatpush.bf16.msra.mxu0 %v6132_v16  ;;  %v6125_v30 = vld [vmem:[%s10735_s1 + $0x118] sm:$0xf0]  ;;  %v6635_v31 = vld [vmem:[%s10735_s1 + $0x154] sm:$0xf]  ;;  %v6156_v33 = vor.u32 %v6636_v27, %v6155_v26  ;;  %v6115_v35 = vld [vmem:[%s10735_s1 + $0x100] sm:$0xf] }
  0x14   : > { %v6157_v32 = vld [vmem:[%s10735_s1 + $0x158] sm:$0xf0]  ;;  %1407 = vmatpush.bf16.msra.mxu1 %v6164_v17  ;;  %1575 = vmatpush.bf16.msra.mxu2 %v6136_v21  ;;  %v6128_v34 = vor.u32 %v6627_v28, %v6125_v30  ;;  %v6626_v36 = vld [vmem:[%s10735_s1 + $0x104] sm:$0xf0]  ;;  %v6147_v37 = vld [vmem:[%s10735_s1 + $0x140] sm:$0xf] }
  0x15   : > { %1751 = vmatpush.bf16.msra.mxu3 %v6168_v25  ;;  %v6160_v38 = vor.u32 %v6635_v31, %v6157_v32  ;;  %v6634_v39 = vld [vmem:[%s10735_s1 + $0x144] sm:$0xf0]  ;;  %v6625_v40 = vld [vmem:[%s10735_s1 + $0x104] sm:$0xf]  ;;  %v6117_v41 = vld [vmem:[%s10735_s1 + $0x108] sm:$0xf0]  ;;  %v6116_v44 = vor.u32 %v6626_v36, %v6115_v35 }
  0x16   : > { %v6633_v42 = vld [vmem:[%s10735_s1 + $0x144] sm:$0xf]  ;;  %v6149_v43 = vld [vmem:[%s10735_s1 + $0x148] sm:$0xf0]  ;;  %p164_p4 = scmp.lt.s32.totalorder %s6714_s9, 6  ;;  %v6148_v47 = vor.u32 %v6634_v39, %v6147_v37  ;;  %v6120_v48 = vor.u32 %v6625_v40, %v6117_v41  ;;  %vm1130_vm0 = vcmask 523264  }
  0x17   : > { %1232 = vmatpush.bf16.msra.mxu0 %v6124_v29  ;;  %v6333_v45 = vld [vmem:[%s10735_s1 + $0xb0] sm:$0xf]  ;;  %v6616_v46 = vld [vmem:[%s10735_s1 + $0xb4] sm:$0xf0]  ;;  %v6152_v51 = vor.u32 %v6633_v42, %v6149_v43  ;;  %v6623_v52 = vld [vmem:[%s10735_s1 + $0xf4] sm:$0xf] }
  0x18   : > { %1408 = vmatpush.bf16.msra.mxu1 %v6156_v33  ;;  %1576 = vmatpush.bf16.msra.mxu2 %v6128_v34  ;;  %s11717_s9 = smov (!%p164_p4, %s6714_s9), 6  ;;  %v6107_v49 = vld [vmem:[%s10735_s1 + $0xf0] sm:$0xf]  ;;  %v6624_v50 = vld [vmem:[%s10735_s1 + $0xf4] sm:$0xf0]  ;;  %v6334_v54 = vor.u32 %v6616_v46, %v6333_v45  ;;  %vm4268_vm1 = vcmask 1045504  }
  0x19   : > { %1752 = vmatpush.bf16.msra.mxu3 %v6160_v38  ;;  %v6109_v53 = vld [vmem:[%s10735_s1 + $0xf8] sm:$0xf0]  ;;  %s6665_s17 = smul.u32 648, %s11717_s9  ;;  %v6108_v55 = vor.u32 %v6624_v50, %v6107_v49  ;;  %v6099_v56 = vld [vmem:[%s10735_s1 + $0xe0] sm:$0xf]  ;;  %vm3859_vm2 = vcmask 1046528  }
  0x1a   : > { %v6301_v57 = vld [vmem:[%s10735_s1 + $0x70] sm:$0xf]  ;;  %v6608_v58 = vld [vmem:[%s10735_s1 + $0x74] sm:$0xf0]  ;;  %v6112_v59 = vor.u32 %v6623_v52, %v6109_v53  ;;  %v6622_v60 = vld [vmem:[%s10735_s1 + $0xe4] sm:$0xf0] }
  0x1b   : > { %1233 = vmatpush.bf16.msra.mxu0 %v6116_v44  ;;  %s6899_s26 = scalar_lea.vmem %s10734_s0, %s6665_s17  ;;  %v6621_v61 = vld [vmem:[%s10735_s1 + $0xe4] sm:$0xf]  ;;  %v6101_v62 = vld [vmem:[%s10735_s1 + $0xe8] sm:$0xf0]  ;;  %v6302_v63 = vor.u32 %v6608_v58, %v6301_v57  ;;  %v6100_v6 = vor.u32 %v6622_v60, %v6099_v56  ;;  %v6091_v8 = vld [vmem:[%s10735_s1 + $0xd0] sm:$0xf] }
  0x1c   : > { %1409 = vmatpush.bf16.msra.mxu1 %v6148_v47  ;;  %1577 = vmatpush.bf16.msra.mxu2 %v6120_v48  ;;  %v189_v0 = vld [vmem:[%s6899_s26 + $0x40] sm:$0xff]  ;;  %v190_v1 = vld [vmem:[%s6899_s26 + $0x48] sm:$0xff]  ;;  %v6104_v7 = vor.u32 %v6621_v61, %v6101_v62  ;;  %v6620_v9 = vld [vmem:[%s10735_s1 + $0xd4] sm:$0xf0]  ;;  %s6724_s25 = smov 32   ;;  %s6725_s27 = smov 80  }
  0x1d   : > { %1753 = vmatpush.bf16.msra.mxu3 %v6152_v51  ;;  %v278_v2 = vunpack.c.l.bf16 %v189_v0  ;;  %v279_v3 = vunpack.c.h.bf16 %v189_v0  ;;  %v280_v4 = vunpack.c.l.bf16 %v190_v1  ;;  %v281_v5 = vunpack.c.h.bf16 %v190_v1  ;;  %v191_v14 = vld [vmem:[%s6899_s26 + $0x50] sm:$0xff]  ;;  %v192_v15 = vld [vmem:[%s6899_s26 + $0x58] sm:$0xff]  ;;  %v6083_v21 = vld [vmem:[%s10735_s1 + $0xc0] sm:$0xf]  ;;  %s6728_s28 = smov 112   ;;  %s6729_s29 = smov 16  }
  0x1e   : > { %v6619_v18 = vld [vmem:[%s10735_s1 + $0xd4] sm:$0xf]  ;;  %v6093_v19 = vld [vmem:[%s10735_s1 + $0xd8] sm:$0xf0]  ;;  %v6092_v20 = vor.u32 %v6620_v9, %v6091_v8  ;;  %v282_v22 = vunpack.c.l.bf16 %v191_v14  ;;  %v283_v23 = vunpack.c.h.bf16 %v191_v14  ;;  %v6618_v26 = vld [vmem:[%s10735_s1 + $0xc4] sm:$0xf0]  ;;  %v284_v27 = vunpack.c.l.bf16 %v192_v15 }
  0x1f   : > { %1234 = vmatpush.bf16.msra.mxu0 %v6108_v55  ;;  %v440_v10 = vmax.f32 %v278_v2, 0.0  ;;  %v441_v11 = vmax.f32 %v279_v3, 0.0  ;;  %v442_v12 = vmax.f32 %v280_v4, 0.0  ;;  %v443_v13 = vmax.f32 %v281_v5, 0.0  ;;  %v6607_v29 = vld [vmem:[%s10735_s1 + $0x74] sm:$0xf] }
  0x20   : > { %2092 = vmatpush.bf16.msrb.mxu1 %v6302_v63  ;;  %1578 = vmatpush.bf16.msra.mxu2 %v6112_v59  ;;  %v285_v28 = vunpack.c.h.bf16 %v192_v15  ;;  %v6303_v30 = vld [vmem:[%s10735_s1 + $0x78] sm:$0xf0]  ;;  %v6096_v31 = vor.u32 %v6619_v18, %v6093_v19  ;;  %v6617_v33 = vld [vmem:[%s10735_s1 + $0xc4] sm:$0xf]  ;;  %v6085_v34 = vld [vmem:[%s10735_s1 + $0xc8] sm:$0xf0]  ;;  %v6084_v37 = vor.u32 %v6618_v26, %v6083_v21 }
  0x21   : > { %2268 = vmatpush.bf16.msrb.mxu3 %v6334_v54  ;;  %v594_v16 = vpack.c.bf16 %v441_v11, %v440_v10  ;;  %v595_v17 = vpack.c.bf16 %v443_v13, %v442_v12  ;;  %v6615_v38 = vld [vmem:[%s10735_s1 + $0xb4] sm:$0xf]  ;;  %v6335_v39 = vld [vmem:[%s10735_s1 + $0xb8] sm:$0xf0]  ;;  %v6306_v40 = vor.u32 %v6607_v29, %v6303_v30  ;;  %v444_v41 = vmax.f32 %v282_v22, 0.0  ;;  %v193_v52 = vld [vmem:[%s6899_s26 + $0x60] sm:$0xff] }
  0x22   : > { %v445_v42 = vmax.f32 %v283_v23, 0.0  ;;  %v446_v43 = vmax.f32 %v284_v27, 0.0  ;;  %v447_v44 = vmax.f32 %v285_v28, 0.0  ;;  %v6088_v45 = vor.u32 %v6617_v33, %v6085_v34  ;;  %v194_v53 = vld [vmem:[%s6899_s26 + $0x68] sm:$0xff]  ;;  %v6293_v19 = vld [vmem:[%s10735_s1 + $0x60] sm:$0xf] }
  0x23   : > { %1235 = vmatpush.bf16.msra.mxu0 %v6100_v6  ;;  %v782_v24 = vunpack.c.h.b16 %v594_v16  ;;  %v784_v25 = vunpack.c.h.b16 %v595_v17  ;;  %v781_v35 = vunpack.c.l.b16 %v594_v16  ;;  %v783_v36 = vunpack.c.l.b16 %v595_v17  ;;  %v195_v6 = vld [vmem:[%s6899_s26 + $0x70] sm:$0xff]  ;;  %v197_v27 = vld [vmem:[%s6899_s26 + $0x80] sm:$0xff]  ;;  %v198_v28 = vld [vmem:[%s6899_s26 + $0x88] sm:$0xff]  ;;  %s6730_s30 = smov 48   ;;  %s6731_s3 = smov 96  }
  0x24   : > { %1579 = vmatpush.bf16.msra.mxu2 %v6104_v7  ;;  %v6338_v47 = vor.u32 %v6615_v38, %v6335_v39  ;;  %v596_v48 = vpack.c.bf16 %v445_v42, %v444_v41  ;;  %v597_v49 = vpack.c.bf16 %v447_v44, %v446_v43  ;;  %v286_v54 = vunpack.c.l.bf16 %v193_v52  ;;  %v196_v7 = vld [vmem:[%s6899_s26 + $0x78] sm:$0xff]  ;;  %v6605_v41 = vld [vmem:[%s10735_s1 + $0x64] sm:$0xf]  ;;  %v6295_v42 = vld [vmem:[%s10735_s1 + $0x68] sm:$0xf0]  ;;  %s6732_s4 = smov 64  }
  0x25   : > { %v6938_v32 = vpack.c.b16 %v784_v25, %v782_v24  ;;  %v6956_v46 = vpack.c.b16 %v783_v36, %v781_v35  ;;  %v287_v56 = vunpack.c.h.bf16 %v193_v52  ;;  %v288_v57 = vunpack.c.l.bf16 %v194_v53 }
  0x26   : > { %v786_v50 = vunpack.c.h.b16 %v596_v48  ;;  %v788_v51 = vunpack.c.h.b16 %v597_v49  ;;  %v289_v58 = vunpack.c.h.bf16 %v194_v53  ;;  %v785_v59 = vunpack.c.l.b16 %v596_v48 }
  0x27   : > { %1236 = vmatpush.bf16.msra.mxu0 %v6092_v20  ;;  %6177 = vmatmul.msk.bf16.vlgmr.msra.gmra.mxu1 %vm1130_vm0, %v6938_v32  ;;  %v787_v60 = vunpack.c.l.b16 %v597_v49  ;;  %v448_v61 = vmax.f32 %v286_v54, 0.0  ;;  %v449_v62 = vmax.f32 %v287_v56, 0.0  ;;  %v450_v63 = vmax.f32 %v288_v57, 0.0  ;;  %v6606_v20 = vld [vmem:[%s10735_s1 + $0x64] sm:$0xf0] }
  0x28   : > { %6210 = vmatmul.msk.bf16.vlgmr.msra.gmra.mxu3 %vm1130_vm0, %v6938_v32  ;;  %1580 = vmatpush.bf16.msra.mxu2 %v6096_v31  ;;  %v6962_v55 = vpack.c.b16 %v788_v51, %v786_v50  ;;  %v451_v0 = vmax.f32 %v289_v58, 0.0  ;;  %v290_v8 = vunpack.c.l.bf16 %v195_v6  ;;  %v291_v9 = vunpack.c.h.bf16 %v195_v6  ;;  %v199_v50 = vld [vmem:[%s6899_s26 + $0x90] sm:$0xff]  ;;  %v200_v51 = vld [vmem:[%s6899_s26 + $0x98] sm:$0xff]  ;;  %v201_v6 = vld [vmem:[%s6899_s26 + $0xa0] sm:$0xff] }
  0x29   : > { %v6968_v1 = vpack.c.b16 %v787_v60, %v785_v59  ;;  %v598_v2 = vpack.c.bf16 %v449_v62, %v448_v61  ;;  %v292_v11 = vunpack.c.l.bf16 %v196_v7  ;;  %v293_v12 = vunpack.c.h.bf16 %v196_v7  ;;  %v202_v7 = vld [vmem:[%s6899_s26 + $0xa8] sm:$0xff] }
  0x2a   : > { %v599_v3 = vpack.c.bf16 %v451_v0, %v450_v63  ;;  %v452_v15 = vmax.f32 %v290_v8, 0.0  ;;  %v453_v16 = vmax.f32 %v291_v9, 0.0  ;;  %v6294_v21 = vor.u32 %v6606_v20, %v6293_v19 }
  0x2b   : > { %1237 = vmatpush.bf16.msra.mxu0 %v6084_v37  ;;  %v790_v4 = vunpack.c.h.b16 %v598_v2  ;;  %v789_v13 = vunpack.c.l.b16 %v598_v2  ;;  %v454_v17 = vmax.f32 %v292_v11, 0.0  ;;  %v455_v18 = vmax.f32 %v293_v12, 0.0 }
  0x2c   : > { %1581 = vmatpush.bf16.msra.mxu2 %v6088_v45  ;;  %v792_v5 = vunpack.c.h.b16 %v599_v3  ;;  %v791_v14 = vunpack.c.l.b16 %v599_v3  ;;  %2093 = vmatpush.bf16.msrb.mxu1 %v6294_v21  ;;  %v600_v23 = vpack.c.bf16 %v453_v16, %v452_v15  ;;  %v294_v29 = vunpack.c.l.bf16 %v197_v27 }
  0x2d   : > { %v601_v24 = vpack.c.bf16 %v455_v18, %v454_v17  ;;  %v295_v30 = vunpack.c.h.bf16 %v197_v27  ;;  %v296_v33 = vunpack.c.l.bf16 %v198_v28  ;;  %v297_v34 = vunpack.c.h.bf16 %v198_v28  ;;  %v204_v27 = vld [vmem:[%s6899_s26 + $0xb8] sm:$0xff] }
  0x2e   : > { %1238 = vmatmul.bf16.vlgmr.msra.gmra.mxu0 %v6956_v46  ;;  %v6974_v10 = vpack.c.b16 %v792_v5, %v790_v4  ;;  %v6986_v22 = vpack.c.b16 %v791_v14, %v789_v13  ;;  %v794_v25 = vunpack.c.h.b16 %v600_v23  ;;  %v793_v35 = vunpack.c.l.b16 %v600_v23 }
  0x2f   : > { %2436 = vmatpush.bf16.msrb.mxu0 %v6306_v40  ;;  %1582 = vmatmul.bf16.vlgmr.msra.gmra.mxu2 %v6956_v46  ;;  %v796_v26 = vunpack.c.h.b16 %v601_v24  ;;  %v795_v36 = vunpack.c.l.b16 %v601_v24  ;;  %v456_v37 = vmax.f32 %v294_v29, 0.0  ;;  %v457_v38 = vmax.f32 %v295_v30, 0.0 }
  0x30   : > { %2612 = vmatpush.bf16.msrb.mxu2 %v6338_v47  ;;  %v458_v39 = vmax.f32 %v296_v33, 0.0  ;;  %v459_v40 = vmax.f32 %v297_v34, 0.0  ;;  %v6298_v43 = vor.u32 %v6605_v41, %v6295_v42  ;;  %v298_v52 = vunpack.c.l.bf16 %v199_v50 }
  0x31   : > { %v6992_v31 = vpack.c.b16 %v796_v26, %v794_v25  ;;  %v7004_v44 = vpack.c.b16 %v795_v36, %v793_v35  ;;  %v602_v45 = vpack.c.bf16 %v457_v38, %v456_v37  ;;  %v299_v53 = vunpack.c.h.bf16 %v199_v50  ;;  %v203_v26 = vld [vmem:[%s6899_s26 + $0xb0] sm:$0xff]  ;;  %v6604_v50 = vld [vmem:[%s10735_s1 + $0x54] sm:$0xf0] }
  0x32   : > { %v603_v47 = vpack.c.bf16 %v459_v40, %v458_v39  ;;  %v300_v54 = vunpack.c.l.bf16 %v200_v51  ;;  %v301_v56 = vunpack.c.h.bf16 %v200_v51  ;;  %v460_v60 = vmax.f32 %v298_v52, 0.0 }
  0x33   : > { %2437 = vmatpush.bf16.msrb.mxu0 %v6298_v43  ;;  %v798_v48 = vunpack.c.h.b16 %v602_v45  ;;  %v797_v58 = vunpack.c.l.b16 %v602_v45  ;;  %v461_v61 = vmax.f32 %v299_v53, 0.0  ;;  %v302_v9 = vunpack.c.l.bf16 %v201_v6  ;;  %v6325_v45 = vld [vmem:[%s10735_s1 + $0xa0] sm:$0xf] }
  0x34   : > { %v800_v49 = vunpack.c.h.b16 %v603_v47  ;;  %v799_v59 = vunpack.c.l.b16 %v603_v47  ;;  %v462_v62 = vmax.f32 %v300_v54, 0.0  ;;  %v463_v63 = vmax.f32 %v301_v56, 0.0  ;;  %v6614_v47 = vld [vmem:[%s10735_s1 + $0xa4] sm:$0xf0]  ;;  %v205_v54 = vld [vmem:[%s6899_s26 + $0xc0] sm:$0xff] }
  0x35   : > { %v604_v2 = vpack.c.bf16 %v461_v61, %v460_v60  ;;  %v303_v11 = vunpack.c.h.bf16 %v201_v6  ;;  %v304_v12 = vunpack.c.l.bf16 %v202_v7  ;;  %v305_v13 = vunpack.c.h.bf16 %v202_v7  ;;  %v206_v56 = vld [vmem:[%s6899_s26 + $0xc8] sm:$0xff] }
  0x36   : > { %v7010_v57 = vpack.c.b16 %v800_v49, %v798_v48  ;;  %v7016_v0 = vpack.c.b16 %v799_v59, %v797_v58  ;;  %v605_v3 = vpack.c.bf16 %v463_v63, %v462_v62  ;;  %v464_v16 = vmax.f32 %v302_v9, 0.0  ;;  %v6285_v49 = vld [vmem:[%s10735_s1 + $0x50] sm:$0xf] }
  0x37   : > { %6178 = vmatmul.msk.bf16.gmra.mxu1 %vm1130_vm0, %v6962_v55  ;;  %v802_v4 = vunpack.c.h.b16 %v604_v2  ;;  %v801_v14 = vunpack.c.l.b16 %v604_v2  ;;  %v465_v17 = vmax.f32 %v303_v11, 0.0  ;;  %v466_v18 = vmax.f32 %v304_v12, 0.0  ;;  %v6613_v12 = vld [vmem:[%s10735_s1 + $0xa4] sm:$0xf] }
  0x38   : > { %6211 = vmatmul.msk.bf16.gmra.mxu3 %vm1130_vm0, %v6962_v55  ;;  %v804_v5 = vunpack.c.h.b16 %v605_v3  ;;  %v803_v15 = vunpack.c.l.b16 %v605_v3  ;;  %v467_v19 = vmax.f32 %v305_v13, 0.0  ;;  %v306_v28 = vunpack.c.l.bf16 %v203_v26  ;;  %v6327_v13 = vld [vmem:[%s10735_s1 + $0xa8] sm:$0xf0] }
  0x39   : > { %v606_v21 = vpack.c.bf16 %v465_v17, %v464_v16  ;;  %v307_v29 = vunpack.c.h.bf16 %v203_v26  ;;  %v308_v30 = vunpack.c.l.bf16 %v204_v27  ;;  %v309_v33 = vunpack.c.h.bf16 %v204_v27  ;;  %v207_v17 = vld [vmem:[%s6899_s26 + $0xd0] sm:$0xff]  ;;  %v6287_v26 = vld [vmem:[%s10735_s1 + $0x58] sm:$0xf0] }
  0x3a   : > { %v7022_v8 = vpack.c.b16 %v804_v5, %v802_v4  ;;  %v7028_v20 = vpack.c.b16 %v803_v15, %v801_v14  ;;  %v607_v23 = vpack.c.bf16 %v467_v19, %v466_v18  ;;  %v468_v37 = vmax.f32 %v306_v28, 0.0  ;;  %v208_v18 = vld [vmem:[%s6899_s26 + $0xd8] sm:$0xff] }
  0x3b   : > { %v806_v24 = vunpack.c.h.b16 %v606_v21  ;;  %v805_v35 = vunpack.c.l.b16 %v606_v21  ;;  %v469_v38 = vmax.f32 %v307_v29, 0.0  ;;  %v470_v39 = vmax.f32 %v308_v30, 0.0 }
  0x3c   : > { %v808_v25 = vunpack.c.h.b16 %v607_v23  ;;  %v807_v36 = vunpack.c.l.b16 %v607_v23  ;;  %v471_v40 = vmax.f32 %v309_v33, 0.0  ;;  %v6326_v48 = vor.u32 %v6614_v47, %v6325_v45 }
  0x3d   : > { %v608_v42 = vpack.c.bf16 %v469_v38, %v468_v37  ;;  %v6286_v51 = vor.u32 %v6604_v50, %v6285_v49  ;;  %v310_v59 = vunpack.c.l.bf16 %v205_v54  ;;  %v311_v60 = vunpack.c.h.bf16 %v205_v54 }
  0x3e   : > { %1243 = vmatmul.bf16.gmra.mxu0 %v6968_v1  ;;  %v7034_v34 = vpack.c.b16 %v808_v25, %v806_v24  ;;  %v7040_v41 = vpack.c.b16 %v807_v36, %v805_v35  ;;  %v609_v43 = vpack.c.bf16 %v471_v40, %v470_v39  ;;  %2269 = vmatpush.bf16.msrb.mxu3 %v6326_v48  ;;  %v312_v61 = vunpack.c.l.bf16 %v206_v56  ;;  %v6603_v25 = vld [vmem:[%s10735_s1 + $0x54] sm:$0xf] }
  0x3f   : > { %1587 = vmatmul.bf16.gmra.mxu2 %v6968_v1  ;;  %v810_v52 = vunpack.c.h.b16 %v608_v42  ;;  %2094 = vmatpush.bf16.msrb.mxu1 %v6286_v51  ;;  %v313_v62 = vunpack.c.h.bf16 %v206_v56  ;;  %v809_v63 = vunpack.c.l.b16 %v608_v42  ;;  %v472_v3 = vmax.f32 %v310_v59, 0.0  ;;  %v209_v51 = vld [vmem:[%s6899_s26 + $0xe0] sm:$0xff] }
  0x40   : > { %v812_v53 = vunpack.c.h.b16 %v609_v43  ;;  %v811_v2 = vunpack.c.l.b16 %v609_v43  ;;  %v473_v4 = vmax.f32 %v311_v60, 0.0  ;;  %v474_v5 = vmax.f32 %v312_v61, 0.0 }
  0x41   : > { %v475_v6 = vmax.f32 %v313_v62, 0.0  ;;  %v6330_v14 = vor.u32 %v6613_v12, %v6327_v13  ;;  %v314_v19 = vunpack.c.l.bf16 %v207_v17  ;;  %v315_v21 = vunpack.c.h.bf16 %v207_v17 }
  0x42   : > { %v7058_v58 = vpack.c.b16 %v812_v53, %v810_v52  ;;  %v7064_v7 = vpack.c.b16 %v811_v2, %v809_v63  ;;  %v610_v9 = vpack.c.bf16 %v473_v4, %v472_v3  ;;  %v316_v23 = vunpack.c.l.bf16 %v208_v18  ;;  %v210_v52 = vld [vmem:[%s6899_s26 + $0xe8] sm:$0xff] }
  0x43   : > { %v611_v11 = vpack.c.bf16 %v475_v6, %v474_v5  ;;  %2613 = vmatpush.bf16.msrb.mxu2 %v6330_v14  ;;  %v317_v24 = vunpack.c.h.bf16 %v208_v18  ;;  %v6290_v28 = vor.u32 %v6603_v25, %v6287_v26  ;;  %v476_v35 = vmax.f32 %v314_v19, 0.0 }
  0x44   : > { %v814_v15 = vunpack.c.h.b16 %v610_v9  ;;  %v813_v30 = vunpack.c.l.b16 %v610_v9  ;;  %v477_v36 = vmax.f32 %v315_v21, 0.0  ;;  %v478_v37 = vmax.f32 %v316_v23, 0.0 }
  0x45   : > { %v816_v16 = vunpack.c.h.b16 %v611_v11  ;;  %v815_v33 = vunpack.c.l.b16 %v611_v11  ;;  %2438 = vmatpush.bf16.msrb.mxu0 %v6290_v28  ;;  %v479_v38 = vmax.f32 %v317_v24, 0.0  ;;  %v318_v59 = vunpack.c.l.bf16 %v209_v51  ;;  %v211_v28 = vld [vmem:[%s6899_s26 + $0xf0] sm:$0xff] }
  0x46   : > { %v612_v43 = vpack.c.bf16 %v477_v36, %v476_v35  ;;  %v319_v62 = vunpack.c.h.bf16 %v209_v51  ;;  %v320_v63 = vunpack.c.l.bf16 %v210_v52  ;;  %v321_v2 = vunpack.c.h.bf16 %v210_v52 }
  0x47   : > { %6179 = vmatmul.msk.bf16.gmra.mxu1 %vm1130_vm0, %v6974_v10  ;;  %v7082_v27 = vpack.c.b16 %v816_v16, %v814_v15  ;;  %v7088_v39 = vpack.c.b16 %v815_v33, %v813_v30  ;;  %v613_v45 = vpack.c.bf16 %v479_v38, %v478_v37  ;;  %v480_v9 = vmax.f32 %v318_v59, 0.0 }
  0x48   : > { %6212 = vmatmul.msk.bf16.gmra.mxu3 %vm1130_vm0, %v6974_v10  ;;  %v818_v49 = vunpack.c.h.b16 %v612_v43  ;;  %v817_v5 = vunpack.c.l.b16 %v612_v43  ;;  %v481_v11 = vmax.f32 %v319_v62, 0.0  ;;  %v482_v12 = vmax.f32 %v320_v63, 0.0 }
  0x49   : > { %v820_v50 = vunpack.c.h.b16 %v613_v45  ;;  %v819_v6 = vunpack.c.l.b16 %v613_v45  ;;  %v483_v13 = vmax.f32 %v321_v2, 0.0  ;;  %v322_v35 = vunpack.c.l.bf16 %v211_v28 }
  0x4a   : > { %v614_v19 = vpack.c.bf16 %v481_v11, %v480_v9  ;;  %v323_v36 = vunpack.c.h.bf16 %v211_v28  ;;  %vm4733_vm3 = vcmask 261120   ;;  %vm4903_vm4 = vcmask 1047556  }
  0x4b   : > { %v7096_v54 = vpack.c.b16 %v820_v50, %v818_v49  ;;  %v7106_v14 = vpack.c.b16 %v819_v6, %v817_v5  ;;  %v615_v21 = vpack.c.bf16 %v483_v13, %v482_v12  ;;  %v484_v51 = vmax.f32 %v322_v35, 0.0  ;;  %v213_v13 = vld [vmem:[%s6899_s26 + $0x100] sm:$0xff] }
  0x4c   : > { %v822_v25 = vunpack.c.h.b16 %v614_v19  ;;  %v821_v49 = vunpack.c.l.b16 %v614_v19  ;;  %v485_v52 = vmax.f32 %v323_v36, 0.0  ;;  %vm5893_vm5 = vcmask 654336  }
  0x4d   : > { %10914 = vst [vmem:[#allocation2_spill] sm:$0xff] %v7096_v54  ;;  %v824_v26 = vunpack.c.h.b16 %v615_v21  ;;  %v823_v50 = vunpack.c.l.b16 %v615_v21  ;;  %v326_v21 = vunpack.c.l.bf16 %v213_v13  ;;  %vm5883_vm6 = vcmask 392192  }
  0x4e   : > { %1248 = vmatmul.bf16.gmra.mxu0 %v6986_v22  ;;  %10915 = vst [vmem:[#allocation3_spill] sm:$0xff] %v7106_v14  ;;  %v616_v63 = vpack.c.bf16 %v485_v52, %v484_v51  ;;  %vm5885_vm7 = vcmask 785408   ;;  %vm5887_vm8 = vcmask 130048   ;;  %vm5890_vm9 = vcmask 916480  }
  0x4f   : > { %1592 = vmatmul.bf16.gmra.mxu2 %v6986_v22  ;;  %v7126_v59 = vpack.c.b16 %v823_v50, %v821_v49 }
  0x50   : > { %v826_v11 = vunpack.c.h.b16 %v616_v63 }
  0x51   : > { %10917 = vst [vmem:[#allocation5_spill] sm:$0xff] %v7126_v59 }
  0x57   : > { %6180 = vmatmul.msk.bf16.gmra.mxu1 %vm1130_vm0, %v6992_v31 }
  0x58   : > { %6213 = vmatmul.msk.bf16.gmra.mxu3 %vm1130_vm0, %v6992_v31 }
  0x5e   : > { %1253 = vmatmul.bf16.gmra.mxu0 %v7004_v44 }
  0x5f   : > { %1597 = vmatmul.bf16.gmra.mxu2 %v7004_v44 }
  0x67   : > { %6181 = vmatmul.msk.bf16.gmra.mxu1 %vm1130_vm0, %v7010_v57 }
  0x68   : > { %6214 = vmatmul.msk.bf16.gmra.mxu3 %vm1130_vm0, %v7010_v57 }
  0x6e   : > { %1258 = vmatmul.bf16.gmra.mxu0 %v7016_v0 }
  0x6f   : > { %1602 = vmatmul.bf16.gmra.mxu2 %v7016_v0 }
  0x77   : > { %6182 = vmatmul.msk.bf16.gmra.mxu1 %vm1130_vm0, %v7022_v8 }
  0x78   : > { %6215 = vmatmul.msk.bf16.gmra.mxu3 %vm1130_vm0, %v7022_v8 }
  0x7e   : > { %1263 = vmatmul.bf16.gmra.mxu0 %v7028_v20 }
  0x7f   : > { %1607 = vmatmul.bf16.gmra.mxu2 %v7028_v20 }
  0x87   : > { %6183 = vmatmul.msk.bf16.gmra.mxu1 %vm1130_vm0, %v7034_v34 }
  0x88   : > { %6216 = vmatmul.msk.bf16.gmra.mxu3 %vm1130_vm0, %v7034_v34 }
  0x8e   : > { %1268 = vmatmul.bf16.gmra.mxu0 %v7040_v41 }
  0x8f   : > { %1612 = vmatmul.bf16.gmra.mxu2 %v7040_v41 }
  0x97   : > { %6184 = vmatmul.msk.bf16.gmra.mxu1 %vm1130_vm0, %v7058_v58 }
  0x98   : > { %6217 = vmatmul.msk.bf16.gmra.mxu3 %vm1130_vm0, %v7058_v58 }
  0x9e   : > { %1273 = vmatmul.bf16.gmra.mxu0 %v7064_v7 }
  0x9f   : > { %1617 = vmatmul.bf16.gmra.mxu2 %v7064_v7 }
  0xa4   : > { %v1411_v29 = vpop.f32.mrf.mxu1 }
  0xa7   : > { %6185 = vmatmul.msk.bf16.gmra.mxu1 %vm1130_vm0, %v7082_v27 }
  0xa8   : > { %6218 = vmatmul.msk.bf16.gmra.mxu3 %vm1130_vm0, %v7082_v27 }
  0xab   : > { %v1755_v40 = vpop.f32.mrf.mxu3  ;;  %v1239_v42 = vpop.f32.mrf.mxu0 }
  0xac   : > { %v7090_v47 = vadd.f32 %v1411_v29, %v1239_v42  ;;  %v1413_v48 = vpop.f32.mrf.mxu1  ;;  %v212_v29 = vld [vmem:[%s6899_s26 + $0xf8] sm:$0xff] }
  0xad   : > { %v324_v37 = vunpack.c.l.bf16 %v212_v29  ;;  %v325_v38 = vunpack.c.h.bf16 %v212_v29 }
  0xae   : > { %1278 = vmatmul.bf16.gmra.mxu0 %v7088_v39 }
  0xaf   : > { %1622 = vmatmul.bf16.gmra.mxu2 %v7088_v39 }
  0xb2   : > { %v1583_v56 = vpop.f32.mrf.mxu2 }
  0xb3   : > { %v1757_v53 = vpop.f32.mrf.mxu3  ;;  %v7098_v60 = vadd.f32 %v1755_v40, %v1583_v56  ;;  %v1241_v61 = vpop.f32.mrf.mxu0  ;;  %v7116_v40 = vpack.c.b16 %v824_v26, %v822_v25  ;;  %v487_v56 = vmax.f32 %v325_v38, 0.0  ;;  %v6277_v25 = vld [vmem:[%s10735_s1 + $0x40] sm:$0xf]  ;;  %v6602_v26 = vld [vmem:[%s10735_s1 + $0x44] sm:$0xf0]  ;;  %v825_v38 = vunpack.c.l.b16 %v616_v63 }
  0xb4   : > { %v1416_v3 = vpop.f32.mrf.mxu1  ;;  %v7100_v4 = vadd.f32 %v1413_v48, %v1241_v61  ;;  %v6278_v35 = vor.u32 %v6602_v26, %v6277_v25 }
  0xb5   : > { %10916 = vst [vmem:[#allocation4_spill] sm:$0xff] %v7116_v40 }
  0xb6   : > { %2095 = vmatpush.bf16.msrb.mxu1 %v6278_v35 }
  0xb7   : > { %6186 = vmatmul.msk.bf16.gmra.mxu1 %vm1130_vm0, %v7096_v54 }
  0xb8   : > { %6219 = vmatmul.msk.bf16.gmra.mxu3 %vm1130_vm0, %v7096_v54 }
  0xba   : > { %v1585_v16 = vpop.f32.mrf.mxu2 }
  0xbb   : > { %v1760_v15 = vpop.f32.mrf.mxu3  ;;  %v7108_v17 = vadd.f32 %v1757_v53, %v1585_v16  ;;  %v1244_v18 = vpop.f32.mrf.mxu0  ;;  %v486_v53 = vmax.f32 %v324_v37, 0.0 }
  0xbc   : > { %v1418_v23 = vpop.f32.mrf.mxu1  ;;  %v7110_v24 = vadd.f32 %v1416_v3, %v1244_v18 }
  0xbd   : > { %v617_v2 = vpack.c.bf16 %v487_v56, %v486_v53 }
  0xbe   : > { %1283 = vmatmul.bf16.gmra.mxu0 %v7106_v14 }
  0xbf   : > { %1627 = vmatmul.bf16.gmra.mxu2 %v7106_v14  ;;  %v828_v12 = vunpack.c.h.b16 %v617_v2 }
  0xc1   : > { %v7136_v18 = vpack.c.b16 %v828_v12, %v826_v11 }
  0xc2   : > { %v1588_v33 = vpop.f32.mrf.mxu2 }
  0xc3   : > { %v1762_v30 = vpop.f32.mrf.mxu3  ;;  %v7118_v42 = vadd.f32 %v1760_v15, %v1588_v33  ;;  %v1246_v43 = vpop.f32.mrf.mxu0  ;;  %v214_v15 = vld [vmem:[%s6899_s26 + $0x108] sm:$0xff]  ;;  %10918 = vst [vmem:[#allocation6_spill] sm:$0xff] %v7136_v18 }
  0xc4   : > { %v1421_v45 = vpop.f32.mrf.mxu1  ;;  %v7120_v48 = vadd.f32 %v1418_v23, %v1246_v43  ;;  %v327_v23 = vunpack.c.h.bf16 %v213_v13  ;;  %v329_v33 = vunpack.c.h.bf16 %v214_v15  ;;  %v827_v43 = vunpack.c.l.b16 %v617_v2  ;;  %v215_v13 = vld [vmem:[%s6899_s26 + $0x110] sm:$0xff] }
  0xc5   : > { %v331_v25 = vunpack.c.h.bf16 %v215_v13 }
  0xc6   : > { %v489_v49 = vmax.f32 %v327_v23, 0.0  ;;  %v491_v51 = vmax.f32 %v329_v33, 0.0  ;;  %v7152_v52 = vpack.c.b16 %v827_v43, %v825_v38  ;;  %v330_v23 = vunpack.c.l.bf16 %v215_v13  ;;  %v6601_v38 = vld [vmem:[%s10735_s1 + $0x44] sm:$0xf]  ;;  %v6279_v43 = vld [vmem:[%s10735_s1 + $0x48] sm:$0xf0] }
  0xc7   : > { %6187 = vmatmul.msk.bf16.gmra.mxu1 %vm1130_vm0, %v7116_v40 }
  0xc8   : > { %6220 = vmatmul.msk.bf16.gmra.mxu3 %vm1130_vm0, %v7116_v40  ;;  %10919 = vst [vmem:[#allocation7_spill] sm:$0xff] %v7152_v52 }
  0xca   : > { %v1590_v62 = vpop.f32.mrf.mxu2 }
  0xcb   : > { %v1765_v61 = vpop.f32.mrf.mxu3  ;;  %v7128_v3 = vadd.f32 %v1762_v30, %v1590_v62  ;;  %v1249_v5 = vpop.f32.mrf.mxu0  ;;  %v328_v30 = vunpack.c.l.bf16 %v214_v15  ;;  %v216_v15 = vld [vmem:[%s6899_s26 + $0x118] sm:$0xff] }
  0xcc   : > { %v1423_v6 = vpop.f32.mrf.mxu1  ;;  %v7130_v9 = vadd.f32 %v1421_v45, %v1249_v5  ;;  %v488_v45 = vmax.f32 %v326_v21, 0.0  ;;  %v333_v26 = vunpack.c.h.bf16 %v216_v15 }
  0xcd   : > { %v490_v50 = vmax.f32 %v328_v30, 0.0 }
  0xce   : > { %1288 = vmatmul.bf16.gmra.mxu0 %v7126_v59  ;;  %v618_v63 = vpack.c.bf16 %v489_v49, %v488_v45 }
  0xcf   : > { %1632 = vmatmul.bf16.gmra.mxu2 %v7126_v59  ;;  %v619_v2 = vpack.c.bf16 %v491_v51, %v490_v50  ;;  %v6282_v50 = vor.u32 %v6601_v38, %v6279_v43  ;;  %v492_v51 = vmax.f32 %v330_v23, 0.0 }
  0xd0   : > { %v830_v11 = vunpack.c.h.b16 %v618_v63  ;;  %v829_v45 = vunpack.c.l.b16 %v618_v63 }
  0xd1   : > { %v832_v12 = vunpack.c.h.b16 %v619_v2  ;;  %v831_v49 = vunpack.c.l.b16 %v619_v2  ;;  %2439 = vmatpush.bf16.msrb.mxu0 %v6282_v50 }
  0xd2   : > { %v1593_v19 = vpop.f32.mrf.mxu2 }
  0xd3   : > { %v1767_v16 = vpop.f32.mrf.mxu3  ;;  %v7144_v28 = vadd.f32 %v1765_v61, %v1593_v19  ;;  %v1251_v29 = vpop.f32.mrf.mxu0 }
  0xd4   : > { %v1426_v36 = vpop.f32.mrf.mxu1  ;;  %v7146_v37 = vadd.f32 %v1423_v6, %v1251_v29  ;;  %v7162_v29 = vpack.c.b16 %v832_v12, %v830_v11 }
  0xd6   : > { %10920 = vst [vmem:[#allocation8_spill] sm:$0xff] %v7162_v29 }
  0xd7   : > { %6188 = vmatmul.msk.bf16.gmra.mxu1 %vm1130_vm0, %v7136_v18 }
  0xd8   : > { %6221 = vmatmul.msk.bf16.gmra.mxu3 %vm1130_vm0, %v7136_v18 }
  0xda   : > { %v1595_v56 = vpop.f32.mrf.mxu2 }
  0xdb   : > { %v1770_v53 = vpop.f32.mrf.mxu3  ;;  %v7154_v61 = vadd.f32 %v1767_v16, %v1595_v56  ;;  %v1254_v62 = vpop.f32.mrf.mxu0  ;;  %v332_v16 = vunpack.c.l.bf16 %v216_v15  ;;  %v493_v56 = vmax.f32 %v331_v25, 0.0 }
  0xdc   : > { %v1428_v5 = vpop.f32.mrf.mxu1  ;;  %v7156_v6 = vadd.f32 %v1426_v36, %v1254_v62 }
  0xdd   : > { %v494_v62 = vmax.f32 %v332_v16, 0.0  ;;  %v620_v63 = vpack.c.bf16 %v493_v56, %v492_v51 }
  0xde   : > { %1293 = vmatmul.bf16.gmra.mxu0 %v7152_v52 }
  0xdf   : > { %1637 = vmatmul.bf16.gmra.mxu2 %v7152_v52  ;;  %v834_v25 = vunpack.c.h.b16 %v620_v63 }
  0xe2   : > { %v1598_v21 = vpop.f32.mrf.mxu2 }
  0xe3   : > { %v1772_v19 = vpop.f32.mrf.mxu3  ;;  %v7164_v30 = vadd.f32 %v1770_v53, %v1598_v21  ;;  %v1256_v33 = vpop.f32.mrf.mxu0  ;;  %v495_v53 = vmax.f32 %v333_v26, 0.0  ;;  %v217_v26 = vld [vmem:[%s6899_s26 + $0x120] sm:$0xff] }
  0xe4   : > { %v1431_v35 = vpop.f32.mrf.mxu1  ;;  %v7166_v36 = vadd.f32 %v1428_v5, %v1256_v33  ;;  %v7178_v5 = vpack.c.b16 %v831_v49, %v829_v45  ;;  %v218_v33 = vld [vmem:[%s6899_s26 + $0x128] sm:$0xff]  ;;  %v334_v49 = vunpack.c.l.bf16 %v217_v26  ;;  %v335_v51 = vunpack.c.h.bf16 %v217_v26 }
  0xe5   : > { %v621_v2 = vpack.c.bf16 %v495_v53, %v494_v62  ;;  %v336_v56 = vunpack.c.l.bf16 %v218_v33 }
  0xe6   : > { %10921 = vst [vmem:[#allocation9_spill] sm:$0xff] %v7178_v5 }
  0xe7   : > { %6189 = vmatmul.msk.bf16.gmra.mxu1 %vm1130_vm0, %v7162_v29  ;;  %v836_v16 = vunpack.c.h.b16 %v621_v2 }
  0xe8   : > { %6222 = vmatmul.msk.bf16.gmra.mxu3 %vm1130_vm0, %v7162_v29 }
  0xe9   : > { %v7188_v43 = vpack.c.b16 %v836_v16, %v834_v25  ;;  %v496_v25 = vmax.f32 %v334_v49, 0.0  ;;  %v497_v16 = vmax.f32 %v335_v51, 0.0 }
  0xea   : > { %v1600_v12 = vpop.f32.mrf.mxu2 }
  0xeb   : > { %v1775_v11 = vpop.f32.mrf.mxu3  ;;  %v7180_v13 = vadd.f32 %v1772_v19, %v1600_v12  ;;  %v1259_v15 = vpop.f32.mrf.mxu0  ;;  %10922 = vst [vmem:[#allocation10_spill] sm:$0xff] %v7188_v43  ;;  %v833_v12 = vunpack.c.l.b16 %v620_v63 }
  0xec   : > { %v1433_v21 = vpop.f32.mrf.mxu1  ;;  %v7182_v23 = vadd.f32 %v1431_v35, %v1259_v15  ;;  %v337_v35 = vunpack.c.h.bf16 %v218_v33  ;;  %v835_v15 = vunpack.c.l.b16 %v621_v2  ;;  %v622_v2 = vpack.c.bf16 %v497_v16, %v496_v25 }
  0xee   : > { %1298 = vmatmul.bf16.gmra.mxu0 %v7178_v5  ;;  %v7198_v26 = vpack.c.b16 %v835_v15, %v833_v12  ;;  %v838_v49 = vunpack.c.h.b16 %v622_v2 }
  0xef   : > { %1642 = vmatmul.bf16.gmra.mxu2 %v7178_v5 }
  0xf0   : > { %10923 = vst [vmem:[#allocation11_spill] sm:$0xff] %v7198_v26 }
  0xf2   : > { %v1603_v45 = vpop.f32.mrf.mxu2 }
  0xf3   : > { %v1777_v38 = vpop.f32.mrf.mxu3  ;;  %v7190_v50 = vadd.f32 %v1775_v11, %v1603_v45  ;;  %v1261_v19 = vpop.f32.mrf.mxu0  ;;  %v498_v11 = vmax.f32 %v336_v56, 0.0  ;;  %v499_v45 = vmax.f32 %v337_v35, 0.0  ;;  %v219_v56 = vld [vmem:[%s6899_s26 + $0x130] sm:$0xff]  ;;  %v220_v35 = vld [vmem:[%s6899_s26 + $0x138] sm:$0xff] }
  0xf4   : > { %v1436_v62 = vpop.f32.mrf.mxu1  ;;  %v7192_v53 = vadd.f32 %v1433_v21, %v1261_v19  ;;  %v339_v52 = vunpack.c.h.bf16 %v219_v56 }
  0xf5   : > { %v623_v19 = vpack.c.bf16 %v499_v45, %v498_v11  ;;  %v837_v45 = vunpack.c.l.b16 %v622_v2 }
  0xf7   : > { %6190 = vmatmul.msk.bf16.gmra.mxu1 %vm1130_vm0, %v7188_v43  ;;  %v840_v51 = vunpack.c.h.b16 %v623_v19 }
  0xf8   : > { %6223 = vmatmul.msk.bf16.gmra.mxu3 %vm1130_vm0, %v7188_v43  ;;  %v338_v43 = vunpack.c.l.bf16 %v219_v56 }
  0xf9   : > { %v7208_v40 = vpack.c.b16 %v840_v51, %v838_v49 }
  0xfa   : > { %v1605_v29 = vpop.f32.mrf.mxu2  ;;  %v500_v59 = vmax.f32 %v338_v43, 0.0 }
  0xfb   : > { %v1780_v33 = vpop.f32.mrf.mxu3  ;;  %v7200_v21 = vadd.f32 %v1777_v38, %v1605_v29  ;;  %v1264_v63 = vpop.f32.mrf.mxu0  ;;  %v340_v29 = vunpack.c.l.bf16 %v220_v35  ;;  %v341_v38 = vunpack.c.h.bf16 %v220_v35  ;;  %10925 = vst [vmem:[#allocation13_spill] sm:$0xff] %v7208_v40  ;;  %v6317_v35 = vld [vmem:[%s10735_s1 + $0x90] sm:$0xf] }
  0xfc   : > { %v1438_v5 = vpop.f32.mrf.mxu1  ;;  %v7202_v18 = vadd.f32 %v1436_v62, %v1264_v63  ;;  %v839_v63 = vunpack.c.l.b16 %v623_v19 }
  0xfd   : > { %v502_v54 = vmax.f32 %v340_v29, 0.0  ;;  %v503_v14 = vmax.f32 %v341_v38, 0.0 }
  0xfe   : > { %10924 = vst [vmem:[#allocation12_spill] sm:$0xff] %v7202_v18  ;;  %1303 = vmatmul.bf16.gmra.mxu0 %v7198_v26  ;;  %v7218_v49 = vpack.c.b16 %v839_v63, %v837_v45 }
  0xff   : > { %1647 = vmatmul.bf16.gmra.mxu2 %v7198_v26  ;;  %v501_v26 = vmax.f32 %v339_v52, 0.0  ;;  %v625_v56 = vpack.c.bf16 %v503_v14, %v502_v54  ;;  %v221_v54 = vld [vmem:[%s6899_s26 + $0x140] sm:$0xff]  ;;  %v222_v14 = vld [vmem:[%s6899_s26 + $0x148] sm:$0xff] }
 0x100   : > { %10928 = vst [vmem:[#allocation16_spill] sm:$0xff] %v7218_v49 }
 0x102   : > { %v1608_v15 = vpop.f32.mrf.mxu2 }
 0x103   : > { %v1782_v12 = vpop.f32.mrf.mxu3  ;;  %v7210_v25 = vadd.f32 %v1780_v33, %v1608_v15  ;;  %v1266_v62 = vpop.f32.mrf.mxu0  ;;  %v6612_v15 = vld [vmem:[%s10735_s1 + $0x94] sm:$0xf0] }
 0x104   : > { %v1441_v16 = vpop.f32.mrf.mxu1  ;;  %v7212_v11 = vadd.f32 %v1438_v5, %v1266_v62  ;;  %v624_v5 = vpack.c.bf16 %v501_v26, %v500_v59  ;;  %v6318_v29 = vor.u32 %v6612_v15, %v6317_v35  ;;  %v844_v59 = vunpack.c.h.b16 %v625_v56  ;;  %v6269_v15 = vld [vmem:[%s10735_s1 + $0x30] sm:$0xf] }
 0x105   : > { %10926 = vst [vmem:[#allocation14_spill] sm:$0xff] %v7210_v25 }
 0x106   : > { %10927 = vst [vmem:[#allocation15_spill] sm:$0xff] %v7212_v11  ;;  %v842_v38 = vunpack.c.h.b16 %v624_v5  ;;  %2270 = vmatpush.bf16.msrb.mxu3 %v6318_v29  ;;  %v6600_v29 = vld [vmem:[%s10735_s1 + $0x34] sm:$0xf0] }
 0x107   : > { %6191 = vmatmul.msk.bf16.gmra.mxu1 %vm1130_vm0, %v7208_v40 }
 0x108   : > { %6224 = vmatmul.msk.bf16.gmra.mxu3 %vm1130_vm0, %v7208_v40  ;;  %v345_v40 = vunpack.c.h.bf16 %v222_v14 }
 0x10a   : > { %v1610_v51 = vpop.f32.mrf.mxu2 }
 0x10b   : > { %v1785_v33 = vpop.f32.mrf.mxu3  ;;  %v7220_v2 = vadd.f32 %v1782_v12, %v1610_v51  ;;  %v1269_v43 = vpop.f32.mrf.mxu0  ;;  %v7234_v12 = vpack.c.b16 %v844_v59, %v842_v38  ;;  %v343_v51 = vunpack.c.h.bf16 %v221_v54  ;;  %v841_v38 = vunpack.c.l.b16 %v624_v5 }
 0x10c   : > { %v1443_v52 = vpop.f32.mrf.mxu1  ;;  %v7222_v19 = vadd.f32 %v1441_v16, %v1269_v43  ;;  %v342_v16 = vunpack.c.l.bf16 %v221_v54  ;;  %v344_v43 = vunpack.c.l.bf16 %v222_v14  ;;  %v843_v59 = vunpack.c.l.b16 %v625_v56 }
 0x10d   : > { %10929 = vst [vmem:[#allocation17_spill] sm:$0xff] %v7220_v2  ;;  %v507_v14 = vmax.f32 %v345_v40, 0.0  ;;  %v6319_v40 = vld [vmem:[%s10735_s1 + $0x98] sm:$0xf0] }
 0x10e   : > { %10930 = vst [vmem:[#allocation18_spill] sm:$0xff] %v7222_v19  ;;  %1308 = vmatmul.bf16.gmra.mxu0 %v7218_v49  ;;  %v506_v54 = vmax.f32 %v344_v43, 0.0  ;;  %v223_v43 = vld [vmem:[%s6899_s26 + $0x150] sm:$0xff] }
 0x10f   : > { %1652 = vmatmul.bf16.gmra.mxu2 %v7218_v49  ;;  %10931 = vst [vmem:[#allocation19_spill] sm:$0xff] %v7234_v12  ;;  %v6270_v49 = vor.u32 %v6600_v29, %v6269_v15 }
 0x110   : > { %v627_v29 = vpack.c.bf16 %v507_v14, %v506_v54 }
 0x111   : > { %2096 = vmatpush.bf16.msrb.mxu1 %v6270_v49 }
 0x112   : > { %v1613_v62 = vpop.f32.mrf.mxu2 }
 0x113   : > { %v1787_v26 = vpop.f32.mrf.mxu3  ;;  %v7236_v45 = vadd.f32 %v1785_v33, %v1613_v62  ;;  %v1271_v63 = vpop.f32.mrf.mxu0  ;;  %v504_v33 = vmax.f32 %v342_v16, 0.0  ;;  %v7250_v62 = vpack.c.b16 %v843_v59, %v841_v38  ;;  %v6611_v16 = vld [vmem:[%s10735_s1 + $0x94] sm:$0xf]  ;;  %v346_v59 = vunpack.c.l.bf16 %v223_v43 }
 0x114   : > { %v1446_v19 = vpop.f32.mrf.mxu1  ;;  %v7238_v35 = vadd.f32 %v1443_v52, %v1271_v63  ;;  %v505_v52 = vmax.f32 %v343_v51, 0.0  ;;  %v6322_v49 = vor.u32 %v6611_v16, %v6319_v40 }
 0x115   : > { %10932 = vst [vmem:[#allocation20_spill] sm:$0xff] %v7236_v45 }
 0x116   : > { %10933 = vst [vmem:[#allocation21_spill] sm:$0xff] %v7238_v35  ;;  %v626_v15 = vpack.c.bf16 %v505_v52, %v504_v33  ;;  %2614 = vmatpush.bf16.msrb.mxu2 %v6322_v49  ;;  %v347_v33 = vunpack.c.h.bf16 %v223_v43 }
 0x117   : > { %6192 = vmatmul.msk.bf16.gmra.mxu1 %vm1130_vm0, %v7234_v12  ;;  %10934 = vst [vmem:[#allocation22_spill] sm:$0xff] %v7250_v62 }
 0x118   : > { %6225 = vmatmul.msk.bf16.gmra.mxu3 %vm1130_vm0, %v7234_v12  ;;  %v846_v51 = vunpack.c.h.b16 %v626_v15  ;;  %v845_v40 = vunpack.c.l.b16 %v626_v15  ;;  %v509_v11 = vmax.f32 %v347_v33, 0.0 }
 0x11a   : > { %v1615_v35 = vpop.f32.mrf.mxu2 }
 0x11b   : > { %v1790_v63 = vpop.f32.mrf.mxu3  ;;  %v7252_v5 = vadd.f32 %v1787_v26, %v1615_v35  ;;  %v1274_v56 = vpop.f32.mrf.mxu0  ;;  %v848_v26 = vunpack.c.h.b16 %v627_v29  ;;  %v224_v35 = vld [vmem:[%s6899_s26 + $0x158] sm:$0xff] }
 0x11c   : > { %v1448_v45 = vpop.f32.mrf.mxu1  ;;  %v7254_v2 = vadd.f32 %v1446_v19, %v1274_v56  ;;  %v348_v56 = vunpack.c.l.bf16 %v224_v35  ;;  %v349_v12 = vunpack.c.h.bf16 %v224_v35 }
 0x11d   : > { %10935 = vst [vmem:[#allocation23_spill] sm:$0xff] %v7252_v5  ;;  %v7266_v52 = vpack.c.b16 %v848_v26, %v846_v51  ;;  %v847_v5 = vunpack.c.l.b16 %v627_v29 }
 0x11e   : > { %10936 = vst [vmem:[#allocation24_spill] sm:$0xff] %v7254_v2  ;;  %1313 = vmatmul.bf16.gmra.mxu0 %v7250_v62  ;;  %v510_v49 = vmax.f32 %v348_v56, 0.0  ;;  %v511_v51 = vmax.f32 %v349_v12, 0.0 }
 0x11f   : > { %1657 = vmatmul.bf16.gmra.mxu2 %v7250_v62  ;;  %10937 = vst [vmem:[#allocation25_spill] sm:$0xff] %v7266_v52  ;;  %v508_v62 = vmax.f32 %v346_v59, 0.0  ;;  %v7282_v29 = vpack.c.b16 %v847_v5, %v845_v40  ;;  %v226_v5 = vld [vmem:[%s6899_s26 + $0x168] sm:$0xff] }
 0x120   : > { %v629_v59 = vpack.c.bf16 %v511_v51, %v510_v49 }
 0x121   : > { %10940 = vst [vmem:[#allocation28_spill] sm:$0xff] %v7282_v29  ;;  %v628_v12 = vpack.c.bf16 %v509_v11, %v508_v62 }
 0x122   : > { %v1618_v38 = vpop.f32.mrf.mxu2 }
 0x123   : > { %v1792_v19 = vpop.f32.mrf.mxu3  ;;  %v7268_v54 = vadd.f32 %v1790_v63, %v1618_v38  ;;  %v1276_v14 = vpop.f32.mrf.mxu0  ;;  %v6599_v63 = vld [vmem:[%s10735_s1 + $0x34] sm:$0xf]  ;;  %v850_v56 = vunpack.c.h.b16 %v628_v12  ;;  %v849_v51 = vunpack.c.l.b16 %v628_v12 }
 0x124   : > { %v1451_v2 = vpop.f32.mrf.mxu1  ;;  %v7270_v16 = vadd.f32 %v1448_v45, %v1276_v14  ;;  %v6271_v45 = vld [vmem:[%s10735_s1 + $0x38] sm:$0xf0] }
 0x125   : > { %10938 = vst [vmem:[#allocation26_spill] sm:$0xff] %v7268_v54  ;;  %v6274_v15 = vor.u32 %v6599_v63, %v6271_v45  ;;  %v225_v63 = vld [vmem:[%s6899_s26 + $0x160] sm:$0xff] }
 0x126   : > { %10939 = vst [vmem:[#allocation27_spill] sm:$0xff] %v7270_v16  ;;  %v350_v16 = vunpack.c.l.bf16 %v225_v63 }
 0x127   : > { %6193 = vmatmul.msk.bf16.gmra.mxu1 %vm1130_vm0, %v7266_v52  ;;  %2440 = vmatpush.bf16.msrb.mxu0 %v6274_v15  ;;  %v351_v15 = vunpack.c.h.bf16 %v225_v63 }
 0x128   : > { %6226 = vmatmul.msk.bf16.gmra.mxu3 %vm1130_vm0, %v7266_v52  ;;  %v852_v52 = vunpack.c.h.b16 %v629_v59 }
 0x12a   : > { %v1620_v43 = vpop.f32.mrf.mxu2 }
 0x12b   : > { %v1795_v26 = vpop.f32.mrf.mxu3  ;;  %v7284_v35 = vadd.f32 %v1792_v19, %v1620_v43  ;;  %v1279_v38 = vpop.f32.mrf.mxu0  ;;  %v352_v19 = vunpack.c.l.bf16 %v226_v5  ;;  %v353_v43 = vunpack.c.h.bf16 %v226_v5 }
 0x12c   : > { %v1453_v33 = vpop.f32.mrf.mxu1  ;;  %v7286_v14 = vadd.f32 %v1451_v2, %v1279_v38  ;;  %v851_v38 = vunpack.c.l.b16 %v629_v59 }
 0x12d   : > { %10941 = vst [vmem:[#allocation29_spill] sm:$0xff] %v7284_v35  ;;  %v7292_v35 = vpack.c.b16 %v852_v52, %v850_v56  ;;  %v514_v54 = vmax.f32 %v352_v19, 0.0  ;;  %v515_v25 = vmax.f32 %v353_v43, 0.0  ;;  %v227_v19 = vld [vmem:[%s6899_s26 + $0x170] sm:$0xff]  ;;  %v228_v43 = vld [vmem:[%s6899_s26 + $0x178] sm:$0xff] }
 0x12e   : > { %10942 = vst [vmem:[#allocation30_spill] sm:$0xff] %v7286_v14  ;;  %1318 = vmatmul.bf16.gmra.mxu0 %v7282_v29  ;;  %v512_v14 = vmax.f32 %v350_v16, 0.0  ;;  %v7302_v52 = vpack.c.b16 %v851_v38, %v849_v51 }
 0x12f   : > { %1662 = vmatmul.bf16.gmra.mxu2 %v7282_v29  ;;  %10943 = vst [vmem:[#allocation31_spill] sm:$0xff] %v7292_v35  ;;  %v513_v29 = vmax.f32 %v351_v15, 0.0  ;;  %v631_v63 = vpack.c.bf16 %v515_v25, %v514_v54 }
 0x130   : > { %10946 = vst [vmem:[#allocation34_spill] sm:$0xff] %v7302_v52 }
 0x131   : > { %v856_v15 = vunpack.c.h.b16 %v631_v63 }
 0x132   : > { %v1623_v45 = vpop.f32.mrf.mxu2 }
 0x133   : > { %v1797_v40 = vpop.f32.mrf.mxu3  ;;  %v7294_v11 = vadd.f32 %v1795_v26, %v1623_v45  ;;  %v1281_v2 = vpop.f32.mrf.mxu0 }
 0x134   : > { %v1456_v62 = vpop.f32.mrf.mxu1  ;;  %v7296_v49 = vadd.f32 %v1453_v33, %v1281_v2  ;;  %v630_v33 = vpack.c.bf16 %v513_v29, %v512_v14  ;;  %v354_v29 = vunpack.c.l.bf16 %v227_v19  ;;  %v355_v14 = vunpack.c.h.bf16 %v227_v19 }
 0x135   : > { %10944 = vst [vmem:[#allocation32_spill] sm:$0xff] %v7294_v11 }
 0x136   : > { %10945 = vst [vmem:[#allocation33_spill] sm:$0xff] %v7296_v49  ;;  %v854_v45 = vunpack.c.h.b16 %v630_v33 }
 0x137   : > { %6194 = vmatmul.msk.bf16.gmra.mxu1 %vm1130_vm0, %v7292_v35 }
 0x138   : > { %6227 = vmatmul.msk.bf16.gmra.mxu3 %vm1130_vm0, %v7292_v35  ;;  %v7312_v51 = vpack.c.b16 %v856_v15, %v854_v45  ;;  %v853_v35 = vunpack.c.l.b16 %v630_v33  ;;  %v516_v45 = vmax.f32 %v354_v29, 0.0  ;;  %v517_v15 = vmax.f32 %v355_v14, 0.0 }
 0x13a   : > { %v1625_v56 = vpop.f32.mrf.mxu2  ;;  %10949 = vst [vmem:[#allocation37_spill] sm:$0xff] %v7312_v51 }
 0x13b   : > { %v1800_v26 = vpop.f32.mrf.mxu3  ;;  %v7304_v12 = vadd.f32 %v1797_v40, %v1625_v56  ;;  %v1284_v16 = vpop.f32.mrf.mxu0  ;;  %v356_v40 = vunpack.c.l.bf16 %v228_v43 }
 0x13c   : > { %v1458_v59 = vpop.f32.mrf.mxu1  ;;  %v7306_v5 = vadd.f32 %v1456_v62, %v1284_v16  ;;  %v357_v62 = vunpack.c.h.bf16 %v228_v43 }
 0x13d   : > { %10947 = vst [vmem:[#allocation35_spill] sm:$0xff] %v7304_v12 }
 0x13e   : > { %10948 = vst [vmem:[#allocation36_spill] sm:$0xff] %v7306_v5  ;;  %1323 = vmatmul.bf16.gmra.mxu0 %v7302_v52  ;;  %v855_v5 = vunpack.c.l.b16 %v631_v63  ;;  %v632_v63 = vpack.c.bf16 %v517_v15, %v516_v45 }
 0x13f   : > { %1667 = vmatmul.bf16.gmra.mxu2 %v7302_v52 }
 0x140   : > { %v7322_v19 = vpack.c.b16 %v855_v5, %v853_v35  ;;  %v858_v29 = vunpack.c.h.b16 %v632_v63 }
 0x142   : > { %v1628_v38 = vpop.f32.mrf.mxu2  ;;  %10952 = vst [vmem:[#allocation40_spill] sm:$0xff] %v7322_v19 }
 0x143   : > { %v1802_v2 = vpop.f32.mrf.mxu3  ;;  %v7314_v25 = vadd.f32 %v1800_v26, %v1628_v38  ;;  %v1286_v54 = vpop.f32.mrf.mxu0  ;;  %v518_v26 = vmax.f32 %v356_v40, 0.0  ;;  %v519_v38 = vmax.f32 %v357_v62, 0.0  ;;  %v229_v40 = vld [vmem:[%s6899_s26 + $0x180] sm:$0xff]  ;;  %v230_v62 = vld [vmem:[%s6899_s26 + $0x188] sm:$0xff] }
 0x144   : > { %v1461_v56 = vpop.f32.mrf.mxu1  ;;  %v7316_v16 = vadd.f32 %v1458_v59, %v1286_v54  ;;  %v359_v12 = vunpack.c.h.bf16 %v229_v40  ;;  %v360_v15 = vunpack.c.l.bf16 %v230_v62 }
 0x145   : > { %10950 = vst [vmem:[#allocation38_spill] sm:$0xff] %v7314_v25  ;;  %v633_v54 = vpack.c.bf16 %v519_v38, %v518_v26 }
 0x146   : > { %10951 = vst [vmem:[#allocation39_spill] sm:$0xff] %v7316_v16 }
 0x147   : > { %6195 = vmatmul.msk.bf16.gmra.mxu1 %vm1130_vm0, %v7312_v51  ;;  %v860_v14 = vunpack.c.h.b16 %v633_v54 }
 0x148   : > { %6228 = vmatmul.msk.bf16.gmra.mxu3 %vm1130_vm0, %v7312_v51  ;;  %v358_v51 = vunpack.c.l.bf16 %v229_v40 }
 0x14a   : > { %v1630_v52 = vpop.f32.mrf.mxu2 }
 0x14b   : > { %v1805_v43 = vpop.f32.mrf.mxu3  ;;  %v7324_v59 = vadd.f32 %v1802_v2, %v1630_v52  ;;  %v1289_v33 = vpop.f32.mrf.mxu0  ;;  %v7332_v52 = vpack.c.b16 %v860_v14, %v858_v29  ;;  %v522_v29 = vmax.f32 %v360_v15, 0.0 }
 0x14c   : > { %v1463_v16 = vpop.f32.mrf.mxu1  ;;  %v7326_v25 = vadd.f32 %v1461_v56, %v1289_v33  ;;  %v361_v56 = vunpack.c.h.bf16 %v230_v62  ;;  %v857_v33 = vunpack.c.l.b16 %v632_v63 }
 0x14d   : > { %10953 = vst [vmem:[#allocation41_spill] sm:$0xff] %v7324_v59  ;;  %v520_v59 = vmax.f32 %v358_v51, 0.0 }
 0x14e   : > { %10954 = vst [vmem:[#allocation42_spill] sm:$0xff] %v7326_v25  ;;  %1328 = vmatmul.bf16.gmra.mxu0 %v7322_v19  ;;  %v859_v25 = vunpack.c.l.b16 %v633_v54  ;;  %v523_v14 = vmax.f32 %v361_v56, 0.0 }
 0x14f   : > { %1672 = vmatmul.bf16.gmra.mxu2 %v7322_v19  ;;  %10955 = vst [vmem:[#allocation43_spill] sm:$0xff] %v7332_v52  ;;  %v521_v19 = vmax.f32 %v359_v12, 0.0 }
 0x150   : > { %v7348_v12 = vpack.c.b16 %v859_v25, %v857_v33  ;;  %v232_v25 = vld [vmem:[%s6899_s26 + $0x198] sm:$0xff] }
 0x152   : > { %v1633_v5 = vpop.f32.mrf.mxu2  ;;  %10958 = vst [vmem:[#allocation46_spill] sm:$0xff] %v7348_v12 }
 0x153   : > { %v1807_v35 = vpop.f32.mrf.mxu3  ;;  %v7334_v2 = vadd.f32 %v1805_v43, %v1633_v5  ;;  %v1291_v45 = vpop.f32.mrf.mxu0  ;;  %v6261_v43 = vld [vmem:[%s10735_s1 + $0x20] sm:$0xf]  ;;  %v634_v5 = vpack.c.bf16 %v521_v19, %v520_v59  ;;  %v364_v59 = vunpack.c.l.bf16 %v232_v25 }
 0x154   : > { %v1466_v26 = vpop.f32.mrf.mxu1  ;;  %v7336_v38 = vadd.f32 %v1463_v16, %v1291_v45  ;;  %v6598_v16 = vld [vmem:[%s10735_s1 + $0x24] sm:$0xf0]  ;;  %v635_v45 = vpack.c.bf16 %v523_v14, %v522_v29 }
 0x155   : > { %10956 = vst [vmem:[#allocation44_spill] sm:$0xff] %v7334_v2  ;;  %v6262_v63 = vor.u32 %v6598_v16, %v6261_v43  ;;  %v231_v43 = vld [vmem:[%s6899_s26 + $0x190] sm:$0xff] }
 0x156   : > { %10957 = vst [vmem:[#allocation45_spill] sm:$0xff] %v7336_v38  ;;  %v864_v38 = vunpack.c.h.b16 %v635_v45  ;;  %v362_v2 = vunpack.c.l.bf16 %v231_v43 }
 0x157   : > { %6196 = vmatmul.msk.bf16.gmra.mxu1 %vm1130_vm0, %v7332_v52 }
 0x158   : > { %6229 = vmatmul.msk.bf16.gmra.mxu3 %vm1130_vm0, %v7332_v52  ;;  %2097 = vmatpush.bf16.msrb.mxu1 %v6262_v63  ;;  %v862_v52 = vunpack.c.h.b16 %v634_v5  ;;  %v363_v63 = vunpack.c.h.bf16 %v231_v43 }
 0x15a   : > { %v1635_v54 = vpop.f32.mrf.mxu2 }
 0x15b   : > { %v1810_v51 = vpop.f32.mrf.mxu3  ;;  %v7350_v40 = vadd.f32 %v1807_v35, %v1635_v54  ;;  %v1294_v62 = vpop.f32.mrf.mxu0  ;;  %v7358_v35 = vpack.c.b16 %v864_v38, %v862_v52  ;;  %v526_v52 = vmax.f32 %v364_v59, 0.0 }
 0x15c   : > { %v1468_v15 = vpop.f32.mrf.mxu1  ;;  %v7352_v56 = vadd.f32 %v1466_v26, %v1294_v62  ;;  %v365_v26 = vunpack.c.h.bf16 %v232_v25  ;;  %v861_v62 = vunpack.c.l.b16 %v634_v5 }
 0x15d   : > { %10959 = vst [vmem:[#allocation47_spill] sm:$0xff] %v7350_v40  ;;  %v524_v40 = vmax.f32 %v362_v2, 0.0 }
 0x15e   : > { %10960 = vst [vmem:[#allocation48_spill] sm:$0xff] %v7352_v56  ;;  %1333 = vmatmul.bf16.gmra.mxu0 %v7348_v12  ;;  %v863_v56 = vunpack.c.l.b16 %v635_v45  ;;  %v527_v38 = vmax.f32 %v365_v26, 0.0 }
 0x15f   : > { %1677 = vmatmul.bf16.gmra.mxu2 %v7348_v12  ;;  %10961 = vst [vmem:[#allocation49_spill] sm:$0xff] %v7358_v35  ;;  %v525_v12 = vmax.f32 %v363_v63, 0.0 }
 0x160   : > { %v7374_v2 = vpack.c.b16 %v863_v56, %v861_v62  ;;  %v234_v56 = vld [vmem:[%s6899_s26 + $0x1a8] sm:$0xff] }
 0x161   : > { %v636_v63 = vpack.c.bf16 %v525_v12, %v524_v40 }
 0x162   : > { %v1638_v16 = vpop.f32.mrf.mxu2  ;;  %10964 = vst [vmem:[#allocation52_spill] sm:$0xff] %v7374_v2 }
 0x163   : > { %v1812_v33 = vpop.f32.mrf.mxu3  ;;  %v7360_v54 = vadd.f32 %v1810_v51, %v1638_v16  ;;  %v1296_v19 = vpop.f32.mrf.mxu0  ;;  %v6597_v51 = vld [vmem:[%s10735_s1 + $0x24] sm:$0xf] }
 0x164   : > { %v1471_v29 = vpop.f32.mrf.mxu1  ;;  %v7362_v14 = vadd.f32 %v1468_v15, %v1296_v19  ;;  %v6263_v15 = vld [vmem:[%s10735_s1 + $0x28] sm:$0xf0]  ;;  %v637_v19 = vpack.c.bf16 %v527_v38, %v526_v52  ;;  %v865_v38 = vunpack.c.l.b16 %v636_v63 }
 0x165   : > { %10962 = vst [vmem:[#allocation50_spill] sm:$0xff] %v7360_v54  ;;  %v6266_v5 = vor.u32 %v6597_v51, %v6263_v15  ;;  %v233_v51 = vld [vmem:[%s6899_s26 + $0x1a0] sm:$0xff] }
 0x166   : > { %10963 = vst [vmem:[#allocation51_spill] sm:$0xff] %v7362_v14  ;;  %v868_v14 = vunpack.c.h.b16 %v637_v19  ;;  %v366_v54 = vunpack.c.l.bf16 %v233_v51 }
 0x167   : > { %6197 = vmatmul.msk.bf16.gmra.mxu1 %vm1130_vm0, %v7358_v35  ;;  %2441 = vmatpush.bf16.msrb.mxu0 %v6266_v5  ;;  %v367_v5 = vunpack.c.h.bf16 %v233_v51 }
 0x168   : > { %6230 = vmatmul.msk.bf16.gmra.mxu3 %vm1130_vm0, %v7358_v35  ;;  %v866_v35 = vunpack.c.h.b16 %v636_v63 }
 0x16a   : > { %v1640_v43 = vpop.f32.mrf.mxu2 }
 0x16b   : > { %v1815_v45 = vpop.f32.mrf.mxu3  ;;  %v7376_v25 = vadd.f32 %v1812_v33, %v1640_v43  ;;  %v1299_v16 = vpop.f32.mrf.mxu0  ;;  %v368_v33 = vunpack.c.l.bf16 %v234_v56  ;;  %v369_v43 = vunpack.c.h.bf16 %v234_v56 }
 0x16c   : > { %v1473_v59 = vpop.f32.mrf.mxu1  ;;  %v7378_v26 = vadd.f32 %v1471_v29, %v1299_v16  ;;  %v867_v16 = vunpack.c.l.b16 %v637_v19 }
 0x16d   : > { %10965 = vst [vmem:[#allocation53_spill] sm:$0xff] %v7376_v25  ;;  %v7384_v25 = vpack.c.b16 %v868_v14, %v866_v35  ;;  %v530_v49 = vmax.f32 %v368_v33, 0.0  ;;  %v531_v11 = vmax.f32 %v369_v43, 0.0  ;;  %v235_v33 = vld [vmem:[%s6899_s26 + $0x1b0] sm:$0xff]  ;;  %v236_v43 = vld [vmem:[%s6899_s26 + $0x1b8] sm:$0xff] }
 0x16e   : > { %10966 = vst [vmem:[#allocation54_spill] sm:$0xff] %v7378_v26  ;;  %1338 = vmatmul.bf16.gmra.mxu0 %v7374_v2  ;;  %v528_v26 = vmax.f32 %v366_v54, 0.0  ;;  %v7394_v35 = vpack.c.b16 %v867_v16, %v865_v38 }
 0x16f   : > { %1682 = vmatmul.bf16.gmra.mxu2 %v7374_v2  ;;  %10967 = vst [vmem:[#allocation55_spill] sm:$0xff] %v7384_v25  ;;  %v529_v2 = vmax.f32 %v367_v5, 0.0  ;;  %v639_v51 = vpack.c.bf16 %v531_v11, %v530_v49 }
 0x170   : > { %10970 = vst [vmem:[#allocation58_spill] sm:$0xff] %v7394_v35 }
 0x171   : > { %v872_v5 = vunpack.c.h.b16 %v639_v51 }
 0x172   : > { %v1643_v15 = vpop.f32.mrf.mxu2 }
 0x173   : > { %v1817_v62 = vpop.f32.mrf.mxu3  ;;  %v7386_v12 = vadd.f32 %v1815_v45, %v1643_v15  ;;  %v1301_v40 = vpop.f32.mrf.mxu0 }
 0x174   : > { %v1476_v29 = vpop.f32.mrf.mxu1  ;;  %v7388_v52 = vadd.f32 %v1473_v59, %v1301_v40  ;;  %v638_v59 = vpack.c.bf16 %v529_v2, %v528_v26  ;;  %v370_v2 = vunpack.c.l.bf16 %v235_v33  ;;  %v371_v26 = vunpack.c.h.bf16 %v235_v33 }
 0x175   : > { %10968 = vst [vmem:[#allocation56_spill] sm:$0xff] %v7386_v12 }
 0x176   : > { %10969 = vst [vmem:[#allocation57_spill] sm:$0xff] %v7388_v52  ;;  %v870_v15 = vunpack.c.h.b16 %v638_v59 }
 0x177   : > { %6198 = vmatmul.msk.bf16.gmra.mxu1 %vm1130_vm0, %v7384_v25 }
 0x178   : > { %6231 = vmatmul.msk.bf16.gmra.mxu3 %vm1130_vm0, %v7384_v25  ;;  %v7404_v38 = vpack.c.b16 %v872_v5, %v870_v15  ;;  %v869_v25 = vunpack.c.l.b16 %v638_v59  ;;  %v532_v15 = vmax.f32 %v370_v2, 0.0  ;;  %v533_v5 = vmax.f32 %v371_v26, 0.0 }
 0x17a   : > { %v1645_v45 = vpop.f32.mrf.mxu2  ;;  %10973 = vst [vmem:[#allocation61_spill] sm:$0xff] %v7404_v38 }
 0x17b   : > { %v1820_v14 = vpop.f32.mrf.mxu3  ;;  %v7396_v63 = vadd.f32 %v1817_v62, %v1645_v45  ;;  %v1304_v54 = vpop.f32.mrf.mxu0  ;;  %v372_v62 = vunpack.c.l.bf16 %v236_v43 }
 0x17c   : > { %v1478_v19 = vpop.f32.mrf.mxu1  ;;  %v7398_v56 = vadd.f32 %v1476_v29, %v1304_v54  ;;  %v373_v29 = vunpack.c.h.bf16 %v236_v43 }
 0x17d   : > { %10971 = vst [vmem:[#allocation59_spill] sm:$0xff] %v7396_v63 }
 0x17e   : > { %10972 = vst [vmem:[#allocation60_spill] sm:$0xff] %v7398_v56  ;;  %1343 = vmatmul.bf16.gmra.mxu0 %v7394_v35  ;;  %v871_v56 = vunpack.c.l.b16 %v639_v51  ;;  %v640_v51 = vpack.c.bf16 %v533_v5, %v532_v15  ;;  %v6309_v15 = vld [vmem:[%s10735_s1 + $0x80] sm:$0xf] }
 0x17f   : > { %1687 = vmatmul.bf16.gmra.mxu2 %v7394_v35 }
 0x180   : > { %v7414_v33 = vpack.c.b16 %v871_v56, %v869_v25  ;;  %v874_v2 = vunpack.c.h.b16 %v640_v51 }
 0x182   : > { %v1648_v16 = vpop.f32.mrf.mxu2  ;;  %10976 = vst [vmem:[#allocation64_spill] sm:$0xff] %v7414_v33 }
 0x183   : > { %v1822_v40 = vpop.f32.mrf.mxu3  ;;  %v7406_v11 = vadd.f32 %v1820_v14, %v1648_v16  ;;  %v1306_v49 = vpop.f32.mrf.mxu0  ;;  %v534_v14 = vmax.f32 %v372_v62, 0.0  ;;  %v535_v16 = vmax.f32 %v373_v29, 0.0  ;;  %v237_v62 = vld [vmem:[%s6899_s26 + $0x1c0] sm:$0xff]  ;;  %v238_v29 = vld [vmem:[%s6899_s26 + $0x1c8] sm:$0xff] }
 0x184   : > { %v1481_v45 = vpop.f32.mrf.mxu1  ;;  %v7408_v54 = vadd.f32 %v1478_v19, %v1306_v49  ;;  %v375_v63 = vunpack.c.h.bf16 %v237_v62 }
 0x185   : > { %10974 = vst [vmem:[#allocation62_spill] sm:$0xff] %v7406_v11  ;;  %v641_v49 = vpack.c.bf16 %v535_v16, %v534_v14 }
 0x186   : > { %10975 = vst [vmem:[#allocation63_spill] sm:$0xff] %v7408_v54  ;;  %v537_v52 = vmax.f32 %v375_v63, 0.0 }
 0x187   : > { %6199 = vmatmul.msk.bf16.gmra.mxu1 %vm1130_vm0, %v7404_v38  ;;  %v876_v26 = vunpack.c.h.b16 %v641_v49 }
 0x188   : > { %6232 = vmatmul.msk.bf16.gmra.mxu3 %vm1130_vm0, %v7404_v38  ;;  %v374_v38 = vunpack.c.l.bf16 %v237_v62  ;;  %v873_v62 = vunpack.c.l.b16 %v640_v51 }
 0x189   : > { %v7430_v5 = vpack.c.b16 %v876_v26, %v874_v2 }
 0x18a   : > { %v1650_v35 = vpop.f32.mrf.mxu2 }
 0x18b   : > { %v1825_v43 = vpop.f32.mrf.mxu3  ;;  %v7416_v19 = vadd.f32 %v1822_v40, %v1650_v35  ;;  %v1309_v59 = vpop.f32.mrf.mxu0  ;;  %v376_v35 = vunpack.c.l.bf16 %v238_v29  ;;  %v377_v40 = vunpack.c.h.bf16 %v238_v29  ;;  %10979 = vst [vmem:[#allocation67_spill] sm:$0xff] %v7430_v5  ;;  %v536_v29 = vmax.f32 %v374_v38, 0.0 }
 0x18c   : > { %v1483_v54 = vpop.f32.mrf.mxu1  ;;  %v7418_v11 = vadd.f32 %v1481_v45, %v1309_v59  ;;  %v6610_v45 = vld [vmem:[%s10735_s1 + $0x84] sm:$0xf0] }
 0x18d   : > { %10977 = vst [vmem:[#allocation65_spill] sm:$0xff] %v7416_v19  ;;  %v6310_v59 = vor.u32 %v6610_v45, %v6309_v15  ;;  %v875_v19 = vunpack.c.l.b16 %v641_v49  ;;  %v538_v12 = vmax.f32 %v376_v35, 0.0  ;;  %v539_v18 = vmax.f32 %v377_v40, 0.0 }
 0x18e   : > { %10978 = vst [vmem:[#allocation66_spill] sm:$0xff] %v7418_v11  ;;  %1348 = vmatmul.bf16.gmra.mxu0 %v7414_v33  ;;  %v642_v2 = vpack.c.bf16 %v537_v52, %v536_v29 }
 0x18f   : > { %1692 = vmatmul.bf16.gmra.mxu2 %v7414_v33  ;;  %2271 = vmatpush.bf16.msrb.mxu3 %v6310_v59  ;;  %v7446_v63 = vpack.c.b16 %v875_v19, %v873_v62  ;;  %v643_v26 = vpack.c.bf16 %v539_v18, %v538_v12  ;;  %v239_v59 = vld [vmem:[%s6899_s26 + $0x1d0] sm:$0xff]  ;;  %v240_v19 = vld [vmem:[%s6899_s26 + $0x1d8] sm:$0xff] }
 0x190   : > { %v878_v45 = vunpack.c.h.b16 %v642_v2  ;;  %v378_v18 = vunpack.c.l.bf16 %v239_v59  ;;  %v379_v29 = vunpack.c.h.bf16 %v239_v59 }
 0x191   : > { %10981 = vst [vmem:[#allocation69_spill] sm:$0xff] %v7446_v63 }
 0x192   : > { %v1653_v56 = vpop.f32.mrf.mxu2 }
 0x193   : > { %v1827_v25 = vpop.f32.mrf.mxu3  ;;  %v7432_v14 = vadd.f32 %v1825_v43, %v1653_v56  ;;  %v1311_v16 = vpop.f32.mrf.mxu0  ;;  %v6253_v43 = vld [vmem:[%s10735_s1 + $0x10] sm:$0xf] }
 0x194   : > { %v1486_v33 = vpop.f32.mrf.mxu1  ;;  %v7434_v11 = vadd.f32 %v1483_v54, %v1311_v16  ;;  %v6596_v54 = vld [vmem:[%s10735_s1 + $0x14] sm:$0xf0]  ;;  %v880_v16 = vunpack.c.h.b16 %v643_v26 }
 0x195   : > { %v6254_v51 = vor.u32 %v6596_v54, %v6253_v43  ;;  %v380_v54 = vunpack.c.l.bf16 %v240_v19 }
 0x196   : > { %10980 = vst [vmem:[#allocation68_spill] sm:$0xff] %v7434_v11  ;;  %v7456_v43 = vpack.c.b16 %v880_v16, %v878_v45  ;;  %v6311_v45 = vld [vmem:[%s10735_s1 + $0x88] sm:$0xf0]  ;;  %v877_v16 = vunpack.c.l.b16 %v642_v2  ;;  %v6595_v2 = vld [vmem:[%s10735_s1 + $0x14] sm:$0xf] }
 0x197   : > { %6200 = vmatmul.msk.bf16.gmra.mxu1 %vm1130_vm0, %v7430_v5  ;;  %v542_v59 = vmax.f32 %v380_v54, 0.0 }
 0x198   : > { %6233 = vmatmul.msk.bf16.gmra.mxu3 %vm1130_vm0, %v7430_v5  ;;  %2098 = vmatpush.bf16.msrb.mxu1 %v6254_v51  ;;  %10984 = vst [vmem:[#allocation72_spill] sm:$0xff] %v7456_v43  ;;  %v879_v5 = vunpack.c.l.b16 %v643_v26  ;;  %v6255_v26 = vld [vmem:[%s10735_s1 + $0x18] sm:$0xf0] }
 0x19a   : > { %v1655_v49 = vpop.f32.mrf.mxu2 }
 0x19b   : > { %v1830_v38 = vpop.f32.mrf.mxu3  ;;  %v7448_v56 = vadd.f32 %v1827_v25, %v1655_v49  ;;  %v1314_v35 = vpop.f32.mrf.mxu0 }
 0x19c   : > { %v1488_v40 = vpop.f32.mrf.mxu1  ;;  %v7450_v15 = vadd.f32 %v1486_v33, %v1314_v35  ;;  %v381_v33 = vunpack.c.h.bf16 %v240_v19  ;;  %v6609_v35 = vld [vmem:[%s10735_s1 + $0x84] sm:$0xf] }
 0x19d   : > { %10982 = vst [vmem:[#allocation70_spill] sm:$0xff] %v7448_v56 }
 0x19e   : > { %10983 = vst [vmem:[#allocation71_spill] sm:$0xff] %v7450_v15  ;;  %1353 = vmatmul.bf16.gmra.mxu0 %v7446_v63  ;;  %v543_v19 = vmax.f32 %v381_v33, 0.0 }
 0x19f   : > { %1697 = vmatmul.bf16.gmra.mxu2 %v7446_v63  ;;  %v6314_v63 = vor.u32 %v6609_v35, %v6311_v45 }
 0x1a0   : > { %v645_v54 = vpack.c.bf16 %v543_v19, %v542_v59 }
 0x1a1   : > { %2615 = vmatpush.bf16.msrb.mxu2 %v6314_v63  ;;  %v6258_v63 = vor.u32 %v6595_v2, %v6255_v26 }
 0x1a2   : > { %v1658_v52 = vpop.f32.mrf.mxu2 }
 0x1a3   : > { %v1832_v62 = vpop.f32.mrf.mxu3  ;;  %v7458_v12 = vadd.f32 %v1830_v38, %v1658_v52  ;;  %v1316_v25 = vpop.f32.mrf.mxu0  ;;  %v540_v38 = vmax.f32 %v378_v18, 0.0  ;;  %v7472_v52 = vpack.c.b16 %v879_v5, %v877_v16  ;;  %2442 = vmatpush.bf16.msrb.mxu0 %v6258_v63  ;;  %v884_v16 = vunpack.c.h.b16 %v645_v54 }
 0x1a4   : > { %v1491_v51 = vpop.f32.mrf.mxu1  ;;  %v7460_v49 = vadd.f32 %v1488_v40, %v1316_v25  ;;  %v541_v40 = vmax.f32 %v379_v29, 0.0 }
 0x1a5   : > { %10985 = vst [vmem:[#allocation73_spill] sm:$0xff] %v7458_v12  ;;  %v242_v12 = vld [vmem:[%s6899_s26 + $0x1e8] sm:$0xff] }
 0x1a6   : > { %10986 = vst [vmem:[#allocation74_spill] sm:$0xff] %v7460_v49  ;;  %v644_v29 = vpack.c.bf16 %v541_v40, %v540_v38  ;;  %v385_v38 = vunpack.c.h.bf16 %v242_v12 }
 0x1a7   : > { %6201 = vmatmul.msk.bf16.gmra.mxu1 %vm1130_vm0, %v7456_v43  ;;  %10987 = vst [vmem:[#allocation75_spill] sm:$0xff] %v7472_v52 }
 0x1a8   : > { %6234 = vmatmul.msk.bf16.gmra.mxu3 %vm1130_vm0, %v7456_v43  ;;  %v882_v45 = vunpack.c.h.b16 %v644_v29  ;;  %v241_v43 = vld [vmem:[%s6899_s26 + $0x1e0] sm:$0xff]  ;;  %v881_v26 = vunpack.c.l.b16 %v644_v29  ;;  %v547_v11 = vmax.f32 %v385_v38, 0.0  ;;  %v244_v38 = vld [vmem:[%s6899_s26 + $0x1f8] sm:$0xff] }
 0x1aa   : > { %v1660_v49 = vpop.f32.mrf.mxu2  ;;  %v7488_v40 = vpack.c.b16 %v884_v16, %v882_v45 }
 0x1ab   : > { %v1835_v25 = vpop.f32.mrf.mxu3  ;;  %v7480_v35 = vadd.f32 %v1832_v62, %v1660_v49  ;;  %v1319_v18 = vpop.f32.mrf.mxu0  ;;  %v382_v62 = vunpack.c.l.bf16 %v241_v43  ;;  %v383_v49 = vunpack.c.h.bf16 %v241_v43 }
 0x1ac   : > { %v1493_v5 = vpop.f32.mrf.mxu1  ;;  %v7482_v33 = vadd.f32 %v1491_v51, %v1319_v18  ;;  %10990 = vst [vmem:[#allocation78_spill] sm:$0xff] %v7488_v40  ;;  %v883_v18 = vunpack.c.l.b16 %v645_v54 }
 0x1ad   : > { %10988 = vst [vmem:[#allocation76_spill] sm:$0xff] %v7480_v35  ;;  %v384_v35 = vunpack.c.l.bf16 %v242_v12  ;;  %v544_v63 = vmax.f32 %v382_v62, 0.0 }
 0x1ae   : > { %10989 = vst [vmem:[#allocation77_spill] sm:$0xff] %v7482_v33  ;;  %1358 = vmatmul.bf16.gmra.mxu0 %v7472_v52 }
 0x1af   : > { %1702 = vmatmul.bf16.gmra.mxu2 %v7472_v52  ;;  %v545_v52 = vmax.f32 %v383_v49, 0.0  ;;  %v546_v33 = vmax.f32 %v384_v35, 0.0  ;;  %v243_v49 = vld [vmem:[%s6899_s26 + $0x1f0] sm:$0xff] }
 0x1b2   : > { %v1663_v56 = vpop.f32.mrf.mxu2 }
 0x1b3   : > { %v1837_v15 = vpop.f32.mrf.mxu3  ;;  %v7490_v59 = vadd.f32 %v1835_v25, %v1663_v56  ;;  %v1321_v51 = vpop.f32.mrf.mxu0  ;;  %v7498_v56 = vpack.c.b16 %v883_v18, %v881_v26  ;;  %v646_v25 = vpack.c.bf16 %v545_v52, %v544_v63  ;;  %v386_v52 = vunpack.c.l.bf16 %v243_v49 }
 0x1b4   : > { %v1496_v19 = vpop.f32.mrf.mxu1  ;;  %v7492_v2 = vadd.f32 %v1493_v5, %v1321_v51  ;;  %v647_v5 = vpack.c.bf16 %v547_v11, %v546_v33  ;;  %v387_v33 = vunpack.c.h.bf16 %v243_v49  ;;  %v388_v63 = vunpack.c.l.bf16 %v244_v38 }
 0x1b5   : > { %10991 = vst [vmem:[#allocation79_spill] sm:$0xff] %v7490_v59  ;;  %v886_v16 = vunpack.c.h.b16 %v646_v25 }
 0x1b6   : > { %10992 = vst [vmem:[#allocation80_spill] sm:$0xff] %v7492_v2  ;;  %v888_v62 = vunpack.c.h.b16 %v647_v5 }
 0x1b7   : > { %6202 = vmatmul.msk.bf16.gmra.mxu1 %vm1130_vm0, %v7488_v40  ;;  %10993 = vst [vmem:[#allocation81_spill] sm:$0xff] %v7498_v56 }
 0x1b8   : > { %6235 = vmatmul.msk.bf16.gmra.mxu3 %vm1130_vm0, %v7488_v40  ;;  %v7508_v26 = vpack.c.b16 %v888_v62, %v886_v16  ;;  %v885_v40 = vunpack.c.l.b16 %v646_v25  ;;  %v548_v16 = vmax.f32 %v386_v52, 0.0  ;;  %v549_v62 = vmax.f32 %v387_v33, 0.0 }
 0x1ba   : > { %v1665_v12 = vpop.f32.mrf.mxu2  ;;  %10996 = vst [vmem:[#allocation84_spill] sm:$0xff] %v7508_v26 }
 0x1bb   : > { %v1840_v43 = vpop.f32.mrf.mxu3  ;;  %v7500_v29 = vadd.f32 %v1837_v15, %v1665_v12  ;;  %v1324_v54 = vpop.f32.mrf.mxu0 }
 0x1bc   : > { %v1498_v45 = vpop.f32.mrf.mxu1  ;;  %v7502_v35 = vadd.f32 %v1496_v19, %v1324_v54  ;;  %v389_v19 = vunpack.c.h.bf16 %v244_v38 }
 0x1bd   : > { %10994 = vst [vmem:[#allocation82_spill] sm:$0xff] %v7500_v29 }
 0x1be   : > { %10995 = vst [vmem:[#allocation83_spill] sm:$0xff] %v7502_v35  ;;  %1363 = vmatmul.bf16.gmra.mxu0 %v7498_v56  ;;  %v887_v35 = vunpack.c.l.b16 %v647_v5  ;;  %v648_v5 = vpack.c.bf16 %v549_v62, %v548_v16 }
 0x1bf   : > { %1707 = vmatmul.bf16.gmra.mxu2 %v7498_v56 }
 0x1c0   : > { %v7518_v49 = vpack.c.b16 %v887_v35, %v885_v40  ;;  %v890_v52 = vunpack.c.h.b16 %v648_v5 }
 0x1c2   : > { %v1668_v18 = vpop.f32.mrf.mxu2  ;;  %10999 = vst [vmem:[#allocation87_spill] sm:$0xff] %v7518_v49 }
 0x1c3   : > { %v1842_v51 = vpop.f32.mrf.mxu3  ;;  %v7510_v11 = vadd.f32 %v1840_v43, %v1668_v18  ;;  %v1326_v15 = vpop.f32.mrf.mxu0  ;;  %v550_v43 = vmax.f32 %v388_v63, 0.0  ;;  %v551_v18 = vmax.f32 %v389_v19, 0.0  ;;  %v245_v63 = vld [vmem:[%s6899_s26 + $0x200] sm:$0xff]  ;;  %v246_v19 = vld [vmem:[%s6899_s26 + $0x208] sm:$0xff] }
 0x1c4   : > { %v1501_v12 = vpop.f32.mrf.mxu1  ;;  %v7512_v54 = vadd.f32 %v1498_v45, %v1326_v15  ;;  %v391_v29 = vunpack.c.h.bf16 %v245_v63 }
 0x1c5   : > { %10997 = vst [vmem:[#allocation85_spill] sm:$0xff] %v7510_v11  ;;  %v649_v15 = vpack.c.bf16 %v551_v18, %v550_v43  ;;  %v889_v18 = vunpack.c.l.b16 %v648_v5 }
 0x1c6   : > { %10998 = vst [vmem:[#allocation86_spill] sm:$0xff] %v7512_v54 }
 0x1c7   : > { %6203 = vmatmul.msk.bf16.gmra.mxu1 %vm1130_vm0, %v7508_v26  ;;  %v892_v33 = vunpack.c.h.b16 %v649_v15 }
 0x1c8   : > { %6236 = vmatmul.msk.bf16.gmra.mxu3 %vm1130_vm0, %v7508_v26  ;;  %v390_v26 = vunpack.c.l.bf16 %v245_v63 }
 0x1ca   : > { %v1670_v56 = vpop.f32.mrf.mxu2 }
 0x1cb   : > { %v1845_v38 = vpop.f32.mrf.mxu3  ;;  %v7520_v45 = vadd.f32 %v1842_v51, %v1670_v56  ;;  %v1329_v25 = vpop.f32.mrf.mxu0  ;;  %v392_v56 = vunpack.c.l.bf16 %v246_v19  ;;  %v393_v51 = vunpack.c.h.bf16 %v246_v19 }
 0x1cc   : > { %v1503_v54 = vpop.f32.mrf.mxu1  ;;  %v7522_v11 = vadd.f32 %v1501_v12, %v1329_v25  ;;  %v891_v25 = vunpack.c.l.b16 %v649_v15 }
 0x1cd   : > { %11000 = vst [vmem:[#allocation88_spill] sm:$0xff] %v7520_v45  ;;  %v7528_v45 = vpack.c.b16 %v892_v33, %v890_v52  ;;  %v554_v2 = vmax.f32 %v392_v56, 0.0  ;;  %v555_v59 = vmax.f32 %v393_v51, 0.0 }
 0x1ce   : > { %11001 = vst [vmem:[#allocation89_spill] sm:$0xff] %v7522_v11  ;;  %1368 = vmatmul.bf16.gmra.mxu0 %v7518_v49  ;;  %v552_v11 = vmax.f32 %v390_v26, 0.0  ;;  %v7538_v52 = vpack.c.b16 %v891_v25, %v889_v18  ;;  %v6594_v26 = vld [vmem:[%s10735_s1 + $0x4] sm:$0xf0] }
 0x1cf   : > { %1712 = vmatmul.bf16.gmra.mxu2 %v7518_v49  ;;  %11002 = vst [vmem:[#allocation90_spill] sm:$0xff] %v7528_v45  ;;  %v553_v49 = vmax.f32 %v391_v29, 0.0  ;;  %v651_v63 = vpack.c.bf16 %v555_v59, %v554_v2  ;;  %v6245_v29 = vld [vmem:[%s10735_s1] sm:$0xf]  ;;  %v247_v2 = vld [vmem:[%s6899_s26 + $0x210] sm:$0xff] }
 0x1d0   : > { %11005 = vst [vmem:[#allocation93_spill] sm:$0xff] %v7538_v52  ;;  %v6246_v19 = vor.u32 %v6594_v26, %v6245_v29  ;;  %v394_v18 = vunpack.c.l.bf16 %v247_v2 }
 0x1d1   : > { %v896_v59 = vunpack.c.h.b16 %v651_v63 }
 0x1d2   : > { %v1673_v35 = vpop.f32.mrf.mxu2  ;;  %2099 = vmatpush.bf16.msrb.mxu1 %v6246_v19 }
 0x1d3   : > { %v1847_v40 = vpop.f32.mrf.mxu3  ;;  %v7530_v16 = vadd.f32 %v1845_v38, %v1673_v35  ;;  %v1331_v12 = vpop.f32.mrf.mxu0 }
 0x1d4   : > { %v1506_v62 = vpop.f32.mrf.mxu1  ;;  %v7532_v43 = vadd.f32 %v1503_v54, %v1331_v12  ;;  %v650_v54 = vpack.c.bf16 %v553_v49, %v552_v11  ;;  %v248_v49 = vld [vmem:[%s6899_s26 + $0x218] sm:$0xff] }
 0x1d5   : > { %11003 = vst [vmem:[#allocation91_spill] sm:$0xff] %v7530_v16  ;;  %v396_v29 = vunpack.c.l.bf16 %v248_v49  ;;  %v397_v26 = vunpack.c.h.bf16 %v248_v49 }
 0x1d6   : > { %11004 = vst [vmem:[#allocation92_spill] sm:$0xff] %v7532_v43  ;;  %v7551_v11 = vunpack.c.h.b16 %v650_v54 }
 0x1d7   : > { %6204 = vmatmul.msk.bf16.gmra.mxu1 %vm1130_vm0, %v7528_v45 }
 0x1d8   : > { %6237 = vmatmul.msk.bf16.gmra.mxu3 %vm1130_vm0, %v7528_v45  ;;  %11008 = vst [vmem:[#allocation96_spill] sm:$0xff] %v7551_v11  ;;  %v7557_v12 = vpack.c.b16 %v896_v59, %v7551_v11  ;;  %v7563_v45 = vunpack.c.l.b16 %v650_v54  ;;  %v556_v59 = vmax.f32 %v394_v18, 0.0  ;;  %v6593_v18 = vld [vmem:[%s10735_s1 + $0x4] sm:$0xf] }
 0x1da   : > { %v1675_v33 = vpop.f32.mrf.mxu2  ;;  %11009 = vst [vmem:[#allocation97_spill] sm:$0xff] %v7557_v12 }
 0x1db   : > { %v1850_v38 = vpop.f32.mrf.mxu3  ;;  %v7546_v5 = vadd.f32 %v1847_v40, %v1675_v33  ;;  %v1334_v15 = vpop.f32.mrf.mxu0  ;;  %v395_v33 = vunpack.c.h.bf16 %v247_v2  ;;  %11012 = vst [vmem:[#allocation100_spill] sm:$0xff] %v7563_v45 }
 0x1dc   : > { %v1508_v35 = vpop.f32.mrf.mxu1  ;;  %v7548_v56 = vadd.f32 %v1506_v62, %v1334_v15 }
 0x1dd   : > { %11006 = vst [vmem:[#allocation94_spill] sm:$0xff] %v7546_v5  ;;  %v557_v11 = vmax.f32 %v395_v33, 0.0 }
 0x1de   : > { %11007 = vst [vmem:[#allocation95_spill] sm:$0xff] %v7548_v56  ;;  %1373 = vmatmul.bf16.gmra.mxu0 %v7538_v52 }
 0x1df   : > { %1717 = vmatmul.bf16.gmra.mxu2 %v7538_v52  ;;  %v895_v52 = vunpack.c.l.b16 %v651_v63 }
 0x1e1   : > { %v7570_v2 = vpack.c.b16 %v895_v52, %v7563_v45  ;;  %v6247_v52 = vld [vmem:[%s10735_s1 + $0x8] sm:$0xf0] }
 0x1e2   : > { %v1678_v40 = vpop.f32.mrf.mxu2  ;;  %v6250_v33 = vor.u32 %v6593_v18, %v6247_v52 }
 0x1e3   : > { %v1852_v51 = vpop.f32.mrf.mxu3  ;;  %v7559_v25 = vadd.f32 %v1850_v38, %v1678_v40  ;;  %v1336_v62 = vpop.f32.mrf.mxu0  ;;  %v558_v38 = vmax.f32 %v396_v29, 0.0  ;;  %v559_v40 = vmax.f32 %v397_v26, 0.0  ;;  %11013 = vst [vmem:[#allocation101_spill] sm:$0xff] %v7570_v2  ;;  %v250_v26 = vld [vmem:[%s6899_s26 + $0x228] sm:$0xff] }
 0x1e4   : > { %v1511_v15 = vpop.f32.mrf.mxu1  ;;  %v7561_v19 = vadd.f32 %v1508_v35, %v1336_v62  ;;  %v652_v62 = vpack.c.bf16 %v557_v11, %v556_v59  ;;  %v249_v11 = vld [vmem:[%s6899_s26 + $0x220] sm:$0xff]  ;;  %2443 = vmatpush.bf16.msrb.mxu0 %v6250_v33 }
 0x1e5   : > { %11010 = vst [vmem:[#allocation98_spill] sm:$0xff] %v7559_v25 }
 0x1e6   : > { %11011 = vst [vmem:[#allocation99_spill] sm:$0xff] %v7561_v19  ;;  %v653_v19 = vpack.c.bf16 %v559_v40, %v558_v38  ;;  %v898_v29 = vunpack.c.h.b16 %v652_v62  ;;  %v398_v38 = vunpack.c.l.bf16 %v249_v11  ;;  %v399_v40 = vunpack.c.h.bf16 %v249_v11 }
 0x1e7   : > { %6205 = vmatmul.msk.bf16.gmra.mxu1 %vm1130_vm0, %v7557_v12  ;;  %v897_v52 = vunpack.c.l.b16 %v652_v62 }
 0x1e8   : > { %6238 = vmatmul.msk.bf16.gmra.mxu3 %vm1130_vm0, %v7557_v12  ;;  %v899_v5 = vunpack.c.l.b16 %v653_v19  ;;  %v561_v43 = vmax.f32 %v399_v40, 0.0  ;;  %v251_v40 = vld [vmem:[%s6899_s26 + $0x230] sm:$0xff] }
 0x1ea   : > { %v1680_v35 = vpop.f32.mrf.mxu2 }
 0x1eb   : > { %v1855_v49 = vpop.f32.mrf.mxu3  ;;  %v7572_v54 = vadd.f32 %v1852_v51, %v1680_v35  ;;  %v1339_v63 = vpop.f32.mrf.mxu0  ;;  %v900_v51 = vunpack.c.h.b16 %v653_v19  ;;  %v400_v35 = vunpack.c.l.bf16 %v250_v26 }
 0x1ec   : > { %v1513_v25 = vpop.f32.mrf.mxu1  ;;  %v7574_v56 = vadd.f32 %v1511_v15, %v1339_v63  ;;  %v401_v63 = vunpack.c.h.bf16 %v250_v26 }
 0x1ed   : > { %11014 = vst [vmem:[#allocation102_spill] sm:$0xff] %v7572_v54  ;;  %v7586_v12 = vpack.c.b16 %v900_v51, %v898_v29  ;;  %v562_v16 = vmax.f32 %v400_v35, 0.0  ;;  %v252_v35 = vld [vmem:[%s6899_s26 + $0x238] sm:$0xff] }
 0x1ee   : > { %11015 = vst [vmem:[#allocation103_spill] sm:$0xff] %v7574_v56  ;;  %1378 = vmatmul.bf16.gmra.mxu0 %v7570_v2  ;;  %v563_v33 = vmax.f32 %v401_v63, 0.0 }
 0x1ef   : > { %1722 = vmatmul.bf16.gmra.mxu2 %v7570_v2  ;;  %11016 = vst [vmem:[#allocation104_spill] sm:$0xff] %v7586_v12  ;;  %v560_v2 = vmax.f32 %v398_v38, 0.0 }
 0x1f2   : > { %v1683_v59 = vpop.f32.mrf.mxu2 }
 0x1f3   : > { %v1857_v15 = vpop.f32.mrf.mxu3  ;;  %v7588_v45 = vadd.f32 %v1855_v49, %v1683_v59  ;;  %v1341_v56 = vpop.f32.mrf.mxu0  ;;  %v7596_v49 = vpack.c.b16 %v899_v5, %v897_v52 }
 0x1f4   : > { %v1516_v54 = vpop.f32.mrf.mxu1  ;;  %v7590_v18 = vadd.f32 %v1513_v25, %v1341_v56  ;;  %v654_v56 = vpack.c.bf16 %v561_v43, %v560_v2  ;;  %v655_v25 = vpack.c.bf16 %v563_v33, %v562_v16  ;;  %v402_v43 = vunpack.c.l.bf16 %v251_v40 }
 0x1f5   : > { %11017 = vst [vmem:[#allocation105_spill] sm:$0xff] %v7588_v45  ;;  %v404_v33 = vunpack.c.l.bf16 %v252_v35 }
 0x1f6   : > { %11018 = vst [vmem:[#allocation106_spill] sm:$0xff] %v7590_v18  ;;  %v902_v59 = vunpack.c.h.b16 %v654_v56  ;;  %v904_v38 = vunpack.c.h.b16 %v655_v25 }
 0x1f7   : > { %6206 = vmatmul.msk.bf16.gmra.mxu1 %vm1130_vm0, %v7586_v12  ;;  %11019 = vst [vmem:[#allocation107_spill] sm:$0xff] %v7596_v49 }
 0x1f8   : > { %6239 = vmatmul.msk.bf16.gmra.mxu3 %vm1130_vm0, %v7586_v12  ;;  %v7606_v63 = vpack.c.b16 %v904_v38, %v902_v59  ;;  %v901_v12 = vunpack.c.l.b16 %v654_v56  ;;  %v564_v59 = vmax.f32 %v402_v43, 0.0 }
 0x1fa   : > { %v1685_v51 = vpop.f32.mrf.mxu2  ;;  %11022 = vst [vmem:[#allocation110_spill] sm:$0xff] %v7606_v63 }
 0x1fb   : > { %v1860_v29 = vpop.f32.mrf.mxu3  ;;  %v7598_v62 = vadd.f32 %v1857_v15, %v1685_v51  ;;  %v1344_v19 = vpop.f32.mrf.mxu0  ;;  %v403_v15 = vunpack.c.h.bf16 %v251_v40 }
 0x1fc   : > { %v1518_v11 = vpop.f32.mrf.mxu1  ;;  %v7600_v26 = vadd.f32 %v1516_v54, %v1344_v19  ;;  %v405_v54 = vunpack.c.h.bf16 %v252_v35 }
 0x1fd   : > { %11020 = vst [vmem:[#allocation108_spill] sm:$0xff] %v7598_v62  ;;  %v565_v38 = vmax.f32 %v403_v15, 0.0  ;;  %v253_v15 = vld [vmem:[%s6899_s26 + $0x240] sm:$0xff] }
 0x1fe   : > { %11021 = vst [vmem:[#allocation109_spill] sm:$0xff] %v7600_v26  ;;  %1383 = vmatmul.bf16.gmra.mxu0 %v7596_v49  ;;  %v903_v26 = vunpack.c.l.b16 %v655_v25 }
 0x1ff   : > { %1727 = vmatmul.bf16.gmra.mxu2 %v7596_v49  ;;  %v656_v56 = vpack.c.bf16 %v565_v38, %v564_v59  ;;  %v407_v59 = vunpack.c.h.bf16 %v253_v15 }
 0x200   : > { %v7616_v49 = vpack.c.b16 %v903_v26, %v901_v12 }
 0x202   : > { %v1688_v52 = vpop.f32.mrf.mxu2  ;;  %11025 = vst [vmem:[#allocation113_spill] sm:$0xff] %v7616_v49 }
 0x203   : > { %v1862_v5 = vpop.f32.mrf.mxu3  ;;  %v7608_v16 = vadd.f32 %v1860_v29, %v1688_v52  ;;  %v1346_v2 = vpop.f32.mrf.mxu0  ;;  %v566_v29 = vmax.f32 %v404_v33, 0.0  ;;  %v567_v52 = vmax.f32 %v405_v54, 0.0 }
 0x204   : > { %v1521_v51 = vpop.f32.mrf.mxu1  ;;  %v7610_v19 = vadd.f32 %v1518_v11, %v1346_v2 }
 0x205   : > { %11023 = vst [vmem:[#allocation111_spill] sm:$0xff] %v7608_v16  ;;  %v657_v25 = vpack.c.bf16 %v567_v52, %v566_v29 }
 0x206   : > { %11024 = vst [vmem:[#allocation112_spill] sm:$0xff] %v7610_v19 }
 0x207   : > { %6207 = vmatmul.msk.bf16.gmra.mxu1 %vm1130_vm0, %v7606_v63  ;;  %v908_v43 = vunpack.c.h.b16 %v657_v25  ;;  %v907_v52 = vunpack.c.l.b16 %v657_v25 }
 0x208   : > { %6240 = vmatmul.msk.bf16.gmra.mxu3 %vm1130_vm0, %v7606_v63  ;;  %v906_v63 = vunpack.c.h.b16 %v656_v56 }
 0x20a   : > { %v1690_v35 = vpop.f32.mrf.mxu2  ;;  %v7625_v26 = vpack.c.b16 %v908_v43, %v906_v63  ;;  %v6519_v63 = vld [vmem:[%s10735_s1 + $0x230] sm:$0xf] }
 0x20b   : > { %v1865_v40 = vpop.f32.mrf.mxu3  ;;  %v7618_v16 = vadd.f32 %v1862_v5, %v1690_v35  ;;  %v1349_v11 = vpop.f32.mrf.mxu0  ;;  %v406_v35 = vunpack.c.l.bf16 %v253_v15 }
 0x20c   : > { %v1523_v2 = vpop.f32.mrf.mxu1  ;;  %v7620_v19 = vadd.f32 %v1521_v51, %v1349_v11  ;;  %11028 = vst [vmem:[#allocation116_spill] sm:$0xff] %v7625_v26  ;;  %v905_v51 = vunpack.c.l.b16 %v656_v56 }
 0x20d   : > { %11026 = vst [vmem:[#allocation114_spill] sm:$0xff] %v7618_v16  ;;  %v568_v11 = vmax.f32 %v406_v35, 0.0 }
 0x20e   : > { %11027 = vst [vmem:[#allocation115_spill] sm:$0xff] %v7620_v19  ;;  %1388 = vmatmul.bf16.gmra.mxu0 %v7616_v49  ;;  %v7641_v56 = vpack.c.b16 %v907_v52, %v905_v51  ;;  %v6656_v51 = vld [vmem:[%s10735_s1 + $0x1f4] sm:$0xf0] }
 0x20f   : > { %1732 = vmatmul.bf16.gmra.mxu2 %v7616_v49  ;;  %v569_v49 = vmax.f32 %v407_v59, 0.0 }
 0x210   : > { %11031 = vst [vmem:[#allocation119_spill] sm:$0xff] %v7641_v56 }
 0x212   : > { %v1693_v12 = vpop.f32.mrf.mxu2 }
 0x213   : > { %v1867_v33 = vpop.f32.mrf.mxu3  ;;  %v7627_v54 = vadd.f32 %v1865_v40, %v1693_v12  ;;  %v1351_v5 = vpop.f32.mrf.mxu0  ;;  %v6664_v40 = vld [vmem:[%s10735_s1 + $0x234] sm:$0xf0] }
 0x214   : > { %v1526_v38 = vpop.f32.mrf.mxu1  ;;  %v7629_v29 = vadd.f32 %v1523_v2, %v1351_v5  ;;  %v6520_v2 = vor.u32 %v6664_v40, %v6519_v63  ;;  %v658_v5 = vpack.c.bf16 %v569_v49, %v568_v11  ;;  %v182_v49 = vld [vmem:[%s6899_s26 + $0x8] sm:$0xff] }
 0x215   : > { %11029 = vst [vmem:[#allocation117_spill] sm:$0xff] %v7627_v54 }
 0x216   : > { %11030 = vst [vmem:[#allocation118_spill] sm:$0xff] %v7629_v29  ;;  %3155 = vmatpush.bf16.msra.mxu3 %v6520_v2  ;;  %v7654_v63 = vunpack.c.h.b16 %v658_v5  ;;  %v7665_v54 = vunpack.c.l.b16 %v658_v5 }
 0x217   : > { %6208 = vmatmul.msk.bf16.gmra.mxu1 %vm1130_vm0, %v7625_v26 }
 0x218   : > { %6241 = vmatmul.msk.bf16.gmra.mxu3 %vm1130_vm0, %v7625_v26  ;;  %v6487_v26 = vld [vmem:[%s10735_s1 + $0x1f0] sm:$0xf]  ;;  %11034 = vst [vmem:[#allocation122_spill] sm:$0xff] %v7654_v63  ;;  %v975_v5 = vpack.c.b16 %v7665_v54, %v7665_v54 }
 0x219   : > { %v6488_v52 = vor.u32 %v6656_v51, %v6487_v26  ;;  %11037 = vst [vmem:[#allocation125_spill] sm:$0xff] %v7665_v54 }
 0x21a   : > { %v1695_v43 = vpop.f32.mrf.mxu2 }
 0x21b   : > { %v1870_v25 = vpop.f32.mrf.mxu3  ;;  %v7643_v15 = vadd.f32 %v1867_v33, %v1695_v43  ;;  %v1354_v12 = vpop.f32.mrf.mxu0  ;;  %v181_v33 = vld [vmem:[%s6899_s26] sm:$0xff]  ;;  %2979 = vmatpush.bf16.msra.mxu1 %v6488_v52  ;;  %v264_v43 = vunpack.c.l.bf16 %v182_v49 }
 0x21c   : > { %v1528_v35 = vpop.f32.mrf.mxu1  ;;  %v7645_v59 = vadd.f32 %v1526_v38, %v1354_v12  ;;  %v262_v40 = vunpack.c.l.bf16 %v181_v33  ;;  %v263_v2 = vunpack.c.h.bf16 %v181_v33  ;;  %v265_v12 = vunpack.c.h.bf16 %v182_v49  ;;  %v6663_v33 = vld [vmem:[%s10735_s1 + $0x234] sm:$0xf] }
 0x21d   : > { %11032 = vst [vmem:[#allocation120_spill] sm:$0xff] %v7643_v15  ;;  %v426_v52 = vmax.f32 %v264_v43, 0.0 }
 0x21e   : > { %11033 = vst [vmem:[#allocation121_spill] sm:$0xff] %v7645_v59  ;;  %1393 = vmatmul.bf16.gmra.mxu0 %v7641_v56  ;;  %v976_v59 = vpack.c.b16 %v7654_v63, %v7654_v63  ;;  %v425_v19 = vmax.f32 %v263_v2, 0.0  ;;  %v427_v16 = vmax.f32 %v265_v12, 0.0 }
 0x21f   : > { %1737 = vmatmul.bf16.gmra.mxu2 %v7641_v56  ;;  %v424_v56 = vmax.f32 %v262_v40, 0.0 }
 0x220   : > { %v587_v40 = vpack.c.bf16 %v427_v16, %v426_v52 }
 0x222   : > { %v1698_v11 = vpop.f32.mrf.mxu2  ;;  %v1928_v52 = vunpack.c.l.b16 %v587_v40 }
 0x223   : > { %v1872_v38 = vpop.f32.mrf.mxu3  ;;  %v7661_v15 = vadd.f32 %v1870_v25, %v1698_v11  ;;  %v1356_v29 = vpop.f32.mrf.mxu0  ;;  %v6521_v25 = vld [vmem:[%s10735_s1 + $0x238] sm:$0xf0]  ;;  %v586_v11 = vpack.c.bf16 %v425_v19, %v424_v56 }
 0x224   : > { %v1531_v26 = vpop.f32.mrf.mxu1  ;;  %v7663_v51 = vadd.f32 %v1528_v35, %v1356_v29  ;;  %v6524_v29 = vor.u32 %v6663_v33, %v6521_v25  ;;  %v6655_v33 = vld [vmem:[%s10735_s1 + $0x1f4] sm:$0xf]  ;;  %v6489_v25 = vld [vmem:[%s10735_s1 + $0x1f8] sm:$0xf0] }
 0x225   : > { %11035 = vst [vmem:[#allocation123_spill] sm:$0xff] %v7661_v15  ;;  %v6492_v19 = vor.u32 %v6655_v33, %v6489_v25  ;;  %v1926_v56 = vunpack.c.l.b16 %v586_v11  ;;  %v1927_v16 = vunpack.c.h.b16 %v586_v11 }
 0x226   : > { %11036 = vst [vmem:[#allocation124_spill] sm:$0xff] %v7663_v51  ;;  %3499 = vmatpush.bf16.msra.mxu2 %v6524_v29  ;;  %v1929_v29 = vunpack.c.h.b16 %v587_v40 }
 0x227   : > { %6209 = vmatmul.msk.bf16.gmra.mxu1 %vm1130_vm0, %v976_v59  ;;  %3323 = vmatpush.bf16.msra.mxu0 %v6492_v19 }
 0x228   : > { %6242 = vmatmul.msk.bf16.gmra.mxu3 %vm1130_vm0, %v976_v59  ;;  %v1943_v63 = vpack.c.b16 %v1929_v29, %v1927_v16 }
 0x22a   : > { %v1700_v49 = vpop.f32.mrf.mxu2 }
 0x22b   : > { %v1875_v35 = vpop.f32.mrf.mxu3  ;;  %v7677_v59 = vadd.f32 %v1872_v38, %v1700_v49  ;;  %v1359_v2 = vpop.f32.mrf.mxu0  ;;  %v183_v38 = vld [vmem:[%s6899_s26 + $0x10] sm:$0xff]  ;;  %v184_v49 = vld [vmem:[%s6899_s26 + $0x18] sm:$0xff] }
 0x22c   : > { %v1533_v43 = vpop.f32.mrf.mxu1  ;;  %v7679_v12 = vadd.f32 %v1531_v26, %v1359_v2  ;;  %v1942_v2 = vpack.c.b16 %v1928_v52, %v1926_v56  ;;  %v267_v15 = vunpack.c.h.bf16 %v183_v38  ;;  %v268_v62 = vunpack.c.l.bf16 %v184_v49 }
 0x22d   : > { %11038 = vst [vmem:[#allocation126_spill] sm:$0xff] %v7677_v59  ;;  %v269_v18 = vunpack.c.h.bf16 %v184_v49 }
 0x22e   : > { %11039 = vst [vmem:[#allocation127_spill] sm:$0xff] %v7679_v12  ;;  %1398 = vmatmul.bf16.gmra.mxu0 %v975_v5  ;;  %v266_v12 = vunpack.c.l.bf16 %v183_v38  ;;  %v429_v11 = vmax.f32 %v267_v15, 0.0  ;;  %v430_v40 = vmax.f32 %v268_v62, 0.0  ;;  %v185_v62 = vld [vmem:[%s6899_s26 + $0x20] sm:$0xff] }
 0x22f   : > { %1742 = vmatmul.bf16.gmra.mxu2 %v975_v5  ;;  %v431_v19 = vmax.f32 %v269_v18, 0.0  ;;  %v186_v18 = vld [vmem:[%s6899_s26 + $0x28] sm:$0xff]  ;;  %v270_v45 = vunpack.c.l.bf16 %v185_v62 }
 0x230   : > { %v428_v5 = vmax.f32 %v266_v12, 0.0 }
 0x231   : > { %v589_v29 = vpack.c.bf16 %v431_v19, %v430_v40 }
 0x232   : > { %v1703_v54 = vpop.f32.mrf.mxu2  ;;  %v588_v52 = vpack.c.bf16 %v429_v11, %v428_v5 }
 0x233   : > { %v1877_v26 = vpop.f32.mrf.mxu3  ;;  %v7689_v59 = vadd.f32 %v1875_v35, %v1703_v54  ;;  %v1361_v51 = vpop.f32.mrf.mxu0  ;;  %v1933_v12 = vunpack.c.h.b16 %v589_v29 }
 0x234   : > { %v1536_v33 = vpop.f32.mrf.mxu1  ;;  %v7691_v25 = vadd.f32 %v1533_v43, %v1361_v51  ;;  %v1930_v51 = vunpack.c.l.b16 %v588_v52  ;;  %v1932_v43 = vunpack.c.l.b16 %v589_v29 }
 0x235   : > { %11040 = vst [vmem:[#allocation128_spill] sm:$0xff] %v7689_v59 }
 0x236   : > { %11041 = vst [vmem:[#allocation129_spill] sm:$0xff] %v7691_v25  ;;  %v1931_v25 = vunpack.c.h.b16 %v588_v52  ;;  %v1944_v5 = vpack.c.b16 %v1932_v43, %v1930_v51 }
 0x237   : > { %2100 = vmatmul.bf16.vlgmr.msrb.gmra.mxu1 %v1942_v2 }
 0x238   : > { %6339 = vmatmul.msk.bf16.vlgmr.msrb.gmra.mxu3 %vm1130_vm0, %v1943_v63  ;;  %v1945_v11 = vpack.c.b16 %v1933_v12, %v1931_v25 }
 0x23a   : > { %v1705_v16 = vpop.f32.mrf.mxu2 }
 0x23b   : > { %v1880_v56 = vpop.f32.mrf.mxu3  ;;  %v7694_v54 = vadd.f32 %v1877_v26, %v1705_v16  ;;  %v1364_v35 = vpop.f32.mrf.mxu0  ;;  %v271_v26 = vunpack.c.h.bf16 %v185_v62  ;;  %v272_v16 = vunpack.c.l.bf16 %v186_v18 }
 0x23c   : > { %v1538_v38 = vpop.f32.mrf.mxu1  ;;  %v7696_v49 = vadd.f32 %v1536_v33, %v1364_v35  ;;  %v432_v35 = vmax.f32 %v270_v45, 0.0 }
 0x23d   : > { %11042 = vst [vmem:[#allocation130_spill] sm:$0xff] %v7694_v54  ;;  %v273_v54 = vunpack.c.h.bf16 %v186_v18  ;;  %v433_v52 = vmax.f32 %v271_v26, 0.0  ;;  %v434_v29 = vmax.f32 %v272_v16, 0.0  ;;  %v187_v26 = vld [vmem:[%s6899_s26 + $0x30] sm:$0xff]  ;;  %v188_v16 = vld [vmem:[%s6899_s26 + $0x38] sm:$0xff] }
 0x23e   : > { %11043 = vst [vmem:[#allocation131_spill] sm:$0xff] %v7696_v49  ;;  %2444 = vmatmul.bf16.vlgmr.msrb.gmra.mxu0 %v1942_v2 }
 0x23f   : > { %6372 = vmatmul.msk.bf16.vlgmr.msrb.gmra.mxu2 %vm1130_vm0, %v1943_v63  ;;  %v435_v63 = vmax.f32 %v273_v54, 0.0  ;;  %v590_v18 = vpack.c.bf16 %v433_v52, %v432_v35  ;;  %v274_v52 = vunpack.c.l.bf16 %v187_v26 }
 0x241   : > { %v591_v51 = vpack.c.bf16 %v435_v63, %v434_v29  ;;  %v1934_v45 = vunpack.c.l.b16 %v590_v18  ;;  %v1935_v12 = vunpack.c.h.b16 %v590_v18  ;;  %v275_v29 = vunpack.c.h.bf16 %v187_v26 }
 0x242   : > { %v1708_v59 = vpop.f32.mrf.mxu2  ;;  %v277_v63 = vunpack.c.h.bf16 %v188_v16 }
 0x243   : > { %v1882_v15 = vpop.f32.mrf.mxu3  ;;  %v7701_v40 = vadd.f32 %v1880_v56, %v1708_v59  ;;  %v1366_v33 = vpop.f32.mrf.mxu0  ;;  %v1937_v54 = vunpack.c.h.b16 %v591_v51  ;;  %v437_v18 = vmax.f32 %v275_v29, 0.0 }
 0x244   : > { %v1541_v2 = vpop.f32.mrf.mxu1  ;;  %v7703_v19 = vadd.f32 %v1538_v38, %v1366_v33  ;;  %v1936_v38 = vunpack.c.l.b16 %v591_v51 }
 0x245   : > { %11044 = vst [vmem:[#allocation132_spill] sm:$0xff] %v7701_v40  ;;  %v1947_v40 = vpack.c.b16 %v1937_v54, %v1935_v12 }
 0x246   : > { %11045 = vst [vmem:[#allocation133_spill] sm:$0xff] %v7703_v19  ;;  %v1946_v19 = vpack.c.b16 %v1936_v38, %v1934_v45 }
 0x247   : > { %2105 = vmatmul.bf16.gmra.mxu1 %v1944_v5 }
 0x248   : > { %6340 = vmatmul.msk.bf16.gmra.mxu3 %vm1130_vm0, %v1945_v11 }
 0x24a   : > { %v1710_v49 = vpop.f32.mrf.mxu2 }
 0x24b   : > { %v1885_v62 = vpop.f32.mrf.mxu3  ;;  %v7706_v25 = vadd.f32 %v1882_v15, %v1710_v49  ;;  %v1369_v59 = vpop.f32.mrf.mxu0 }
 0x24c   : > { %v1543_v56 = vpop.f32.mrf.mxu1  ;;  %v7708_v43 = vadd.f32 %v1541_v2, %v1369_v59  ;;  %v276_v2 = vunpack.c.l.bf16 %v188_v16  ;;  %v6654_v16 = vld [vmem:[%s10735_s1 + $0x1e4] sm:$0xf0] }
 0x24e   : > { %11046 = vst [vmem:[#allocation134_spill] sm:$0xff] %v7708_v43  ;;  %2449 = vmatmul.bf16.gmra.mxu0 %v1944_v5  ;;  %v438_v51 = vmax.f32 %v276_v2, 0.0  ;;  %v439_v43 = vmax.f32 %v277_v63, 0.0 }
 0x24f   : > { %6373 = vmatmul.msk.bf16.gmra.mxu2 %vm1130_vm0, %v1945_v11  ;;  %v436_v11 = vmax.f32 %v274_v52, 0.0 }
 0x251   : > { %v592_v54 = vpack.c.bf16 %v437_v18, %v436_v11 }
 0x252   : > { %v1713_v35 = vpop.f32.mrf.mxu2 }
 0x253   : > { %v1887_v33 = vpop.f32.mrf.mxu3  ;;  %v7713_v49 = vadd.f32 %v1885_v62, %v1713_v35  ;;  %v1371_v15 = vpop.f32.mrf.mxu0  ;;  %v593_v35 = vpack.c.bf16 %v439_v43, %v438_v51 }
 0x254   : > { %v1546_v5 = vpop.f32.mrf.mxu1  ;;  %v7715_v59 = vadd.f32 %v1543_v56, %v1371_v15  ;;  %v6479_v56 = vld [vmem:[%s10735_s1 + $0x1e0] sm:$0xf]  ;;  %v1938_v15 = vunpack.c.l.b16 %v592_v54 }
 0x255   : > { %11047 = vst [vmem:[#allocation135_spill] sm:$0xff] %v7713_v49  ;;  %v6480_v52 = vor.u32 %v6654_v16, %v6479_v56  ;;  %v1940_v29 = vunpack.c.l.b16 %v593_v35  ;;  %v1941_v2 = vunpack.c.h.b16 %v593_v35 }
 0x257   : > { %2110 = vmatmul.bf16.gmra.mxu1 %v1946_v19 }
 0x258   : > { %6341 = vmatmul.msk.bf16.gmra.mxu3 %vm1130_vm0, %v1947_v40  ;;  %2980 = vmatpush.bf16.msra.mxu1 %v6480_v52 }
 0x25a   : > { %v1715_v38 = vpop.f32.mrf.mxu2 }
 0x25b   : > { %v1890_v45 = vpop.f32.mrf.mxu3  ;;  %v7718_v12 = vadd.f32 %v1887_v33, %v1715_v38  ;;  %v1374_v62 = vpop.f32.mrf.mxu0  ;;  %v1939_v33 = vunpack.c.h.b16 %v592_v54 }
 0x25c   : > { %v1548_v26 = vpop.f32.mrf.mxu1  ;;  %v7720_v49 = vadd.f32 %v1546_v5, %v1374_v62  ;;  %v1948_v5 = vpack.c.b16 %v1940_v29, %v1938_v15 }
 0x25d   : > { %v1949_v11 = vpack.c.b16 %v1941_v2, %v1939_v33 }
 0x25e   : > { %2454 = vmatmul.bf16.gmra.mxu0 %v1946_v19 }
 0x25f   : > { %6374 = vmatmul.msk.bf16.gmra.mxu2 %vm1130_vm0, %v1947_v40 }
 0x262   : > { %v1718_v63 = vpop.f32.mrf.mxu2 }
 0x263   : > { %v1892_v43 = vpop.f32.mrf.mxu3  ;;  %v7729_v18 = vadd.f32 %v1890_v45, %v1718_v63  ;;  %v1376_v51 = vpop.f32.mrf.mxu0  ;;  %v6653_v45 = vld [vmem:[%s10735_s1 + $0x1e4] sm:$0xf] }
 0x264   : > { %v1551_v38 = vpop.f32.mrf.mxu1  ;;  %v7731_v62 = vadd.f32 %v1548_v26, %v1376_v51  ;;  %v6481_v26 = vld [vmem:[%s10735_s1 + $0x1e8] sm:$0xf0] }
 0x265   : > { %v6484_v52 = vor.u32 %v6653_v45, %v6481_v26 }
 0x267   : > { %2115 = vmatmul.bf16.gmra.mxu1 %v1948_v5  ;;  %3324 = vmatpush.bf16.msra.mxu0 %v6484_v52 }
 0x268   : > { %6342 = vmatmul.msk.bf16.gmra.mxu3 %vm1130_vm0, %v1949_v11 }
 0x26a   : > { %v1720_v56 = vpop.f32.mrf.mxu2 }
 0x26b   : > { %v1895_v19 = vpop.f32.mrf.mxu3  ;;  %v7734_v54 = vadd.f32 %v1892_v43, %v1720_v56  ;;  %v1379_v35 = vpop.f32.mrf.mxu0 }
 0x26c   : > { %v1553_v40 = vpop.f32.mrf.mxu1  ;;  %v7736_v16 = vadd.f32 %v1551_v38, %v1379_v35 }
 0x26e   : > { %2459 = vmatmul.bf16.gmra.mxu0 %v1948_v5 }
 0x26f   : > { %6375 = vmatmul.msk.bf16.gmra.mxu2 %vm1130_vm0, %v1949_v11 }
 0x272   : > { %v1723_v29 = vpop.f32.mrf.mxu2 }
 0x273   : > { %v1897_v15 = vpop.f32.mrf.mxu3  ;;  %v7745_v33 = vadd.f32 %v1895_v19, %v1723_v29  ;;  %v1381_v2 = vpop.f32.mrf.mxu0 }
 0x274   : > { %v1556_v43 = vpop.f32.mrf.mxu1  ;;  %v7747_v63 = vadd.f32 %v1553_v40, %v1381_v2 }
 0x277   : > { %2120 = vmatmul.bf16.gmra.mxu1 %v6956_v46 }
 0x278   : > { %6343 = vmatmul.msk.bf16.gmra.mxu3 %vm1130_vm0, %v6938_v32 }
 0x27a   : > { %v1725_v38 = vpop.f32.mrf.mxu2 }
 0x27b   : > { %v1900_v51 = vpop.f32.mrf.mxu3  ;;  %v7752_v5 = vadd.f32 %v1897_v15, %v1725_v38  ;;  %v1384_v56 = vpop.f32.mrf.mxu0 }
 0x27c   : > { %v1558_v11 = vpop.f32.mrf.mxu1  ;;  %v7754_v35 = vadd.f32 %v1556_v43, %v1384_v56 }
 0x27e   : > { %2464 = vmatmul.bf16.gmra.mxu0 %v6956_v46 }
 0x27f   : > { %6376 = vmatmul.msk.bf16.gmra.mxu2 %vm1130_vm0, %v6938_v32 }
 0x282   : > { %v1728_v40 = vpop.f32.mrf.mxu2 }
 0x283   : > { %v1902_v19 = vpop.f32.mrf.mxu3  ;;  %v7759_v45 = vadd.f32 %v1900_v51, %v1728_v40  ;;  %v1386_v26 = vpop.f32.mrf.mxu0 }
 0x284   : > { %v1561_v52 = vpop.f32.mrf.mxu1  ;;  %v7761_v29 = vadd.f32 %v1558_v11, %v1386_v26 }
 0x286   : > { %11048 = vst [vmem:[#allocation136_spill] sm:$0xff] %v7761_v29 }
 0x287   : > { %2125 = vmatmul.bf16.gmra.mxu1 %v6968_v1 }
 0x288   : > { %6344 = vmatmul.msk.bf16.gmra.mxu3 %vm1130_vm0, %v6962_v55 }
 0x28a   : > { %v1730_v2 = vpop.f32.mrf.mxu2 }
 0x28b   : > { %v1905_v15 = vpop.f32.mrf.mxu3  ;;  %v7766_v43 = vadd.f32 %v1902_v19, %v1730_v2  ;;  %v1389_v46 = vpop.f32.mrf.mxu0 }
 0x28c   : > { %v1563_v38 = vpop.f32.mrf.mxu1  ;;  %v7768_v32 = vadd.f32 %v1561_v52, %v1389_v46 }
 0x28e   : > { %2469 = vmatmul.bf16.gmra.mxu0 %v6968_v1 }
 0x28f   : > { %6377 = vmatmul.msk.bf16.gmra.mxu2 %vm1130_vm0, %v6962_v55  ;;  %v6511_v55 = vld [vmem:[%s10735_s1 + $0x220] sm:$0xf] }
 0x292   : > { %v1733_v56 = vpop.f32.mrf.mxu2 }
 0x293   : > { %v1907_v51 = vpop.f32.mrf.mxu3  ;;  %v7773_v11 = vadd.f32 %v1905_v15, %v1733_v56  ;;  %v1391_v40 = vpop.f32.mrf.mxu0  ;;  %v6662_v15 = vld [vmem:[%s10735_s1 + $0x224] sm:$0xf0] }
 0x294   : > { %v1566_v26 = vpop.f32.mrf.mxu1  ;;  %v7775_v29 = vadd.f32 %v1563_v38, %v1391_v40  ;;  %v6512_v56 = vor.u32 %v6662_v15, %v6511_v55  ;;  %v6652_v40 = vld [vmem:[%s10735_s1 + $0x1d4] sm:$0xf0] }
 0x296   : > { %3156 = vmatpush.bf16.msra.mxu3 %v6512_v56 }
 0x297   : > { %2130 = vmatmul.bf16.gmra.mxu1 %v6986_v22 }
 0x298   : > { %6345 = vmatmul.msk.bf16.gmra.mxu3 %vm1130_vm0, %v6974_v10 }
 0x29a   : > { %v1735_v52 = vpop.f32.mrf.mxu2 }
 0x29b   : > { %v1910_v19 = vpop.f32.mrf.mxu3  ;;  %v7780_v2 = vadd.f32 %v1907_v51, %v1735_v52  ;;  %v1394_v1 = vpop.f32.mrf.mxu0  ;;  %v6471_v51 = vld [vmem:[%s10735_s1 + $0x1d0] sm:$0xf] }
 0x29c   : > { %v1568_v46 = vpop.f32.mrf.mxu1  ;;  %v7788_v38 = vadd.f32 %v1566_v26, %v1394_v1  ;;  %v6472_v52 = vor.u32 %v6652_v40, %v6471_v51 }
 0x29d   : > { %11049 = vst [vmem:[#allocation137_spill] sm:$0xff] %v7780_v2 }
 0x29e   : > { %11050 = vst [vmem:[#allocation138_spill] sm:$0xff] %v7788_v38  ;;  %2474 = vmatmul.bf16.gmra.mxu0 %v6986_v22  ;;  %2981 = vmatpush.bf16.msra.mxu1 %v6472_v52 }
 0x29f   : > { %6378 = vmatmul.msk.bf16.gmra.mxu2 %vm1130_vm0, %v6974_v10 }
 0x2a2   : > { %v1738_v26 = vpop.f32.mrf.mxu2 }
 0x2a3   : > { %v1912_v2 = vpop.f32.mrf.mxu3  ;;  %v7799_v1 = vadd.f32 %v1910_v19, %v1738_v26  ;;  %v1396_v55 = vpop.f32.mrf.mxu0  ;;  %v6661_v19 = vld [vmem:[%s10735_s1 + $0x224] sm:$0xf] }
 0x2a4   : > { %v1571_v22 = vpop.f32.mrf.mxu1  ;;  %v7801_v15 = vadd.f32 %v1568_v46, %v1396_v55  ;;  %v6513_v46 = vld [vmem:[%s10735_s1 + $0x228] sm:$0xf0]  ;;  %v6473_v55 = vld [vmem:[%s10735_s1 + $0x1d8] sm:$0xf0] }
 0x2a5   : > { %v6516_v52 = vor.u32 %v6661_v19, %v6513_v46 }
 0x2a7   : > { %2135 = vmatmul.bf16.gmra.mxu1 %v7004_v44  ;;  %3500 = vmatpush.bf16.msra.mxu2 %v6516_v52 }
 0x2a8   : > { %6346 = vmatmul.msk.bf16.gmra.mxu3 %vm1130_vm0, %v6992_v31 }
 0x2aa   : > { %v1740_v56 = vpop.f32.mrf.mxu2 }
 0x2ab   : > { %v1915_v38 = vpop.f32.mrf.mxu3  ;;  %v7806_v51 = vadd.f32 %v1912_v2, %v1740_v56  ;;  %v1399_v40 = vpop.f32.mrf.mxu0 }
 0x2ac   : > { %v1572_v10 = vpop.f32.mrf.mxu1 }
 0x2ae   : > { %2479 = vmatmul.bf16.gmra.mxu0 %v7004_v44  ;;  %v6651_v44 = vld [vmem:[%s10735_s1 + $0x1d4] sm:$0xf] }
 0x2af   : > { %6379 = vmatmul.msk.bf16.gmra.mxu2 %vm1130_vm0, %v6992_v31  ;;  %v6476_v56 = vor.u32 %v6651_v44, %v6473_v55 }
 0x2b1   : > { %3325 = vmatpush.bf16.msra.mxu0 %v6476_v56 }
 0x2b2   : > { %v1743_v2 = vpop.f32.mrf.mxu2 }
 0x2b3   : > { %v1916_v38 = vpop.f32.mrf.mxu3  ;;  %v1400_v26 = vpop.f32.mrf.mxu0 }
 0x2b4   : > { %v2101_v22 = vpop.f32.mrf.mxu1 }
 0x2b5   : > { %v2102_v40 = vadd.f32 %v2101_v22, %v7090_v47 }
 0x2b7   : > { %2140 = vmatmul.bf16.gmra.mxu1 %v7016_v0 }
 0x2b8   : > { %6347 = vmatmul.msk.bf16.gmra.mxu3 %vm1130_vm0, %v7010_v57 }
 0x2ba   : > { %v1744_v10 = vpop.f32.mrf.mxu2 }
 0x2bb   : > { %v2273_v31 = vpop.f32.mrf.mxu3  ;;  %v2445_v46 = vpop.f32.mrf.mxu0 }
 0x2bc   : > { %v7827_v19 = vadd.f32 %v2273_v31, %v2102_v40  ;;  %v2103_v52 = vpop.f32.mrf.mxu1  ;;  %v2446_v38 = vadd.f32 %v2445_v46, %v7098_v60 }
 0x2bd   : > { %v2104_v2 = vadd.f32 %v2103_v52, %v7100_v4 }
 0x2be   : > { %2484 = vmatmul.bf16.gmra.mxu0 %v7016_v0 }
 0x2bf   : > { %6380 = vmatmul.msk.bf16.gmra.mxu2 %vm1130_vm0, %v7010_v57 }
 0x2c2   : > { %v2617_v26 = vpop.f32.mrf.mxu2 }
 0x2c3   : > { %v2275_v47 = vpop.f32.mrf.mxu3  ;;  %v7836_v55 = vadd.f32 %v2617_v26, %v2446_v38  ;;  %v2447_v22 = vpop.f32.mrf.mxu0 }
 0x2c4   : > { %v7834_v44 = vadd.f32 %v2275_v47, %v2104_v2  ;;  %v2106_v56 = vpop.f32.mrf.mxu1  ;;  %v2448_v40 = vadd.f32 %v2447_v22, %v7108_v17 }
 0x2c5   : > { %v2107_v31 = vadd.f32 %v2106_v56, %v7110_v24 }
 0x2c7   : > { %2145 = vmatmul.bf16.gmra.mxu1 %v7028_v20 }
 0x2c8   : > { %6348 = vmatmul.msk.bf16.gmra.mxu3 %vm1130_vm0, %v7022_v8 }
 0x2ca   : > { %v2619_v4 = vpop.f32.mrf.mxu2 }
 0x2cb   : > { %v2278_v60 = vpop.f32.mrf.mxu3  ;;  %v7845_v46 = vadd.f32 %v2619_v4, %v2448_v40  ;;  %v2450_v52 = vpop.f32.mrf.mxu0 }
 0x2cc   : > { %v7843_v10 = vadd.f32 %v2278_v60, %v2107_v31  ;;  %v2108_v38 = vpop.f32.mrf.mxu1  ;;  %v2451_v2 = vadd.f32 %v2450_v52, %v7118_v42 }
 0x2cd   : > { %v2109_v47 = vadd.f32 %v2108_v38, %v7120_v48 }
 0x2ce   : > { %2489 = vmatmul.bf16.gmra.mxu0 %v7028_v20 }
 0x2cf   : > { %6381 = vmatmul.msk.bf16.gmra.mxu2 %vm1130_vm0, %v7022_v8 }
 0x2d2   : > { %v2622_v24 = vpop.f32.mrf.mxu2 }
 0x2d3   : > { %v2280_v17 = vpop.f32.mrf.mxu3  ;;  %v7854_v22 = vadd.f32 %v2622_v24, %v2451_v2  ;;  %v2452_v56 = vpop.f32.mrf.mxu0 }
 0x2d4   : > { %v7852_v26 = vadd.f32 %v2280_v17, %v2109_v47  ;;  %v2111_v40 = vpop.f32.mrf.mxu1  ;;  %v2453_v31 = vadd.f32 %v2452_v56, %v7128_v3 }
 0x2d5   : > { %11052 = vst [vmem:[#allocation140_spill] sm:$0xff] %v7854_v22  ;;  %v2112_v60 = vadd.f32 %v2111_v40, %v7130_v9 }
 0x2d6   : > { %11051 = vst [vmem:[#allocation139_spill] sm:$0xff] %v7852_v26 }
 0x2d7   : > { %2150 = vmatmul.bf16.gmra.mxu1 %v7040_v41 }
 0x2d8   : > { %6349 = vmatmul.msk.bf16.gmra.mxu3 %vm1130_vm0, %v7034_v34 }
 0x2da   : > { %v2624_v48 = vpop.f32.mrf.mxu2 }
 0x2db   : > { %v2283_v42 = vpop.f32.mrf.mxu3  ;;  %v7863_v52 = vadd.f32 %v2624_v48, %v2453_v31  ;;  %v2455_v38 = vpop.f32.mrf.mxu0  ;;  %v6463_v31 = vld [vmem:[%s10735_s1 + $0x1c0] sm:$0xf] }
 0x2dc   : > { %v7861_v4 = vadd.f32 %v2283_v42, %v2112_v60  ;;  %v2113_v2 = vpop.f32.mrf.mxu1  ;;  %v2456_v47 = vadd.f32 %v2455_v38, %v7144_v28  ;;  %v6650_v28 = vld [vmem:[%s10735_s1 + $0x1c4] sm:$0xf0] }
 0x2dd   : > { %11054 = vst [vmem:[#allocation142_spill] sm:$0xff] %v7863_v52  ;;  %v2114_v17 = vadd.f32 %v2113_v2, %v7146_v37  ;;  %v6464_v42 = vor.u32 %v6650_v28, %v6463_v31 }
 0x2de   : > { %11053 = vst [vmem:[#allocation141_spill] sm:$0xff] %v7861_v4  ;;  %2494 = vmatmul.bf16.gmra.mxu0 %v7040_v41 }
 0x2df   : > { %6382 = vmatmul.msk.bf16.gmra.mxu2 %vm1130_vm0, %v7034_v34  ;;  %2982 = vmatpush.bf16.msra.mxu1 %v6464_v42 }
 0x2e2   : > { %v2627_v9 = vpop.f32.mrf.mxu2 }
 0x2e3   : > { %v2285_v3 = vpop.f32.mrf.mxu3  ;;  %v7872_v56 = vadd.f32 %v2627_v9, %v2456_v47  ;;  %v2457_v40 = vpop.f32.mrf.mxu0 }
 0x2e4   : > { %v7870_v24 = vadd.f32 %v2285_v3, %v2114_v17  ;;  %v2116_v37 = vpop.f32.mrf.mxu1  ;;  %v2458_v60 = vadd.f32 %v2457_v40, %v7154_v61 }
 0x2e5   : > { %11056 = vst [vmem:[#allocation144_spill] sm:$0xff] %v7872_v56  ;;  %v2117_v48 = vadd.f32 %v2116_v37, %v7156_v6 }
 0x2e6   : > { %11055 = vst [vmem:[#allocation143_spill] sm:$0xff] %v7870_v24 }
 0x2e7   : > { %2155 = vmatmul.bf16.gmra.mxu1 %v7064_v7 }
 0x2e8   : > { %6350 = vmatmul.msk.bf16.gmra.mxu3 %vm1130_vm0, %v7058_v58 }
 0x2ea   : > { %v2629_v2 = vpop.f32.mrf.mxu2 }
 0x2eb   : > { %v2288_v38 = vpop.f32.mrf.mxu3  ;;  %v7887_v17 = vadd.f32 %v2629_v2, %v2458_v60  ;;  %v2460_v3 = vpop.f32.mrf.mxu0 }
 0x2ec   : > { %v7885_v47 = vadd.f32 %v2288_v38, %v2117_v48  ;;  %v2118_v9 = vpop.f32.mrf.mxu1  ;;  %v2461_v56 = vadd.f32 %v2460_v3, %v7164_v30  ;;  %v6649_v30 = vld [vmem:[%s10735_s1 + $0x1c4] sm:$0xf] }
 0x2ed   : > { %11058 = vst [vmem:[#allocation146_spill] sm:$0xff] %v7887_v17  ;;  %v2119_v61 = vadd.f32 %v2118_v9, %v7166_v36  ;;  %v6465_v36 = vld [vmem:[%s10735_s1 + $0x1c8] sm:$0xf0]  ;;  %v11096_v17 = vld [vmem:[#allocation9_spill] sm:$0xff] }
 0x2ee   : > { %11057 = vst [vmem:[#allocation145_spill] sm:$0xff] %v7885_v47  ;;  %2499 = vmatmul.bf16.gmra.mxu0 %v7064_v7  ;;  %v6468_v38 = vor.u32 %v6649_v30, %v6465_v36  ;;  %v11097_v47 = vld [vmem:[#allocation8_spill] sm:$0xff] }
 0x2ef   : > { %6383 = vmatmul.msk.bf16.gmra.mxu2 %vm1130_vm0, %v7058_v58 }
 0x2f0   : > { %3326 = vmatpush.bf16.msra.mxu0 %v6468_v38  ;;  %v11065_v38 = vld [vmem:[#allocation12_spill] sm:$0xff] }
 0x2f2   : > { %v2632_v40 = vpop.f32.mrf.mxu2 }
 0x2f3   : > { %v2290_v6 = vpop.f32.mrf.mxu3  ;;  %v7896_v28 = vadd.f32 %v2632_v40, %v2461_v56  ;;  %v2462_v37 = vpop.f32.mrf.mxu0 }
 0x2f4   : > { %v7894_v31 = vadd.f32 %v2290_v6, %v2119_v61  ;;  %v2121_v60 = vpop.f32.mrf.mxu1  ;;  %v2463_v42 = vadd.f32 %v2462_v37, %v7180_v13 }
 0x2f5   : > { %11060 = vst [vmem:[#allocation148_spill] sm:$0xff] %v7896_v28  ;;  %v2122_v48 = vadd.f32 %v2121_v60, %v7182_v23 }
 0x2f6   : > { %11059 = vst [vmem:[#allocation147_spill] sm:$0xff] %v7894_v31 }
 0x2f7   : > { %2160 = vmatmul.bf16.gmra.mxu1 %v7088_v39 }
 0x2f8   : > { %6351 = vmatmul.msk.bf16.gmra.mxu3 %vm1130_vm0, %v7082_v27 }
 0x2fa   : > { %v2634_v2 = vpop.f32.mrf.mxu2 }
 0x2fb   : > { %v2293_v56 = vpop.f32.mrf.mxu3  ;;  %v7911_v23 = vadd.f32 %v2634_v2, %v2463_v42  ;;  %v2465_v3 = vpop.f32.mrf.mxu0 }
 0x2fc   : > { %v7909_v13 = vadd.f32 %v2293_v56, %v2122_v48  ;;  %v2123_v9 = vpop.f32.mrf.mxu1  ;;  %v2466_v61 = vadd.f32 %v2465_v3, %v7190_v50  ;;  %v11066_v50 = vld [vmem:[#allocation3_spill] sm:$0xff] }
 0x2fd   : > { %11062 = vst [vmem:[#allocation150_spill] sm:$0xff] %v7911_v23  ;;  %v2124_v6 = vadd.f32 %v2123_v9, %v7192_v53  ;;  %v11067_v53 = vld [vmem:[#allocation2_spill] sm:$0xff] }
 0x2fe   : > { %11061 = vst [vmem:[#allocation149_spill] sm:$0xff] %v7909_v13  ;;  %2504 = vmatmul.bf16.gmra.mxu0 %v7088_v39 }
 0x2ff   : > { %6384 = vmatmul.msk.bf16.gmra.mxu2 %vm1130_vm0, %v7082_v27 }
 0x302   : > { %v2637_v37 = vpop.f32.mrf.mxu2 }
 0x303   : > { %v2295_v40 = vpop.f32.mrf.mxu3  ;;  %v7920_v30 = vadd.f32 %v2637_v37, %v2466_v61  ;;  %v2467_v48 = vpop.f32.mrf.mxu0 }
 0x304   : > { %v7918_v60 = vadd.f32 %v2295_v40, %v2124_v6  ;;  %v2126_v42 = vpop.f32.mrf.mxu1  ;;  %v2468_v36 = vadd.f32 %v2467_v48, %v7200_v21  ;;  %v11070_v40 = vld [vmem:[#allocation14_spill] sm:$0xff] }
 0x305   : > { %11064 = vst [vmem:[#allocation152_spill] sm:$0xff] %v7920_v30  ;;  %v2127_v56 = vadd.f32 %v2126_v42, %v11065_v38  ;;  %v11071_v30 = vld [vmem:[#allocation15_spill] sm:$0xff] }
 0x306   : > { %11063 = vst [vmem:[#allocation151_spill] sm:$0xff] %v7918_v60 }
 0x307   : > { %2165 = vmatmul.bf16.gmra.mxu1 %v11066_v50 }
 0x308   : > { %6352 = vmatmul.msk.bf16.gmra.mxu3 %vm1130_vm0, %v11067_v53 }
 0x30a   : > { %v2639_v3 = vpop.f32.mrf.mxu2 }
 0x30b   : > { %v2298_v2 = vpop.f32.mrf.mxu3  ;;  %v7929_v13 = vadd.f32 %v2639_v3, %v2468_v36  ;;  %v2470_v6 = vpop.f32.mrf.mxu0 }
 0x30c   : > { %v7927_v9 = vadd.f32 %v2298_v2, %v2127_v56  ;;  %v2128_v61 = vpop.f32.mrf.mxu1  ;;  %v2471_v37 = vadd.f32 %v2470_v6, %v11070_v40  ;;  %v11074_v2 = vld [vmem:[#allocation17_spill] sm:$0xff] }
 0x30d   : > { %11069 = vst [vmem:[#allocation3_spill] sm:$0xff] %v7929_v13  ;;  %v2129_v60 = vadd.f32 %v2128_v61, %v11071_v30  ;;  %v11075_v13 = vld [vmem:[#allocation18_spill] sm:$0xff]  ;;  %v11076_v6 = vld [vmem:[#allocation5_spill] sm:$0xff]  ;;  %v11077_v30 = vld [vmem:[#allocation4_spill] sm:$0xff] }
 0x30e   : > { %11068 = vst [vmem:[#allocation12_spill] sm:$0xff] %v7927_v9  ;;  %2509 = vmatmul.bf16.gmra.mxu0 %v11066_v50 }
 0x30f   : > { %6385 = vmatmul.msk.bf16.gmra.mxu2 %vm1130_vm0, %v11067_v53 }
 0x312   : > { %v2642_v48 = vpop.f32.mrf.mxu2 }
 0x313   : > { %v2300_v21 = vpop.f32.mrf.mxu3  ;;  %v7938_v38 = vadd.f32 %v2642_v48, %v2471_v37  ;;  %v2472_v56 = vpop.f32.mrf.mxu0 }
 0x314   : > { %v7936_v42 = vadd.f32 %v2300_v21, %v2129_v60  ;;  %v2131_v36 = vpop.f32.mrf.mxu1  ;;  %v2473_v3 = vadd.f32 %v2472_v56, %v11074_v2  ;;  %v11080_v21 = vld [vmem:[#allocation20_spill] sm:$0xff]  ;;  %v6660_v56 = vld [vmem:[%s10735_s1 + $0x214] sm:$0xf0] }
 0x315   : > { %11073 = vst [vmem:[#allocation14_spill] sm:$0xff] %v7938_v38  ;;  %v2132_v9 = vadd.f32 %v2131_v36, %v11075_v13  ;;  %v11081_v38 = vld [vmem:[#allocation21_spill] sm:$0xff]  ;;  %v6503_v13 = vld [vmem:[%s10735_s1 + $0x210] sm:$0xf] }
 0x316   : > { %11072 = vst [vmem:[#allocation2_spill] sm:$0xff] %v7936_v42 }
 0x317   : > { %2170 = vmatmul.bf16.gmra.mxu1 %v11076_v6 }
 0x318   : > { %6353 = vmatmul.msk.bf16.gmra.mxu3 %vm1130_vm0, %v11077_v30 }
 0x31a   : > { %v2644_v40 = vpop.f32.mrf.mxu2 }
 0x31b   : > { %v2303_v61 = vpop.f32.mrf.mxu3  ;;  %v7947_v28 = vadd.f32 %v2644_v40, %v2473_v3  ;;  %v2475_v60 = vpop.f32.mrf.mxu0 }
 0x31c   : > { %v7945_v23 = vadd.f32 %v2303_v61, %v2132_v9  ;;  %v2133_v37 = vpop.f32.mrf.mxu1  ;;  %v2476_v48 = vadd.f32 %v2475_v60, %v11080_v21  ;;  %v6504_v9 = vor.u32 %v6660_v56, %v6503_v13  ;;  %v11084_v60 = vld [vmem:[#allocation23_spill] sm:$0xff]  ;;  %v11085_v21 = vld [vmem:[#allocation24_spill] sm:$0xff]  ;;  %v6648_v56 = vld [vmem:[%s10735_s1 + $0x1b4] sm:$0xf0] }
 0x31d   : > { %11079 = vst [vmem:[#allocation17_spill] sm:$0xff] %v7947_v28  ;;  %v2134_v42 = vadd.f32 %v2133_v37, %v11081_v38  ;;  %v6455_v13 = vld [vmem:[%s10735_s1 + $0x1b0] sm:$0xf] }
 0x31e   : > { %11078 = vst [vmem:[#allocation15_spill] sm:$0xff] %v7945_v23  ;;  %2514 = vmatmul.bf16.gmra.mxu0 %v11076_v6  ;;  %3157 = vmatpush.bf16.msra.mxu3 %v6504_v9  ;;  %v6456_v9 = vor.u32 %v6648_v56, %v6455_v13  ;;  %v11086_v23 = vld [vmem:[#allocation7_spill] sm:$0xff]  ;;  %v6659_v13 = vld [vmem:[%s10735_s1 + $0x214] sm:$0xf]  ;;  %v6505_v56 = vld [vmem:[%s10735_s1 + $0x218] sm:$0xf0] }
 0x31f   : > { %6386 = vmatmul.msk.bf16.gmra.mxu2 %vm1130_vm0, %v11077_v30 }
 0x320   : > { %2983 = vmatpush.bf16.msra.mxu1 %v6456_v9 }
 0x322   : > { %v2647_v2 = vpop.f32.mrf.mxu2 }
 0x323   : > { %v2305_v36 = vpop.f32.mrf.mxu3  ;;  %v7962_v38 = vadd.f32 %v2647_v2, %v2476_v48  ;;  %v2477_v61 = vpop.f32.mrf.mxu0 }
 0x324   : > { %v7960_v3 = vadd.f32 %v2305_v36, %v2134_v42  ;;  %v2136_v40 = vpop.f32.mrf.mxu1  ;;  %v2478_v37 = vadd.f32 %v2477_v61, %v11084_v60  ;;  %v11087_v42 = vld [vmem:[#allocation6_spill] sm:$0xff] }
 0x325   : > { %11083 = vst [vmem:[#allocation5_spill] sm:$0xff] %v7962_v38  ;;  %v2137_v28 = vadd.f32 %v2136_v40, %v11085_v21  ;;  %v11090_v21 = vld [vmem:[#allocation26_spill] sm:$0xff] }
 0x326   : > { %11082 = vst [vmem:[#allocation18_spill] sm:$0xff] %v7960_v3  ;;  %v11091_v3 = vld [vmem:[#allocation27_spill] sm:$0xff] }
 0x327   : > { %2175 = vmatmul.bf16.gmra.mxu1 %v11086_v23 }
 0x328   : > { %6354 = vmatmul.msk.bf16.gmra.mxu3 %vm1130_vm0, %v11087_v42 }
 0x32a   : > { %v2649_v36 = vpop.f32.mrf.mxu2 }
 0x32b   : > { %v2308_v48 = vpop.f32.mrf.mxu3  ;;  %v7977_v61 = vadd.f32 %v2649_v36, %v2478_v37  ;;  %v2480_v40 = vpop.f32.mrf.mxu0 }
 0x32c   : > { %v7975_v2 = vadd.f32 %v2308_v48, %v2137_v28  ;;  %v2138_v60 = vpop.f32.mrf.mxu1  ;;  %v2481_v38 = vadd.f32 %v2480_v40, %v11090_v21  ;;  %v6508_v28 = vor.u32 %v6659_v13, %v6505_v56  ;;  %v6647_v13 = vld [vmem:[%s10735_s1 + $0x1b4] sm:$0xf] }
 0x32d   : > { %11089 = vst [vmem:[#allocation20_spill] sm:$0xff] %v7977_v61  ;;  %v2139_v31 = vadd.f32 %v2138_v60, %v11091_v3  ;;  %v11094_v60 = vld [vmem:[#allocation29_spill] sm:$0xff]  ;;  %v11095_v61 = vld [vmem:[#allocation30_spill] sm:$0xff] }
 0x32e   : > { %11088 = vst [vmem:[#allocation4_spill] sm:$0xff] %v7975_v2  ;;  %2519 = vmatmul.bf16.gmra.mxu0 %v11086_v23  ;;  %3501 = vmatpush.bf16.msra.mxu2 %v6508_v28 }
 0x32f   : > { %6387 = vmatmul.msk.bf16.gmra.mxu2 %vm1130_vm0, %v11087_v42 }
 0x332   : > { %v2652_v9 = vpop.f32.mrf.mxu2 }
 0x333   : > { %v2310_v37 = vpop.f32.mrf.mxu3  ;;  %v7992_v3 = vadd.f32 %v2652_v9, %v2481_v38  ;;  %v2482_v36 = vpop.f32.mrf.mxu0 }
 0x334   : > { %v7990_v48 = vadd.f32 %v2310_v37, %v2139_v31  ;;  %v2141_v40 = vpop.f32.mrf.mxu1  ;;  %v2483_v21 = vadd.f32 %v2482_v36, %v11094_v60  ;;  %v6457_v31 = vld [vmem:[%s10735_s1 + $0x1b8] sm:$0xf0] }
 0x335   : > { %11093 = vst [vmem:[#allocation23_spill] sm:$0xff] %v7992_v3  ;;  %v2142_v2 = vadd.f32 %v2141_v40, %v11095_v61  ;;  %v6460_v38 = vor.u32 %v6647_v13, %v6457_v31  ;;  %v11100_v40 = vld [vmem:[#allocation32_spill] sm:$0xff]  ;;  %v11101_v3 = vld [vmem:[#allocation33_spill] sm:$0xff] }
 0x336   : > { %11092 = vst [vmem:[#allocation21_spill] sm:$0xff] %v7990_v48 }
 0x337   : > { %2180 = vmatmul.bf16.gmra.mxu1 %v11096_v17  ;;  %3327 = vmatpush.bf16.msra.mxu0 %v6460_v38 }
 0x338   : > { %6355 = vmatmul.msk.bf16.gmra.mxu3 %vm1130_vm0, %v11097_v47 }
 0x33a   : > { %v2654_v28 = vpop.f32.mrf.mxu2 }
 0x33b   : > { %v2313_v56 = vpop.f32.mrf.mxu3  ;;  %v8007_v61 = vadd.f32 %v2654_v28, %v2483_v21  ;;  %v2485_v9 = vpop.f32.mrf.mxu0 }
 0x33c   : > { %v8005_v37 = vadd.f32 %v2313_v56, %v2142_v2  ;;  %v2143_v36 = vpop.f32.mrf.mxu1  ;;  %v2486_v60 = vadd.f32 %v2485_v9, %v11100_v40  ;;  %v11104_v56 = vld [vmem:[#allocation35_spill] sm:$0xff] }
 0x33d   : > { %11099 = vst [vmem:[#allocation7_spill] sm:$0xff] %v8007_v61  ;;  %v2144_v48 = vadd.f32 %v2143_v36, %v11101_v3  ;;  %v11106_v9 = vld [vmem:[#allocation11_spill] sm:$0xff]  ;;  %v11107_v3 = vld [vmem:[#allocation10_spill] sm:$0xff] }
 0x33e   : > { %11098 = vst [vmem:[#allocation24_spill] sm:$0xff] %v8005_v37  ;;  %2524 = vmatmul.bf16.gmra.mxu0 %v11096_v17  ;;  %v11105_v37 = vld [vmem:[#allocation36_spill] sm:$0xff] }
 0x33f   : > { %6388 = vmatmul.msk.bf16.gmra.mxu2 %vm1130_vm0, %v11097_v47 }
 0x342   : > { %v2657_v13 = vpop.f32.mrf.mxu2 }
 0x343   : > { %v2315_v24 = vpop.f32.mrf.mxu3  ;;  %v8016_v38 = vadd.f32 %v2657_v13, %v2486_v60  ;;  %v2487_v2 = vpop.f32.mrf.mxu0  ;;  %v11110_v60 = vld [vmem:[#allocation38_spill] sm:$0xff] }
 0x344   : > { %v8014_v31 = vadd.f32 %v2315_v24, %v2144_v48  ;;  %v2146_v21 = vpop.f32.mrf.mxu1  ;;  %v2488_v28 = vadd.f32 %v2487_v2, %v11104_v56 }
 0x345   : > { %11103 = vst [vmem:[#allocation26_spill] sm:$0xff] %v8016_v38  ;;  %v2147_v61 = vadd.f32 %v2146_v21, %v11105_v37  ;;  %v11111_v38 = vld [vmem:[#allocation39_spill] sm:$0xff] }
 0x346   : > { %11102 = vst [vmem:[#allocation6_spill] sm:$0xff] %v8014_v31 }
 0x347   : > { %2185 = vmatmul.bf16.gmra.mxu1 %v11106_v9 }
 0x348   : > { %6356 = vmatmul.msk.bf16.gmra.mxu3 %vm1130_vm0, %v11107_v3 }
 0x34a   : > { %v2659_v40 = vpop.f32.mrf.mxu2 }
 0x34b   : > { %v2318_v36 = vpop.f32.mrf.mxu3  ;;  %v8025_v4 = vadd.f32 %v2659_v40, %v2488_v28  ;;  %v2490_v24 = vpop.f32.mrf.mxu0 }
 0x34c   : > { %v8023_v52 = vadd.f32 %v2318_v36, %v2147_v61  ;;  %v2148_v48 = vpop.f32.mrf.mxu1  ;;  %v2491_v13 = vadd.f32 %v2490_v24, %v11110_v60  ;;  %v11114_v36 = vld [vmem:[#allocation41_spill] sm:$0xff]  ;;  %v11116_v24 = vld [vmem:[#allocation16_spill] sm:$0xff] }
 0x34d   : > { %11109 = vst [vmem:[#allocation29_spill] sm:$0xff] %v8025_v4  ;;  %v2149_v31 = vadd.f32 %v2148_v48, %v11111_v38  ;;  %v11115_v4 = vld [vmem:[#allocation42_spill] sm:$0xff]  ;;  %v11117_v38 = vld [vmem:[#allocation13_spill] sm:$0xff] }
 0x34e   : > { %11108 = vst [vmem:[#allocation27_spill] sm:$0xff] %v8023_v52  ;;  %2529 = vmatmul.bf16.gmra.mxu0 %v11106_v9 }
 0x34f   : > { %6389 = vmatmul.msk.bf16.gmra.mxu2 %vm1130_vm0, %v11107_v3 }
 0x352   : > { %v2662_v2 = vpop.f32.mrf.mxu2 }
 0x353   : > { %v2320_v37 = vpop.f32.mrf.mxu3  ;;  %v8034_v56 = vadd.f32 %v2662_v2, %v2491_v13  ;;  %v2492_v61 = vpop.f32.mrf.mxu0 }
 0x354   : > { %v8032_v21 = vadd.f32 %v2320_v37, %v2149_v31  ;;  %v2151_v28 = vpop.f32.mrf.mxu1  ;;  %v2493_v40 = vadd.f32 %v2492_v61, %v11114_v36  ;;  %v11120_v37 = vld [vmem:[#allocation44_spill] sm:$0xff] }
 0x355   : > { %11113 = vst [vmem:[#allocation9_spill] sm:$0xff] %v8034_v56  ;;  %v2152_v52 = vadd.f32 %v2151_v28, %v11115_v4  ;;  %v11121_v56 = vld [vmem:[#allocation45_spill] sm:$0xff] }
 0x356   : > { %11112 = vst [vmem:[#allocation30_spill] sm:$0xff] %v8032_v21 }
 0x357   : > { %2190 = vmatmul.bf16.gmra.mxu1 %v11116_v24 }
 0x358   : > { %6357 = vmatmul.msk.bf16.gmra.mxu3 %vm1130_vm0, %v11117_v38 }
 0x35a   : > { %v2664_v60 = vpop.f32.mrf.mxu2 }
 0x35b   : > { %v2323_v48 = vpop.f32.mrf.mxu3  ;;  %v8043_v26 = vadd.f32 %v2664_v60, %v2493_v40  ;;  %v2495_v31 = vpop.f32.mrf.mxu0 }
 0x35c   : > { %v8041_v22 = vadd.f32 %v2323_v48, %v2152_v52  ;;  %v2153_v13 = vpop.f32.mrf.mxu1  ;;  %v2496_v2 = vadd.f32 %v2495_v31, %v11120_v37  ;;  %v11124_v48 = vld [vmem:[#allocation47_spill] sm:$0xff]  ;;  %v11126_v31 = vld [vmem:[#allocation22_spill] sm:$0xff] }
 0x35d   : > { %11119 = vst [vmem:[#allocation32_spill] sm:$0xff] %v8043_v26  ;;  %v2154_v21 = vadd.f32 %v2153_v13, %v11121_v56  ;;  %v11125_v26 = vld [vmem:[#allocation48_spill] sm:$0xff]  ;;  %v11127_v56 = vld [vmem:[#allocation19_spill] sm:$0xff]  ;;  %v6447_v13 = vld [vmem:[%s10735_s1 + $0x1a0] sm:$0xf] }
 0x35e   : > { %11118 = vst [vmem:[#allocation8_spill] sm:$0xff] %v8041_v22  ;;  %2534 = vmatmul.bf16.gmra.mxu0 %v11116_v24 }
 0x35f   : > { %6390 = vmatmul.msk.bf16.gmra.mxu2 %vm1130_vm0, %v11117_v38 }
 0x362   : > { %v2667_v61 = vpop.f32.mrf.mxu2 }
 0x363   : > { %v2325_v4 = vpop.f32.mrf.mxu3  ;;  %v8052_v36 = vadd.f32 %v2667_v61, %v2496_v2  ;;  %v2497_v52 = vpop.f32.mrf.mxu0 }
 0x364   : > { %v8050_v28 = vadd.f32 %v2325_v4, %v2154_v21  ;;  %v2156_v40 = vpop.f32.mrf.mxu1  ;;  %v2498_v60 = vadd.f32 %v2497_v52, %v11124_v48  ;;  %v6646_v21 = vld [vmem:[%s10735_s1 + $0x1a4] sm:$0xf0]  ;;  %v11130_v48 = vld [vmem:[#allocation50_spill] sm:$0xff] }
 0x365   : > { %11123 = vst [vmem:[#allocation35_spill] sm:$0xff] %v8052_v36  ;;  %v2157_v22 = vadd.f32 %v2156_v40, %v11125_v26  ;;  %v6448_v37 = vor.u32 %v6646_v21, %v6447_v13 }
 0x366   : > { %11122 = vst [vmem:[#allocation33_spill] sm:$0xff] %v8050_v28  ;;  %v11131_v28 = vld [vmem:[#allocation51_spill] sm:$0xff] }
 0x367   : > { %2195 = vmatmul.bf16.gmra.mxu1 %v11126_v31 }
 0x368   : > { %6358 = vmatmul.msk.bf16.gmra.mxu3 %vm1130_vm0, %v11127_v56  ;;  %2984 = vmatpush.bf16.msra.mxu1 %v6448_v37 }
 0x36a   : > { %v2669_v4 = vpop.f32.mrf.mxu2 }
 0x36b   : > { %v2328_v2 = vpop.f32.mrf.mxu3  ;;  %v8067_v26 = vadd.f32 %v2669_v4, %v2498_v60  ;;  %v2500_v52 = vpop.f32.mrf.mxu0 }
 0x36c   : > { %v8065_v61 = vadd.f32 %v2328_v2, %v2157_v22  ;;  %v2158_v40 = vpop.f32.mrf.mxu1  ;;  %v2501_v36 = vadd.f32 %v2500_v52, %v11130_v48  ;;  %v11134_v2 = vld [vmem:[#allocation53_spill] sm:$0xff]  ;;  %v11136_v52 = vld [vmem:[#allocation28_spill] sm:$0xff] }
 0x36d   : > { %11129 = vst [vmem:[#allocation11_spill] sm:$0xff] %v8067_v26  ;;  %v2159_v38 = vadd.f32 %v2158_v40, %v11131_v28  ;;  %v11135_v26 = vld [vmem:[#allocation54_spill] sm:$0xff]  ;;  %v11137_v28 = vld [vmem:[#allocation25_spill] sm:$0xff] }
 0x36e   : > { %11128 = vst [vmem:[#allocation36_spill] sm:$0xff] %v8065_v61  ;;  %2539 = vmatmul.bf16.gmra.mxu0 %v11126_v31  ;;  %v6645_v40 = vld [vmem:[%s10735_s1 + $0x1a4] sm:$0xf] }
 0x36f   : > { %6391 = vmatmul.msk.bf16.gmra.mxu2 %vm1130_vm0, %v11127_v56 }
 0x372   : > { %v2672_v13 = vpop.f32.mrf.mxu2 }
 0x373   : > { %v2330_v24 = vpop.f32.mrf.mxu3  ;;  %v8076_v37 = vadd.f32 %v2672_v13, %v2501_v36  ;;  %v2502_v22 = vpop.f32.mrf.mxu0 }
 0x374   : > { %v8074_v21 = vadd.f32 %v2330_v24, %v2159_v38  ;;  %v2161_v60 = vpop.f32.mrf.mxu1  ;;  %v2503_v4 = vadd.f32 %v2502_v22, %v11134_v2  ;;  %v6449_v24 = vld [vmem:[%s10735_s1 + $0x1a8] sm:$0xf0]  ;;  %v11140_v2 = vld [vmem:[#allocation56_spill] sm:$0xff] }
 0x375   : > { %11133 = vst [vmem:[#allocation38_spill] sm:$0xff] %v8076_v37  ;;  %v2162_v61 = vadd.f32 %v2161_v60, %v11135_v26  ;;  %v6452_v38 = vor.u32 %v6645_v40, %v6449_v24 }
 0x376   : > { %11132 = vst [vmem:[#allocation10_spill] sm:$0xff] %v8074_v21  ;;  %v11141_v21 = vld [vmem:[#allocation57_spill] sm:$0xff] }
 0x377   : > { %2200 = vmatmul.bf16.gmra.mxu1 %v11136_v52  ;;  %3328 = vmatpush.bf16.msra.mxu0 %v6452_v38 }
 0x378   : > { %6359 = vmatmul.msk.bf16.gmra.mxu3 %vm1130_vm0, %v11137_v28 }
 0x37a   : > { %v2674_v48 = vpop.f32.mrf.mxu2 }
 0x37b   : > { %v2333_v36 = vpop.f32.mrf.mxu3  ;;  %v8091_v26 = vadd.f32 %v2674_v48, %v2503_v4  ;;  %v2505_v22 = vpop.f32.mrf.mxu0 }
 0x37c   : > { %v8089_v13 = vadd.f32 %v2333_v36, %v2162_v61  ;;  %v2163_v60 = vpop.f32.mrf.mxu1  ;;  %v2506_v37 = vadd.f32 %v2505_v22, %v11140_v2  ;;  %v11144_v36 = vld [vmem:[#allocation59_spill] sm:$0xff]  ;;  %v11146_v22 = vld [vmem:[#allocation34_spill] sm:$0xff] }
 0x37d   : > { %11139 = vst [vmem:[#allocation41_spill] sm:$0xff] %v8091_v26  ;;  %v2164_v56 = vadd.f32 %v2163_v60, %v11141_v21  ;;  %v11147_v21 = vld [vmem:[#allocation31_spill] sm:$0xff] }
 0x37e   : > { %11138 = vst [vmem:[#allocation39_spill] sm:$0xff] %v8089_v13  ;;  %2544 = vmatmul.bf16.gmra.mxu0 %v11136_v52  ;;  %v11145_v13 = vld [vmem:[#allocation60_spill] sm:$0xff] }
 0x37f   : > { %6392 = vmatmul.msk.bf16.gmra.mxu2 %vm1130_vm0, %v11137_v28 }
 0x382   : > { %v2677_v40 = vpop.f32.mrf.mxu2 }
 0x383   : > { %v2335_v31 = vpop.f32.mrf.mxu3  ;;  %v8100_v38 = vadd.f32 %v2677_v40, %v2506_v37  ;;  %v2507_v61 = vpop.f32.mrf.mxu0  ;;  %v11150_v37 = vld [vmem:[#allocation62_spill] sm:$0xff] }
 0x384   : > { %v8098_v24 = vadd.f32 %v2335_v31, %v2164_v56  ;;  %v2166_v4 = vpop.f32.mrf.mxu1  ;;  %v2508_v48 = vadd.f32 %v2507_v61, %v11144_v36 }
 0x385   : > { %11143 = vst [vmem:[#allocation44_spill] sm:$0xff] %v8100_v38  ;;  %v2167_v26 = vadd.f32 %v2166_v4, %v11145_v13  ;;  %v11151_v38 = vld [vmem:[#allocation63_spill] sm:$0xff] }
 0x386   : > { %11142 = vst [vmem:[#allocation42_spill] sm:$0xff] %v8098_v24 }
 0x387   : > { %2205 = vmatmul.bf16.gmra.mxu1 %v11146_v22 }
 0x388   : > { %6360 = vmatmul.msk.bf16.gmra.mxu3 %vm1130_vm0, %v11147_v21 }
 0x38a   : > { %v2679_v2 = vpop.f32.mrf.mxu2 }
 0x38b   : > { %v2338_v60 = vpop.f32.mrf.mxu3  ;;  %v8109_v52 = vadd.f32 %v2679_v2, %v2508_v48  ;;  %v2510_v31 = vpop.f32.mrf.mxu0 }
 0x38c   : > { %v8107_v28 = vadd.f32 %v2338_v60, %v2167_v26  ;;  %v2168_v56 = vpop.f32.mrf.mxu1  ;;  %v2511_v40 = vadd.f32 %v2510_v31, %v11150_v37  ;;  %v11154_v60 = vld [vmem:[#allocation65_spill] sm:$0xff]  ;;  %v11156_v31 = vld [vmem:[#allocation40_spill] sm:$0xff] }
 0x38d   : > { %11149 = vst [vmem:[#allocation47_spill] sm:$0xff] %v8109_v52  ;;  %v2169_v24 = vadd.f32 %v2168_v56, %v11151_v38  ;;  %v11155_v52 = vld [vmem:[#allocation66_spill] sm:$0xff]  ;;  %v11157_v38 = vld [vmem:[#allocation37_spill] sm:$0xff] }
 0x38e   : > { %11148 = vst [vmem:[#allocation45_spill] sm:$0xff] %v8107_v28  ;;  %2549 = vmatmul.bf16.gmra.mxu0 %v11146_v22 }
 0x38f   : > { %6393 = vmatmul.msk.bf16.gmra.mxu2 %vm1130_vm0, %v11147_v21 }
 0x392   : > { %v2682_v61 = vpop.f32.mrf.mxu2 }
 0x393   : > { %v2340_v13 = vpop.f32.mrf.mxu3  ;;  %v8118_v36 = vadd.f32 %v2682_v61, %v2511_v40  ;;  %v2512_v26 = vpop.f32.mrf.mxu0  ;;  %v11160_v61 = vld [vmem:[#allocation68_spill] sm:$0xff] }
 0x394   : > { %v8116_v4 = vadd.f32 %v2340_v13, %v2169_v24  ;;  %v2171_v48 = vpop.f32.mrf.mxu1  ;;  %v2513_v2 = vadd.f32 %v2512_v26, %v11154_v60 }
 0x395   : > { %11153 = vst [vmem:[#allocation50_spill] sm:$0xff] %v8118_v36  ;;  %v2172_v28 = vadd.f32 %v2171_v48, %v11155_v52 }
 0x396   : > { %11152 = vst [vmem:[#allocation48_spill] sm:$0xff] %v8116_v4 }
 0x397   : > { %2210 = vmatmul.bf16.gmra.mxu1 %v11156_v31 }
 0x398   : > { %6361 = vmatmul.msk.bf16.gmra.mxu3 %vm1130_vm0, %v11157_v38 }
 0x39a   : > { %v2684_v37 = vpop.f32.mrf.mxu2 }
 0x39b   : > { %v2343_v56 = vpop.f32.mrf.mxu3  ;;  %v8127_v22 = vadd.f32 %v2684_v37, %v2513_v2  ;;  %v2515_v24 = vpop.f32.mrf.mxu0  ;;  %v6495_v2 = vld [vmem:[%s10735_s1 + $0x200] sm:$0xf] }
 0x39c   : > { %v8125_v21 = vadd.f32 %v2343_v56, %v2172_v28  ;;  %v2173_v40 = vpop.f32.mrf.mxu1  ;;  %v2516_v13 = vadd.f32 %v2515_v24, %v7432_v14  ;;  %v6658_v14 = vld [vmem:[%s10735_s1 + $0x204] sm:$0xf0]  ;;  %v11163_v37 = vld [vmem:[#allocation70_spill] sm:$0xff] }
 0x39d   : > { %11159 = vst [vmem:[#allocation53_spill] sm:$0xff] %v8127_v22  ;;  %v2174_v36 = vadd.f32 %v2173_v40, %v11160_v61  ;;  %v6496_v40 = vor.u32 %v6658_v14, %v6495_v2  ;;  %v11164_v61 = vld [vmem:[#allocation71_spill] sm:$0xff] }
 0x39e   : > { %11158 = vst [vmem:[#allocation51_spill] sm:$0xff] %v8125_v21  ;;  %2554 = vmatmul.bf16.gmra.mxu0 %v11156_v31  ;;  %v11170_v21 = vld [vmem:[#allocation74_spill] sm:$0xff] }
 0x39f   : > { %6394 = vmatmul.msk.bf16.gmra.mxu2 %vm1130_vm0, %v11157_v38  ;;  %3158 = vmatpush.bf16.msra.mxu3 %v6496_v40  ;;  %v11169_v40 = vld [vmem:[#allocation73_spill] sm:$0xff] }
 0x3a2   : > { %v2687_v26 = vpop.f32.mrf.mxu2 }
 0x3a3   : > { %v2345_v52 = vpop.f32.mrf.mxu3  ;;  %v8136_v60 = vadd.f32 %v2687_v26, %v2516_v13  ;;  %v2517_v28 = vpop.f32.mrf.mxu0  ;;  %v11166_v13 = vld [vmem:[#allocation43_spill] sm:$0xff]  ;;  %v6644_v26 = vld [vmem:[%s10735_s1 + $0x194] sm:$0xf0] }
 0x3a4   : > { %v8134_v48 = vadd.f32 %v2345_v52, %v2174_v36  ;;  %v2176_v56 = vpop.f32.mrf.mxu1  ;;  %v2518_v24 = vadd.f32 %v2517_v28, %v11163_v37  ;;  %v11165_v36 = vld [vmem:[#allocation46_spill] sm:$0xff]  ;;  %v6439_v52 = vld [vmem:[%s10735_s1 + $0x190] sm:$0xf] }
 0x3a5   : > { %11162 = vst [vmem:[#allocation56_spill] sm:$0xff] %v8136_v60  ;;  %v2177_v22 = vadd.f32 %v2176_v56, %v11164_v61  ;;  %v6440_v60 = vor.u32 %v6644_v26, %v6439_v52 }
 0x3a6   : > { %11161 = vst [vmem:[#allocation54_spill] sm:$0xff] %v8134_v48 }
 0x3a7   : > { %2215 = vmatmul.bf16.gmra.mxu1 %v11165_v36 }
 0x3a8   : > { %6362 = vmatmul.msk.bf16.gmra.mxu3 %vm1130_vm0, %v11166_v13  ;;  %2985 = vmatpush.bf16.msra.mxu1 %v6440_v60 }
 0x3aa   : > { %v2689_v28 = vpop.f32.mrf.mxu2 }
 0x3ab   : > { %v2348_v48 = vpop.f32.mrf.mxu3  ;;  %v8157_v14 = vadd.f32 %v2689_v28, %v2518_v24  ;;  %v2520_v56 = vpop.f32.mrf.mxu0  ;;  %v11173_v24 = vld [vmem:[#allocation76_spill] sm:$0xff] }
 0x3ac   : > { %v8155_v2 = vadd.f32 %v2348_v48, %v2177_v22  ;;  %v2178_v37 = vpop.f32.mrf.mxu1  ;;  %v2521_v61 = vadd.f32 %v2520_v56, %v11169_v40  ;;  %v6497_v56 = vld [vmem:[%s10735_s1 + $0x208] sm:$0xf0]  ;;  %v11175_v40 = vld [vmem:[#allocation52_spill] sm:$0xff] }
 0x3ad   : > { %11168 = vst [vmem:[#allocation59_spill] sm:$0xff] %v8157_v14  ;;  %v2179_v4 = vadd.f32 %v2178_v37, %v11170_v21  ;;  %v11174_v14 = vld [vmem:[#allocation77_spill] sm:$0xff]  ;;  %v6657_v21 = vld [vmem:[%s10735_s1 + $0x204] sm:$0xf] }
 0x3ae   : > { %11167 = vst [vmem:[#allocation57_spill] sm:$0xff] %v8155_v2  ;;  %2559 = vmatmul.bf16.gmra.mxu0 %v11165_v36  ;;  %v6500_v37 = vor.u32 %v6657_v21, %v6497_v56  ;;  %v11179_v56 = vld [vmem:[#allocation79_spill] sm:$0xff]  ;;  %v11183_v36 = vld [vmem:[#allocation82_spill] sm:$0xff] }
 0x3af   : > { %6395 = vmatmul.msk.bf16.gmra.mxu2 %vm1130_vm0, %v11166_v13 }
 0x3b0   : > { %3502 = vmatpush.bf16.msra.mxu2 %v6500_v37  ;;  %v11180_v37 = vld [vmem:[#allocation80_spill] sm:$0xff] }
 0x3b2   : > { %v2692_v52 = vpop.f32.mrf.mxu2 }
 0x3b3   : > { %v2350_v38 = vpop.f32.mrf.mxu3  ;;  %v8166_v60 = vadd.f32 %v2692_v52, %v2521_v61  ;;  %v2522_v22 = vpop.f32.mrf.mxu0 }
 0x3b4   : > { %v8164_v26 = vadd.f32 %v2350_v38, %v2179_v4  ;;  %v2181_v48 = vpop.f32.mrf.mxu1  ;;  %v2523_v28 = vadd.f32 %v2522_v22, %v11173_v24  ;;  %v11176_v4 = vld [vmem:[#allocation49_spill] sm:$0xff] }
 0x3b5   : > { %11172 = vst [vmem:[#allocation62_spill] sm:$0xff] %v8166_v60  ;;  %v2182_v2 = vadd.f32 %v2181_v48, %v11174_v14  ;;  %v6643_v48 = vld [vmem:[%s10735_s1 + $0x194] sm:$0xf]  ;;  %v6441_v24 = vld [vmem:[%s10735_s1 + $0x198] sm:$0xf0] }
 0x3b6   : > { %11171 = vst [vmem:[#allocation60_spill] sm:$0xff] %v8164_v26  ;;  %v6444_v26 = vor.u32 %v6643_v48, %v6441_v24  ;;  %v11185_v24 = vld [vmem:[#allocation58_spill] sm:$0xff] }
 0x3b7   : > { %2220 = vmatmul.bf16.gmra.mxu1 %v11175_v40 }
 0x3b8   : > { %6363 = vmatmul.msk.bf16.gmra.mxu3 %vm1130_vm0, %v11176_v4  ;;  %3329 = vmatpush.bf16.msra.mxu0 %v6444_v26 }
 0x3ba   : > { %v2694_v61 = vpop.f32.mrf.mxu2 }
 0x3bb   : > { %v2353_v38 = vpop.f32.mrf.mxu3  ;;  %v8181_v14 = vadd.f32 %v2694_v61, %v2523_v28  ;;  %v2525_v22 = vpop.f32.mrf.mxu0 }
 0x3bc   : > { %v8179_v52 = vadd.f32 %v2353_v38, %v2182_v2  ;;  %v2183_v21 = vpop.f32.mrf.mxu1  ;;  %v2526_v60 = vadd.f32 %v2525_v22, %v11179_v56  ;;  %v11184_v22 = vld [vmem:[#allocation83_spill] sm:$0xff] }
 0x3bd   : > { %11178 = vst [vmem:[#allocation65_spill] sm:$0xff] %v8181_v14  ;;  %v2184_v13 = vadd.f32 %v2183_v21, %v11180_v37  ;;  %v11186_v21 = vld [vmem:[#allocation55_spill] sm:$0xff] }
 0x3be   : > { %11177 = vst [vmem:[#allocation63_spill] sm:$0xff] %v8179_v52  ;;  %2564 = vmatmul.bf16.gmra.mxu0 %v11175_v40 }
 0x3bf   : > { %6396 = vmatmul.msk.bf16.gmra.mxu2 %vm1130_vm0, %v11176_v4 }
 0x3c2   : > { %v2697_v28 = vpop.f32.mrf.mxu2 }
 0x3c3   : > { %v2355_v2 = vpop.f32.mrf.mxu3  ;;  %v8196_v61 = vadd.f32 %v2697_v28, %v2526_v60  ;;  %v2527_v52 = vpop.f32.mrf.mxu0 }
 0x3c4   : > { %v8194_v38 = vadd.f32 %v2355_v2, %v2184_v13  ;;  %v2186_v14 = vpop.f32.mrf.mxu1  ;;  %v2528_v31 = vadd.f32 %v2527_v52, %v11183_v36  ;;  %v11189_v2 = vld [vmem:[#allocation85_spill] sm:$0xff] }
 0x3c5   : > { %11182 = vst [vmem:[#allocation68_spill] sm:$0xff] %v8196_v61  ;;  %v2187_v48 = vadd.f32 %v2186_v14, %v11184_v22  ;;  %v11190_v61 = vld [vmem:[#allocation86_spill] sm:$0xff] }
 0x3c6   : > { %11181 = vst [vmem:[#allocation66_spill] sm:$0xff] %v8194_v38 }
 0x3c7   : > { %2225 = vmatmul.bf16.gmra.mxu1 %v11185_v24 }
 0x3c8   : > { %6364 = vmatmul.msk.bf16.gmra.mxu3 %vm1130_vm0, %v11186_v21 }
 0x3ca   : > { %v2699_v56 = vpop.f32.mrf.mxu2 }
 0x3cb   : > { %v2358_v26 = vpop.f32.mrf.mxu3  ;;  %v8205_v4 = vadd.f32 %v2699_v56, %v2528_v31  ;;  %v2530_v13 = vpop.f32.mrf.mxu0 }
 0x3cc   : > { %v8203_v37 = vadd.f32 %v2358_v26, %v2187_v48  ;;  %v2188_v60 = vpop.f32.mrf.mxu1  ;;  %v2531_v28 = vadd.f32 %v2530_v13, %v11189_v2  ;;  %v11193_v26 = vld [vmem:[#allocation88_spill] sm:$0xff] }
 0x3cd   : > { %11188 = vst [vmem:[#allocation71_spill] sm:$0xff] %v8205_v4  ;;  %v2189_v38 = vadd.f32 %v2188_v60, %v11190_v61  ;;  %v11194_v4 = vld [vmem:[#allocation89_spill] sm:$0xff]  ;;  %v11195_v13 = vld [vmem:[#allocation64_spill] sm:$0xff] }
 0x3ce   : > { %11187 = vst [vmem:[#allocation70_spill] sm:$0xff] %v8203_v37  ;;  %2569 = vmatmul.bf16.gmra.mxu0 %v11185_v24  ;;  %v11196_v61 = vld [vmem:[#allocation61_spill] sm:$0xff] }
 0x3cf   : > { %6397 = vmatmul.msk.bf16.gmra.mxu2 %vm1130_vm0, %v11186_v21 }
 0x3d2   : > { %v2702_v52 = vpop.f32.mrf.mxu2 }
 0x3d3   : > { %v2360_v36 = vpop.f32.mrf.mxu3  ;;  %v8214_v22 = vadd.f32 %v2702_v52, %v2531_v28  ;;  %v2532_v48 = vpop.f32.mrf.mxu0 }
 0x3d4   : > { %v8212_v14 = vadd.f32 %v2360_v36, %v2189_v38  ;;  %v2191_v31 = vpop.f32.mrf.mxu1  ;;  %v2533_v56 = vadd.f32 %v2532_v48, %v11193_v26  ;;  %v11199_v36 = vld [vmem:[#allocation91_spill] sm:$0xff] }
 0x3d5   : > { %11192 = vst [vmem:[#allocation74_spill] sm:$0xff] %v8214_v22  ;;  %v2192_v37 = vadd.f32 %v2191_v31, %v11194_v4  ;;  %v11200_v22 = vld [vmem:[#allocation92_spill] sm:$0xff] }
 0x3d6   : > { %11191 = vst [vmem:[#allocation73_spill] sm:$0xff] %v8212_v14 }
 0x3d7   : > { %2230 = vmatmul.bf16.gmra.mxu1 %v11195_v13 }
 0x3d8   : > { %6365 = vmatmul.msk.bf16.gmra.mxu3 %vm1130_vm0, %v11196_v61 }
 0x3da   : > { %v2704_v2 = vpop.f32.mrf.mxu2 }
 0x3db   : > { %v2363_v60 = vpop.f32.mrf.mxu3  ;;  %v8223_v24 = vadd.f32 %v2704_v2, %v2533_v56  ;;  %v2535_v38 = vpop.f32.mrf.mxu0 }
 0x3dc   : > { %v8221_v21 = vadd.f32 %v2363_v60, %v2192_v37  ;;  %v2193_v28 = vpop.f32.mrf.mxu1  ;;  %v2536_v52 = vadd.f32 %v2535_v38, %v11199_v36  ;;  %v11203_v60 = vld [vmem:[#allocation94_spill] sm:$0xff]  ;;  %v11205_v38 = vld [vmem:[#allocation69_spill] sm:$0xff] }
 0x3dd   : > { %11198 = vst [vmem:[#allocation77_spill] sm:$0xff] %v8223_v24  ;;  %v2194_v14 = vadd.f32 %v2193_v28, %v11200_v22  ;;  %v11204_v24 = vld [vmem:[#allocation95_spill] sm:$0xff] }
 0x3de   : > { %11197 = vst [vmem:[#allocation76_spill] sm:$0xff] %v8221_v21  ;;  %2574 = vmatmul.bf16.gmra.mxu0 %v11195_v13  ;;  %v11206_v22 = vld [vmem:[#allocation67_spill] sm:$0xff] }
 0x3df   : > { %6398 = vmatmul.msk.bf16.gmra.mxu2 %vm1130_vm0, %v11196_v61 }
 0x3e2   : > { %v2707_v48 = vpop.f32.mrf.mxu2 }
 0x3e3   : > { %v2365_v4 = vpop.f32.mrf.mxu3  ;;  %v8232_v26 = vadd.f32 %v2707_v48, %v2536_v52  ;;  %v2537_v37 = vpop.f32.mrf.mxu0  ;;  %v6431_v52 = vld [vmem:[%s10735_s1 + $0x180] sm:$0xf] }
 0x3e4   : > { %v8230_v31 = vadd.f32 %v2365_v4, %v2194_v14  ;;  %v2196_v56 = vpop.f32.mrf.mxu1  ;;  %v2538_v2 = vadd.f32 %v2537_v37, %v11203_v60  ;;  %v11209_v48 = vld [vmem:[#allocation98_spill] sm:$0xff]  ;;  %v11210_v60 = vld [vmem:[#allocation99_spill] sm:$0xff] }
 0x3e5   : > { %11202 = vst [vmem:[#allocation80_spill] sm:$0xff] %v8232_v26  ;;  %v2197_v21 = vadd.f32 %v2196_v56, %v11204_v24  ;;  %v6642_v24 = vld [vmem:[%s10735_s1 + $0x184] sm:$0xf0] }
 0x3e6   : > { %11201 = vst [vmem:[#allocation79_spill] sm:$0xff] %v8230_v31  ;;  %v6432_v56 = vor.u32 %v6642_v24, %v6431_v52  ;;  %v11213_v31 = vld [vmem:[#allocation102_spill] sm:$0xff]  ;;  %v11215_v24 = vld [vmem:[#allocation75_spill] sm:$0xff] }
 0x3e7   : > { %2235 = vmatmul.bf16.gmra.mxu1 %v11205_v38 }
 0x3e8   : > { %6366 = vmatmul.msk.bf16.gmra.mxu3 %vm1130_vm0, %v11206_v22  ;;  %2986 = vmatpush.bf16.msra.mxu1 %v6432_v56 }
 0x3ea   : > { %v2709_v36 = vpop.f32.mrf.mxu2 }
 0x3eb   : > { %v2368_v28 = vpop.f32.mrf.mxu3  ;;  %v8241_v13 = vadd.f32 %v2709_v36, %v2538_v2  ;;  %v2540_v14 = vpop.f32.mrf.mxu0 }
 0x3ec   : > { %v8239_v61 = vadd.f32 %v2368_v28, %v2197_v21  ;;  %v2198_v4 = vpop.f32.mrf.mxu1  ;;  %v2541_v37 = vadd.f32 %v2540_v14, %v11209_v48  ;;  %v11214_v14 = vld [vmem:[#allocation103_spill] sm:$0xff] }
 0x3ed   : > { %11208 = vst [vmem:[#allocation83_spill] sm:$0xff] %v8241_v13  ;;  %v2199_v26 = vadd.f32 %v2198_v4, %v11210_v60  ;;  %v11216_v4 = vld [vmem:[#allocation72_spill] sm:$0xff] }
 0x3ee   : > { %11207 = vst [vmem:[#allocation82_spill] sm:$0xff] %v8239_v61  ;;  %2579 = vmatmul.bf16.gmra.mxu0 %v11205_v38 }
 0x3ef   : > { %6399 = vmatmul.msk.bf16.gmra.mxu2 %vm1130_vm0, %v11206_v22 }
 0x3f2   : > { %v2712_v2 = vpop.f32.mrf.mxu2 }
 0x3f3   : > { %v2370_v21 = vpop.f32.mrf.mxu3  ;;  %v8256_v36 = vadd.f32 %v2712_v2, %v2541_v37  ;;  %v2542_v13 = vpop.f32.mrf.mxu0 }
 0x3f4   : > { %v8254_v28 = vadd.f32 %v2370_v21, %v2199_v26  ;;  %v2201_v61 = vpop.f32.mrf.mxu1  ;;  %v2543_v40 = vadd.f32 %v2542_v13, %v11213_v31  ;;  %v11219_v21 = vld [vmem:[#allocation105_spill] sm:$0xff]  ;;  %v6641_v13 = vld [vmem:[%s10735_s1 + $0x184] sm:$0xf] }
 0x3f5   : > { %11212 = vst [vmem:[#allocation86_spill] sm:$0xff] %v8256_v36  ;;  %v2202_v52 = vadd.f32 %v2201_v61, %v11214_v14  ;;  %v11220_v36 = vld [vmem:[#allocation106_spill] sm:$0xff]  ;;  %v6433_v61 = vld [vmem:[%s10735_s1 + $0x188] sm:$0xf0] }
 0x3f6   : > { %11211 = vst [vmem:[#allocation85_spill] sm:$0xff] %v8254_v28  ;;  %v6436_v31 = vor.u32 %v6641_v13, %v6433_v61 }
 0x3f7   : > { %2240 = vmatmul.bf16.gmra.mxu1 %v11215_v24 }
 0x3f8   : > { %6367 = vmatmul.msk.bf16.gmra.mxu3 %vm1130_vm0, %v11216_v4  ;;  %3330 = vmatpush.bf16.msra.mxu0 %v6436_v31 }
 0x3fa   : > { %v2714_v56 = vpop.f32.mrf.mxu2 }
 0x3fb   : > { %v2373_v48 = vpop.f32.mrf.mxu3  ;;  %v8265_v22 = vadd.f32 %v2714_v56, %v2543_v40  ;;  %v2545_v26 = vpop.f32.mrf.mxu0 }
 0x3fc   : > { %v8263_v60 = vadd.f32 %v2373_v48, %v2202_v52  ;;  %v2203_v37 = vpop.f32.mrf.mxu1  ;;  %v2546_v2 = vadd.f32 %v2545_v26, %v11219_v21  ;;  %v11223_v26 = vld [vmem:[#allocation108_spill] sm:$0xff]  ;;  %v11224_v21 = vld [vmem:[#allocation109_spill] sm:$0xff] }
 0x3fd   : > { %11218 = vst [vmem:[#allocation89_spill] sm:$0xff] %v8265_v22  ;;  %v2204_v28 = vadd.f32 %v2203_v37, %v11220_v36  ;;  %v11225_v22 = vld [vmem:[#allocation81_spill] sm:$0xff] }
 0x3fe   : > { %11217 = vst [vmem:[#allocation88_spill] sm:$0xff] %v8263_v60  ;;  %2584 = vmatmul.bf16.gmra.mxu0 %v11215_v24  ;;  %v11226_v24 = vld [vmem:[#allocation78_spill] sm:$0xff] }
 0x3ff   : > { %6400 = vmatmul.msk.bf16.gmra.mxu2 %vm1130_vm0, %v11216_v4 }
 0x402   : > { %v2717_v14 = vpop.f32.mrf.mxu2 }
 0x403   : > { %v2375_v40 = vpop.f32.mrf.mxu3  ;;  %v8280_v36 = vadd.f32 %v2717_v14, %v2546_v2  ;;  %v2547_v48 = vpop.f32.mrf.mxu0 }
 0x404   : > { %v8278_v52 = vadd.f32 %v2375_v40, %v2204_v28  ;;  %v2206_v56 = vpop.f32.mrf.mxu1  ;;  %v2548_v37 = vadd.f32 %v2547_v48, %v11223_v26  ;;  %v11229_v40 = vld [vmem:[#allocation111_spill] sm:$0xff] }
 0x405   : > { %11222 = vst [vmem:[#allocation92_spill] sm:$0xff] %v8280_v36  ;;  %v2207_v60 = vadd.f32 %v2206_v56, %v11224_v21  ;;  %v11230_v36 = vld [vmem:[#allocation112_spill] sm:$0xff] }
 0x406   : > { %11221 = vst [vmem:[#allocation91_spill] sm:$0xff] %v8278_v52 }
 0x407   : > { %2245 = vmatmul.bf16.gmra.mxu1 %v11225_v22 }
 0x408   : > { %6368 = vmatmul.msk.bf16.gmra.mxu3 %vm1130_vm0, %v11226_v24 }
 0x40a   : > { %v2719_v61 = vpop.f32.mrf.mxu2 }
 0x40b   : > { %v2378_v13 = vpop.f32.mrf.mxu3  ;;  %v8289_v4 = vadd.f32 %v2719_v61, %v2548_v37  ;;  %v2550_v28 = vpop.f32.mrf.mxu0 }
 0x40c   : > { %v8287_v31 = vadd.f32 %v2378_v13, %v2207_v60  ;;  %v2208_v2 = vpop.f32.mrf.mxu1  ;;  %v2551_v14 = vadd.f32 %v2550_v28, %v11229_v40  ;;  %v11233_v13 = vld [vmem:[#allocation114_spill] sm:$0xff]  ;;  %v11235_v28 = vld [vmem:[#allocation87_spill] sm:$0xff] }
 0x40d   : > { %11228 = vst [vmem:[#allocation95_spill] sm:$0xff] %v8289_v4  ;;  %v2209_v52 = vadd.f32 %v2208_v2, %v11230_v36  ;;  %v11234_v4 = vld [vmem:[#allocation115_spill] sm:$0xff]  ;;  %v11236_v36 = vld [vmem:[#allocation84_spill] sm:$0xff] }
 0x40e   : > { %11227 = vst [vmem:[#allocation94_spill] sm:$0xff] %v8287_v31  ;;  %2589 = vmatmul.bf16.gmra.mxu0 %v11225_v22 }
 0x40f   : > { %6401 = vmatmul.msk.bf16.gmra.mxu2 %vm1130_vm0, %v11226_v24 }
 0x412   : > { %v2722_v56 = vpop.f32.mrf.mxu2 }
 0x413   : > { %v2380_v48 = vpop.f32.mrf.mxu3  ;;  %v8298_v21 = vadd.f32 %v2722_v56, %v2551_v14  ;;  %v2552_v60 = vpop.f32.mrf.mxu0 }
 0x414   : > { %v8296_v26 = vadd.f32 %v2380_v48, %v2209_v52  ;;  %v2211_v37 = vpop.f32.mrf.mxu1  ;;  %v2553_v61 = vadd.f32 %v2552_v60, %v11233_v13  ;;  %v11239_v48 = vld [vmem:[#allocation117_spill] sm:$0xff] }
 0x415   : > { %11232 = vst [vmem:[#allocation99_spill] sm:$0xff] %v8298_v21  ;;  %v2212_v31 = vadd.f32 %v2211_v37, %v11234_v4  ;;  %v11240_v21 = vld [vmem:[#allocation118_spill] sm:$0xff] }
 0x416   : > { %11231 = vst [vmem:[#allocation98_spill] sm:$0xff] %v8296_v26 }
 0x417   : > { %2250 = vmatmul.bf16.gmra.mxu1 %v11235_v28 }
 0x418   : > { %6369 = vmatmul.msk.bf16.gmra.mxu3 %vm1130_vm0, %v11236_v36 }
 0x41a   : > { %v2724_v40 = vpop.f32.mrf.mxu2 }
 0x41b   : > { %v2383_v2 = vpop.f32.mrf.mxu3  ;;  %v8307_v22 = vadd.f32 %v2724_v40, %v2553_v61  ;;  %v2555_v52 = vpop.f32.mrf.mxu0 }
 0x41c   : > { %v8305_v24 = vadd.f32 %v2383_v2, %v2212_v31  ;;  %v2213_v14 = vpop.f32.mrf.mxu1  ;;  %v2556_v56 = vadd.f32 %v2555_v52, %v11239_v48  ;;  %v11243_v2 = vld [vmem:[#allocation120_spill] sm:$0xff]  ;;  %v11245_v52 = vld [vmem:[#allocation93_spill] sm:$0xff] }
 0x41d   : > { %11238 = vst [vmem:[#allocation103_spill] sm:$0xff] %v8307_v22  ;;  %v2214_v26 = vadd.f32 %v2213_v14, %v11240_v21  ;;  %v11244_v22 = vld [vmem:[#allocation121_spill] sm:$0xff]  ;;  %v11246_v21 = vld [vmem:[#allocation90_spill] sm:$0xff] }
 0x41e   : > { %11237 = vst [vmem:[#allocation102_spill] sm:$0xff] %v8305_v24  ;;  %2594 = vmatmul.bf16.gmra.mxu0 %v11235_v28 }
 0x41f   : > { %6402 = vmatmul.msk.bf16.gmra.mxu2 %vm1130_vm0, %v11236_v36 }
 0x422   : > { %v2727_v60 = vpop.f32.mrf.mxu2 }
 0x423   : > { %v2385_v4 = vpop.f32.mrf.mxu3  ;;  %v8316_v13 = vadd.f32 %v2727_v60, %v2556_v56  ;;  %v2557_v31 = vpop.f32.mrf.mxu0 }
 0x424   : > { %v8314_v37 = vadd.f32 %v2385_v4, %v2214_v26  ;;  %v2216_v61 = vpop.f32.mrf.mxu1  ;;  %v2558_v40 = vadd.f32 %v2557_v31, %v11243_v2  ;;  %v11249_v4 = vld [vmem:[#allocation123_spill] sm:$0xff]  ;;  %v11252_v2 = vld [vmem:[#allocation100_spill] sm:$0xff] }
 0x425   : > { %11242 = vst [vmem:[#allocation106_spill] sm:$0xff] %v8316_v13  ;;  %v2217_v24 = vadd.f32 %v2216_v61, %v11244_v22  ;;  %v11250_v13 = vld [vmem:[#allocation124_spill] sm:$0xff] }
 0x426   : > { %11241 = vst [vmem:[#allocation105_spill] sm:$0xff] %v8314_v37 }
 0x427   : > { %2255 = vmatmul.bf16.gmra.mxu1 %v11245_v52 }
 0x428   : > { %6370 = vmatmul.msk.bf16.gmra.mxu3 %vm1130_vm0, %v11246_v21 }
 0x42a   : > { %v2729_v48 = vpop.f32.mrf.mxu2 }
 0x42b   : > { %v2388_v14 = vpop.f32.mrf.mxu3  ;;  %v8325_v28 = vadd.f32 %v2729_v48, %v2558_v40  ;;  %v2560_v26 = vpop.f32.mrf.mxu0  ;;  %v11253_v40 = vld [vmem:[#allocation96_spill] sm:$0xff] }
 0x42c   : > { %v8323_v36 = vadd.f32 %v2388_v14, %v2217_v24  ;;  %v2218_v56 = vpop.f32.mrf.mxu1  ;;  %v2561_v60 = vadd.f32 %v2560_v26, %v11249_v4  ;;  %v1950_v24 = vpack.c.b16 %v11252_v2, %v11252_v2  ;;  %v1951_v14 = vpack.c.b16 %v11253_v40, %v11253_v40  ;;  %v11258_v40 = vld [vmem:[#allocation128_spill] sm:$0xff] }
 0x42d   : > { %11248 = vst [vmem:[#allocation109_spill] sm:$0xff] %v8325_v28  ;;  %v2219_v37 = vadd.f32 %v2218_v56, %v11250_v13  ;;  %v11255_v13 = vld [vmem:[#allocation126_spill] sm:$0xff]  ;;  %v11256_v28 = vld [vmem:[#allocation127_spill] sm:$0xff] }
 0x42e   : > { %11247 = vst [vmem:[#allocation108_spill] sm:$0xff] %v8323_v36  ;;  %2599 = vmatmul.bf16.gmra.mxu0 %v11245_v52 }
 0x42f   : > { %6403 = vmatmul.msk.bf16.gmra.mxu2 %vm1130_vm0, %v11246_v21 }
 0x432   : > { %v2732_v31 = vpop.f32.mrf.mxu2 }
 0x433   : > { %v2390_v22 = vpop.f32.mrf.mxu3  ;;  %v8338_v48 = vadd.f32 %v2732_v31, %v2561_v60  ;;  %v2562_v26 = vpop.f32.mrf.mxu0  ;;  %v11259_v31 = vld [vmem:[#allocation129_spill] sm:$0xff] }
 0x434   : > { %v8332_v61 = vadd.f32 %v2390_v22, %v2219_v37  ;;  %v2221_v4 = vpop.f32.mrf.mxu1  ;;  %v2563_v56 = vadd.f32 %v2562_v26, %v11255_v13 }
 0x435   : > { %11254 = vst [vmem:[#allocation112_spill] sm:$0xff] %v8338_v48  ;;  %v2222_v36 = vadd.f32 %v2221_v4, %v11256_v28 }
 0x436   : > { %11251 = vst [vmem:[#allocation111_spill] sm:$0xff] %v8332_v61 }
 0x437   : > { %2260 = vmatmul.bf16.gmra.mxu1 %v1950_v24 }
 0x438   : > { %6371 = vmatmul.msk.bf16.gmra.mxu3 %vm1130_vm0, %v1951_v14 }
 0x43a   : > { %v2734_v37 = vpop.f32.mrf.mxu2 }
 0x43b   : > { %v2393_v21 = vpop.f32.mrf.mxu3  ;;  %v8345_v61 = vadd.f32 %v2734_v37, %v2563_v56  ;;  %v2565_v2 = vpop.f32.mrf.mxu0  ;;  %v11261_v37 = vld [vmem:[#allocation131_spill] sm:$0xff] }
 0x43c   : > { %v8343_v22 = vadd.f32 %v2393_v21, %v2222_v36  ;;  %v2223_v52 = vpop.f32.mrf.mxu1  ;;  %v2566_v60 = vadd.f32 %v2565_v2, %v11258_v40  ;;  %v11260_v21 = vld [vmem:[#allocation130_spill] sm:$0xff] }
 0x43d   : > { %v2224_v48 = vadd.f32 %v2223_v52, %v11259_v31 }
 0x43e   : > { %11257 = vst [vmem:[#allocation114_spill] sm:$0xff] %v8343_v22  ;;  %2604 = vmatmul.bf16.gmra.mxu0 %v1950_v24 }
 0x43f   : > { %6404 = vmatmul.msk.bf16.gmra.mxu2 %vm1130_vm0, %v1951_v14 }
 0x442   : > { %v2737_v28 = vpop.f32.mrf.mxu2 }
 0x443   : > { %v2395_v26 = vpop.f32.mrf.mxu3  ;;  %v8352_v13 = vadd.f32 %v2737_v28, %v2566_v60  ;;  %v2567_v38 = vpop.f32.mrf.mxu0  ;;  %v11263_v60 = vld [vmem:[#allocation132_spill] sm:$0xff] }
 0x444   : > { %v8350_v4 = vadd.f32 %v2395_v26, %v2224_v48  ;;  %v2226_v36 = vpop.f32.mrf.mxu1  ;;  %v2568_v56 = vadd.f32 %v2567_v38, %v11260_v21  ;;  %v11264_v26 = vld [vmem:[#allocation133_spill] sm:$0xff] }
 0x445   : > { %v2227_v22 = vadd.f32 %v2226_v36, %v11261_v37 }
 0x447   : > { %2987 = vmatmul.bf16.vlgmr.msra.gmra.mxu1 %v7016_v0 }
 0x448   : > { %6525 = vmatmul.msk.bf16.vlgmr.msra.gmra.mxu3 %vm1130_vm0, %v7010_v57 }
 0x44a   : > { %v2739_v24 = vpop.f32.mrf.mxu2 }
 0x44b   : > { %v2398_v52 = vpop.f32.mrf.mxu3  ;;  %v8361_v2 = vadd.f32 %v2739_v24, %v2568_v56  ;;  %v2570_v48 = vpop.f32.mrf.mxu0  ;;  %v11265_v24 = vld [vmem:[#allocation134_spill] sm:$0xff] }
 0x44c   : > { %v8359_v14 = vadd.f32 %v2398_v52, %v2227_v22  ;;  %v2228_v40 = vpop.f32.mrf.mxu1  ;;  %v2571_v31 = vadd.f32 %v2570_v48, %v11263_v60 }
 0x44d   : > { %11262 = vst [vmem:[#allocation115_spill] sm:$0xff] %v8361_v2  ;;  %v2229_v28 = vadd.f32 %v2228_v40, %v11264_v26  ;;  %v11266_v26 = vld [vmem:[#allocation135_spill] sm:$0xff] }
 0x44e   : > { %3331 = vmatmul.bf16.vlgmr.msra.gmra.mxu0 %v7016_v0 }
 0x44f   : > { %6558 = vmatmul.msk.bf16.vlgmr.msra.gmra.mxu2 %vm1130_vm0, %v7010_v57 }
 0x452   : > { %v2742_v36 = vpop.f32.mrf.mxu2 }
 0x453   : > { %v2400_v38 = vpop.f32.mrf.mxu3  ;;  %v8370_v37 = vadd.f32 %v2742_v36, %v2571_v31  ;;  %v2572_v22 = vpop.f32.mrf.mxu0 }
 0x454   : > { %v8368_v21 = vadd.f32 %v2400_v38, %v2229_v28  ;;  %v2231_v56 = vpop.f32.mrf.mxu1  ;;  %v2573_v52 = vadd.f32 %v2572_v22, %v7706_v25 }
 0x455   : > { %v2232_v2 = vadd.f32 %v2231_v56, %v11265_v24 }
 0x457   : > { %2992 = vmatmul.bf16.gmra.mxu1 %v7028_v20 }
 0x458   : > { %6526 = vmatmul.msk.bf16.gmra.mxu3 %vm1130_vm0, %v7022_v8 }
 0x45a   : > { %v2744_v48 = vpop.f32.mrf.mxu2 }
 0x45b   : > { %v2403_v0 = vpop.f32.mrf.mxu3  ;;  %v8379_v40 = vadd.f32 %v2744_v48, %v2573_v52  ;;  %v2575_v60 = vpop.f32.mrf.mxu0 }
 0x45c   : > { %v8377_v57 = vadd.f32 %v2403_v0, %v2232_v2  ;;  %v2233_v31 = vpop.f32.mrf.mxu1  ;;  %v2576_v28 = vadd.f32 %v2575_v60, %v11266_v26 }
 0x45d   : > { %v2234_v38 = vadd.f32 %v2233_v31, %v7715_v59 }
 0x45e   : > { %3336 = vmatmul.bf16.gmra.mxu0 %v7028_v20 }
 0x45f   : > { %6559 = vmatmul.msk.bf16.gmra.mxu2 %vm1130_vm0, %v7022_v8 }
 0x462   : > { %v2747_v36 = vpop.f32.mrf.mxu2 }
 0x463   : > { %v2405_v25 = vpop.f32.mrf.mxu3  ;;  %v8388_v56 = vadd.f32 %v2747_v36, %v2576_v28  ;;  %v2577_v2 = vpop.f32.mrf.mxu0 }
 0x464   : > { %v8386_v22 = vadd.f32 %v2405_v25, %v2234_v38  ;;  %v2236_v52 = vpop.f32.mrf.mxu1  ;;  %v2578_v24 = vadd.f32 %v2577_v2, %v7718_v12 }
 0x465   : > { %v2237_v0 = vadd.f32 %v2236_v52, %v7720_v49 }
 0x467   : > { %2997 = vmatmul.bf16.gmra.mxu1 %v7040_v41 }
 0x468   : > { %6527 = vmatmul.msk.bf16.gmra.mxu3 %vm1130_vm0, %v7034_v34 }
 0x46a   : > { %v2749_v59 = vpop.f32.mrf.mxu2 }
 0x46b   : > { %v2408_v20 = vpop.f32.mrf.mxu3  ;;  %v8397_v48 = vadd.f32 %v2749_v59, %v2578_v24  ;;  %v2580_v60 = vpop.f32.mrf.mxu0 }
 0x46c   : > { %v8395_v8 = vadd.f32 %v2408_v20, %v2237_v0  ;;  %v2238_v31 = vpop.f32.mrf.mxu1  ;;  %v2581_v26 = vadd.f32 %v2580_v60, %v7729_v18 }
 0x46d   : > { %v2239_v28 = vadd.f32 %v2238_v31, %v7731_v62 }
 0x46e   : > { %3341 = vmatmul.bf16.gmra.mxu0 %v7040_v41 }
 0x46f   : > { %6560 = vmatmul.msk.bf16.gmra.mxu2 %vm1130_vm0, %v7034_v34 }
 0x472   : > { %v2752_v12 = vpop.f32.mrf.mxu2 }
 0x473   : > { %v2410_v49 = vpop.f32.mrf.mxu3  ;;  %v8406_v25 = vadd.f32 %v2752_v12, %v2581_v26  ;;  %v2582_v36 = vpop.f32.mrf.mxu0 }
 0x474   : > { %v8404_v38 = vadd.f32 %v2410_v49, %v2239_v28  ;;  %v2241_v2 = vpop.f32.mrf.mxu1  ;;  %v2583_v52 = vadd.f32 %v2582_v36, %v7734_v54 }
 0x475   : > { %v2242_v24 = vadd.f32 %v2241_v2, %v7736_v16 }
 0x477   : > { %3002 = vmatmul.bf16.gmra.mxu1 %v7064_v7 }
 0x478   : > { %6528 = vmatmul.msk.bf16.gmra.mxu3 %vm1130_vm0, %v7058_v58 }
 0x47a   : > { %v2754_v18 = vpop.f32.mrf.mxu2 }
 0x47b   : > { %v2413_v41 = vpop.f32.mrf.mxu3  ;;  %v8415_v62 = vadd.f32 %v2754_v18, %v2583_v52  ;;  %v2585_v0 = vpop.f32.mrf.mxu0 }
 0x47c   : > { %v8413_v34 = vadd.f32 %v2413_v41, %v2242_v24  ;;  %v2243_v20 = vpop.f32.mrf.mxu1  ;;  %v2586_v59 = vadd.f32 %v2585_v0, %v7745_v33  ;;  %v11269_v41 = vld [vmem:[#allocation136_spill] sm:$0xff] }
 0x47d   : > { %v2244_v60 = vadd.f32 %v2243_v20, %v7747_v63 }
 0x47e   : > { %3346 = vmatmul.bf16.gmra.mxu0 %v7064_v7 }
 0x47f   : > { %6561 = vmatmul.msk.bf16.gmra.mxu2 %vm1130_vm0, %v7058_v58 }
 0x482   : > { %v2757_v16 = vpop.f32.mrf.mxu2 }
 0x483   : > { %v2415_v54 = vpop.f32.mrf.mxu3  ;;  %v8424_v26 = vadd.f32 %v2757_v16, %v2586_v59  ;;  %v2587_v28 = vpop.f32.mrf.mxu0 }
 0x484   : > { %v8422_v31 = vadd.f32 %v2415_v54, %v2244_v60  ;;  %v2246_v49 = vpop.f32.mrf.mxu1  ;;  %v2588_v12 = vadd.f32 %v2587_v28, %v7752_v5 }
 0x485   : > { %v2247_v36 = vadd.f32 %v2246_v49, %v7754_v35 }
 0x487   : > { %3007 = vmatmul.bf16.gmra.mxu1 %v7088_v39 }
 0x488   : > { %6529 = vmatmul.msk.bf16.gmra.mxu3 %vm1130_vm0, %v7082_v27 }
 0x48a   : > { %v2759_v33 = vpop.f32.mrf.mxu2 }
 0x48b   : > { %v2418_v7 = vpop.f32.mrf.mxu3  ;;  %v8433_v63 = vadd.f32 %v2759_v33, %v2588_v12  ;;  %v2590_v2 = vpop.f32.mrf.mxu0 }
 0x48c   : > { %v8431_v58 = vadd.f32 %v2418_v7, %v2247_v36  ;;  %v2248_v52 = vpop.f32.mrf.mxu1  ;;  %v2591_v24 = vadd.f32 %v2590_v2, %v7759_v45 }
 0x48d   : > { %11268 = vst [vmem:[#allocation118_spill] sm:$0xff] %v8433_v63  ;;  %v2249_v18 = vadd.f32 %v2248_v52, %v11269_v41  ;;  %v11276_v41 = vld [vmem:[#allocation137_spill] sm:$0xff] }
 0x48e   : > { %11267 = vst [vmem:[#allocation117_spill] sm:$0xff] %v8431_v58  ;;  %3351 = vmatmul.bf16.gmra.mxu0 %v7088_v39 }
 0x48f   : > { %6562 = vmatmul.msk.bf16.gmra.mxu2 %vm1130_vm0, %v7082_v27 }
 0x492   : > { %v2762_v35 = vpop.f32.mrf.mxu2 }
 0x493   : > { %v2420_v5 = vpop.f32.mrf.mxu3  ;;  %v8442_v20 = vadd.f32 %v2762_v35, %v2591_v24  ;;  %v2592_v59 = vpop.f32.mrf.mxu0 }
 0x494   : > { %v8440_v0 = vadd.f32 %v2420_v5, %v2249_v18  ;;  %v2251_v60 = vpop.f32.mrf.mxu1  ;;  %v2593_v54 = vadd.f32 %v2592_v59, %v7766_v43  ;;  %v11277_v5 = vld [vmem:[#allocation138_spill] sm:$0xff] }
 0x495   : > { %11271 = vst [vmem:[#allocation121_spill] sm:$0xff] %v8442_v20  ;;  %v2252_v16 = vadd.f32 %v2251_v60, %v7768_v32 }
 0x496   : > { %11270 = vst [vmem:[#allocation120_spill] sm:$0xff] %v8440_v0  ;;  %v11497_v0 = vld [vmem:[#allocation98_spill] sm:$0xff] }
 0x497   : > { %3012 = vmatmul.bf16.gmra.mxu1 %v11066_v50 }
 0x498   : > { %6530 = vmatmul.msk.bf16.gmra.mxu3 %vm1130_vm0, %v11067_v53 }
 0x49a   : > { %v2764_v45 = vpop.f32.mrf.mxu2 }
 0x49b   : > { %v2423_v39 = vpop.f32.mrf.mxu3  ;;  %v8451_v28 = vadd.f32 %v2764_v45, %v2593_v54  ;;  %v2595_v49 = vpop.f32.mrf.mxu0 }
 0x49c   : > { %v8449_v27 = vadd.f32 %v2423_v39, %v2252_v16  ;;  %v2253_v12 = vpop.f32.mrf.mxu1  ;;  %v2596_v36 = vadd.f32 %v2595_v49, %v7773_v11 }
 0x49d   : > { %11273 = vst [vmem:[#allocation124_spill] sm:$0xff] %v8451_v28  ;;  %v2254_v7 = vadd.f32 %v2253_v12, %v7775_v29 }
 0x49e   : > { %11272 = vst [vmem:[#allocation123_spill] sm:$0xff] %v8449_v27  ;;  %3356 = vmatmul.bf16.gmra.mxu0 %v11066_v50 }
 0x49f   : > { %6563 = vmatmul.msk.bf16.gmra.mxu2 %vm1130_vm0, %v11067_v53 }
 0x4a2   : > { %v2767_v32 = vpop.f32.mrf.mxu2 }
 0x4a3   : > { %v2425_v43 = vpop.f32.mrf.mxu3  ;;  %v8460_v2 = vadd.f32 %v2767_v32, %v2596_v36  ;;  %v2597_v52 = vpop.f32.mrf.mxu0 }
 0x4a4   : > { %v8458_v33 = vadd.f32 %v2425_v43, %v2254_v7  ;;  %v2256_v24 = vpop.f32.mrf.mxu1  ;;  %v2598_v18 = vadd.f32 %v2597_v52, %v11276_v41 }
 0x4a5   : > { %11275 = vst [vmem:[#allocation96_spill] sm:$0xff] %v8460_v2  ;;  %v2257_v35 = vadd.f32 %v2256_v24, %v11277_v5 }
 0x4a6   : > { %11274 = vst [vmem:[#allocation100_spill] sm:$0xff] %v8458_v33 }
 0x4a7   : > { %3017 = vmatmul.bf16.gmra.mxu1 %v11076_v6 }
 0x4a8   : > { %6531 = vmatmul.msk.bf16.gmra.mxu3 %vm1130_vm0, %v11077_v30 }
 0x4aa   : > { %v2769_v11 = vpop.f32.mrf.mxu2 }
 0x4ab   : > { %v2428_v29 = vpop.f32.mrf.mxu3  ;;  %v8469_v53 = vadd.f32 %v2769_v11, %v2598_v18  ;;  %v2600_v59 = vpop.f32.mrf.mxu0 }
 0x4ac   : > { %v8467_v50 = vadd.f32 %v2428_v29, %v2257_v35  ;;  %v2258_v60 = vpop.f32.mrf.mxu1  ;;  %v2601_v54 = vadd.f32 %v2600_v59, %v7799_v1 }
 0x4ad   : > { %11279 = vst [vmem:[#allocation127_spill] sm:$0xff] %v8469_v53  ;;  %v2259_v16 = vadd.f32 %v2258_v60, %v7801_v15 }
 0x4ae   : > { %11278 = vst [vmem:[#allocation126_spill] sm:$0xff] %v8467_v50  ;;  %3361 = vmatmul.bf16.gmra.mxu0 %v11076_v6 }
 0x4af   : > { %6564 = vmatmul.msk.bf16.gmra.mxu2 %vm1130_vm0, %v11077_v30 }
 0x4b2   : > { %v2772_v45 = vpop.f32.mrf.mxu2 }
 0x4b3   : > { %v2430_v39 = vpop.f32.mrf.mxu3  ;;  %v8478_v12 = vadd.f32 %v2772_v45, %v2601_v54  ;;  %v2602_v36 = vpop.f32.mrf.mxu0 }
 0x4b4   : > { %v8476_v49 = vadd.f32 %v2430_v39, %v2259_v16  ;;  %v2261_v7 = vpop.f32.mrf.mxu1  ;;  %v2603_v43 = vadd.f32 %v2602_v36, %v7806_v51 }
 0x4b5   : > { %11281 = vst [vmem:[#allocation129_spill] sm:$0xff] %v8478_v12 }
 0x4b6   : > { %11280 = vst [vmem:[#allocation128_spill] sm:$0xff] %v8476_v49 }
 0x4b7   : > { %3022 = vmatmul.bf16.gmra.mxu1 %v11086_v23 }
 0x4b8   : > { %6532 = vmatmul.msk.bf16.gmra.mxu3 %vm1130_vm0, %v11087_v42 }
 0x4ba   : > { %v2774_v15 = vpop.f32.mrf.mxu2 }
 0x4bb   : > { %v2433_v1 = vpop.f32.mrf.mxu3  ;;  %v8484_v6 = vadd.f32 %v2774_v15, %v2603_v43  ;;  %v2605_v30 = vpop.f32.mrf.mxu0 }
 0x4bc   : > { %v2262_v32 = vpop.f32.mrf.mxu1 }
 0x4bd   : > { %11282 = vst [vmem:[#allocation130_spill] sm:$0xff] %v8484_v6  ;;  %v11469_v6 = vld [vmem:[#allocation119_spill] sm:$0xff] }
 0x4be   : > { %3366 = vmatmul.bf16.gmra.mxu0 %v11086_v23 }
 0x4bf   : > { %6565 = vmatmul.msk.bf16.gmra.mxu2 %vm1130_vm0, %v11087_v42 }
 0x4c2   : > { %v2777_v24 = vpop.f32.mrf.mxu2 }
 0x4c3   : > { %v2434_v52 = vpop.f32.mrf.mxu3  ;;  %v2606_v41 = vpop.f32.mrf.mxu0 }
 0x4c4   : > { %v2988_v51 = vpop.f32.mrf.mxu1 }
 0x4c7   : > { %3027 = vmatmul.bf16.gmra.mxu1 %v11096_v17 }
 0x4c8   : > { %6533 = vmatmul.msk.bf16.gmra.mxu3 %vm1130_vm0, %v11097_v47 }
 0x4ca   : > { %v2778_v5 = vpop.f32.mrf.mxu2 }
 0x4cb   : > { %v3160_v18 = vpop.f32.mrf.mxu3  ;;  %v3332_v35 = vpop.f32.mrf.mxu0 }
 0x4cc   : > { %v2990_v29 = vpop.f32.mrf.mxu1  ;;  %v3161_v11 = vadd.f32 %v3160_v18, %v2988_v51 }
 0x4ce   : > { %3371 = vmatmul.bf16.gmra.mxu0 %v11096_v17  ;;  %v8496_v23 = vadd.f32 %v3161_v11, %v7827_v19 }
 0x4cf   : > { %6566 = vmatmul.msk.bf16.gmra.mxu2 %vm1130_vm0, %v11097_v47 }
 0x4d0   : > { %11283 = vst [vmem:[#allocation131_spill] sm:$0xff] %v8496_v23  ;;  %v4269_v45 = vrot.slane %v8496_v23, 2  ;;  %v3860_v17 = vrot.slane %v8496_v23, 1 }
 0x4d2   : > { %v3504_v59 = vpop.f32.mrf.mxu2 }
 0x4d3   : > { %v3162_v42 = vpop.f32.mrf.mxu3  ;;  %v3334_v54 = vpop.f32.mrf.mxu0  ;;  %v3505_v47 = vadd.f32 %v3504_v59, %v3332_v35 }
 0x4d4   : > { %v3163_v60 = vadd.f32 %v3162_v42, %v2990_v29  ;;  %v2993_v16 = vpop.f32.mrf.mxu1 }
 0x4d5   : > { %v3668_v30 = vadd.f32 %v3505_v47, %v7836_v55 }
 0x4d6   : > { %v8499_v39 = vadd.f32 %v3163_v60, %v7834_v44 }
 0x4d7   : > { %3032 = vmatmul.bf16.gmra.mxu1 %v11106_v9  ;;  %v4272_v18 = vrot.slane %v3668_v30, 2 }
 0x4d8   : > { %11284 = vst [vmem:[#allocation132_spill] sm:$0xff] %v8499_v39  ;;  %6534 = vmatmul.msk.bf16.gmra.mxu3 %vm1130_vm0, %v11107_v3  ;;  %v4270_v19 = vrot.slane %v8499_v39, 2  ;;  %v3861_v36 = vrot.slane %v8499_v39, 1 }
 0x4da   : > { %v4271_v7 = vsel %vm4268_vm1, %v4269_v45, %v4270_v19  ;;  %v3862_v44 = vsel %vm3859_vm2, %v3860_v17, %v3861_v36  ;;  %v3506_v1 = vpop.f32.mrf.mxu2  ;;  %v11290_v17 = vld [vmem:[#allocation13_spill] sm:$0xff] }
 0x4db   : > { %v3165_v43 = vpop.f32.mrf.mxu3  ;;  %4509 = vrot.lane.b32.xlu2 %v4271_v7, %s6724_s25  ;;  %3980 = vrot.lane.b32.xlu0 %v3862_v44, %s6725_s27  ;;  %v3507_v32 = vadd.f32 %v3506_v1, %v3334_v54  ;;  %v3337_v52 = vpop.f32.mrf.mxu0 }
 0x4dc   : > { %v3166_v15 = vadd.f32 %v3165_v43, %v2993_v16  ;;  %v2995_v24 = vpop.f32.mrf.mxu1  ;;  %v11286_v16 = vld [vmem:[#allocation139_spill] sm:$0xff] }
 0x4dd   : > { %v3670_v51 = vadd.f32 %v3507_v32, %v7845_v46 }
 0x4de   : > { %v8514_v41 = vadd.f32 %v3166_v15, %v7843_v10  ;;  %3376 = vmatmul.bf16.gmra.mxu0 %v11106_v9 }
 0x4df   : > { %v4273_v5 = vrot.slane %v3670_v51, 2  ;;  %6567 = vmatmul.msk.bf16.gmra.mxu2 %vm1130_vm0, %v11107_v3  ;;  %v11288_v3 = vld [vmem:[#allocation140_spill] sm:$0xff]  ;;  %v11291_v51 = vld [vmem:[#allocation141_spill] sm:$0xff] }
 0x4e0   : > { %11285 = vst [vmem:[#allocation133_spill] sm:$0xff] %v8514_v41  ;;  %v4275_v35 = vrot.slane %v8514_v41, 2  ;;  %v3863_v29 = vrot.slane %v8514_v41, 1 }
 0x4e1   : > { %v4274_v10 = vsel %vm4268_vm1, %v4272_v18, %v4273_v5 }
 0x4e2   : > { %v4276_v55 = vsel %vm4268_vm1, %v4270_v19, %v4275_v35  ;;  %v3864_v11 = vsel %vm3859_vm2, %v3861_v36, %v3863_v29  ;;  %v3509_v46 = vpop.f32.mrf.mxu2  ;;  %v11289_v19 = vld [vmem:[#allocation16_spill] sm:$0xff] }
 0x4e3   : > { %v3167_v42 = vpop.f32.mrf.mxu3  ;;  %4513 = vrot.lane.b32.xlu1 %v4276_v55, %s6724_s25  ;;  %3982 = vrot.lane.b32.xlu0 %v3864_v11, %s6725_s27  ;;  %v3510_v59 = vadd.f32 %v3509_v46, %v3337_v52  ;;  %v3339_v60 = vpop.f32.mrf.mxu0  ;;  %v11293_v55 = vld [vmem:[#allocation142_spill] sm:$0xff] }
 0x4e4   : > { %v3168_v9 = vadd.f32 %v3167_v42, %v2995_v24  ;;  %v2998_v54 = vpop.f32.mrf.mxu1 }
 0x4e5   : > { %v3672_v47 = vadd.f32 %v3510_v59, %v11288_v3 }
 0x4e6   : > { %v8528_v45 = vadd.f32 %v3168_v9, %v11286_v16 }
 0x4e7   : > { %3037 = vmatmul.bf16.gmra.mxu1 %v11289_v19  ;;  %v4277_v36 = vrot.slane %v3672_v47, 2 }
 0x4e8   : > { %11287 = vst [vmem:[#allocation134_spill] sm:$0xff] %v8528_v45  ;;  %6535 = vmatmul.msk.bf16.gmra.mxu3 %vm1130_vm0, %v11290_v17  ;;  %v3865_v7 = vrot.slane %v8528_v45, 1 }
 0x4e9   : > { %v4278_v43 = vsel %vm4268_vm1, %v4273_v5, %v4277_v36 }
 0x4ea   : > { %v3866_v44 = vsel %vm3859_vm2, %v3863_v29, %v3865_v7  ;;  %v3511_v15 = vpop.f32.mrf.mxu2  ;;  %4515 = vrot.lane.b32.xlu2 %v4278_v43, %s6724_s25  ;;  %v4279_v29 = vrot.slane %v8528_v45, 2  ;;  %v11352_v45 = vld [vmem:[#allocation27_spill] sm:$0xff] }
 0x4eb   : > { %v3170_v1 = vpop.f32.mrf.mxu3  ;;  %3984 = vrot.lane.b32.xlu1 %v3866_v44, %s6725_s27  ;;  %4511 = vrot.lane.b32.xlu0 %v4274_v10, %s6724_s25  ;;  %v3512_v32 = vadd.f32 %v3511_v15, %v3339_v60  ;;  %v3342_v52 = vpop.f32.mrf.mxu0  ;;  %v11294_v44 = vld [vmem:[#allocation143_spill] sm:$0xff] }
 0x4ec   : > { %v3171_v30 = vadd.f32 %v3170_v1, %v2998_v54  ;;  %v3000_v24 = vpop.f32.mrf.mxu1  ;;  %v4280_v9 = vsel %vm4268_vm1, %v4275_v35, %v4279_v29  ;;  %v11296_v35 = vld [vmem:[#allocation144_spill] sm:$0xff]  ;;  %v11298_v1 = vld [vmem:[#allocation19_spill] sm:$0xff] }
 0x4ed   : > { %v3674_v11 = vadd.f32 %v3512_v32, %v11293_v55 }
 0x4ee   : > { %v8541_v18 = vadd.f32 %v3171_v30, %v11291_v51  ;;  %3381 = vmatmul.bf16.gmra.mxu0 %v11289_v19 }
 0x4ef   : > { %v4281_v5 = vrot.slane %v3674_v11, 2  ;;  %6568 = vmatmul.msk.bf16.gmra.mxu2 %vm1130_vm0, %v11290_v17 }
 0x4f0   : > { %11292 = vst [vmem:[#allocation135_spill] sm:$0xff] %v8541_v18  ;;  %v3867_v42 = vrot.slane %v8541_v18, 1  ;;  %v4283_v10 = vrot.slane %v8541_v18, 2 }
 0x4f1   : > { %v4282_v59 = vsel %vm4268_vm1, %v4277_v36, %v4281_v5  ;;  %v11297_v36 = vld [vmem:[#allocation22_spill] sm:$0xff] }
 0x4f2   : > { %v3868_v46 = vsel %vm3859_vm2, %v3865_v7, %v3867_v42  ;;  %v3514_v54 = vpop.f32.mrf.mxu2  ;;  %v4284_v16 = vsel %vm4268_vm1, %v4279_v29, %v4283_v10 }
 0x4f3   : > { %v3172_v60 = vpop.f32.mrf.mxu3  ;;  %3986 = vrot.lane.b32.xlu1 %v3868_v46, %s6725_s27  ;;  %4517 = vrot.lane.b32.xlu0 %v4280_v9, %s6724_s25  ;;  %v3515_v47 = vadd.f32 %v3514_v54, %v3342_v52  ;;  %v3344_v19 = vpop.f32.mrf.mxu0  ;;  %v11299_v9 = vld [vmem:[#allocation145_spill] sm:$0xff]  ;;  %v11301_v54 = vld [vmem:[#allocation146_spill] sm:$0xff] }
 0x4f4   : > { %v3173_v3 = vadd.f32 %v3172_v60, %v3000_v24  ;;  %4521 = vrot.lane.b32.xlu2 %v4284_v16, %s6724_s25  ;;  %v3003_v17 = vpop.f32.mrf.mxu1 }
 0x4f5   : > { %v3676_v43 = vadd.f32 %v3515_v47, %v11296_v35 }
 0x4f6   : > { %v8558_v7 = vadd.f32 %v3173_v3, %v11294_v44 }
 0x4f7   : > { %3042 = vmatmul.bf16.gmra.mxu1 %v11297_v36  ;;  %v4285_v15 = vrot.slane %v3676_v43, 2 }
 0x4f8   : > { %11295 = vst [vmem:[#allocation136_spill] sm:$0xff] %v8558_v7  ;;  %6536 = vmatmul.msk.bf16.gmra.mxu3 %vm1130_vm0, %v11298_v1  ;;  %v3869_v30 = vrot.slane %v8558_v7, 1 }
 0x4f9   : > { %v4286_v32 = vsel %vm4268_vm1, %v4281_v5, %v4285_v15  ;;  %v4287_v5 = vrot.slane %v8558_v7, 2 }
 0x4fa   : > { %v3516_v24 = vpop.f32.mrf.mxu2  ;;  %v3870_v51 = vsel %vm3859_vm2, %v3867_v42, %v3869_v30 }
 0x4fb   : > { %v3175_v52 = vpop.f32.mrf.mxu3  ;;  %4519 = vrot.lane.b32.xlu1 %v4282_v59, %s6724_s25  ;;  %4523 = vrot.lane.b32.xlu0 %v4286_v32, %s6724_s25  ;;  %v3517_v11 = vadd.f32 %v3516_v24, %v3344_v19  ;;  %v3347_v29 = vpop.f32.mrf.mxu0  ;;  %v4288_v47 = vsel %vm4268_vm1, %v4283_v10, %v4287_v5  ;;  %v11302_v24 = vld [vmem:[#allocation147_spill] sm:$0xff] }
 0x4fc   : > { %v3176_v55 = vadd.f32 %v3175_v52, %v3003_v17  ;;  %3988 = vrot.lane.b32.xlu2 %v3870_v51, %s6725_s27  ;;  %v3005_v46 = vpop.f32.mrf.mxu1  ;;  %v11303_v51 = vld [vmem:[#allocation148_spill] sm:$0xff] }
 0x4fd   : > { %v3678_v16 = vadd.f32 %v3517_v11, %v11301_v54 }
 0x4fe   : > { %v8571_v60 = vadd.f32 %v3176_v55, %v11299_v9  ;;  %3386 = vmatmul.bf16.gmra.mxu0 %v11297_v36  ;;  %v11305_v9 = vld [vmem:[#allocation25_spill] sm:$0xff] }
 0x4ff   : > { %v4289_v59 = vrot.slane %v3678_v16, 2  ;;  %6569 = vmatmul.msk.bf16.gmra.mxu2 %vm1130_vm0, %v11298_v1 }
 0x500   : > { %11300 = vst [vmem:[#allocation137_spill] sm:$0xff] %v8571_v60  ;;  %v3871_v42 = vrot.slane %v8571_v60, 1  ;;  %v4291_v3 = vrot.slane %v8571_v60, 2  ;;  %v11344_v60 = vld [vmem:[#allocation6_spill] sm:$0xff] }
 0x501   : > { %v4290_v17 = vsel %vm4268_vm1, %v4285_v15, %v4289_v59  ;;  %v11304_v15 = vld [vmem:[#allocation28_spill] sm:$0xff] }
 0x502   : > { %v4292_v19 = vsel %vm4268_vm1, %v4287_v5, %v4291_v3  ;;  %v3519_v35 = vpop.f32.mrf.mxu2  ;;  %v3872_v43 = vsel %vm3859_vm2, %v3869_v30, %v3871_v42 }
 0x503   : > { %v3177_v44 = vpop.f32.mrf.mxu3  ;;  %4525 = vrot.lane.b32.xlu1 %v4288_v47, %s6724_s25  ;;  %4529 = vrot.lane.b32.xlu0 %v4292_v19, %s6724_s25  ;;  %v3520_v1 = vadd.f32 %v3519_v35, %v3347_v29  ;;  %v3349_v32 = vpop.f32.mrf.mxu0 }
 0x504   : > { %v3178_v36 = vadd.f32 %v3177_v44, %v3005_v46  ;;  %3990 = vrot.lane.b32.xlu2 %v3872_v43, %s6725_s27  ;;  %v3008_v52 = vpop.f32.mrf.mxu1  ;;  %v11306_v44 = vld [vmem:[#allocation150_spill] sm:$0xff] }
 0x505   : > { %v3680_v55 = vadd.f32 %v3520_v1, %v11303_v51 }
 0x506   : > { %v3681_v10 = vadd.f32 %v3178_v36, %v11302_v24 }
 0x507   : > { %3047 = vmatmul.bf16.gmra.mxu1 %v11304_v15  ;;  %v4293_v54 = vrot.slane %v3680_v55, 2 }
 0x508   : > { %v3873_v11 = vrot.slane %v3681_v10, 1  ;;  %6537 = vmatmul.msk.bf16.gmra.mxu3 %vm1130_vm0, %v11305_v9  ;;  %v4295_v43 = vrot.slane %v3681_v10, 2 }
 0x509   : > { %v4294_v30 = vsel %vm4268_vm1, %v4289_v59, %v4293_v54 }
 0x50a   : > { %v3874_v46 = vsel %vm3859_vm2, %v3871_v42, %v3873_v11  ;;  %v3521_v16 = vpop.f32.mrf.mxu2  ;;  %v11309_v11 = vld [vmem:[#allocation151_spill] sm:$0xff] }
 0x50b   : > { %v3180_v29 = vpop.f32.mrf.mxu3  ;;  %4531 = vrot.lane.b32.xlu1 %v4294_v30, %s6724_s25  ;;  %3992 = vrot.lane.b32.xlu0 %v3874_v46, %s6725_s27  ;;  %v3522_v5 = vadd.f32 %v3521_v16, %v3349_v32  ;;  %v3352_v47 = vpop.f32.mrf.mxu0  ;;  %v4296_v32 = vsel %vm4268_vm1, %v4291_v3, %v4295_v43 }
 0x50c   : > { %4527 = vrot.lane.b32.xlu2 %v4290_v17, %s6724_s25  ;;  %v3010_v19 = vpop.f32.mrf.mxu1  ;;  %v3181_v36 = vadd.f32 %v3180_v29, %v3008_v52  ;;  %v11307_v17 = vld [vmem:[#allocation149_spill] sm:$0xff] }
 0x50d   : > { %v3682_v35 = vadd.f32 %v3522_v5, %v11306_v44  ;;  %v11313_v44 = vld [vmem:[#allocation152_spill] sm:$0xff] }
 0x50e   : > { %3391 = vmatmul.bf16.gmra.mxu0 %v11304_v15  ;;  %v8605_v51 = vadd.f32 %v3181_v36, %v11307_v17 }
 0x50f   : > { %v4297_v59 = vrot.slane %v3682_v35, 2  ;;  %6570 = vmatmul.msk.bf16.gmra.mxu2 %vm1130_vm0, %v11305_v9  ;;  %v11311_v9 = vld [vmem:[#allocation34_spill] sm:$0xff] }
 0x510   : > { %11308 = vst [vmem:[#allocation138_spill] sm:$0xff] %v8605_v51  ;;  %v3875_v3 = vrot.slane %v8605_v51, 1  ;;  %v4299_v17 = vrot.slane %v8605_v51, 2 }
 0x511   : > { %v4298_v42 = vsel %vm4268_vm1, %v4293_v54, %v4297_v59  ;;  %v11312_v54 = vld [vmem:[#allocation31_spill] sm:$0xff] }
 0x512   : > { %v3524_v24 = vpop.f32.mrf.mxu2 }
 0x513   : > { %v3182_v1 = vpop.f32.mrf.mxu3  ;;  %4535 = vrot.lane.b32.xlu0 %v4298_v42, %s6724_s25  ;;  %v3354_v10 = vpop.f32.mrf.mxu0  ;;  %v3525_v30 = vadd.f32 %v3524_v24, %v3352_v47  ;;  %v11314_v42 = vld [vmem:[#allocation12_spill] sm:$0xff]  ;;  %v11316_v47 = vld [vmem:[#allocation3_spill] sm:$0xff] }
 0x514   : > { %v3183_v55 = vadd.f32 %v3182_v1, %v3010_v19  ;;  %4533 = vrot.lane.b32.xlu2 %v4296_v32, %s6724_s25  ;;  %v3013_v52 = vpop.f32.mrf.mxu1 }
 0x515   : > { %v3684_v35 = vadd.f32 %v3525_v30, %v11313_v44 }
 0x516   : > { %v8609_v15 = vadd.f32 %v3183_v55, %v11309_v11 }
 0x517   : > { %3052 = vmatmul.bf16.gmra.mxu1 %v11311_v9  ;;  %v4302_v55 = vrot.slane %v3684_v35, 2 }
 0x518   : > { %11310 = vst [vmem:[#allocation139_spill] sm:$0xff] %v8609_v15  ;;  %6538 = vmatmul.msk.bf16.gmra.mxu3 %vm1130_vm0, %v11312_v54  ;;  %v3876_v46 = vrot.slane %v8609_v15, 1  ;;  %v4300_v32 = vrot.slane %v8609_v15, 2  ;;  %v11337_v15 = vld [vmem:[#allocation52_spill] sm:$0xff] }
 0x51a   : > { %v3877_v29 = vsel %vm3859_vm2, %v3875_v3, %v3876_v46  ;;  %v3526_v5 = vpop.f32.mrf.mxu2 }
 0x51b   : > { %v3185_v16 = vpop.f32.mrf.mxu3  ;;  %3994 = vrot.lane.b32.xlu1 %v3877_v29, %s6725_s27  ;;  %v3527_v43 = vadd.f32 %v3526_v5, %v3354_v10  ;;  %v3357_v36 = vpop.f32.mrf.mxu0  ;;  %v4301_v10 = vsel %vm4268_vm1, %v4299_v17, %v4300_v32 }
 0x51c   : > { %v3186_v19 = vadd.f32 %v3185_v16, %v3013_v52  ;;  %v3015_v59 = vpop.f32.mrf.mxu1 }
 0x51d   : > { %v3686_v24 = vadd.f32 %v3527_v43, %v11316_v47  ;;  %v11317_v43 = vld [vmem:[#allocation2_spill] sm:$0xff] }
 0x51e   : > { %v8620_v1 = vadd.f32 %v3186_v19, %v11314_v42  ;;  %3396 = vmatmul.bf16.gmra.mxu0 %v11311_v9 }
 0x51f   : > { %v4303_v11 = vrot.slane %v3686_v24, 2  ;;  %6571 = vmatmul.msk.bf16.gmra.mxu2 %vm1130_vm0, %v11312_v54  ;;  %v11320_v24 = vld [vmem:[#allocation40_spill] sm:$0xff] }
 0x520   : > { %11315 = vst [vmem:[#allocation140_spill] sm:$0xff] %v8620_v1  ;;  %v3878_v52 = vrot.slane %v8620_v1, 1  ;;  %v4305_v30 = vrot.slane %v8620_v1, 2 }
 0x521   : > { %v4304_v16 = vsel %vm4268_vm1, %v4302_v55, %v4303_v11 }
 0x522   : > { %v3879_v3 = vsel %vm3859_vm2, %v3876_v46, %v3878_v52  ;;  %v4306_v29 = vsel %vm4268_vm1, %v4300_v32, %v4305_v30  ;;  %v3529_v5 = vpop.f32.mrf.mxu2  ;;  %v11319_v46 = vld [vmem:[#allocation14_spill] sm:$0xff]  ;;  %v11321_v32 = vld [vmem:[#allocation37_spill] sm:$0xff] }
 0x523   : > { %v3187_v9 = vpop.f32.mrf.mxu3  ;;  %4537 = vrot.lane.b32.xlu1 %v4301_v10, %s6724_s25  ;;  %3996 = vrot.lane.b32.xlu2 %v3879_v3, %s6725_s27  ;;  %v3530_v44 = vadd.f32 %v3529_v5, %v3357_v36  ;;  %v3359_v35 = vpop.f32.mrf.mxu0 }
 0x524   : > { %v3188_v19 = vadd.f32 %v3187_v9, %v3015_v59  ;;  %4541 = vrot.lane.b32.xlu0 %v4306_v29, %s6724_s25  ;;  %v3018_v54 = vpop.f32.mrf.mxu1 }
 0x525   : > { %v3688_v47 = vadd.f32 %v3530_v44, %v11319_v46  ;;  %v11322_v44 = vld [vmem:[#allocation15_spill] sm:$0xff]  ;;  %v11324_v46 = vld [vmem:[#allocation17_spill] sm:$0xff] }
 0x526   : > { %v8638_v42 = vadd.f32 %v3188_v19, %v11317_v43 }
 0x527   : > { %3057 = vmatmul.bf16.gmra.mxu1 %v11320_v24  ;;  %v4307_v17 = vrot.slane %v3688_v47, 2 }
 0x528   : > { %11318 = vst [vmem:[#allocation16_spill] sm:$0xff] %v8638_v42  ;;  %6539 = vmatmul.msk.bf16.gmra.mxu3 %vm1130_vm0, %v11321_v32  ;;  %v3880_v55 = vrot.slane %v8638_v42, 1  ;;  %v4309_v1 = vrot.slane %v8638_v42, 2  ;;  %v11331_v42 = vld [vmem:[#allocation4_spill] sm:$0xff] }
 0x529   : > { %v4308_v10 = vsel %vm4268_vm1, %v4303_v11, %v4307_v17 }
 0x52a   : > { %v3881_v59 = vsel %vm3859_vm2, %v3878_v52, %v3880_v55  ;;  %v3531_v3 = vpop.f32.mrf.mxu2 }
 0x52b   : > { %v3190_v36 = vpop.f32.mrf.mxu3  ;;  %4539 = vrot.lane.b32.xlu2 %v4304_v16, %s6724_s25  ;;  %v3532_v9 = vadd.f32 %v3531_v3, %v3359_v35  ;;  %v3362_v5 = vpop.f32.mrf.mxu0  ;;  %v4310_v35 = vsel %vm4268_vm1, %v4305_v30, %v4309_v1  ;;  %v11328_v30 = vld [vmem:[#allocation46_spill] sm:$0xff] }
 0x52c   : > { %v3191_v29 = vadd.f32 %v3190_v36, %v3018_v54  ;;  %3998 = vrot.lane.b32.xlu0 %v3881_v59, %s6725_s27  ;;  %v3020_v19 = vpop.f32.mrf.mxu1 }
 0x52d   : > { %v3690_v47 = vadd.f32 %v3532_v9, %v11324_v46 }
 0x52e   : > { %v8650_v43 = vadd.f32 %v3191_v29, %v11322_v44  ;;  %3401 = vmatmul.bf16.gmra.mxu0 %v11320_v24  ;;  %v11325_v44 = vld [vmem:[#allocation18_spill] sm:$0xff] }
 0x52f   : > { %v4311_v11 = vrot.slane %v3690_v47, 2  ;;  %6572 = vmatmul.msk.bf16.gmra.mxu2 %vm1130_vm0, %v11321_v32 }
 0x530   : > { %11323 = vst [vmem:[#allocation13_spill] sm:$0xff] %v8650_v43  ;;  %v3882_v52 = vrot.slane %v8650_v43, 1 }
 0x531   : > { %v4312_v54 = vsel %vm4268_vm1, %v4307_v17, %v4311_v11  ;;  %v11329_v17 = vld [vmem:[#allocation43_spill] sm:$0xff] }
 0x532   : > { %v3883_v16 = vsel %vm3859_vm2, %v3880_v55, %v3882_v52  ;;  %v3534_v36 = vpop.f32.mrf.mxu2  ;;  %v11327_v55 = vld [vmem:[#allocation5_spill] sm:$0xff] }
 0x533   : > { %v3192_v59 = vpop.f32.mrf.mxu3  ;;  %4000 = vrot.lane.b32.xlu1 %v3883_v16, %s6725_s27  ;;  %4545 = vrot.lane.b32.xlu2 %v4310_v35, %s6724_s25  ;;  %v3535_v24 = vadd.f32 %v3534_v36, %v3362_v5  ;;  %v3364_v29 = vpop.f32.mrf.mxu0  ;;  %v4313_v5 = vrot.slane %v8650_v43, 2 }
 0x534   : > { %v3193_v3 = vadd.f32 %v3192_v59, %v3020_v19  ;;  %4547 = vrot.lane.b32.xlu0 %v4312_v54, %s6724_s25  ;;  %v3023_v9 = vpop.f32.mrf.mxu1 }
 0x535   : > { %v3692_v46 = vadd.f32 %v3535_v24, %v11327_v55 }
 0x536   : > { %v8665_v32 = vadd.f32 %v3193_v3, %v11325_v44 }
 0x537   : > { %3062 = vmatmul.bf16.gmra.mxu1 %v11328_v30  ;;  %v4315_v47 = vrot.slane %v3692_v46, 2 }
 0x538   : > { %11326 = vst [vmem:[#allocation141_spill] sm:$0xff] %v8665_v32  ;;  %6540 = vmatmul.msk.bf16.gmra.mxu3 %vm1130_vm0, %v11329_v17  ;;  %v3884_v16 = vrot.slane %v8665_v32, 1  ;;  %v4317_v19 = vrot.slane %v8665_v32, 2  ;;  %v8680_v32 = vpop.permute.xlu2 %4509 }
 0x539   : > { %v4316_v54 = vsel %vm4268_vm1, %v4311_v11, %v4315_v47  ;;  %11330 = vst [vmem:[#allocation142_spill] sm:$0xff] %v8680_v32  ;;  %v11333_v11 = vld [vmem:[#allocation20_spill] sm:$0xff]  ;;  %v11435_v32 = vld [vmem:[#allocation101_spill] sm:$0xff] }
 0x53a   : > { %v3885_v35 = vsel %vm3859_vm2, %v3882_v52, %v3884_v16  ;;  %v3536_v36 = vpop.f32.mrf.mxu2  ;;  %v4318_v3 = vsel %vm4268_vm1, %v4313_v5, %v4317_v19 }
 0x53b   : > { %v3195_v59 = vpop.f32.mrf.mxu3  ;;  %4543 = vrot.lane.b32.xlu1 %v4308_v10, %s6724_s25  ;;  %4002 = vrot.lane.b32.xlu2 %v3885_v35, %s6725_s27  ;;  %v3537_v44 = vadd.f32 %v3536_v36, %v3364_v29  ;;  %v3367_v55 = vpop.f32.mrf.mxu0  ;;  %v4314_v29 = vsel %vm4268_vm1, %v4309_v1, %v4313_v5 }
 0x53c   : > { %v3196_v24 = vadd.f32 %v3195_v59, %v3023_v9  ;;  %4553 = vrot.lane.b32.xlu0 %v4318_v3, %s6724_s25  ;;  %v3025_v46 = vpop.f32.mrf.mxu1 }
 0x53d   : > { %v3694_v43 = vadd.f32 %v3537_v44, %v11333_v11  ;;  %v11335_v11 = vld [vmem:[#allocation23_spill] sm:$0xff] }
 0x53e   : > { %v8683_v52 = vadd.f32 %v3196_v24, %v11331_v42  ;;  %3406 = vmatmul.bf16.gmra.mxu0 %v11328_v30  ;;  %v11334_v24 = vld [vmem:[#allocation21_spill] sm:$0xff] }
 0x53f   : > { %v4319_v10 = vrot.slane %v3694_v43, 2  ;;  %6573 = vmatmul.msk.bf16.gmra.mxu2 %vm1130_vm0, %v11329_v17 }
 0x540   : > { %11332 = vst [vmem:[#allocation143_spill] sm:$0xff] %v8683_v52  ;;  %v3886_v9 = vrot.slane %v8683_v52, 1 }
 0x541   : > { %v4320_v35 = vsel %vm4268_vm1, %v4315_v47, %v4319_v10  ;;  %v4321_v47 = vrot.slane %v8683_v52, 2 }
 0x542   : > { %v3539_v42 = vpop.f32.mrf.mxu2  ;;  %v3887_v36 = vsel %vm3859_vm2, %v3884_v16, %v3886_v9 }
 0x543   : > { %v3197_v59 = vpop.f32.mrf.mxu3  ;;  %4549 = vrot.lane.b32.xlu1 %v4314_v29, %s6724_s25  ;;  %4551 = vrot.lane.b32.xlu2 %v4316_v54, %s6724_s25  ;;  %v3540_v30 = vadd.f32 %v3539_v42, %v3367_v55  ;;  %v3369_v43 = vpop.f32.mrf.mxu0  ;;  %v11338_v54 = vld [vmem:[#allocation49_spill] sm:$0xff] }
 0x544   : > { %v3198_v3 = vadd.f32 %v3197_v59, %v3025_v46  ;;  %4004 = vrot.lane.b32.xlu0 %v3887_v36, %s6725_s27  ;;  %v3028_v17 = vpop.f32.mrf.mxu1  ;;  %v8699_v5 = vpop.permute.xlu2 %4515  ;;  %v4322_v46 = vsel %vm4268_vm1, %v4317_v19, %v4321_v47 }
 0x545   : > { %v3696_v1 = vadd.f32 %v3540_v30, %v11335_v11  ;;  %11336 = vst [vmem:[#allocation144_spill] sm:$0xff] %v8699_v5 }
 0x546   : > { %v3697_v44 = vadd.f32 %v3198_v3, %v11334_v24 }
 0x547   : > { %3067 = vmatmul.bf16.gmra.mxu1 %v11337_v15  ;;  %v4323_v16 = vrot.slane %v3696_v1, 2  ;;  %v11340_v1 = vld [vmem:[#allocation7_spill] sm:$0xff] }
 0x548   : > { %v3888_v29 = vrot.slane %v3697_v44, 1  ;;  %6541 = vmatmul.msk.bf16.gmra.mxu3 %vm1130_vm0, %v11338_v54  ;;  %v4325_v51 = vrot.slane %v3697_v44, 2 }
 0x549   : > { %v4324_v59 = vsel %vm4268_vm1, %v4319_v10, %v4323_v16 }
 0x54a   : > { %v3889_v55 = vsel %vm3859_vm2, %v3886_v9, %v3888_v29  ;;  %v3541_v36 = vpop.f32.mrf.mxu2 }
 0x54b   : > { %v3200_v42 = vpop.f32.mrf.mxu3  ;;  %4006 = vrot.lane.b32.xlu1 %v3889_v55, %s6725_s27  ;;  %4557 = vrot.lane.b32.xlu2 %v4322_v46, %s6724_s25  ;;  %v3542_v3 = vadd.f32 %v3541_v36, %v3369_v43  ;;  %v3372_v30 = vpop.f32.mrf.mxu0  ;;  %v11342_v43 = vld [vmem:[#allocation24_spill] sm:$0xff] }
 0x54c   : > { %4559 = vrot.lane.b32.xlu0 %v4324_v59, %s6724_s25  ;;  %v3030_v24 = vpop.f32.mrf.mxu1  ;;  %v3201_v19 = vadd.f32 %v3200_v42, %v3028_v17  ;;  %v11349_v42 = vld [vmem:[#allocation58_spill] sm:$0xff] }
 0x54d   : > { %v8710_v11 = vpop.permute.xlu0 %3980  ;;  %v3698_v52 = vadd.f32 %v3542_v3, %v11340_v1 }
 0x54e   : > { %11339 = vst [vmem:[#allocation22_spill] sm:$0xff] %v8710_v11  ;;  %v8713_v9 = vpop.permute.xlu2 %4521  ;;  %3411 = vmatmul.bf16.gmra.mxu0 %v11337_v15  ;;  %v8720_v55 = vadd.f32 %v3201_v19, %v11342_v43  ;;  %v11350_v19 = vld [vmem:[#allocation55_spill] sm:$0xff] }
 0x54f   : > { %11341 = vst [vmem:[#allocation19_spill] sm:$0xff] %v8713_v9  ;;  %v4327_v10 = vrot.slane %v3698_v52, 2  ;;  %6574 = vmatmul.msk.bf16.gmra.mxu2 %vm1130_vm0, %v11338_v54 }
 0x550   : > { %11343 = vst [vmem:[#allocation145_spill] sm:$0xff] %v8720_v55  ;;  %v3890_v54 = vrot.slane %v8720_v55, 1  ;;  %v4329_v44 = vrot.slane %v8720_v55, 2 }
 0x551   : > { %v4328_v29 = vsel %vm4268_vm1, %v4323_v16, %v4327_v10  ;;  %v4326_v10 = vsel %vm4268_vm1, %v4321_v47, %v4325_v51 }
 0x552   : > { %v3544_v59 = vpop.f32.mrf.mxu2 }
 0x553   : > { %v3202_v46 = vpop.f32.mrf.mxu3  ;;  %4555 = vrot.lane.b32.xlu1 %v4320_v35, %s6724_s25  ;;  %v3374_v3 = vpop.f32.mrf.mxu0  ;;  %v3545_v35 = vadd.f32 %v3544_v59, %v3372_v30  ;;  %v11351_v30 = vld [vmem:[#allocation26_spill] sm:$0xff] }
 0x554   : > { %v3203_v36 = vadd.f32 %v3202_v46, %v3030_v24  ;;  %v3033_v1 = vpop.f32.mrf.mxu1 }
 0x555   : > { %v8726_v52 = vpop.permute.xlu0 %3982  ;;  %v8731_v16 = vpop.permute.xlu1 %4513  ;;  %v3700_v59 = vadd.f32 %v3545_v35, %v11351_v30  ;;  %v11358_v30 = vld [vmem:[#allocation30_spill] sm:$0xff] }
 0x556   : > { %v8724_v15 = vadd.f32 %v3203_v36, %v11344_v60  ;;  %11346 = vst [vmem:[#allocation147_spill] sm:$0xff] %v8726_v52  ;;  %v8728_v17 = vpop.permute.xlu2 %3988 }
 0x557   : > { %11347 = vst [vmem:[#allocation148_spill] sm:$0xff] %v8728_v17  ;;  %3072 = vmatmul.bf16.gmra.mxu1 %v11349_v42 }
 0x558   : > { %11345 = vst [vmem:[#allocation146_spill] sm:$0xff] %v8724_v15  ;;  %6542 = vmatmul.msk.bf16.gmra.mxu3 %vm1130_vm0, %v11350_v19  ;;  %v3891_v24 = vrot.slane %v8724_v15, 1  ;;  %v4330_v60 = vrot.slane %v8724_v15, 2 }
 0x559   : > { %11348 = vst [vmem:[#allocation28_spill] sm:$0xff] %v8731_v16 }
 0x55a   : > { %v3892_v43 = vsel %vm3859_vm2, %v3890_v54, %v3891_v24  ;;  %v4331_v46 = vsel %vm4268_vm1, %v4329_v44, %v4330_v60  ;;  %v3546_v7 = vpop.f32.mrf.mxu2  ;;  %v11355_v54 = vld [vmem:[#allocation29_spill] sm:$0xff] }
 0x55b   : > { %v3205_v36 = vpop.f32.mrf.mxu3  ;;  %4561 = vrot.lane.b32.xlu1 %v4326_v10, %s6724_s25  ;;  %4008 = vrot.lane.b32.xlu2 %v3892_v43, %s6725_s27  ;;  %v3547_v55 = vadd.f32 %v3546_v7, %v3374_v3  ;;  %v3377_v18 = vpop.f32.mrf.mxu0  ;;  %v4332_v10 = vrot.slane %v3700_v59, 2 }
 0x55c   : > { %v3206_v17 = vadd.f32 %v3205_v36, %v3033_v1  ;;  %4565 = vrot.lane.b32.xlu0 %v4331_v46, %s6724_s25  ;;  %v3035_v15 = vpop.f32.mrf.mxu1 }
 0x55d   : > { %v8749_v47 = vpop.permute.xlu0 %4511  ;;  %v3702_v44 = vadd.f32 %v3547_v55, %v11355_v54  ;;  %v8758_v7 = vpop.permute.xlu1 %3984  ;;  %v11361_v54 = vld [vmem:[#allocation9_spill] sm:$0xff] }
 0x55e   : > { %v8747_v51 = vadd.f32 %v3206_v17, %v11352_v45  ;;  %11354 = vst [vmem:[#allocation150_spill] sm:$0xff] %v8749_v47  ;;  %v8752_v9 = vpop.permute.xlu2 %3990  ;;  %3416 = vmatmul.bf16.gmra.mxu0 %v11349_v42 }
 0x55f   : > { %11356 = vst [vmem:[#allocation149_spill] sm:$0xff] %v8752_v9  ;;  %v4333_v1 = vrot.slane %v3702_v44, 2  ;;  %6575 = vmatmul.msk.bf16.gmra.mxu2 %vm1130_vm0, %v11350_v19  ;;  %v11363_v9 = vld [vmem:[#allocation61_spill] sm:$0xff] }
 0x560   : > { %11353 = vst [vmem:[#allocation25_spill] sm:$0xff] %v8747_v51  ;;  %v3893_v35 = vrot.slane %v8747_v51, 1 }
 0x561   : > { %11357 = vst [vmem:[#allocation151_spill] sm:$0xff] %v8758_v7  ;;  %v4334_v3 = vsel %vm4268_vm1, %v4332_v10, %v4333_v1  ;;  %v11362_v10 = vld [vmem:[#allocation64_spill] sm:$0xff] }
 0x562   : > { %v3894_v45 = vsel %vm3859_vm2, %v3891_v24, %v3893_v35  ;;  %v3549_v55 = vpop.f32.mrf.mxu2  ;;  %v4335_v24 = vrot.slane %v8747_v51, 2  ;;  %v11366_v7 = vld [vmem:[#allocation8_spill] sm:$0xff] }
 0x563   : > { %v3207_v17 = vpop.f32.mrf.mxu3  ;;  %4563 = vrot.lane.b32.xlu2 %v4328_v29, %s6724_s25  ;;  %v3550_v42 = vadd.f32 %v3549_v55, %v3377_v18  ;;  %v3379_v46 = vpop.f32.mrf.mxu0 }
 0x564   : > { %v3208_v43 = vadd.f32 %v3207_v17, %v3035_v15  ;;  %4010 = vrot.lane.b32.xlu0 %v3894_v45, %s6725_s27  ;;  %v3038_v36 = vpop.f32.mrf.mxu1  ;;  %v4336_v17 = vsel %vm4268_vm1, %v4330_v60, %v4335_v24  ;;  %v11368_v60 = vld [vmem:[#allocation32_spill] sm:$0xff] }
 0x565   : > { %v8767_v19 = vpop.permute.xlu0 %4517  ;;  %v3704_v44 = vadd.f32 %v3550_v42, %v11361_v54 }
 0x566   : > { %v8765_v59 = vadd.f32 %v3208_v43, %v11358_v30  ;;  %11360 = vst [vmem:[#allocation31_spill] sm:$0xff] %v8767_v19  ;;  %v8775_v18 = vpop.permute.xlu2 %4527  ;;  %v8782_v30 = vpop.permute.xlu1 %3986  ;;  %v11379_v19 = vld [vmem:[#allocation36_spill] sm:$0xff] }
 0x567   : > { %3077 = vmatmul.bf16.gmra.mxu1 %v11362_v10  ;;  %v4337_v29 = vrot.slane %v3704_v44, 2  ;;  %11364 = vst [vmem:[#allocation152_spill] sm:$0xff] %v8775_v18 }
 0x568   : > { %11359 = vst [vmem:[#allocation34_spill] sm:$0xff] %v8765_v59  ;;  %6543 = vmatmul.msk.bf16.gmra.mxu3 %vm1130_vm0, %v11363_v9  ;;  %v3895_v15 = vrot.slane %v8765_v59, 1 }
 0x569   : > { %v4338_v55 = vsel %vm4268_vm1, %v4333_v1, %v4337_v29  ;;  %11365 = vst [vmem:[#allocation12_spill] sm:$0xff] %v8782_v30  ;;  %v11375_v30 = vld [vmem:[#allocation69_spill] sm:$0xff] }
 0x56a   : > { %v3896_v45 = vsel %vm3859_vm2, %v3893_v35, %v3895_v15  ;;  %v3551_v42 = vpop.f32.mrf.mxu2 }
 0x56b   : > { %v3210_v43 = vpop.f32.mrf.mxu3  ;;  %4012 = vrot.lane.b32.xlu1 %v3896_v45, %s6725_s27  ;;  %4569 = vrot.lane.b32.xlu2 %v4336_v17, %s6724_s25  ;;  %v3552_v44 = vadd.f32 %v3551_v42, %v3379_v46  ;;  %v3382_v51 = vpop.f32.mrf.mxu0 }
 0x56c   : > { %v3211_v54 = vadd.f32 %v3210_v43, %v3038_v36  ;;  %4571 = vrot.lane.b32.xlu0 %v4338_v55, %s6724_s25  ;;  %v3040_v18 = vpop.f32.mrf.mxu1  ;;  %v4339_v36 = vrot.slane %v8765_v59, 2 }
 0x56d   : > { %v3706_v41 = vadd.f32 %v3552_v44, %v11368_v60  ;;  %v8789_v1 = vpop.permute.xlu0 %4523 }
 0x56e   : > { %v8786_v35 = vadd.f32 %v3211_v54, %v11366_v7  ;;  %11369 = vst [vmem:[#allocation2_spill] sm:$0xff] %v8789_v1  ;;  %3421 = vmatmul.bf16.gmra.mxu0 %v11362_v10  ;;  %v8798_v7 = vpop.permute.xlu2 %4533  ;;  %v8805_v59 = vpop.permute.xlu1 %4519 }
 0x56f   : > { %v4341_v45 = vrot.slane %v3706_v41, 2  ;;  %6576 = vmatmul.msk.bf16.gmra.mxu2 %vm1130_vm0, %v11363_v9  ;;  %11370 = vst [vmem:[#allocation14_spill] sm:$0xff] %v8798_v7 }
 0x570   : > { %11367 = vst [vmem:[#allocation3_spill] sm:$0xff] %v8786_v35  ;;  %v3897_v17 = vrot.slane %v8786_v35, 1  ;;  %v4343_v46 = vrot.slane %v8786_v35, 2 }
 0x571   : > { %v4342_v43 = vsel %vm4268_vm1, %v4337_v29, %v4341_v45  ;;  %11371 = vst [vmem:[#allocation40_spill] sm:$0xff] %v8805_v59  ;;  %v11374_v29 = vld [vmem:[#allocation35_spill] sm:$0xff] }
 0x572   : > { %v3898_v55 = vsel %vm3859_vm2, %v3895_v15, %v3897_v17  ;;  %v3554_v41 = vpop.f32.mrf.mxu2  ;;  %v4344_v10 = vsel %vm4268_vm1, %v4339_v36, %v4343_v46  ;;  %v11372_v15 = vld [vmem:[#allocation33_spill] sm:$0xff] }
 0x573   : > { %v3212_v42 = vpop.f32.mrf.mxu3  ;;  %4567 = vrot.lane.b32.xlu1 %v4334_v3, %s6724_s25  ;;  %4014 = vrot.lane.b32.xlu2 %v3898_v55, %s6725_s27  ;;  %v3555_v9 = vadd.f32 %v3554_v41, %v3382_v51  ;;  %v3384_v44 = vpop.f32.mrf.mxu0  ;;  %v11376_v3 = vld [vmem:[#allocation67_spill] sm:$0xff] }
 0x574   : > { %v3213_v54 = vadd.f32 %v3212_v42, %v3040_v18  ;;  %4577 = vrot.lane.b32.xlu0 %v4344_v10, %s6724_s25  ;;  %v3043_v60 = vpop.f32.mrf.mxu1  ;;  %v4340_v18 = vsel %vm4268_vm1, %v4335_v24, %v4339_v36 }
 0x575   : > { %v3708_v7 = vadd.f32 %v3555_v9, %v11374_v29  ;;  %v8814_v1 = vpop.permute.xlu0 %4529 }
 0x576   : > { %v8808_v35 = vadd.f32 %v3213_v54, %v11372_v15  ;;  %11377 = vst [vmem:[#allocation15_spill] sm:$0xff] %v8814_v1 }
 0x577   : > { %3082 = vmatmul.bf16.gmra.mxu1 %v11375_v30  ;;  %v4345_v55 = vrot.slane %v3708_v7, 2 }
 0x578   : > { %11373 = vst [vmem:[#allocation37_spill] sm:$0xff] %v8808_v35  ;;  %6544 = vmatmul.msk.bf16.gmra.mxu3 %vm1130_vm0, %v11376_v3  ;;  %v3899_v51 = vrot.slane %v8808_v35, 1 }
 0x579   : > { %v4346_v42 = vsel %vm4268_vm1, %v4341_v45, %v4345_v55  ;;  %v11381_v45 = vld [vmem:[#allocation11_spill] sm:$0xff] }
 0x57a   : > { %v3556_v10 = vpop.f32.mrf.mxu2  ;;  %v3900_v54 = vsel %vm3859_vm2, %v3897_v17, %v3899_v51 }
 0x57b   : > { %v3215_v41 = vpop.f32.mrf.mxu3  ;;  %4573 = vrot.lane.b32.xlu1 %v4340_v18, %s6724_s25  ;;  %4575 = vrot.lane.b32.xlu2 %v4342_v43, %s6724_s25  ;;  %v3557_v15 = vadd.f32 %v3556_v10, %v3384_v44  ;;  %v3387_v7 = vpop.f32.mrf.mxu0  ;;  %v4347_v18 = vrot.slane %v8808_v35, 2 }
 0x57c   : > { %v3216_v9 = vadd.f32 %v3215_v41, %v3043_v60  ;;  %4016 = vrot.lane.b32.xlu0 %v3900_v54, %s6725_s27  ;;  %v3045_v29 = vpop.f32.mrf.mxu1  ;;  %v8831_v43 = vpop.permute.xlu1 %4525 }
 0x57d   : > { %v8823_v1 = vpop.permute.xlu2 %3996  ;;  %v3710_v36 = vadd.f32 %v3557_v15, %v11381_v45  ;;  %11382 = vst [vmem:[#allocation5_spill] sm:$0xff] %v8831_v43  ;;  %v4348_v41 = vsel %vm4268_vm1, %v4343_v46, %v4347_v18  ;;  %v11386_v46 = vld [vmem:[#allocation38_spill] sm:$0xff] }
 0x57e   : > { %11378 = vst [vmem:[#allocation17_spill] sm:$0xff] %v8823_v1  ;;  %v8826_v24 = vadd.f32 %v3216_v9, %v11379_v19  ;;  %3426 = vmatmul.bf16.gmra.mxu0 %v11375_v30  ;;  %v8838_v19 = vpop.permute.xlu0 %3992 }
 0x57f   : > { %v4349_v17 = vrot.slane %v3710_v36, 2  ;;  %6577 = vmatmul.msk.bf16.gmra.mxu2 %vm1130_vm0, %v11376_v3  ;;  %11383 = vst [vmem:[#allocation46_spill] sm:$0xff] %v8838_v19  ;;  %v11384_v36 = vld [vmem:[#allocation10_spill] sm:$0xff] }
 0x580   : > { %11380 = vst [vmem:[#allocation18_spill] sm:$0xff] %v8826_v24  ;;  %v3901_v44 = vrot.slane %v8826_v24, 1 }
 0x581   : > { %v4350_v10 = vsel %vm4268_vm1, %v4345_v55, %v4349_v17 }
 0x582   : > { %v3902_v60 = vsel %vm3859_vm2, %v3899_v51, %v3901_v44  ;;  %v3559_v30 = vpop.f32.mrf.mxu2 }
 0x583   : > { %v3217_v54 = vpop.f32.mrf.mxu3  ;;  %4018 = vrot.lane.b32.xlu1 %v3902_v60, %s6725_s27  ;;  %4581 = vrot.lane.b32.xlu2 %v4348_v41, %s6724_s25  ;;  %v3560_v15 = vadd.f32 %v3559_v30, %v3387_v7  ;;  %v3389_v45 = vpop.f32.mrf.mxu0  ;;  %v11388_v60 = vld [vmem:[#allocation75_spill] sm:$0xff]  ;;  %v11389_v41 = vld [vmem:[#allocation72_spill] sm:$0xff] }
 0x584   : > { %v3218_v9 = vadd.f32 %v3217_v54, %v3045_v29  ;;  %4583 = vrot.lane.b32.xlu0 %v4350_v10, %s6724_s25  ;;  %v3048_v3 = vpop.f32.mrf.mxu1  ;;  %v8848_v43 = vpop.permute.xlu1 %4531  ;;  %v4351_v29 = vrot.slane %v8826_v24, 2  ;;  %v11391_v24 = vld [vmem:[#allocation41_spill] sm:$0xff] }
 0x585   : > { %v8845_v35 = vpop.permute.xlu2 %4539  ;;  %v3712_v1 = vadd.f32 %v3560_v15, %v11386_v46  ;;  %11387 = vst [vmem:[#allocation4_spill] sm:$0xff] %v8848_v43  ;;  %v11418_v43 = vld [vmem:[#allocation53_spill] sm:$0xff] }
 0x586   : > { %v3713_v51 = vadd.f32 %v3218_v9, %v11384_v36  ;;  %11385 = vst [vmem:[#allocation43_spill] sm:$0xff] %v8845_v35  ;;  %v8859_v36 = vpop.permute.xlu0 %4535 }
 0x587   : > { %3087 = vmatmul.bf16.gmra.mxu1 %v11388_v60  ;;  %v4353_v7 = vrot.slane %v3712_v1, 2  ;;  %11390 = vst [vmem:[#allocation20_spill] sm:$0xff] %v8859_v36  ;;  %v11407_v36 = vld [vmem:[#allocation47_spill] sm:$0xff] }
 0x588   : > { %v3903_v19 = vrot.slane %v3713_v51, 1  ;;  %v4355_v55 = vrot.slane %v3713_v51, 2  ;;  %6545 = vmatmul.msk.bf16.gmra.mxu3 %vm1130_vm0, %v11389_v41 }
 0x589   : > { %v4354_v54 = vsel %vm4268_vm1, %v4349_v17, %v4353_v7 }
 0x58a   : > { %v3904_v10 = vsel %vm3859_vm2, %v3901_v44, %v3903_v19  ;;  %v3561_v9 = vpop.f32.mrf.mxu2  ;;  %v4356_v15 = vsel %vm4268_vm1, %v4351_v29, %v4355_v55  ;;  %v4352_v55 = vsel %vm4268_vm1, %v4347_v18, %v4351_v29  ;;  %v11400_v29 = vld [vmem:[#allocation78_spill] sm:$0xff] }
 0x58b   : > { %v3220_v30 = vpop.f32.mrf.mxu3  ;;  %4579 = vrot.lane.b32.xlu1 %v4346_v42, %s6724_s25  ;;  %4020 = vrot.lane.b32.xlu2 %v3904_v10, %s6725_s27  ;;  %v3562_v51 = vadd.f32 %v3561_v9, %v3389_v45  ;;  %v3392_v1 = vpop.f32.mrf.mxu0  ;;  %v11394_v10 = vld [vmem:[#allocation39_spill] sm:$0xff] }
 0x58c   : > { %4589 = vrot.lane.b32.xlu0 %v4356_v15, %s6724_s25  ;;  %v3050_v46 = vpop.f32.mrf.mxu1  ;;  %v3221_v17 = vadd.f32 %v3220_v30, %v3048_v3  ;;  %v11396_v30 = vld [vmem:[#allocation42_spill] sm:$0xff] }
 0x58d   : > { %v3714_v35 = vadd.f32 %v3562_v51, %v11391_v24  ;;  %v8864_v44 = vpop.permute.xlu2 %4545  ;;  %v8868_v19 = vpop.permute.xlu1 %3994 }
 0x58e   : > { %3431 = vmatmul.bf16.gmra.mxu0 %v11388_v60  ;;  %11392 = vst [vmem:[#allocation21_spill] sm:$0xff] %v8864_v44  ;;  %v8873_v9 = vadd.f32 %v3221_v17, %v11394_v10 }
 0x58f   : > { %v4357_v42 = vrot.slane %v3714_v35, 2  ;;  %6578 = vmatmul.msk.bf16.gmra.mxu2 %vm1130_vm0, %v11389_v41  ;;  %11393 = vst [vmem:[#allocation23_spill] sm:$0xff] %v8868_v19  ;;  %v11404_v19 = vld [vmem:[#allocation45_spill] sm:$0xff] }
 0x590   : > { %11395 = vst [vmem:[#allocation52_spill] sm:$0xff] %v8873_v9  ;;  %v4359_v18 = vrot.slane %v8873_v9, 2 }
 0x591   : > { %v4358_v45 = vsel %vm4268_vm1, %v4353_v7, %v4357_v42  ;;  %v11399_v7 = vld [vmem:[#allocation81_spill] sm:$0xff] }
 0x592   : > { %v3564_v24 = vpop.f32.mrf.mxu2 }
 0x593   : > { %v3222_v15 = vpop.f32.mrf.mxu3  ;;  %4585 = vrot.lane.b32.xlu1 %v4352_v55, %s6724_s25  ;;  %4587 = vrot.lane.b32.xlu2 %v4354_v54, %s6724_s25  ;;  %v3394_v35 = vpop.f32.mrf.mxu0  ;;  %v3565_v17 = vadd.f32 %v3564_v24, %v3392_v1  ;;  %v3905_v54 = vrot.slane %v8873_v9, 1  ;;  %v11402_v1 = vld [vmem:[#allocation44_spill] sm:$0xff] }
 0x594   : > { %v3223_v3 = vadd.f32 %v3222_v15, %v3050_v46  ;;  %v3053_v60 = vpop.f32.mrf.mxu1 }
 0x595   : > { %v8889_v55 = vpop.permute.xlu2 %4002  ;;  %v3716_v24 = vadd.f32 %v3565_v17, %v11402_v1 }
 0x596   : > { %v8878_v41 = vadd.f32 %v3223_v3, %v11396_v30  ;;  %v8880_v51 = vpop.permute.xlu0 %4541  ;;  %11401 = vst [vmem:[#allocation24_spill] sm:$0xff] %v8889_v55 }
 0x597   : > { %11398 = vst [vmem:[#allocation7_spill] sm:$0xff] %v8880_v51  ;;  %3092 = vmatmul.bf16.gmra.mxu1 %v11399_v7 }
 0x598   : > { %11397 = vst [vmem:[#allocation49_spill] sm:$0xff] %v8878_v41  ;;  %6546 = vmatmul.msk.bf16.gmra.mxu3 %vm1130_vm0, %v11400_v29  ;;  %v4360_v42 = vrot.slane %v8878_v41, 2  ;;  %v3906_v46 = vrot.slane %v8878_v41, 1  ;;  %v8897_v41 = vpop.permute.xlu1 %4537 }
 0x599   : > { %11403 = vst [vmem:[#allocation6_spill] sm:$0xff] %v8897_v41 }
 0x59a   : > { %v4361_v10 = vsel %vm4268_vm1, %v4359_v18, %v4360_v42  ;;  %v3907_v15 = vsel %vm3859_vm2, %v3905_v54, %v3906_v46  ;;  %v3566_v30 = vpop.f32.mrf.mxu2 }
 0x59b   : > { %v3225_v3 = vpop.f32.mrf.mxu3  ;;  %4591 = vrot.lane.b32.xlu1 %v4358_v45, %s6724_s25  ;;  %4593 = vrot.lane.b32.xlu2 %v4361_v10, %s6724_s25  ;;  %v3567_v9 = vadd.f32 %v3566_v30, %v3394_v35  ;;  %v3397_v44 = vpop.f32.mrf.mxu0  ;;  %v4362_v10 = vrot.slane %v3716_v24, 2  ;;  %v11410_v24 = vld [vmem:[#allocation48_spill] sm:$0xff] }
 0x59c   : > { %v3226_v51 = vadd.f32 %v3225_v3, %v3053_v60  ;;  %4022 = vrot.lane.b32.xlu0 %v3907_v15, %s6725_s27  ;;  %v3055_v55 = vpop.f32.mrf.mxu1 }
 0x59d   : > { %v3718_v45 = vadd.f32 %v3567_v9, %v11407_v36 }
 0x59e   : > { %v8900_v18 = vadd.f32 %v3226_v51, %v11404_v19  ;;  %v8902_v54 = vpop.permute.xlu0 %3998  ;;  %3436 = vmatmul.bf16.gmra.mxu0 %v11399_v7  ;;  %v8912_v51 = vpop.permute.xlu2 %4551 }
 0x59f   : > { %11406 = vst [vmem:[#allocation55_spill] sm:$0xff] %v8902_v54  ;;  %v4363_v60 = vrot.slane %v3718_v45, 2  ;;  %6579 = vmatmul.msk.bf16.gmra.mxu2 %vm1130_vm0, %v11400_v29 }
 0x5a0   : > { %11405 = vst [vmem:[#allocation58_spill] sm:$0xff] %v8900_v18  ;;  %v3908_v17 = vrot.slane %v8900_v18, 1 }
 0x5a1   : > { %v4364_v15 = vsel %vm4268_vm1, %v4362_v10, %v4363_v60  ;;  %11408 = vst [vmem:[#allocation26_spill] sm:$0xff] %v8912_v51  ;;  %v4365_v10 = vrot.slane %v8900_v18, 2  ;;  %v11414_v51 = vld [vmem:[#allocation84_spill] sm:$0xff] }
 0x5a2   : > { %v3909_v35 = vsel %vm3859_vm2, %v3906_v46, %v3908_v17  ;;  %v3569_v19 = vpop.f32.mrf.mxu2  ;;  %v11411_v46 = vld [vmem:[#allocation50_spill] sm:$0xff] }
 0x5a3   : > { %v3227_v3 = vpop.f32.mrf.mxu3  ;;  %4024 = vrot.lane.b32.xlu1 %v3909_v35, %s6725_s27  ;;  %v3570_v9 = vadd.f32 %v3569_v19, %v3397_v44  ;;  %v3399_v7 = vpop.f32.mrf.mxu0  ;;  %v11413_v35 = vld [vmem:[#allocation87_spill] sm:$0xff] }
 0x5a4   : > { %v3228_v36 = vadd.f32 %v3227_v3, %v3055_v55  ;;  %4595 = vrot.lane.b32.xlu0 %v4364_v15, %s6724_s25  ;;  %v3058_v30 = vpop.f32.mrf.mxu1  ;;  %v4366_v3 = vsel %vm4268_vm1, %v4360_v42, %v4365_v10 }
 0x5a5   : > { %v8915_v1 = vpop.permute.xlu1 %4000  ;;  %v3720_v45 = vadd.f32 %v3570_v9, %v11411_v46 }
 0x5a6   : > { %11409 = vst [vmem:[#allocation27_spill] sm:$0xff] %v8915_v1  ;;  %v8918_v29 = vadd.f32 %v3228_v36, %v11410_v24  ;;  %v8922_v54 = vpop.permute.xlu0 %4547  ;;  %v8938_v42 = vpop.permute.xlu2 %4557 }
 0x5a7   : > { %11412 = vst [vmem:[#allocation29_spill] sm:$0xff] %v8922_v54  ;;  %3097 = vmatmul.bf16.gmra.mxu1 %v11413_v35  ;;  %v4367_v44 = vrot.slane %v3720_v45, 2 }
 0x5a8   : > { %6547 = vmatmul.msk.bf16.gmra.mxu3 %vm1130_vm0, %v11414_v51  ;;  %v3910_v55 = vrot.slane %v8918_v29, 1  ;;  %v4369_v15 = vrot.slane %v8918_v29, 2  ;;  %11416 = vst [vmem:[#allocation9_spill] sm:$0xff] %v8938_v42 }
 0x5a9   : > { %v4368_v36 = vsel %vm4268_vm1, %v4363_v60, %v4367_v44 }
 0x5aa   : > { %v3911_v19 = vsel %vm3859_vm2, %v3908_v17, %v3910_v55  ;;  %v3571_v24 = vpop.f32.mrf.mxu2  ;;  %v4370_v46 = vsel %vm4268_vm1, %v4365_v10, %v4369_v15  ;;  %v11417_v17 = vld [vmem:[#allocation51_spill] sm:$0xff] }
 0x5ab   : > { %v3230_v9 = vpop.f32.mrf.mxu3  ;;  %4597 = vrot.lane.b32.xlu1 %v4366_v3, %s6724_s25  ;;  %4026 = vrot.lane.b32.xlu2 %v3911_v19, %s6725_s27  ;;  %v3572_v45 = vadd.f32 %v3571_v24, %v3399_v7  ;;  %v3402_v1 = vpop.f32.mrf.mxu0 }
 0x5ac   : > { %v3231_v18 = vadd.f32 %v3230_v9, %v3058_v30  ;;  %4601 = vrot.lane.b32.xlu0 %v4370_v46, %s6724_s25  ;;  %v3060_v54 = vpop.f32.mrf.mxu1 }
 0x5ad   : > { %v8936_v41 = vpop.permute.xlu1 %4543  ;;  %v3722_v3 = vadd.f32 %v3572_v45, %v11418_v43  ;;  %v11420_v45 = vld [vmem:[#allocation54_spill] sm:$0xff] }
 0x5ae   : > { %11415 = vst [vmem:[#allocation30_spill] sm:$0xff] %v8936_v41  ;;  %v8941_v60 = vadd.f32 %v3231_v18, %v11417_v17  ;;  %3441 = vmatmul.bf16.gmra.mxu0 %v11413_v35  ;;  %v8945_v59 = vpop.permute.xlu0 %4553  ;;  %v11427_v41 = vld [vmem:[#allocation57_spill] sm:$0xff] }
 0x5af   : > { %v4371_v19 = vrot.slane %v3722_v3, 2  ;;  %11419 = vst [vmem:[#allocation64_spill] sm:$0xff] %v8945_v59  ;;  %6580 = vmatmul.msk.bf16.gmra.mxu2 %vm1130_vm0, %v11414_v51  ;;  %v11424_v59 = vld [vmem:[#allocation93_spill] sm:$0xff] }
 0x5b0   : > { %v3912_v7 = vrot.slane %v8941_v60, 1 }
 0x5b1   : > { %v4372_v30 = vsel %vm4268_vm1, %v4367_v44, %v4371_v19  ;;  %v11423_v44 = vld [vmem:[#allocation56_spill] sm:$0xff] }
 0x5b2   : > { %v3574_v9 = vpop.f32.mrf.mxu2  ;;  %v3913_v18 = vsel %vm3859_vm2, %v3910_v55, %v3912_v7  ;;  %v11425_v55 = vld [vmem:[#allocation90_spill] sm:$0xff] }
 0x5b3   : > { %v3232_v10 = vpop.f32.mrf.mxu3  ;;  %4599 = vrot.lane.b32.xlu2 %v4368_v36, %s6724_s25  ;;  %v3575_v43 = vadd.f32 %v3574_v9, %v3402_v1  ;;  %v3404_v35 = vpop.f32.mrf.mxu0  ;;  %v4373_v36 = vrot.slane %v8941_v60, 2 }
 0x5b4   : > { %v3233_v24 = vadd.f32 %v3232_v10, %v3060_v54  ;;  %4028 = vrot.lane.b32.xlu0 %v3913_v18, %s6725_s27  ;;  %v3063_v46 = vpop.f32.mrf.mxu1 }
 0x5b5   : > { %v8957_v51 = vpop.permute.xlu1 %4549  ;;  %v8959_v3 = vpop.permute.xlu2 %4008  ;;  %v3724_v42 = vadd.f32 %v3575_v43, %v11423_v44  ;;  %v4374_v9 = vsel %vm4268_vm1, %v4369_v15, %v4373_v36 }
 0x5b6   : > { %v8955_v17 = vadd.f32 %v3233_v24, %v11420_v45  ;;  %11421 = vst [vmem:[#allocation61_spill] sm:$0xff] %v8957_v51  ;;  %v8969_v18 = vpop.permute.xlu0 %4004 }
 0x5b7   : > { %11422 = vst [vmem:[#allocation8_spill] sm:$0xff] %v8959_v3  ;;  %3102 = vmatmul.bf16.gmra.mxu1 %v11424_v59  ;;  %v4375_v54 = vrot.slane %v3724_v42, 2 }
 0x5b8   : > { %6548 = vmatmul.msk.bf16.gmra.mxu3 %vm1130_vm0, %v11425_v55  ;;  %v3914_v1 = vrot.slane %v8955_v17, 1  ;;  %11426 = vst [vmem:[#allocation32_spill] sm:$0xff] %v8969_v18  ;;  %v11429_v18 = vld [vmem:[#allocation59_spill] sm:$0xff] }
 0x5b9   : > { %v4376_v24 = vsel %vm4268_vm1, %v4371_v19, %v4375_v54 }
 0x5ba   : > { %v3915_v10 = vsel %vm3859_vm2, %v3912_v7, %v3914_v1  ;;  %v3576_v43 = vpop.f32.mrf.mxu2 }
 0x5bb   : > { %v3235_v45 = vpop.f32.mrf.mxu3  ;;  %4030 = vrot.lane.b32.xlu1 %v3915_v10, %s6725_s27  ;;  %4605 = vrot.lane.b32.xlu2 %v4374_v9, %s6724_s25  ;;  %v3577_v51 = vadd.f32 %v3576_v43, %v3404_v35  ;;  %v3407_v42 = vpop.f32.mrf.mxu0 }
 0x5bc   : > { %v3236_v44 = vadd.f32 %v3235_v45, %v3063_v46  ;;  %4607 = vrot.lane.b32.xlu0 %v4376_v24, %s6724_s25  ;;  %v3065_v3 = vpop.f32.mrf.mxu1  ;;  %v4377_v46 = vrot.slane %v8955_v17, 2 }
 0x5bd   : > { %v8978_v15 = vpop.permute.xlu2 %4563  ;;  %v3726_v11 = vadd.f32 %v3577_v51, %v11429_v18  ;;  %v8982_v19 = vpop.permute.xlu1 %4006 }
 0x5be   : > { %v8976_v7 = vadd.f32 %v3236_v44, %v11427_v41  ;;  %11428 = vst [vmem:[#allocation33_spill] sm:$0xff] %v8978_v15  ;;  %3446 = vmatmul.bf16.gmra.mxu0 %v11424_v59  ;;  %v8994_v18 = vpop.permute.xlu0 %4559  ;;  %v11432_v15 = vld [vmem:[#allocation60_spill] sm:$0xff] }
 0x5bf   : > { %11430 = vst [vmem:[#allocation35_spill] sm:$0xff] %v8982_v19  ;;  %v4379_v10 = vrot.slane %v3726_v11, 2  ;;  %6581 = vmatmul.msk.bf16.gmra.mxu2 %vm1130_vm0, %v11425_v55 }
 0x5c0   : > { %v3916_v9 = vrot.slane %v8976_v7, 1  ;;  %v4381_v35 = vrot.slane %v8976_v7, 2  ;;  %11431 = vst [vmem:[#allocation69_spill] sm:$0xff] %v8994_v18 }
 0x5c1   : > { %v4380_v24 = vsel %vm4268_vm1, %v4375_v54, %v4379_v10  ;;  %v11434_v54 = vld [vmem:[#allocation62_spill] sm:$0xff] }
 0x5c2   : > { %v3917_v41 = vsel %vm3859_vm2, %v3914_v1, %v3916_v9  ;;  %v3579_v59 = vpop.f32.mrf.mxu2  ;;  %v4382_v11 = vsel %vm4268_vm1, %v4377_v46, %v4381_v35 }
 0x5c3   : > { %v3237_v45 = vpop.f32.mrf.mxu3  ;;  %4603 = vrot.lane.b32.xlu1 %v4372_v30, %s6724_s25  ;;  %4032 = vrot.lane.b32.xlu2 %v3917_v41, %s6725_s27  ;;  %v3580_v55 = vadd.f32 %v3579_v59, %v3407_v42  ;;  %v3409_v43 = vpop.f32.mrf.mxu0  ;;  %v11436_v41 = vld [vmem:[#allocation97_spill] sm:$0xff]  ;;  %v4378_v42 = vsel %vm4268_vm1, %v4373_v36, %v4377_v46 }
 0x5c4   : > { %v3238_v51 = vadd.f32 %v3237_v45, %v3065_v3  ;;  %4613 = vrot.lane.b32.xlu0 %v4382_v11, %s6724_s25  ;;  %v3068_v44 = vpop.f32.mrf.mxu1  ;;  %v11440_v36 = vld [vmem:[#allocation65_spill] sm:$0xff] }
 0x5c5   : > { %v8998_v19 = vpop.permute.xlu2 %4569  ;;  %v3728_v23 = vadd.f32 %v3580_v55, %v11434_v54  ;;  %v9004_v45 = vpop.permute.xlu1 %4555 }
 0x5c6   : > { %v3729_v1 = vadd.f32 %v3238_v51, %v11432_v15  ;;  %11433 = vst [vmem:[#allocation67_spill] sm:$0xff] %v8998_v19 }
 0x5c7   : > { %3107 = vmatmul.bf16.gmra.mxu1 %v11435_v32  ;;  %v4383_v3 = vrot.slane %v3728_v23, 2  ;;  %11437 = vst [vmem:[#allocation36_spill] sm:$0xff] %v9004_v45 }
 0x5c8   : > { %v3918_v30 = vrot.slane %v3729_v1, 1  ;;  %6549 = vmatmul.msk.bf16.gmra.mxu3 %vm1130_vm0, %v11436_v41  ;;  %v4385_v23 = vrot.slane %v3729_v1, 2 }
 0x5c9   : > { %v4384_v59 = vsel %vm4268_vm1, %v4379_v10, %v4383_v3 }
 0x5ca   : > { %v3581_v15 = vpop.f32.mrf.mxu2  ;;  %v3919_v51 = vsel %vm3859_vm2, %v3916_v9, %v3918_v30  ;;  %v4386_v9 = vsel %vm4268_vm1, %v4381_v35, %v4385_v23  ;;  %v11441_v30 = vld [vmem:[#allocation63_spill] sm:$0xff]  ;;  %v11447_v23 = vld [vmem:[#allocation104_spill] sm:$0xff] }
 0x5cb   : > { %v3240_v11 = vpop.f32.mrf.mxu3  ;;  %4609 = vrot.lane.b32.xlu1 %v4378_v42, %s6724_s25  ;;  %4611 = vrot.lane.b32.xlu2 %v4380_v24, %s6724_s25  ;;  %v3582_v55 = vadd.f32 %v3581_v15, %v3409_v43  ;;  %v3412_v54 = vpop.f32.mrf.mxu0 }
 0x5cc   : > { %4034 = vrot.lane.b32.xlu0 %v3919_v51, %s6725_s27  ;;  %v3070_v18 = vpop.f32.mrf.mxu1  ;;  %v3241_v46 = vadd.f32 %v3240_v11, %v3068_v44  ;;  %v11443_v11 = vld [vmem:[#allocation66_spill] sm:$0xff] }
 0x5cd   : > { %v9012_v19 = vpop.permute.xlu2 %4014  ;;  %v3730_v10 = vadd.f32 %v3582_v55, %v11440_v36  ;;  %v9028_v44 = vpop.permute.xlu1 %4561 }
 0x5ce   : > { %11438 = vst [vmem:[#allocation11_spill] sm:$0xff] %v9012_v19  ;;  %v9014_v45 = vpop.permute.xlu0 %4565  ;;  %3451 = vmatmul.bf16.gmra.mxu0 %v11435_v32  ;;  %v9025_v15 = vadd.f32 %v3241_v46, %v11441_v30 }
 0x5cf   : > { %11439 = vst [vmem:[#allocation10_spill] sm:$0xff] %v9014_v45  ;;  %v4387_v42 = vrot.slane %v3730_v10, 2  ;;  %6582 = vmatmul.msk.bf16.gmra.mxu2 %vm1130_vm0, %v11436_v41 }
 0x5d0   : > { %11442 = vst [vmem:[#allocation38_spill] sm:$0xff] %v9028_v44  ;;  %v11450_v44 = vld [vmem:[#allocation70_spill] sm:$0xff] }
 0x5d1   : > { %v4388_v24 = vsel %vm4268_vm1, %v4383_v3, %v4387_v42 }
 0x5d2   : > { %v3584_v1 = vpop.f32.mrf.mxu2 }
 0x5d3   : > { %v3242_v43 = vpop.f32.mrf.mxu3  ;;  %4615 = vrot.lane.b32.xlu1 %v4384_v59, %s6724_s25  ;;  %4617 = vrot.lane.b32.xlu2 %v4386_v9, %s6724_s25  ;;  %v3414_v32 = vpop.f32.mrf.mxu0  ;;  %v11446_v59 = vld [vmem:[#allocation107_spill] sm:$0xff]  ;;  %v3585_v10 = vadd.f32 %v3584_v1, %v3412_v54 }
 0x5d4   : > { %v3243_v51 = vadd.f32 %v3242_v43, %v3070_v18  ;;  %4619 = vrot.lane.b32.xlu0 %v4388_v24, %s6724_s25  ;;  %v3073_v41 = vpop.f32.mrf.mxu1  ;;  %v3920_v18 = vrot.slane %v9025_v15, 1 }
 0x5d5   : > { %v9033_v3 = vpop.permute.xlu2 %4575 }
 0x5d6   : > { %v9031_v35 = vadd.f32 %v3243_v51, %v11443_v11  ;;  %11444 = vst [vmem:[#allocation75_spill] sm:$0xff] %v9033_v3  ;;  %v9035_v55 = vpop.permute.xlu0 %4010  ;;  %v11448_v51 = vld [vmem:[#allocation68_spill] sm:$0xff] }
 0x5d7   : > { %11445 = vst [vmem:[#allocation72_spill] sm:$0xff] %v9035_v55  ;;  %3112 = vmatmul.bf16.gmra.mxu1 %v11446_v59  ;;  %v3732_v11 = vadd.f32 %v3585_v10, %v11448_v51  ;;  %v11451_v55 = vld [vmem:[#allocation71_spill] sm:$0xff] }
 0x5d8   : > { %6550 = vmatmul.msk.bf16.gmra.mxu3 %vm1130_vm0, %v11447_v23  ;;  %v3921_v36 = vrot.slane %v9031_v35, 1  ;;  %v4390_v54 = vrot.slane %v9031_v35, 2 }
 0x5da   : > { %v3922_v46 = vsel %vm3859_vm2, %v3920_v18, %v3921_v36  ;;  %v3586_v9 = vpop.f32.mrf.mxu2 }
 0x5db   : > { %v3245_v42 = vpop.f32.mrf.mxu3  ;;  %4036 = vrot.lane.b32.xlu1 %v3922_v46, %s6725_s27  ;;  %v3587_v43 = vadd.f32 %v3586_v9, %v3414_v32  ;;  %v3417_v30 = vpop.f32.mrf.mxu0 }
 0x5dc   : > { %v3246_v24 = vadd.f32 %v3245_v42, %v3073_v41  ;;  %v3075_v19 = vpop.f32.mrf.mxu1  ;;  %v4389_v41 = vrot.slane %v9025_v15, 2 }
 0x5dd   : > { %v9045_v3 = vpop.permute.xlu1 %4012  ;;  %v3734_v47 = vadd.f32 %v3587_v43, %v11451_v55  ;;  %v9055_v18 = vpop.permute.xlu2 %4581 }
 0x5de   : > { %11449 = vst [vmem:[#allocation41_spill] sm:$0xff] %v9045_v3  ;;  %v9048_v45 = vadd.f32 %v3246_v24, %v11450_v44  ;;  %v9052_v1 = vpop.permute.xlu0 %4571  ;;  %3456 = vmatmul.bf16.gmra.mxu0 %v11446_v59  ;;  %v4392_v44 = vrot.slane %v3732_v11, 2  ;;  %v4391_v55 = vsel %vm4268_vm1, %v4389_v41, %v4390_v54  ;;  %v11455_v41 = vld [vmem:[#allocation73_spill] sm:$0xff] }
 0x5df   : > { %11452 = vst [vmem:[#allocation39_spill] sm:$0xff] %v9052_v1  ;;  %v4393_v32 = vrot.slane %v3734_v47, 2  ;;  %6583 = vmatmul.msk.bf16.gmra.mxu2 %vm1130_vm0, %v11447_v23 }
 0x5e0   : > { %11453 = vst [vmem:[#allocation42_spill] sm:$0xff] %v9055_v18  ;;  %v3923_v10 = vrot.slane %v9048_v45, 1  ;;  %v4395_v46 = vrot.slane %v9048_v45, 2 }
 0x5e1   : > { %v4394_v24 = vsel %vm4268_vm1, %v4392_v44, %v4393_v32 }
 0x5e2   : > { %v3924_v42 = vsel %vm3859_vm2, %v3921_v36, %v3923_v10  ;;  %v4396_v9 = vsel %vm4268_vm1, %v4390_v54, %v4395_v46  ;;  %v3589_v47 = vpop.f32.mrf.mxu2  ;;  %v11456_v54 = vld [vmem:[#allocation74_spill] sm:$0xff] }
 0x5e3   : > { %v3247_v59 = vpop.f32.mrf.mxu3  ;;  %4621 = vrot.lane.b32.xlu1 %v4391_v55, %s6724_s25  ;;  %4038 = vrot.lane.b32.xlu2 %v3924_v42, %s6725_s27  ;;  %v3590_v51 = vadd.f32 %v3589_v47, %v3417_v30  ;;  %v3419_v23 = vpop.f32.mrf.mxu0  ;;  %v11458_v55 = vld [vmem:[#allocation113_spill] sm:$0xff]  ;;  %v11459_v42 = vld [vmem:[#allocation110_spill] sm:$0xff] }
 0x5e4   : > { %v3248_v43 = vadd.f32 %v3247_v59, %v3075_v19  ;;  %4625 = vrot.lane.b32.xlu0 %v4396_v9, %s6724_s25  ;;  %v3078_v11 = vpop.f32.mrf.mxu1 }
 0x5e5   : > { %v9069_v18 = vpop.permute.xlu1 %4567  ;;  %v3736_v3 = vadd.f32 %v3590_v51, %v11456_v54  ;;  %v9081_v30 = vpop.permute.xlu2 %4020 }
 0x5e6   : > { %11454 = vst [vmem:[#allocation81_spill] sm:$0xff] %v9069_v18  ;;  %v9072_v36 = vadd.f32 %v3248_v43, %v11455_v41  ;;  %v9075_v1 = vpop.permute.xlu0 %4577  ;;  %v11462_v18 = vld [vmem:[#allocation76_spill] sm:$0xff] }
 0x5e7   : > { %11457 = vst [vmem:[#allocation78_spill] sm:$0xff] %v9075_v1  ;;  %3117 = vmatmul.bf16.gmra.mxu1 %v11458_v55  ;;  %v4397_v19 = vrot.slane %v3736_v3, 2 }
 0x5e8   : > { %6551 = vmatmul.msk.bf16.gmra.mxu3 %vm1130_vm0, %v11459_v42  ;;  %v3925_v44 = vrot.slane %v9072_v36, 1  ;;  %11460 = vst [vmem:[#allocation44_spill] sm:$0xff] %v9081_v30  ;;  %v11463_v30 = vld [vmem:[#allocation77_spill] sm:$0xff] }
 0x5e9   : > { %v4398_v59 = vsel %vm4268_vm1, %v4393_v32, %v4397_v19  ;;  %v254_v32 = vld [vmem:[%s6899_s26 + $0x248] sm:$0xff] }
 0x5ea   : > { %v3926_v9 = vsel %vm3859_vm2, %v3923_v10, %v3925_v44  ;;  %v3591_v43 = vpop.f32.mrf.mxu2  ;;  %v4399_v10 = vrot.slane %v9072_v36, 2 }
 0x5eb   : > { %v3250_v47 = vpop.f32.mrf.mxu3  ;;  %4623 = vrot.lane.b32.xlu2 %v4394_v24, %s6724_s25  ;;  %v3592_v41 = vadd.f32 %v3591_v43, %v3419_v23  ;;  %v3422_v54 = vpop.f32.mrf.mxu0  ;;  %v408_v23 = vunpack.c.l.bf16 %v254_v32  ;;  %v409_v43 = vunpack.c.h.bf16 %v254_v32 }
 0x5ec   : > { %v3251_v51 = vadd.f32 %v3250_v47, %v3078_v11  ;;  %4040 = vrot.lane.b32.xlu0 %v3926_v9, %s6725_s27  ;;  %v3080_v1 = vpop.f32.mrf.mxu1 }
 0x5ed   : > { %v9087_v3 = vpop.permute.xlu1 %4573  ;;  %v3738_v5 = vadd.f32 %v3592_v41, %v11463_v30  ;;  %v570_v39 = vmax.f32 %v408_v23, 0.0 }
 0x5ee   : > { %11461 = vst [vmem:[#allocation45_spill] sm:$0xff] %v9087_v3  ;;  %v9090_v16 = vadd.f32 %v3251_v51, %v11462_v18  ;;  %3461 = vmatmul.bf16.gmra.mxu0 %v11458_v55  ;;  %v9097_v47 = vpop.permute.xlu0 %4016  ;;  %v4400_v18 = vsel %vm4268_vm1, %v4395_v46, %v4399_v10  ;;  %v9106_v55 = vpop.permute.xlu2 %4587  ;;  %v11467_v46 = vld [vmem:[#allocation79_spill] sm:$0xff] }
 0x5ef   : > { %v4401_v24 = vrot.slane %v3738_v5, 2  ;;  %11464 = vst [vmem:[#allocation47_spill] sm:$0xff] %v9097_v47  ;;  %6584 = vmatmul.msk.bf16.gmra.mxu2 %vm1130_vm0, %v11459_v42 }
 0x5f0   : > { %v3927_v11 = vrot.slane %v9090_v16, 1  ;;  %11465 = vst [vmem:[#allocation48_spill] sm:$0xff] %v9106_v55 }
 0x5f1   : > { %v4402_v30 = vsel %vm4268_vm1, %v4397_v19, %v4401_v24  ;;  %v11468_v19 = vld [vmem:[#allocation80_spill] sm:$0xff] }
 0x5f2   : > { %v3928_v9 = vsel %vm3859_vm2, %v3925_v44, %v3927_v11  ;;  %v3594_v5 = vpop.f32.mrf.mxu2 }
 0x5f3   : > { %v3252_v51 = vpop.f32.mrf.mxu3  ;;  %4042 = vrot.lane.b32.xlu1 %v3928_v9, %s6725_s27  ;;  %4629 = vrot.lane.b32.xlu2 %v4400_v18, %s6724_s25  ;;  %v3595_v47 = vadd.f32 %v3594_v5, %v3422_v54  ;;  %v3424_v42 = vpop.f32.mrf.mxu0  ;;  %v571_v9 = vmax.f32 %v409_v43, 0.0  ;;  %v11470_v18 = vld [vmem:[#allocation116_spill] sm:$0xff] }
 0x5f4   : > { %v3253_v41 = vadd.f32 %v3252_v51, %v3080_v1  ;;  %4631 = vrot.lane.b32.xlu0 %v4402_v30, %s6724_s25  ;;  %v3083_v3 = vpop.f32.mrf.mxu1  ;;  %v4403_v51 = vrot.slane %v9090_v16, 2 }
 0x5f5   : > { %v9109_v44 = vpop.permute.xlu1 %4018  ;;  %v3740_v32 = vadd.f32 %v3595_v47, %v11468_v19  ;;  %v659_v23 = vpack.c.bf16 %v571_v9, %v570_v39  ;;  %v11474_v39 = vld [vmem:[#allocation82_spill] sm:$0xff] }
 0x5f6   : > { %11466 = vst [vmem:[#allocation50_spill] sm:$0xff] %v9109_v44  ;;  %v9112_v52 = vadd.f32 %v3253_v41, %v11467_v46  ;;  %v9122_v41 = vpop.permute.xlu0 %4583 }
 0x5f7   : > { %3122 = vmatmul.bf16.gmra.mxu1 %v11469_v6  ;;  %v4405_v1 = vrot.slane %v3740_v32, 2  ;;  %11471 = vst [vmem:[#allocation87_spill] sm:$0xff] %v9122_v41  ;;  %v2813_v12 = vunpack.c.l.b16 %v659_v23  ;;  %v2814_v49 = vunpack.c.h.b16 %v659_v23 }
 0x5f8   : > { %6552 = vmatmul.msk.bf16.gmra.mxu3 %vm1130_vm0, %v11470_v18  ;;  %v3929_v54 = vrot.slane %v9112_v52, 1  ;;  %v4407_v30 = vrot.slane %v9112_v52, 2 }
 0x5f9   : > { %v4406_v47 = vsel %vm4268_vm1, %v4401_v24, %v4405_v1  ;;  %v9131_v24 = vpop.permute.xlu2 %4593 }
 0x5fa   : > { %v3930_v5 = vsel %vm3859_vm2, %v3927_v11, %v3929_v54  ;;  %v3596_v46 = vpop.f32.mrf.mxu2  ;;  %v4408_v19 = vsel %vm4268_vm1, %v4403_v51, %v4407_v30  ;;  %11473 = vst [vmem:[#allocation51_spill] sm:$0xff] %v9131_v24  ;;  %v11476_v24 = vld [vmem:[#allocation125_spill] sm:$0xff] }
 0x5fb   : > { %v3255_v43 = vpop.f32.mrf.mxu3  ;;  %4627 = vrot.lane.b32.xlu1 %v4398_v59, %s6724_s25  ;;  %4044 = vrot.lane.b32.xlu2 %v3930_v5, %s6725_s27  ;;  %v3597_v44 = vadd.f32 %v3596_v46, %v3424_v42  ;;  %v3427_v11 = vpop.f32.mrf.mxu0  ;;  %v11475_v59 = vld [vmem:[#allocation83_spill] sm:$0xff]  ;;  %v256_v46 = vld [vmem:[%s6899_s26 + $0x258] sm:$0xff] }
 0x5fc   : > { %v3256_v32 = vadd.f32 %v3255_v43, %v3083_v3  ;;  %4637 = vrot.lane.b32.xlu0 %v4408_v19, %s6724_s25  ;;  %v3085_v55 = vpop.f32.mrf.mxu1  ;;  %v255_v43 = vld [vmem:[%s6899_s26 + $0x250] sm:$0xff]  ;;  %v4404_v19 = vsel %vm4268_vm1, %v4399_v10, %v4403_v51  ;;  %v413_v51 = vunpack.c.h.bf16 %v256_v46 }
 0x5fd   : > { %v9129_v41 = vpop.permute.xlu1 %4579  ;;  %v3742_v5 = vadd.f32 %v3597_v44, %v11475_v59  ;;  %v410_v59 = vunpack.c.l.bf16 %v255_v43 }
 0x5fe   : > { %11472 = vst [vmem:[#allocation84_spill] sm:$0xff] %v9129_v41  ;;  %v9134_v9 = vadd.f32 %v3256_v32, %v11474_v39  ;;  %3466 = vmatmul.bf16.gmra.mxu0 %v11469_v6  ;;  %v2829_v41 = vpack.c.b16 %v2813_v12, %v11476_v24  ;;  %v11477_v6 = vld [vmem:[#allocation122_spill] sm:$0xff]  ;;  %v9150_v50 = vpop.permute.xlu0 %4589 }
 0x5ff   : > { %v4409_v3 = vrot.slane %v3742_v5, 2  ;;  %6585 = vmatmul.msk.bf16.gmra.mxu2 %vm1130_vm0, %v11470_v18  ;;  %v2830_v44 = vpack.c.b16 %v2814_v49, %v11477_v6  ;;  %v411_v5 = vunpack.c.h.bf16 %v255_v43  ;;  %11478 = vst [vmem:[#allocation53_spill] sm:$0xff] %v9150_v50  ;;  %v572_v43 = vmax.f32 %v410_v59, 0.0  ;;  %v257_v50 = vld [vmem:[%s6899_s26 + $0x260] sm:$0xff] }
 0x600   : > { %v3931_v42 = vrot.slane %v9134_v9, 1 }
 0x601   : > { %v4410_v32 = vsel %vm4268_vm1, %v4405_v1, %v4409_v3  ;;  %v412_v1 = vunpack.c.l.bf16 %v256_v46 }
 0x602   : > { %v3599_v23 = vpop.f32.mrf.mxu2  ;;  %v3932_v18 = vsel %vm3859_vm2, %v3929_v54, %v3931_v42  ;;  %v11482_v54 = vld [vmem:[#allocation86_spill] sm:$0xff] }
 0x603   : > { %v3257_v39 = vpop.f32.mrf.mxu3  ;;  %4633 = vrot.lane.b32.xlu1 %v4404_v19, %s6724_s25  ;;  %4635 = vrot.lane.b32.xlu2 %v4406_v47, %s6724_s25  ;;  %v3600_v10 = vadd.f32 %v3599_v23, %v3427_v11  ;;  %v3429_v12 = vpop.f32.mrf.mxu0  ;;  %v11479_v19 = vld [vmem:[#allocation85_spill] sm:$0xff]  ;;  %v574_v23 = vmax.f32 %v412_v1, 0.0 }
 0x604   : > { %v3258_v53 = vadd.f32 %v3257_v39, %v3085_v55  ;;  %4046 = vrot.lane.b32.xlu0 %v3932_v18, %s6725_s27  ;;  %v3088_v24 = vpop.f32.mrf.mxu1  ;;  %v10885_v55 = vrot.slane %v9134_v9, 2  ;;  %v573_v39 = vmax.f32 %v411_v5, 0.0  ;;  %v575_v18 = vmax.f32 %v413_v51, 0.0 }
 0x605   : > { %v9156_v47 = vpop.permute.xlu1 %4585  ;;  %v9158_v49 = vpop.permute.xlu2 %4026  ;;  %v3744_v6 = vadd.f32 %v3600_v10, %v11482_v54 }
 0x606   : > { %v9154_v2 = vadd.f32 %v3258_v53, %v11479_v19  ;;  %11480 = vst [vmem:[#allocation54_spill] sm:$0xff] %v9156_v47  ;;  %v4412_v19 = vsel %vm4268_vm1, %v4407_v30, %v10885_v55  ;;  %v660_v5 = vpack.c.bf16 %v573_v39, %v572_v43 }
 0x607   : > { %11481 = vst [vmem:[#allocation56_spill] sm:$0xff] %v9158_v49  ;;  %3127 = vmatmul.bf16.gmra.mxu1 %v2829_v41  ;;  %v4413_v46 = vrot.slane %v3744_v6, 2 }
 0x608   : > { %v3933_v11 = vrot.slane %v9154_v2, 1  ;;  %6553 = vmatmul.msk.bf16.gmra.mxu3 %vm1130_vm0, %v2830_v44  ;;  %v2816_v39 = vunpack.c.h.b16 %v660_v5 }
 0x609   : > { %v4414_v10 = vsel %vm4268_vm1, %v4409_v3, %v4413_v46  ;;  %v11485_v3 = vld [vmem:[#allocation89_spill] sm:$0xff] }
 0x60a   : > { %v3934_v53 = vsel %vm3859_vm2, %v3931_v42, %v3933_v11  ;;  %v3601_v59 = vpop.f32.mrf.mxu2  ;;  %v661_v42 = vpack.c.bf16 %v575_v18, %v574_v23  ;;  %v258_v23 = vld [vmem:[%s6899_s26 + $0x268] sm:$0xff] }
 0x60b   : > { %v3260_v54 = vpop.f32.mrf.mxu3  ;;  %4048 = vrot.lane.b32.xlu1 %v3934_v53, %s6725_s27  ;;  %4641 = vrot.lane.b32.xlu2 %v4412_v19, %s6724_s25  ;;  %v3602_v49 = vadd.f32 %v3601_v59, %v3429_v12  ;;  %v3432_v1 = vpop.f32.mrf.mxu0  ;;  %v2815_v53 = vunpack.c.l.b16 %v660_v5  ;;  %v414_v59 = vunpack.c.l.bf16 %v257_v50 }
 0x60c   : > { %4643 = vrot.lane.b32.xlu0 %v4414_v10, %s6724_s25  ;;  %v3090_v51 = vpop.f32.mrf.mxu1  ;;  %v3261_v55 = vadd.f32 %v3260_v54, %v3088_v24  ;;  %v2817_v12 = vunpack.c.l.b16 %v661_v42  ;;  %v2818_v10 = vunpack.c.h.b16 %v661_v42  ;;  %v416_v54 = vunpack.c.l.bf16 %v258_v23 }
 0x60d   : > { %v9172_v6 = vpop.permute.xlu2 %4599  ;;  %v3746_v11 = vadd.f32 %v3602_v49, %v11485_v3  ;;  %v9178_v19 = vpop.permute.xlu1 %4591  ;;  %v415_v49 = vunpack.c.h.bf16 %v257_v50  ;;  %v417_v3 = vunpack.c.h.bf16 %v258_v23 }
 0x60e   : > { %11483 = vst [vmem:[#allocation93_spill] sm:$0xff] %v9172_v6  ;;  %v9174_v30 = vpop.permute.xlu0 %4022  ;;  %3471 = vmatmul.bf16.gmra.mxu0 %v2829_v41  ;;  %v11487_v6 = vld [vmem:[#allocation88_spill] sm:$0xff]  ;;  %v2831_v5 = vpack.c.b16 %v2817_v12, %v2815_v53  ;;  %v2832_v42 = vpack.c.b16 %v2818_v10, %v2816_v39  ;;  %v578_v28 = vmax.f32 %v416_v54, 0.0  ;;  %v11492_v10 = vrot.slane %v9134_v9, 2 }
 0x60f   : > { %11484 = vst [vmem:[#allocation90_spill] sm:$0xff] %v9174_v30  ;;  %v4417_v43 = vrot.slane %v3746_v11, 2  ;;  %6586 = vmatmul.msk.bf16.gmra.mxu2 %vm1130_vm0, %v2830_v44  ;;  %v9186_v47 = vadd.f32 %v3261_v55, %v11487_v6  ;;  %v4415_v30 = vrot.slane %v9154_v2, 2  ;;  %v576_v55 = vmax.f32 %v414_v59, 0.0 }
 0x610   : > { %11486 = vst [vmem:[#allocation57_spill] sm:$0xff] %v9178_v19  ;;  %v579_v50 = vmax.f32 %v417_v3, 0.0 }
 0x611   : > { %v9183_v18 = vsel %vm4268_vm1, %v4413_v46, %v4417_v43  ;;  %11488 = vst [vmem:[#allocation59_spill] sm:$0xff] %v9186_v47  ;;  %v11489_v46 = vld [vmem:[#allocation91_spill] sm:$0xff]  ;;  %v3935_v6 = vrot.slane %v9186_v47, 1  ;;  %v4419_v2 = vrot.slane %v9186_v47, 2  ;;  %v4416_v23 = vsel %vm4268_vm1, %v11492_v10, %v4415_v30 }
 0x612   : > { %v3604_v24 = vpop.f32.mrf.mxu2  ;;  %v663_v54 = vpack.c.bf16 %v579_v50, %v578_v28  ;;  %v11498_v47 = vld [vmem:[#allocation99_spill] sm:$0xff] }
 0x613   : > { %v3262_v41 = vpop.f32.mrf.mxu3  ;;  %4639 = vrot.lane.b32.xlu1 %v4410_v32, %s6724_s25  ;;  %v3434_v19 = vpop.f32.mrf.mxu0  ;;  %v577_v32 = vmax.f32 %v415_v49, 0.0 }
 0x614   : > { %v3263_v11 = vadd.f32 %v3262_v41, %v3090_v51  ;;  %v3093_v44 = vpop.f32.mrf.mxu1  ;;  %v3605_v51 = vadd.f32 %v3604_v24, %v3432_v1  ;;  %v2821_v28 = vunpack.c.l.b16 %v663_v54 }
 0x615   : > { %v9196_v27 = vpop.permute.xlu2 %4605  ;;  %v9202_v39 = vpop.permute.xlu1 %4024  ;;  %v662_v24 = vpack.c.bf16 %v577_v32, %v576_v55 }
 0x616   : > { %v9191_v43 = vadd.f32 %v3263_v11, %v11489_v46  ;;  %v9193_v33 = vpop.permute.xlu0 %4595  ;;  %11491 = vst [vmem:[#allocation62_spill] sm:$0xff] %v9202_v39  ;;  %v11493_v11 = vld [vmem:[#allocation92_spill] sm:$0xff]  ;;  %v11494_v39 = vld [vmem:[#allocation94_spill] sm:$0xff] }
 0x617   : > { %11490 = vst [vmem:[#allocation60_spill] sm:$0xff] %v9193_v33  ;;  %3132 = vmatmul.bf16.gmra.mxu1 %v2831_v5  ;;  %v3748_v46 = vadd.f32 %v3605_v51, %v11493_v11  ;;  %v2819_v55 = vunpack.c.l.b16 %v662_v24 }
 0x618   : > { %6554 = vmatmul.msk.bf16.gmra.mxu3 %vm1130_vm0, %v2832_v42  ;;  %v3936_v53 = vrot.slane %v9191_v43, 1  ;;  %v10886_v12 = vrot.slane %v9191_v43, 2 }
 0x619   : > { %v4422_v32 = vrot.slane %v3748_v46, 2 }
 0x61a   : > { %v3937_v59 = vsel %vm3859_vm2, %v3935_v6, %v3936_v53  ;;  %v4421_v41 = vsel %vm4268_vm1, %v4419_v2, %v10886_v12  ;;  %v3606_v1 = vpop.f32.mrf.mxu2  ;;  %v11495_v12 = vld [vmem:[#allocation95_spill] sm:$0xff] }
 0x61b   : > { %v3265_v49 = vpop.f32.mrf.mxu3  ;;  %4645 = vrot.lane.b32.xlu1 %v4416_v23, %s6724_s25  ;;  %4050 = vrot.lane.b32.xlu2 %v3937_v59, %s6725_s27  ;;  %v3607_v30 = vadd.f32 %v3606_v1, %v3434_v19  ;;  %v3437_v6 = vpop.f32.mrf.mxu0  ;;  %v259_v59 = vld [vmem:[%s6899_s26 + $0x270] sm:$0xff]  ;;  %v2822_v19 = vunpack.c.h.b16 %v663_v54 }
 0x61c   : > { %v3266_v3 = vadd.f32 %v3265_v49, %v3093_v44  ;;  %4649 = vrot.lane.b32.xlu0 %v4421_v41, %s6724_s25  ;;  %v3095_v10 = vpop.f32.mrf.mxu1  ;;  %v2820_v44 = vunpack.c.h.b16 %v662_v24  ;;  %v260_v41 = vld [vmem:[%s6899_s26 + $0x278] sm:$0xff]  ;;  %v418_v49 = vunpack.c.l.bf16 %v259_v59 }
 0x61d   : > { %v3750_v33 = vadd.f32 %v3607_v30, %v11495_v12  ;;  %v420_v24 = vunpack.c.l.bf16 %v260_v41  ;;  %v421_v11 = vunpack.c.h.bf16 %v260_v41  ;;  %v9234_v20 = vpop.permute.xlu1 %4597 }
 0x61e   : > { %v9216_v2 = vadd.f32 %v3266_v3, %v11494_v39  ;;  %v9219_v23 = vpop.permute.xlu0 %4601  ;;  %3476 = vmatmul.bf16.gmra.mxu0 %v2831_v5  ;;  %v9225_v39 = vpop.permute.xlu2 %4032  ;;  %v419_v5 = vunpack.c.h.bf16 %v259_v59  ;;  %v2834_v46 = vpack.c.b16 %v2822_v19, %v2820_v44 }
 0x61f   : > { %11496 = vst [vmem:[#allocation101_spill] sm:$0xff] %v9219_v23  ;;  %v4423_v50 = vrot.slane %v3750_v33, 2  ;;  %6587 = vmatmul.msk.bf16.gmra.mxu2 %vm1130_vm0, %v2832_v42  ;;  %v2833_v42 = vpack.c.b16 %v2821_v28, %v2819_v55 }
 0x620   : > { %v3938_v51 = vrot.slane %v9216_v2, 1  ;;  %v581_v41 = vmax.f32 %v419_v5, 0.0 }
 0x621   : > { %v9229_v1 = vsel %vm4268_vm1, %v4422_v32, %v4423_v50  ;;  %v580_v32 = vmax.f32 %v418_v49, 0.0 }
 0x622   : > { %v3939_v12 = vsel %vm3859_vm2, %v3936_v53, %v3938_v51  ;;  %v3609_v33 = vpop.f32.mrf.mxu2 }
 0x623   : > { %v3267_v3 = vpop.f32.mrf.mxu3  ;;  %4647 = vrot.lane.b32.xlu2 %v9183_v18, %s6724_s25  ;;  %v3610_v30 = vadd.f32 %v3609_v33, %v3437_v6  ;;  %v3439_v23 = vpop.f32.mrf.mxu0  ;;  %v10888_v18 = vrot.slane %v9216_v2, 2  ;;  %v664_v19 = vpack.c.bf16 %v581_v41, %v580_v32  ;;  %v11501_v41 = vld [vmem:[#allocation103_spill] sm:$0xff] }
 0x624   : > { %v3268_v54 = vadd.f32 %v3267_v3, %v3095_v10  ;;  %4052 = vrot.lane.b32.xlu0 %v3939_v12, %s6725_s27  ;;  %v3098_v53 = vpop.f32.mrf.mxu1  ;;  %v582_v10 = vmax.f32 %v420_v24, 0.0  ;;  %v583_v3 = vmax.f32 %v421_v11, 0.0 }
 0x625   : > { %v3752_v63 = vadd.f32 %v3610_v30, %v11498_v47  ;;  %v11500_v30 = vld [vmem:[#allocation102_spill] sm:$0xff] }
 0x626   : > { %v9237_v59 = vadd.f32 %v3268_v54, %v11497_v0  ;;  %v4029_v58 = vpop.permute.xlu0 %4028  ;;  %v11499_v0 = vrot.slane %v9191_v43, 2  ;;  %v9252_v5 = vpop.permute.xlu2 %4611 }
 0x627   : > { %3137 = vmatmul.bf16.gmra.mxu1 %v2833_v42  ;;  %v4427_v6 = vrot.slane %v3752_v63, 2  ;;  %v665_v63 = vpack.c.bf16 %v583_v3, %v582_v10  ;;  %v4172_v32 = vadd.f32 %v4029_v58, %v8918_v29  ;;  %v2823_v10 = vunpack.c.l.b16 %v664_v19 }
 0x628   : > { %6555 = vmatmul.msk.bf16.gmra.mxu3 %vm1130_vm0, %v2834_v46  ;;  %v3940_v55 = vrot.slane %v9237_v59, 1  ;;  %v4426_v47 = vsel %vm4268_vm1, %v11499_v0, %v10888_v18  ;;  %v4429_v29 = vrot.slane %v9237_v59, 2 }
 0x629   : > { %v4428_v44 = vsel %vm4268_vm1, %v4423_v50, %v4427_v6  ;;  %v2825_v3 = vunpack.c.l.b16 %v665_v63 }
 0x62a   : > { %v3941_v28 = vsel %vm3859_vm2, %v3938_v51, %v3940_v55  ;;  %v3611_v12 = vpop.f32.mrf.mxu2 }
 0x62b   : > { %v3270_v49 = vpop.f32.mrf.mxu3  ;;  %4054 = vrot.lane.b32.xlu1 %v3941_v28, %s6725_s27  ;;  %4653 = vrot.lane.b32.xlu2 %v4426_v47, %s6724_s25  ;;  %v3612_v51 = vadd.f32 %v3611_v12, %v3439_v23  ;;  %v3442_v24 = vpop.f32.mrf.mxu0  ;;  %v2824_v47 = vunpack.c.h.b16 %v664_v19  ;;  %v2826_v23 = vunpack.c.h.b16 %v665_v63 }
 0x62c   : > { %v3271_v33 = vadd.f32 %v3270_v49, %v3098_v53  ;;  %4655 = vrot.lane.b32.xlu0 %v4428_v44, %s6724_s25  ;;  %v3100_v11 = vpop.f32.mrf.mxu1 }
 0x62d   : > { %v4031_v54 = vpop.permute.xlu1 %4030  ;;  %v3754_v28 = vadd.f32 %v3612_v51, %v11501_v41  ;;  %v2835_v41 = vpack.c.b16 %v2825_v3, %v2823_v10 }
 0x62e   : > { %v9256_v50 = vadd.f32 %v3271_v33, %v11500_v30  ;;  %v4608_v0 = vpop.permute.xlu0 %4607  ;;  %3481 = vmatmul.bf16.gmra.mxu0 %v2833_v42  ;;  %v2836_v30 = vpack.c.b16 %v2826_v23, %v2824_v47 }
 0x62f   : > { %v4758_v53 = vsel %vm4733_vm3, %v9196_v27, %v4608_v0  ;;  %v4431_v44 = vrot.slane %v3754_v28, 2  ;;  %6588 = vmatmul.msk.bf16.gmra.mxu2 %vm1130_vm0, %v2834_v46  ;;  %v11503_v0 = vld [vmem:[#allocation105_spill] sm:$0xff] }
 0x630   : > { %v3942_v49 = vrot.slane %v9256_v50, 1  ;;  %v9263_v12 = vadd.f32 %v4758_v53, %v4172_v32  ;;  %v4433_v58 = vrot.slane %v9256_v50, 2 }
 0x631   : > { %v4432_v42 = vsel %vm4268_vm1, %v4427_v6, %v4431_v44  ;;  %v4618_v6 = vpop.permute.xlu2 %4617 }
 0x632   : > { %11502 = vst [vmem:[#allocation97_spill] sm:$0xff] %v9263_v12  ;;  %v3943_v33 = vsel %vm3859_vm2, %v3940_v55, %v3942_v49  ;;  %v3614_v27 = vpop.f32.mrf.mxu2  ;;  %v4434_v19 = vsel %vm4268_vm1, %v4429_v29, %v4433_v58 }
 0x633   : > { %v3272_v51 = vpop.f32.mrf.mxu3  ;;  %4651 = vrot.lane.b32.xlu1 %v9229_v1, %s6724_s25  ;;  %4056 = vrot.lane.b32.xlu2 %v3943_v33, %s6725_s27  ;;  %v3615_v46 = vadd.f32 %v3614_v27, %v3442_v24  ;;  %v3444_v32 = vpop.f32.mrf.mxu0  ;;  %v11504_v1 = vld [vmem:[#allocation106_spill] sm:$0xff] }
 0x634   : > { %v3273_v63 = vadd.f32 %v3272_v51, %v3100_v11  ;;  %4661 = vrot.lane.b32.xlu0 %v4434_v19, %s6724_s25  ;;  %v3103_v28 = vpop.f32.mrf.mxu1  ;;  %v11505_v11 = vrot.slane %v9216_v2, 2 }
 0x635   : > { %v9275_v55 = vpop.permute.xlu1 %4603  ;;  %v3756_v18 = vadd.f32 %v3615_v46, %v11504_v1 }
 0x636   : > { %v9278_v53 = vadd.f32 %v3273_v63, %v11503_v0  ;;  %v4614_v33 = vpop.permute.xlu0 %4613  ;;  %v4430_v47 = vsel %vm4268_vm1, %v11505_v11, %v4429_v29  ;;  %v4173_v63 = vadd.f32 %v4031_v54, %v8941_v60  ;;  %v11506_v29 = vld [vmem:[#allocation108_spill] sm:$0xff] }
 0x637   : > { %v4435_v12 = vrot.slane %v3756_v18, 2  ;;  %3142 = vmatmul.bf16.gmra.mxu1 %v2835_v41 }
 0x638   : > { %6556 = vmatmul.msk.bf16.gmra.mxu3 %vm1130_vm0, %v2836_v30  ;;  %v3944_v24 = vrot.slane %v9278_v53, 1 }
 0x639   : > { %v4436_v23 = vsel %vm4268_vm1, %v4431_v44, %v4435_v12 }
 0x63a   : > { %v3616_v3 = vpop.f32.mrf.mxu2  ;;  %v3945_v51 = vsel %vm3859_vm2, %v3942_v49, %v3944_v24  ;;  %v4437_v49 = vrot.slane %v9278_v53, 2 }
 0x63b   : > { %v3275_v10 = vpop.f32.mrf.mxu3  ;;  %4657 = vrot.lane.b32.xlu1 %v4430_v47, %s6724_s25  ;;  %4659 = vrot.lane.b32.xlu2 %v4432_v42, %s6724_s25  ;;  %v3617_v19 = vadd.f32 %v3616_v3, %v3444_v32  ;;  %v3447_v18 = vpop.f32.mrf.mxu0  ;;  %v11507_v42 = vld [vmem:[#allocation109_spill] sm:$0xff] }
 0x63c   : > { %v3276_v27 = vadd.f32 %v3275_v10, %v3103_v28  ;;  %4058 = vrot.lane.b32.xlu0 %v3945_v51, %s6725_s27  ;;  %v3105_v46 = vpop.f32.mrf.mxu1  ;;  %v4438_v3 = vsel %vm4268_vm1, %v4433_v58, %v4437_v49 }
 0x63d   : > { %v4610_v0 = vpop.permute.xlu1 %4609  ;;  %v9297_v11 = vpop.permute.xlu2 %4038  ;;  %v3758_v47 = vadd.f32 %v3617_v19, %v11507_v42  ;;  %v11509_v42 = vld [vmem:[#allocation112_spill] sm:$0xff] }
 0x63e   : > { %v9293_v1 = vadd.f32 %v3276_v27, %v11506_v29  ;;  %v4759_v44 = vsel %vm4733_vm3, %v4610_v0, %v9252_v5  ;;  %v4035_v32 = vpop.permute.xlu0 %4034  ;;  %3486 = vmatmul.bf16.gmra.mxu0 %v2835_v41  ;;  %v11508_v29 = vld [vmem:[#allocation111_spill] sm:$0xff] }
 0x63f   : > { %v9301_v28 = vadd.f32 %v4759_v44, %v4173_v63  ;;  %v4439_v10 = vrot.slane %v3758_v47, 2  ;;  %6589 = vmatmul.msk.bf16.gmra.mxu2 %vm1130_vm0, %v2836_v30  ;;  %v4174_v30 = vadd.f32 %v9225_v39, %v8955_v17  ;;  %v4175_v44 = vadd.f32 %v4035_v32, %v8976_v7 }
 0x640   : > { %v3946_v60 = vrot.slane %v9293_v1, 1 }
 0x641   : > { %v4440_v5 = vsel %vm4268_vm1, %v4435_v12, %v4439_v10 }
 0x642   : > { %v3947_v54 = vsel %vm3859_vm2, %v3944_v24, %v3946_v60  ;;  %v3619_v27 = vpop.f32.mrf.mxu2 }
 0x643   : > { %v3277_v51 = vpop.f32.mrf.mxu3  ;;  %4060 = vrot.lane.b32.xlu1 %v3947_v54, %s6725_s27  ;;  %4665 = vrot.lane.b32.xlu2 %v4438_v3, %s6724_s25  ;;  %v3620_v19 = vadd.f32 %v3619_v27, %v3447_v18  ;;  %v3449_v63 = vpop.f32.mrf.mxu0 }
 0x644   : > { %v3278_v41 = vadd.f32 %v3277_v51, %v3105_v46  ;;  %4667 = vrot.lane.b32.xlu0 %v4440_v5, %s6724_s25  ;;  %v3108_v0 = vpop.f32.mrf.mxu1 }
 0x645   : > { %v4616_v24 = vpop.permute.xlu1 %4615  ;;  %v3760_v47 = vadd.f32 %v3620_v19, %v11509_v42  ;;  %v4624_v5 = vpop.permute.xlu2 %4623  ;;  %v11511_v42 = vld [vmem:[#allocation114_spill] sm:$0xff] }
 0x646   : > { %v3761_v58 = vadd.f32 %v3278_v41, %v11508_v29  ;;  %v4760_v12 = vsel %vm4733_vm3, %v4614_v33, %v4616_v24  ;;  %v4620_v54 = vpop.permute.xlu0 %4619  ;;  %v4441_v33 = vrot.slane %v9293_v1, 2 }
 0x647   : > { %v9317_v3 = vadd.f32 %v4760_v12, %v4174_v30  ;;  %v4761_v18 = vsel %vm4733_vm3, %v4618_v6, %v4620_v54  ;;  %v4443_v51 = vrot.slane %v3760_v47, 2 }
 0x648   : > { %v3948_v46 = vrot.slane %v3761_v58, 1  ;;  %v9320_v27 = vadd.f32 %v4761_v18, %v4175_v44  ;;  %v4445_v17 = vrot.slane %v3761_v58, 2  ;;  %v4442_v44 = vsel %vm4268_vm1, %v4437_v49, %v4441_v33 }
 0x649   : > { %v4444_v32 = vsel %vm4268_vm1, %v4439_v10, %v4443_v51 }
 0x64a   : > { %11510 = vst [vmem:[#allocation65_spill] sm:$0xff] %v9320_v27  ;;  %v3949_v39 = vsel %vm3859_vm2, %v3946_v60, %v3948_v46  ;;  %v3621_v7 = vpop.f32.mrf.mxu2  ;;  %v4446_v29 = vsel %vm4268_vm1, %v4441_v33, %v4445_v17  ;;  %v11630_v27 = vld [vmem:[#allocation50_spill] sm:$0xff] }
 0x64b   : > { %v3280_v41 = vpop.f32.mrf.mxu3  ;;  %4663 = vrot.lane.b32.xlu1 %v4436_v23, %s6724_s25  ;;  %4062 = vrot.lane.b32.xlu2 %v3949_v39, %s6725_s27  ;;  %v3452_v19 = vpop.f32.mrf.mxu0  ;;  %v3622_v24 = vadd.f32 %v3621_v7, %v3449_v63 }
 0x64c   : > { %v3110_v6 = vpop.f32.mrf.mxu1  ;;  %4673 = vrot.lane.b32.xlu0 %v4446_v29, %s6724_s25  ;;  %v3281_v58 = vadd.f32 %v3280_v41, %v3108_v0 }
 0x64d   : > { %v4037_v30 = vpop.permute.xlu1 %4036  ;;  %v3762_v60 = vadd.f32 %v3622_v24, %v8345_v61  ;;  %v4630_v23 = vpop.permute.xlu2 %4629 }
 0x64e   : > { %v9332_v47 = vadd.f32 %v3281_v58, %v11511_v42  ;;  %v4176_v0 = vadd.f32 %v4037_v30, %v9025_v15 }
 0x64f   : > { %v4447_v12 = vrot.slane %v3762_v60, 2 }
 0x650   : > { %v4449_v33 = vrot.slane %v9332_v47, 2 }
 0x651   : > { %v4448_v63 = vsel %vm4268_vm1, %v4443_v51, %v4447_v12 }
 0x652   : > { %v3624_v10 = vpop.f32.mrf.mxu2 }
 0x653   : > { %v3282_v54 = vpop.f32.mrf.mxu3  ;;  %4669 = vrot.lane.b32.xlu1 %v4442_v44, %s6724_s25  ;;  %4671 = vrot.lane.b32.xlu2 %v4444_v32, %s6724_s25  ;;  %v3454_v46 = vpop.f32.mrf.mxu0  ;;  %v3625_v32 = vadd.f32 %v3624_v10, %v3452_v19  ;;  %v11512_v10 = vld [vmem:[#allocation115_spill] sm:$0xff] }
 0x654   : > { %v3283_v18 = vadd.f32 %v3282_v54, %v3110_v6  ;;  %v3113_v61 = vpop.f32.mrf.mxu1  ;;  %v3950_v6 = vrot.slane %v9332_v47, 1 }
 0x655   : > { %v4622_v17 = vpop.permute.xlu1 %4621  ;;  %v9354_v29 = vpop.permute.xlu2 %4044  ;;  %v3764_v19 = vadd.f32 %v3625_v32, %v8352_v13 }
 0x656   : > { %v9339_v39 = vadd.f32 %v3283_v18, %v8350_v4  ;;  %v4762_v49 = vsel %vm4733_vm3, %v4622_v17, %v4624_v5  ;;  %v9342_v41 = vpop.permute.xlu0 %4625 }
 0x657   : > { %v9344_v7 = vadd.f32 %v4762_v49, %v4176_v0 }
 0x658   : > { %v4450_v51 = vrot.slane %v9339_v39, 2  ;;  %v3951_v15 = vrot.slane %v9339_v39, 1 }
 0x65a   : > { %v4451_v30 = vsel %vm4268_vm1, %v4449_v33, %v4450_v51  ;;  %v3952_v4 = vsel %vm3859_vm2, %v3950_v6, %v3951_v15  ;;  %v3626_v5 = vpop.f32.mrf.mxu2 }
 0x65b   : > { %v3285_v24 = vpop.f32.mrf.mxu3  ;;  %4675 = vrot.lane.b32.xlu1 %v4448_v63, %s6724_s25  ;;  %4677 = vrot.lane.b32.xlu2 %v4451_v30, %s6724_s25  ;;  %v3627_v60 = vadd.f32 %v3626_v5, %v3454_v46  ;;  %v3457_v12 = vpop.f32.mrf.mxu0  ;;  %v4452_v63 = vrot.slane %v3764_v19, 2 }
 0x65c   : > { %v3286_v58 = vadd.f32 %v3285_v24, %v3113_v61  ;;  %4064 = vrot.lane.b32.xlu0 %v3952_v4, %s6725_s27  ;;  %v3115_v44 = vpop.f32.mrf.mxu1 }
 0x65d   : > { %v3766_v18 = vadd.f32 %v3627_v60, %v11512_v10  ;;  %v4636_v4 = vpop.permute.xlu2 %4635 }
 0x65e   : > { %v9359_v42 = vadd.f32 %v3286_v58, %v8359_v14  ;;  %v4041_v54 = vpop.permute.xlu0 %4040 }
 0x65f   : > { %v4453_v0 = vrot.slane %v3766_v18, 2  ;;  %v4178_v24 = vadd.f32 %v4041_v54, %v9048_v45 }
 0x660   : > { %v3953_v17 = vrot.slane %v9359_v42, 1  ;;  %v4455_v58 = vrot.slane %v9359_v42, 2 }
 0x661   : > { %v4454_v61 = vsel %vm4268_vm1, %v4452_v63, %v4453_v0 }
 0x662   : > { %v3954_v49 = vsel %vm3859_vm2, %v3951_v15, %v3953_v17  ;;  %v3629_v46 = vpop.f32.mrf.mxu2  ;;  %v4456_v63 = vsel %vm4268_vm1, %v4450_v51, %v4455_v58  ;;  %v4177_v51 = vadd.f32 %v9297_v11, %v9031_v35 }
 0x663   : > { %v3287_v13 = vpop.f32.mrf.mxu3  ;;  %4066 = vrot.lane.b32.xlu1 %v3954_v49, %s6725_s27  ;;  %v3630_v32 = vadd.f32 %v3629_v46, %v3457_v12  ;;  %v3459_v14 = vpop.f32.mrf.mxu0 }
 0x664   : > { %v3288_v33 = vadd.f32 %v3287_v13, %v3115_v44  ;;  %4679 = vrot.lane.b32.xlu0 %v4454_v61, %s6724_s25  ;;  %v3118_v6 = vpop.f32.mrf.mxu1 }
 0x665   : > { %v4043_v30 = vpop.permute.xlu1 %4042  ;;  %v3768_v15 = vadd.f32 %v3630_v32, %v8370_v37 }
 0x666   : > { %v9369_v5 = vadd.f32 %v3288_v33, %v8368_v21  ;;  %v4632_v19 = vpop.permute.xlu0 %4631 }
 0x667   : > { %v4764_v60 = vsel %vm4733_vm3, %v4630_v23, %v4632_v19  ;;  %v4457_v44 = vrot.slane %v3768_v15, 2 }
 0x668   : > { %v3955_v12 = vrot.slane %v9369_v5, 1  ;;  %v9375_v10 = vadd.f32 %v4764_v60, %v4178_v24  ;;  %v4459_v18 = vrot.slane %v9369_v5, 2 }
 0x669   : > { %v4458_v21 = vsel %vm4268_vm1, %v4453_v0, %v4457_v44 }
 0x66a   : > { %v3956_v45 = vsel %vm3859_vm2, %v3953_v17, %v3955_v12  ;;  %v3631_v37 = vpop.f32.mrf.mxu2  ;;  %v4460_v23 = vsel %vm4268_vm1, %v4455_v58, %v4459_v18 }
 0x66b   : > { %v3290_v54 = vpop.f32.mrf.mxu3  ;;  %4681 = vrot.lane.b32.xlu1 %v4456_v63, %s6724_s25  ;;  %4068 = vrot.lane.b32.xlu2 %v3956_v45, %s6725_s27  ;;  %v3632_v61 = vadd.f32 %v3631_v37, %v3459_v14  ;;  %v3462_v13 = vpop.f32.mrf.mxu0  ;;  %v4179_v63 = vadd.f32 %v4043_v30, %v9072_v36 }
 0x66c   : > { %v3291_v49 = vadd.f32 %v3290_v54, %v3118_v6  ;;  %4685 = vrot.lane.b32.xlu0 %v4460_v23, %s6724_s25  ;;  %v3120_v46 = vpop.f32.mrf.mxu1  ;;  %v4642_v14 = vpop.permute.xlu2 %4641 }
 0x66d   : > { %v4628_v17 = vpop.permute.xlu1 %4627  ;;  %v3770_v32 = vadd.f32 %v3632_v61, %v8379_v40 }
 0x66e   : > { %v9388_v0 = vadd.f32 %v3291_v49, %v8377_v57  ;;  %v4763_v33 = vsel %vm4733_vm3, %v9342_v41, %v4628_v17  ;;  %v9393_v24 = vpop.permute.xlu0 %4637 }
 0x66f   : > { %v9395_v6 = vadd.f32 %v4763_v33, %v4177_v51  ;;  %v4461_v15 = vrot.slane %v3770_v32, 2 }
 0x670   : > { %v3957_v58 = vrot.slane %v9388_v0, 1 }
 0x671   : > { %v4462_v35 = vsel %vm4268_vm1, %v4457_v44, %v4461_v15 }
 0x672   : > { %v3634_v57 = vpop.f32.mrf.mxu2  ;;  %v3958_v19 = vsel %vm3859_vm2, %v3955_v12, %v3957_v58 }
 0x673   : > { %v3292_v11 = vpop.f32.mrf.mxu3  ;;  %4683 = vrot.lane.b32.xlu2 %v4458_v21, %s6724_s25  ;;  %v3635_v41 = vadd.f32 %v3634_v57, %v3462_v13  ;;  %v3464_v40 = vpop.f32.mrf.mxu0  ;;  %v4463_v21 = vrot.slane %v9388_v0, 2 }
 0x674   : > { %v3293_v60 = vadd.f32 %v3292_v11, %v3120_v46  ;;  %4070 = vrot.lane.b32.xlu0 %v3958_v19, %s6725_s27  ;;  %v3123_v45 = vpop.f32.mrf.mxu1 }
 0x675   : > { %v4634_v54 = vpop.permute.xlu1 %4633  ;;  %v3772_v23 = vadd.f32 %v3635_v41, %v8388_v56  ;;  %v9411_v61 = vpop.permute.xlu2 %4050  ;;  %v4464_v30 = vsel %vm4268_vm1, %v4459_v18, %v4463_v21 }
 0x676   : > { %v9404_v37 = vadd.f32 %v3293_v60, %v8386_v22  ;;  %v4765_v44 = vsel %vm4733_vm3, %v4634_v54, %v4636_v4  ;;  %v4047_v49 = vpop.permute.xlu0 %4046 }
 0x677   : > { %v9409_v12 = vadd.f32 %v4765_v44, %v4179_v63  ;;  %v4465_v13 = vrot.slane %v3772_v23, 2  ;;  %v4181_v18 = vadd.f32 %v4047_v49, %v9112_v52 }
 0x678   : > { %v3959_v51 = vrot.slane %v9404_v37, 1 }
 0x679   : > { %v4466_v22 = vsel %vm4268_vm1, %v4461_v15, %v4465_v13 }
 0x67a   : > { %v3960_v36 = vsel %vm3859_vm2, %v3957_v58, %v3959_v51  ;;  %v3636_v56 = vpop.f32.mrf.mxu2 }
 0x67b   : > { %v3295_v46 = vpop.f32.mrf.mxu3  ;;  %4072 = vrot.lane.b32.xlu1 %v3960_v36, %s6725_s27  ;;  %4689 = vrot.lane.b32.xlu2 %v4464_v30, %s6724_s25  ;;  %v3637_v17 = vadd.f32 %v3636_v56, %v3464_v40  ;;  %v3467_v33 = vpop.f32.mrf.mxu0  ;;  %v4180_v30 = vadd.f32 %v9354_v29, %v9090_v16 }
 0x67c   : > { %v3296_v4 = vadd.f32 %v3295_v46, %v3123_v45  ;;  %4691 = vrot.lane.b32.xlu0 %v4466_v22, %s6724_s25  ;;  %v3125_v32 = vpop.f32.mrf.mxu1  ;;  %v4467_v45 = vrot.slane %v9404_v37, 2 }
 0x67d   : > { %v4049_v11 = vpop.permute.xlu1 %4048  ;;  %v3774_v15 = vadd.f32 %v3637_v17, %v8397_v48  ;;  %v4648_v54 = vpop.permute.xlu2 %4647 }
 0x67e   : > { %v9421_v57 = vadd.f32 %v3296_v4, %v8395_v8  ;;  %v4644_v58 = vpop.permute.xlu0 %4643 }
 0x67f   : > { %v4767_v19 = vsel %vm4733_vm3, %v4642_v14, %v4644_v58  ;;  %v4469_v60 = vrot.slane %v3774_v15, 2  ;;  %v4182_v15 = vadd.f32 %v4049_v11, %v9134_v9 }
 0x680   : > { %v3961_v41 = vrot.slane %v9421_v57, 1  ;;  %v9427_v63 = vadd.f32 %v4767_v19, %v4181_v18  ;;  %v4471_v40 = vrot.slane %v9421_v57, 2 }
 0x681   : > { %v4470_v44 = vsel %vm4268_vm1, %v4465_v13, %v4469_v60 }
 0x682   : > { %v3962_v8 = vsel %vm3859_vm2, %v3959_v51, %v3961_v41  ;;  %v3639_v48 = vpop.f32.mrf.mxu2  ;;  %v4472_v14 = vsel %vm4268_vm1, %v4467_v45, %v4471_v40 }
 0x683   : > { %v3297_v52 = vpop.f32.mrf.mxu3  ;;  %4687 = vrot.lane.b32.xlu1 %v4462_v35, %s6724_s25  ;;  %4074 = vrot.lane.b32.xlu2 %v3962_v8, %s6725_s27  ;;  %v3640_v49 = vadd.f32 %v3639_v48, %v3467_v33  ;;  %v3469_v36 = vpop.f32.mrf.mxu0  ;;  %v4468_v33 = vsel %vm4268_vm1, %v4463_v21, %v4467_v45 }
 0x684   : > { %v3298_v23 = vadd.f32 %v3297_v52, %v3125_v32  ;;  %4697 = vrot.lane.b32.xlu0 %v4472_v14, %s6724_s25  ;;  %v3128_v22 = vpop.f32.mrf.mxu1 }
 0x685   : > { %v4640_v51 = vpop.permute.xlu1 %4639  ;;  %v3776_v46 = vadd.f32 %v3640_v49, %v8406_v25  ;;  %v4654_v29 = vpop.permute.xlu2 %4653 }
 0x686   : > { %v3777_v13 = vadd.f32 %v3298_v23, %v8404_v38  ;;  %v4766_v35 = vsel %vm4733_vm3, %v9393_v24, %v4640_v51 }
 0x687   : > { %v9443_v56 = vadd.f32 %v4766_v35, %v4180_v30  ;;  %v4473_v17 = vrot.slane %v3776_v46, 2 }
 0x688   : > { %v3963_v4 = vrot.slane %v3777_v13, 1  ;;  %v4475_v21 = vrot.slane %v3777_v13, 2 }
 0x689   : > { %v4474_v32 = vsel %vm4268_vm1, %v4469_v60, %v4473_v17 }
 0x68a   : > { %v3641_v16 = vpop.f32.mrf.mxu2  ;;  %v3964_v38 = vsel %vm3859_vm2, %v3961_v41, %v3963_v4  ;;  %v4476_v41 = vsel %vm4268_vm1, %v4471_v40, %v4475_v21 }
 0x68b   : > { %v3300_v18 = vpop.f32.mrf.mxu3  ;;  %4693 = vrot.lane.b32.xlu1 %v4468_v33, %s6724_s25  ;;  %4695 = vrot.lane.b32.xlu2 %v4470_v44, %s6724_s25  ;;  %v3642_v24 = vadd.f32 %v3641_v16, %v3469_v36  ;;  %v3472_v25 = vpop.f32.mrf.mxu0 }
 0x68c   : > { %4076 = vrot.lane.b32.xlu0 %v3964_v38, %s6725_s27  ;;  %v3130_v58 = vpop.f32.mrf.mxu1  ;;  %v3301_v44 = vadd.f32 %v3300_v18, %v3128_v22 }
 0x68d   : > { %v4646_v19 = vpop.permute.xlu1 %4645  ;;  %v3778_v8 = vadd.f32 %v3642_v24, %v8415_v62  ;;  %v9464_v36 = vpop.permute.xlu2 %4056  ;;  %v11514_v24 = vld [vmem:[#allocation117_spill] sm:$0xff] }
 0x68e   : > { %v4768_v60 = vsel %vm4733_vm3, %v4646_v19, %v4648_v54  ;;  %v4650_v45 = vpop.permute.xlu0 %4649  ;;  %v9461_v11 = vadd.f32 %v3301_v44, %v8413_v34 }
 0x68f   : > { %v9454_v52 = vadd.f32 %v4768_v60, %v4182_v15  ;;  %v4477_v48 = vrot.slane %v3778_v8, 2  ;;  %v11516_v15 = vld [vmem:[#allocation118_spill] sm:$0xff] }
 0x690   : > { %v3965_v51 = vrot.slane %v9461_v11, 1 }
 0x691   : > { %v4478_v14 = vsel %vm4268_vm1, %v4473_v17, %v4477_v48 }
 0x692   : > { %v3644_v9 = vpop.f32.mrf.mxu2 }
 0x693   : > { %v3302_v23 = vpop.f32.mrf.mxu3  ;;  %4699 = vrot.lane.b32.xlu1 %v4474_v32, %s6724_s25  ;;  %4701 = vrot.lane.b32.xlu2 %v4476_v41, %s6724_s25  ;;  %v3474_v62 = vpop.f32.mrf.mxu0  ;;  %v3645_v22 = vadd.f32 %v3644_v9, %v3472_v25 }
 0x694   : > { %v3303_v54 = vadd.f32 %v3302_v23, %v3130_v58  ;;  %4703 = vrot.lane.b32.xlu0 %v4478_v14, %s6724_s25  ;;  %v3133_v49 = vpop.f32.mrf.mxu1 }
 0x695   : > { %v3780_v46 = vadd.f32 %v3645_v22, %v8424_v26  ;;  %v4479_v26 = vrot.slane %v9461_v11, 2  ;;  %v4660_v8 = vpop.permute.xlu2 %4659 }
 0x696   : > { %v9467_v40 = vadd.f32 %v3303_v54, %v8422_v31  ;;  %v4053_v30 = vpop.permute.xlu0 %4052 }
 0x697   : > { %v4184_v38 = vadd.f32 %v4053_v30, %v9191_v43  ;;  %v4482_v21 = vrot.slane %v3780_v46, 2  ;;  %v11519_v46 = vld [vmem:[#allocation120_spill] sm:$0xff] }
 0x698   : > { %11513 = vst [vmem:[#allocation63_spill] sm:$0xff] %v9467_v40  ;;  %v3966_v13 = vrot.slane %v9467_v40, 1  ;;  %v4480_v16 = vrot.slane %v9467_v40, 2  ;;  %v11593_v40 = vld [vmem:[#allocation61_spill] sm:$0xff] }
 0x69a   : > { %v3967_v35 = vsel %vm3859_vm2, %v3965_v51, %v3966_v13  ;;  %v3646_v4 = vpop.f32.mrf.mxu2  ;;  %v4481_v43 = vsel %vm4268_vm1, %v4479_v26, %v4480_v16  ;;  %v11518_v51 = vld [vmem:[#allocation59_spill] sm:$0xff] }
 0x69b   : > { %v3305_v34 = vpop.f32.mrf.mxu3  ;;  %4078 = vrot.lane.b32.xlu1 %v3967_v35, %s6725_s27  ;;  %v3647_v33 = vadd.f32 %v3646_v4, %v3474_v62  ;;  %v3477_v32 = vpop.f32.mrf.mxu0  ;;  %v4183_v35 = vadd.f32 %v9411_v61, %v11518_v51 }
 0x69c   : > { %v3306_v17 = vadd.f32 %v3305_v34, %v3133_v49  ;;  %v3135_v18 = vpop.f32.mrf.mxu1 }
 0x69d   : > { %v4055_v31 = vpop.permute.xlu1 %4054  ;;  %v3782_v58 = vadd.f32 %v3647_v33, %v11516_v15  ;;  %v11521_v33 = vld [vmem:[#allocation121_spill] sm:$0xff]  ;;  %v4666_v15 = vpop.permute.xlu2 %4665 }
 0x69e   : > { %v9477_v25 = vadd.f32 %v3306_v17, %v11514_v24  ;;  %v4656_v19 = vpop.permute.xlu0 %4655 }
 0x69f   : > { %v4770_v60 = vsel %vm4733_vm3, %v4654_v29, %v4656_v19  ;;  %v4483_v41 = vrot.slane %v3782_v58, 2 }
 0x6a0   : > { %11515 = vst [vmem:[#allocation66_spill] sm:$0xff] %v9477_v25  ;;  %v3968_v44 = vrot.slane %v9477_v25, 1  ;;  %v4485_v48 = vrot.slane %v9477_v25, 2  ;;  %v9484_v14 = vadd.f32 %v4770_v60, %v4184_v38  ;;  %v11604_v25 = vld [vmem:[#allocation33_spill] sm:$0xff] }
 0x6a1   : > { %v4484_v54 = vsel %vm4268_vm1, %v4482_v21, %v4483_v41 }
 0x6a2   : > { %11517 = vst [vmem:[#allocation107_spill] sm:$0xff] %v9484_v14  ;;  %v3969_v23 = vsel %vm3859_vm2, %v3966_v13, %v3968_v44  ;;  %v4486_v9 = vsel %vm4268_vm1, %v4480_v16, %v4485_v48  ;;  %v3649_v29 = vpop.f32.mrf.mxu2 }
 0x6a3   : > { %v3307_v62 = vpop.f32.mrf.mxu3  ;;  %4705 = vrot.lane.b32.xlu1 %v4481_v43, %s6724_s25  ;;  %4080 = vrot.lane.b32.xlu2 %v3969_v23, %s6725_s27  ;;  %v3650_v30 = vadd.f32 %v3649_v29, %v3477_v32  ;;  %v3479_v22 = vpop.f32.mrf.mxu0  ;;  %v4185_v43 = vadd.f32 %v4055_v31, %v9216_v2 }
 0x6a4   : > { %v3308_v49 = vadd.f32 %v3307_v62, %v3135_v18  ;;  %4709 = vrot.lane.b32.xlu0 %v4486_v9, %s6724_s25  ;;  %v3138_v34 = vpop.f32.mrf.mxu1  ;;  %v11523_v62 = vld [vmem:[#allocation123_spill] sm:$0xff] }
 0x6a5   : > { %v4652_v13 = vpop.permute.xlu1 %4651  ;;  %v3784_v16 = vadd.f32 %v3650_v30, %v11521_v33 }
 0x6a6   : > { %v9496_v4 = vadd.f32 %v3308_v49, %v11519_v46  ;;  %v4769_v17 = vsel %vm4733_vm3, %v4650_v45, %v4652_v13  ;;  %v9500_v38 = vpop.permute.xlu0 %4661  ;;  %v9524_v46 = vpop.permute.xlu2 %4062 }
 0x6a7   : > { %v9502_v24 = vadd.f32 %v4769_v17, %v4183_v35  ;;  %v4487_v32 = vrot.slane %v3784_v16, 2 }
 0x6a8   : > { %11520 = vst [vmem:[#allocation104_spill] sm:$0xff] %v9496_v4  ;;  %v3970_v18 = vrot.slane %v9496_v4, 1  ;;  %v4489_v9 = vrot.slane %v9496_v4, 2  ;;  %v11591_v4 = vld [vmem:[#allocation27_spill] sm:$0xff] }
 0x6a9   : > { %11522 = vst [vmem:[#allocation68_spill] sm:$0xff] %v9502_v24  ;;  %v4488_v61 = vsel %vm4268_vm1, %v4483_v41, %v4487_v32  ;;  %v11525_v41 = vld [vmem:[#allocation124_spill] sm:$0xff] }
 0x6aa   : > { %v3971_v58 = vsel %vm3859_vm2, %v3968_v44, %v3970_v18  ;;  %v3651_v26 = vpop.f32.mrf.mxu2  ;;  %v4490_v2 = vsel %vm4268_vm1, %v4485_v48, %v4489_v9 }
 0x6ab   : > { %v3310_v19 = vpop.f32.mrf.mxu3  ;;  %4707 = vrot.lane.b32.xlu2 %v4484_v54, %s6724_s25  ;;  %v3652_v45 = vadd.f32 %v3651_v26, %v3479_v22  ;;  %v3482_v60 = vpop.f32.mrf.mxu0 }
 0x6ac   : > { %v3311_v21 = vadd.f32 %v3310_v19, %v3138_v34  ;;  %4082 = vrot.lane.b32.xlu0 %v3971_v58, %s6725_s27  ;;  %v3140_v54 = vpop.f32.mrf.mxu1  ;;  %v11527_v19 = vld [vmem:[#allocation100_spill] sm:$0xff] }
 0x6ad   : > { %v4658_v23 = vpop.permute.xlu1 %4657  ;;  %v3786_v49 = vadd.f32 %v3652_v45, %v11525_v41 }
 0x6ae   : > { %v9512_v29 = vadd.f32 %v3311_v21, %v11523_v62  ;;  %v4771_v44 = vsel %vm4733_vm3, %v4658_v23, %v4660_v8  ;;  %v4059_v30 = vpop.permute.xlu0 %4058 }
 0x6af   : > { %v9516_v51 = vadd.f32 %v4771_v44, %v4185_v43  ;;  %v4491_v22 = vrot.slane %v3786_v49, 2  ;;  %v4187_v48 = vadd.f32 %v4059_v30, %v9256_v50 }
 0x6b0   : > { %11524 = vst [vmem:[#allocation70_spill] sm:$0xff] %v9512_v29  ;;  %v3972_v35 = vrot.slane %v9512_v29, 1  ;;  %v4493_v41 = vrot.slane %v9512_v29, 2  ;;  %v11579_v29 = vld [vmem:[#allocation24_spill] sm:$0xff] }
 0x6b1   : > { %11526 = vst [vmem:[#allocation71_spill] sm:$0xff] %v9516_v51  ;;  %v4492_v31 = vsel %vm4268_vm1, %v4487_v32, %v4491_v22  ;;  %v11529_v32 = vld [vmem:[#allocation96_spill] sm:$0xff] }
 0x6b2   : > { %v3973_v34 = vsel %vm3859_vm2, %v3970_v18, %v3972_v35  ;;  %v3654_v8 = vpop.f32.mrf.mxu2 }
 0x6b3   : > { %v3312_v13 = vpop.f32.mrf.mxu3  ;;  %4084 = vrot.lane.b32.xlu1 %v3973_v34, %s6725_s27  ;;  %4713 = vrot.lane.b32.xlu2 %v4490_v2, %s6724_s25  ;;  %v3655_v33 = vadd.f32 %v3654_v8, %v3482_v60  ;;  %v3484_v58 = vpop.f32.mrf.mxu0  ;;  %v11531_v8 = vld [vmem:[#allocation126_spill] sm:$0xff] }
 0x6b4   : > { %v3313_v17 = vadd.f32 %v3312_v13, %v3140_v54  ;;  %4715 = vrot.lane.b32.xlu0 %v4492_v31, %s6724_s25  ;;  %v3143_v45 = vpop.f32.mrf.mxu1  ;;  %v4186_v31 = vadd.f32 %v9464_v36, %v9237_v59 }
 0x6b5   : > { %v4061_v16 = vpop.permute.xlu1 %4060  ;;  %v3788_v26 = vadd.f32 %v3655_v33, %v11529_v32  ;;  %v4672_v33 = vpop.permute.xlu2 %4671 }
 0x6b6   : > { %v9528_v18 = vadd.f32 %v3313_v17, %v11527_v19  ;;  %v4668_v21 = vpop.permute.xlu0 %4667 }
 0x6b7   : > { %v4773_v43 = vsel %vm4733_vm3, %v4666_v15, %v4668_v21  ;;  %v4495_v60 = vrot.slane %v3788_v26, 2  ;;  %v4494_v21 = vsel %vm4268_vm1, %v4489_v9, %v4493_v41 }
 0x6b8   : > { %11528 = vst [vmem:[#allocation73_spill] sm:$0xff] %v9528_v18  ;;  %v3974_v23 = vrot.slane %v9528_v18, 1  ;;  %v4497_v62 = vrot.slane %v9528_v18, 2  ;;  %v9535_v44 = vadd.f32 %v4773_v43, %v4187_v48  ;;  %v11580_v18 = vld [vmem:[#allocation140_spill] sm:$0xff] }
 0x6b9   : > { %v4496_v54 = vsel %vm4268_vm1, %v4491_v22, %v4495_v60 }
 0x6ba   : > { %11530 = vst [vmem:[#allocation74_spill] sm:$0xff] %v9535_v44  ;;  %v3975_v49 = vsel %vm3859_vm2, %v3972_v35, %v3974_v23  ;;  %v3656_v30 = vpop.f32.mrf.mxu2  ;;  %v4498_v15 = vsel %vm4268_vm1, %v4493_v41, %v4497_v62  ;;  %v11535_v41 = vld [vmem:[#allocation128_spill] sm:$0xff] }
 0x6bb   : > { %v3315_v50 = vpop.f32.mrf.mxu3  ;;  %4711 = vrot.lane.b32.xlu1 %v4488_v61, %s6724_s25  ;;  %4086 = vrot.lane.b32.xlu2 %v3975_v49, %s6725_s27  ;;  %v3657_v2 = vadd.f32 %v3656_v30, %v3484_v58  ;;  %v11533_v61 = vld [vmem:[#allocation127_spill] sm:$0xff]  ;;  %v3487_v48 = vpop.f32.mrf.mxu0  ;;  %v4188_v30 = vadd.f32 %v4061_v16, %v9278_v53 }
 0x6bc   : > { %v3316_v34 = vadd.f32 %v3315_v50, %v3143_v45  ;;  %4721 = vrot.lane.b32.xlu0 %v4498_v15, %s6724_s25  ;;  %v3145_v26 = vpop.f32.mrf.mxu1 }
 0x6bd   : > { %v4664_v13 = vpop.permute.xlu1 %4663  ;;  %v3790_v17 = vadd.f32 %v3657_v2, %v11533_v61  ;;  %v11536_v2 = vld [vmem:[#allocation129_spill] sm:$0xff] }
 0x6be   : > { %v9547_v35 = vadd.f32 %v3316_v34, %v11531_v8  ;;  %v4772_v22 = vsel %vm4733_vm3, %v9500_v38, %v4664_v13  ;;  %v4674_v49 = vpop.permute.xlu0 %4673  ;;  %v9568_v8 = vpop.permute.xlu2 %4677 }
 0x6bf   : > { %v9552_v19 = vadd.f32 %v4772_v22, %v4186_v31  ;;  %v4499_v32 = vrot.slane %v3790_v17, 2 }
 0x6c0   : > { %11532 = vst [vmem:[#allocation113_spill] sm:$0xff] %v9547_v35  ;;  %v3976_v58 = vrot.slane %v9547_v35, 1  ;;  %v4501_v9 = vrot.slane %v9547_v35, 2 }
 0x6c1   : > { %11534 = vst [vmem:[#allocation110_spill] sm:$0xff] %v9552_v19  ;;  %v4500_v59 = vsel %vm4268_vm1, %v4495_v60, %v4499_v32  ;;  %v11596_v19 = vld [vmem:[#allocation64_spill] sm:$0xff] }
 0x6c2   : > { %v3659_v38 = vpop.f32.mrf.mxu2  ;;  %v3977_v45 = vsel %vm3859_vm2, %v3974_v23, %v3976_v58  ;;  %v4502_v53 = vsel %vm4268_vm1, %v4497_v62, %v4501_v9 }
 0x6c3   : > { %v3317_v36 = vpop.f32.mrf.mxu3  ;;  %4717 = vrot.lane.b32.xlu1 %v4494_v21, %s6724_s25  ;;  %4719 = vrot.lane.b32.xlu2 %v4496_v54, %s6724_s25  ;;  %v3660_v50 = vadd.f32 %v3659_v38, %v3487_v48  ;;  %v3489_v22 = vpop.f32.mrf.mxu0  ;;  %v4189_v48 = vadd.f32 %v9524_v46, %v9293_v1  ;;  %v11544_v1 = vld [vmem:[#allocation150_spill] sm:$0xff] }
 0x6c4   : > { %v3318_v43 = vadd.f32 %v3317_v36, %v3145_v26  ;;  %4088 = vrot.lane.b32.xlu0 %v3977_v45, %s6725_s27  ;;  %v11541_v45 = vld [vmem:[#allocation147_spill] sm:$0xff]  ;;  %v11545_v46 = vld [vmem:[#allocation142_spill] sm:$0xff] }
 0x6c5   : > { %v4670_v15 = vpop.permute.xlu1 %4669  ;;  %v3792_v31 = vadd.f32 %v3660_v50, %v11536_v2 }
 0x6c6   : > { %v3793_v60 = vadd.f32 %v3318_v43, %v11535_v41  ;;  %v4774_v34 = vsel %vm4733_vm3, %v4670_v15, %v4672_v33  ;;  %v11543_v15 = vld [vmem:[#allocation28_spill] sm:$0xff] }
 0x6c7   : > { %v9566_v54 = vadd.f32 %v4774_v34, %v4188_v30  ;;  %v4503_v23 = vrot.slane %v3792_v31, 2  ;;  %v11542_v30 = vld [vmem:[#allocation144_spill] sm:$0xff]  ;;  %v9589_v34 = vpop.permute.xlu2 %4068  ;;  %v11546_v31 = vld [vmem:[#allocation131_spill] sm:$0xff] }
 0x6c8   : > { %v3978_v13 = vrot.slane %v3793_v60, 1  ;;  %v4735_v41 = vsel %vm4733_vm3, %v11543_v15, %v11542_v30  ;;  %v11556_v30 = vld [vmem:[#allocation152_spill] sm:$0xff]  ;;  %v11557_v15 = vld [vmem:[#allocation5_spill] sm:$0xff] }
 0x6c9   : > { %11537 = vst [vmem:[#allocation76_spill] sm:$0xff] %v9566_v54  ;;  %v4504_v16 = vsel %vm4268_vm1, %v4499_v32, %v4503_v23  ;;  %v11540_v32 = vld [vmem:[#allocation132_spill] sm:$0xff] }
 0x6ca   : > { %v3979_v61 = vsel %vm3859_vm2, %v3976_v58, %v3978_v13  ;;  %v3661_v17 = vpop.f32.mrf.mxu2  ;;  %v11538_v58 = vld [vmem:[#allocation130_spill] sm:$0xff]  ;;  %v4149_v43 = vadd.f32 %v11541_v45, %v11540_v32  ;;  %v11555_v45 = vld [vmem:[#allocation12_spill] sm:$0xff] }
 0x6cb   : > { %4090 = vrot.lane.b32.xlu1 %v3979_v61, %s6725_s27  ;;  %4725 = vrot.lane.b32.xlu2 %v4502_v53, %s6724_s25  ;;  %v3662_v33 = vadd.f32 %v3661_v17, %v3489_v22  ;;  %v11547_v13 = vld [vmem:[#allocation22_spill] sm:$0xff]  ;;  %v11548_v61 = vld [vmem:[#allocation40_spill] sm:$0xff]  ;;  %v11549_v53 = vld [vmem:[#allocation31_spill] sm:$0xff] }
 0x6cc   : > { %4727 = vrot.lane.b32.xlu0 %v4504_v16, %s6724_s25  ;;  %v4148_v22 = vadd.f32 %v11547_v13, %v11546_v31  ;;  %v4736_v16 = vsel %vm4733_vm3, %v11549_v53, %v11548_v61  ;;  %v9602_v17 = vadd.f32 %v4735_v41, %v4149_v43  ;;  %v11554_v32 = vld [vmem:[#allocation134_spill] sm:$0xff]  ;;  %v11561_v31 = vld [vmem:[#allocation148_spill] sm:$0xff]  ;;  %v11563_v53 = vld [vmem:[#allocation149_spill] sm:$0xff] }
 0x6cd   : > { %v4676_v26 = vpop.permute.xlu1 %4675  ;;  %v3794_v62 = vadd.f32 %v3662_v33, %v11538_v58  ;;  %v11550_v33 = vld [vmem:[#allocation133_spill] sm:$0xff]  ;;  %v11553_v58 = vld [vmem:[#allocation19_spill] sm:$0xff]  ;;  %v11562_v61 = vld [vmem:[#allocation136_spill] sm:$0xff] }
 0x6ce   : > { %v4775_v21 = vsel %vm4733_vm3, %v4674_v49, %v4676_v26  ;;  %v9579_v36 = vpop.permute.xlu0 %4064  ;;  %v4734_v49 = vsel %vm4733_vm3, %v11545_v46, %v11544_v1  ;;  %v11558_v1 = vld [vmem:[#allocation4_spill] sm:$0xff]  ;;  %v11559_v46 = vld [vmem:[#allocation15_spill] sm:$0xff] }
 0x6cf   : > { %v9582_v38 = vadd.f32 %v4775_v21, %v4189_v48  ;;  %v4507_v50 = vrot.slane %v3794_v62, 2  ;;  %v11551_v48 = vld [vmem:[#allocation151_spill] sm:$0xff]  ;;  %v11552_v21 = vld [vmem:[#allocation2_spill] sm:$0xff]  ;;  %v9609_v62 = vadd.f32 %v4734_v49, %v4148_v22  ;;  %v4739_v43 = vsel %vm4733_vm3, %v11559_v46, %v11558_v1  ;;  %v11564_v1 = vld [vmem:[#allocation20_spill] sm:$0xff] }
 0x6d0   : > { %v4150_v26 = vadd.f32 %v11551_v48, %v11550_v33  ;;  %v4153_v33 = vadd.f32 %v11563_v53, %v11562_v61  ;;  %v4505_v22 = vrot.slane %v3793_v60, 2  ;;  %v11565_v46 = vld [vmem:[#allocation14_spill] sm:$0xff]  ;;  %v11571_v61 = vld [vmem:[#allocation23_spill] sm:$0xff] }
 0x6d1   : > { %11539 = vst [vmem:[#allocation77_spill] sm:$0xff] %v9582_v38  ;;  %v4508_v2 = vsel %vm4268_vm1, %v4503_v23, %v4507_v50  ;;  %v4737_v23 = vsel %vm4733_vm3, %v11553_v58, %v11552_v21  ;;  %v4151_v50 = vadd.f32 %v11555_v45, %v11554_v32  ;;  %v5017_v45 = vrot.slane %v9602_v17, 4  ;;  %v11567_v60 = vld [vmem:[#allocation6_spill] sm:$0xff]  ;;  %v4684_v38 = vpop.permute.xlu2 %4683 }
 0x6d2   : > { %v9623_v49 = vadd.f32 %v4736_v16, %v4150_v26  ;;  %v9631_v32 = vadd.f32 %v4739_v43, %v4153_v33  ;;  %v4740_v16 = vsel %vm4733_vm3, %v11565_v46, %v11564_v1  ;;  %v11566_v26 = vld [vmem:[#allocation43_spill] sm:$0xff]  ;;  %v11569_v43 = vld [vmem:[#allocation46_spill] sm:$0xff] }
 0x6d3   : > { %4723 = vrot.lane.b32.xlu1 %v4500_v59, %s6724_s25  ;;  %4731 = vrot.lane.b32.xlu2 %v4508_v2, %s6724_s25  ;;  %v4738_v59 = vsel %vm4733_vm3, %v11557_v15, %v11556_v30  ;;  %v11560_v2 = vld [vmem:[#allocation135_spill] sm:$0xff]  ;;  %v9627_v21 = vadd.f32 %v4737_v23, %v4151_v50  ;;  %v4905_v30 = vrot.slane %v9609_v62, 4  ;;  %v4506_v23 = vsel %vm4268_vm1, %v4501_v9, %v4505_v22  ;;  %v11577_v50 = vld [vmem:[#allocation72_spill] sm:$0xff]  ;;  %v11582_v22 = vld [vmem:[#allocation29_spill] sm:$0xff] }
 0x6d4   : > { %v4152_v13 = vadd.f32 %v11561_v31, %v11560_v2  ;;  %v4741_v2 = vsel %vm4733_vm3, %v11567_v60, %v11566_v26  ;;  %v11572_v33 = vld [vmem:[#allocation39_spill] sm:$0xff]  ;;  %v11575_v26 = vld [vmem:[#allocation17_spill] sm:$0xff]  ;;  %v11576_v60 = vld [vmem:[#allocation146_spill] sm:$0xff] }
 0x6d5   : > { %v4067_v41 = vpop.permute.xlu1 %4066  ;;  %v11573_v15 = vld [vmem:[#allocation67_spill] sm:$0xff] }
 0x6d6   : > { %v9625_v48 = vpop.permute.xlu0 %4679  ;;  %v9629_v58 = vadd.f32 %v4738_v59, %v4152_v13  ;;  %v11568_v59 = vld [vmem:[#allocation137_spill] sm:$0xff]  ;;  %v11570_v13 = vld [vmem:[#allocation138_spill] sm:$0xff]  ;;  %v4749_v35 = vsel %vm4733_vm3, %v11573_v15, %v11572_v33  ;;  %v11574_v46 = vld [vmem:[#allocation139_spill] sm:$0xff] }
 0x6d7   : > { %v4154_v31 = vadd.f32 %v11569_v43, %v11568_v59  ;;  %v4155_v53 = vadd.f32 %v11571_v61, %v11570_v13  ;;  %v4156_v9 = vadd.f32 %v11575_v26, %v11574_v46  ;;  %v4163_v59 = vadd.f32 %v11577_v50, %v11576_v60  ;;  %v11578_v33 = vld [vmem:[#allocation13_spill] sm:$0xff]  ;;  %v11581_v1 = vld [vmem:[#allocation55_spill] sm:$0xff] }
 0x6d8   : > { %v4191_v61 = vadd.f32 %v4067_v41, %v9339_v39  ;;  %v4157_v54 = vadd.f32 %v11581_v1, %v11580_v18  ;;  %v11583_v50 = vld [vmem:[#allocation21_spill] sm:$0xff]  ;;  %v5041_v41 = vrot.slane %v9395_v6, 4  ;;  %v11587_v60 = vld [vmem:[#allocation7_spill] sm:$0xff]  ;;  %v11589_v1 = vld [vmem:[#allocation8_spill] sm:$0xff] }
 0x6d9   : > { %v9658_v43 = vadd.f32 %v4740_v16, %v4154_v31  ;;  %v9660_v13 = vadd.f32 %v4741_v2, %v4155_v53  ;;  %v4861_v44 = vadd.f32 %v4749_v35, %v4163_v59  ;;  %v4743_v16 = vsel %vm4733_vm3, %v11583_v50, %v11582_v22  ;;  %v11584_v2 = vld [vmem:[#allocation81_spill] sm:$0xff]  ;;  %v11585_v31 = vld [vmem:[#allocation10_spill] sm:$0xff] }
 0x6da   : > { %v4748_v39 = vsel %vm4733_vm3, %v11585_v31, %v11584_v2  ;;  %v11588_v35 = vld [vmem:[#allocation145_spill] sm:$0xff]  ;;  %v6726_v59 = vmov 1983009808   ;;  %v11592_v50 = vld [vmem:[#allocation26_spill] sm:$0xff] }
 0x6db   : > { %4729 = vrot.lane.b32.xlu1 %v4506_v23, %s6724_s25  ;;  %v4159_v23 = vadd.f32 %v11579_v29, %v11578_v33  ;;  %v11586_v29 = vld [vmem:[#allocation30_spill] sm:$0xff]  ;;  %v11590_v33 = vld [vmem:[#allocation16_spill] sm:$0xff]  ;;  %v4744_v2 = vsel %vm4733_vm3, %v11593_v40, %v11592_v50  ;;  %v5015_v14 = vrot.slane %v4861_v44, 4 }
 0x6dc   : > { %v4742_v18 = vsel %vm4733_vm3, %v11587_v60, %v11586_v29  ;;  %v4158_v22 = vadd.f32 %v11591_v4, %v11590_v33  ;;  %v11597_v60 = vld [vmem:[#allocation69_spill] sm:$0xff]  ;;  %v9698_v4 = vadd.f32 %v4743_v16, %v4157_v54  ;;  %v11600_v40 = vld [vmem:[#allocation32_spill] sm:$0xff] }
 0x6dd   : > { %v4682_v15 = vpop.permute.xlu1 %4681  ;;  %v9696_v51 = vadd.f32 %v4742_v18, %v4156_v9  ;;  %v11599_v33 = vld [vmem:[#allocation141_spill] sm:$0xff]  ;;  %v5018_v18 = vsel %vm4903_vm4, %v4861_v44, %v5017_v45  ;;  %v11614_v45 = vld [vmem:[#allocation3_spill] sm:$0xff] }
 0x6de   : > { %v4777_v46 = vsel %vm4733_vm3, %v4682_v15, %v4684_v38  ;;  %v9668_v26 = vpop.permute.xlu0 %4685  ;;  %v4162_v38 = vadd.f32 %v11589_v1, %v11588_v35  ;;  %v4908_v15 = vunpack.c.l.s4 %v6726_v59  ;;  %v11598_v35 = vld [vmem:[#allocation9_spill] sm:$0xff]  ;;  %v4160_v50 = vadd.f32 %v11600_v40, %v11599_v33 }
 0x6df   : > { %v4889_v53 = vadd.f32 %v4777_v46, %v4191_v61  ;;  %v11595_v46 = vld [vmem:[#allocation36_spill] sm:$0xff]  ;;  %v4746_v1 = vsel %vm4733_vm3, %v11598_v35, %v11597_v60  ;;  %v11605_v60 = vld [vmem:[#allocation38_spill] sm:$0xff]  ;;  %v11610_v35 = vld [vmem:[#allocation41_spill] sm:$0xff] }
 0x6e0   : > { %v4745_v29 = vsel %vm4733_vm3, %v11596_v19, %v11595_v46  ;;  %v4860_v59 = vadd.f32 %v4748_v39, %v4162_v38  ;;  %v11602_v19 = vld [vmem:[#allocation143_spill] sm:$0xff]  ;;  %v4747_v39 = vsel %vm4733_vm3, %v11605_v60, %v11604_v25  ;;  %v9713_v9 = vunpack.c.0.s8 %v4908_v15  ;;  %v11616_v60 = vld [vmem:[#allocation84_spill] sm:$0xff] }
 0x6e1   : > { %v5039_v31 = vrot.slane %v4889_v53, 4  ;;  %v9688_v61 = vsel %vm4903_vm4, %v4889_v53, %v5041_v41  ;;  %v9706_v53 = vadd.f32 %v4744_v2, %v4158_v22  ;;  %v11603_v46 = vld [vmem:[#allocation35_spill] sm:$0xff]  ;;  %v9715_v54 = vadd.f32 %v4745_v29, %v4159_v23  ;;  %v4690_v2 = vpop.permute.xlu2 %4689 }
 0x6e2   : > { %11594 = vst [vmem:[#allocation79_spill] sm:$0xff] %v9688_v61  ;;  %v4161_v61 = vadd.f32 %v11603_v46, %v11602_v19  ;;  %v9717_v16 = vadd.f32 %v4746_v1, %v4160_v50  ;;  %v11607_v38 = vld [vmem:[#allocation75_spill] sm:$0xff]  ;;  %v4902_v40 = vrot.slane %v4860_v59, 4  ;;  %v5016_v25 = vsel %vm4903_vm4, %v5015_v14, %v9602_v17  ;;  %v11612_v19 = vld [vmem:[#allocation42_spill] sm:$0xff] }
 0x6e3   : > { %v9704_v41 = vsel %vm4903_vm4, %v5039_v31, %v9395_v6  ;;  %v11608_v6 = vld [vmem:[#allocation45_spill] sm:$0xff]  ;;  %v11611_v15 = vld [vmem:[#allocation87_spill] sm:$0xff]  ;;  %v4906_v44 = vsel %vm4903_vm4, %v4860_v59, %v4905_v30  ;;  %v9747_v59 = vperm.slane %v5016_v25, %v9713_v9  ;;  %v11620_v25 = vld [vmem:[#allocation18_spill] sm:$0xff] }
 0x6e4   : > { %11601 = vst [vmem:[#allocation80_spill] sm:$0xff] %v9704_v41  ;;  %v4750_v22 = vsel %vm4733_vm3, %v11608_v6, %v11607_v38  ;;  %v11609_v31 = vld [vmem:[#allocation25_spill] sm:$0xff]  ;;  %v4752_v23 = vsel %vm4733_vm3, %v11612_v19, %v11611_v15  ;;  %v9730_v1 = vadd.f32 %v4747_v39, %v4161_v61  ;;  %v11615_v50 = vld [vmem:[#allocation47_spill] sm:$0xff]  ;;  %v11617_v38 = vld [vmem:[#allocation78_spill] sm:$0xff]  ;;  %v9742_v41 = vperm.slane %v5018_v18, %v9713_v9 }
 0x6e5   : > { %11606 = vst [vmem:[#allocation119_spill] sm:$0xff] %v9717_v16  ;;  %v4164_v33 = vadd.f32 %v11610_v35, %v11609_v31  ;;  %v4166_v46 = vadd.f32 %v11615_v50, %v11614_v45  ;;  %v4751_v6 = vsel %vm4733_vm3, %v11617_v38, %v11616_v60  ;;  %v11618_v35 = vld [vmem:[#allocation34_spill] sm:$0xff]  ;;  %v11619_v14 = vld [vmem:[#allocation11_spill] sm:$0xff]  ;;  %v4917_v61 = vrot.slane %v9660_v13, 4  ;;  %v11622_v30 = vld [vmem:[#allocation60_spill] sm:$0xff] }
 0x6e6   : > { %v4071_v29 = vpop.permute.xlu0 %4070  ;;  %11613 = vst [vmem:[#allocation116_spill] sm:$0xff] %v9730_v1  ;;  %v4165_v17 = vadd.f32 %v11619_v14, %v11618_v35  ;;  %v4904_v45 = vsel %vm4903_vm4, %v4902_v40, %v9609_v62  ;;  %v9753_v50 = vperm.slane %v4906_v44, %v9713_v9  ;;  %v11621_v35 = vld [vmem:[#allocation44_spill] sm:$0xff]  ;;  %v11623_v62 = vld [vmem:[#allocation51_spill] sm:$0xff]  ;;  %v11627_v19 = vld [vmem:[#allocation54_spill] sm:$0xff] }
 0x6e7   : > { %v4862_v15 = vadd.f32 %v4750_v22, %v4164_v33  ;;  %v4864_v39 = vadd.f32 %v4752_v23, %v4166_v46  ;;  %v4168_v23 = vadd.f32 %v11621_v35, %v11620_v25  ;;  %v4755_v40 = vsel %vm4733_vm3, %v11623_v62, %v11622_v30  ;;  %v11624_v22 = vld [vmem:[#allocation52_spill] sm:$0xff]  ;;  %v11625_v33 = vld [vmem:[#allocation90_spill] sm:$0xff]  ;;  %v11629_v1 = vld [vmem:[#allocation37_spill] sm:$0xff] }
 0x6e8   : > { %v4863_v60 = vadd.f32 %v4751_v6, %v4165_v17  ;;  %v9766_v44 = vperm.slane %v4904_v45, %v9713_v9  ;;  %v4169_v18 = vadd.f32 %v11625_v33, %v11624_v22  ;;  %v11626_v46 = vld [vmem:[#allocation48_spill] sm:$0xff]  ;;  %v4193_v30 = vadd.f32 %v4071_v29, %v9369_v5 }
 0x6e9   : > { %v5127_v14 = vrot.slane %v4862_v15, 4  ;;  %v5351_v17 = vrot.slane %v4864_v39, 4  ;;  %v4753_v31 = vsel %vm4733_vm3, %v11627_v19, %v11626_v46  ;;  %v11628_v45 = vrot.slane %v9623_v49, 4  ;;  %v9783_v33 = vpop.permute.xlu2 %4074 }
 0x6ea   : > { %v5239_v35 = vrot.slane %v4863_v60, 4  ;;  %v4167_v24 = vadd.f32 %v11630_v27, %v11629_v1  ;;  %v4867_v22 = vadd.f32 %v4755_v40, %v4169_v18  ;;  %v11631_v19 = vrot.slane %v9629_v58, 4  ;;  %v11633_v18 = vld [vmem:[#allocation57_spill] sm:$0xff] }
 0x6eb   : > { %v5130_v6 = vsel %vm4903_vm4, %v4862_v15, %v11628_v45  ;;  %v5128_v16 = vsel %vm4903_vm4, %v5127_v14, %v9623_v49  ;;  %v5265_v29 = vrot.slane %v9409_v12, 4  ;;  %v11632_v15 = vrot.slane %v9627_v21, 4 }
 0x6ec   : > { %v5354_v5 = vsel %vm4903_vm4, %v4864_v39, %v11631_v19  ;;  %v5352_v27 = vsel %vm4903_vm4, %v5351_v17, %v9629_v58  ;;  %v4865_v1 = vadd.f32 %v4753_v31, %v4167_v24  ;;  %v4953_v49 = vrot.slane %v9766_v44, 4 }
 0x6ed   : > { %v9771_v38 = vpop.permute.xlu1 %4072  ;;  %v5242_v45 = vsel %vm4903_vm4, %v4863_v60, %v11632_v15  ;;  %v5240_v39 = vsel %vm4903_vm4, %v5239_v35, %v9627_v21  ;;  %v9810_v60 = vperm.slane %v5130_v6, %v9713_v9  ;;  %v9813_v24 = vperm.slane %v5354_v5, %v9713_v9  ;;  %v11637_v15 = vld [vmem:[#allocation62_spill] sm:$0xff] }
 0x6ee   : > { %v4692_v62 = vpop.permute.xlu0 %4691  ;;  %v4915_v58 = vrot.slane %v4867_v22, 4  ;;  %v9816_v31 = vperm.slane %v5242_v45, %v9713_v9  ;;  %v9819_v17 = vperm.slane %v5352_v27, %v9713_v9  ;;  %v5463_v6 = vrot.slane %v4865_v1, 4 }
 0x6ef   : > { %v4779_v25 = vsel %vm4733_vm3, %v4690_v2, %v4692_v62  ;;  %v11634_v2 = vld [vmem:[#allocation53_spill] sm:$0xff]  ;;  %v4192_v5 = vadd.f32 %v9589_v34, %v9359_v42  ;;  %v5153_v42 = vrot.slane %v9375_v10, 4 }
 0x6f0   : > { %v4891_v46 = vadd.f32 %v4779_v25, %v4193_v30  ;;  %v4754_v40 = vsel %vm4733_vm3, %v11634_v2, %v11633_v18  ;;  %v9807_v30 = vperm.slane %v5128_v16, %v9713_v9  ;;  %v9826_v16 = vperm.slane %v5240_v39, %v9713_v9  ;;  %v11635_v62 = vld [vmem:[#allocation93_spill] sm:$0xff] }
 0x6f1   : > { %v4866_v21 = vadd.f32 %v4754_v40, %v4168_v23  ;;  %v4756_v19 = vsel %vm4733_vm3, %v9234_v20, %v11635_v62  ;;  %v4918_v23 = vsel %vm4903_vm4, %v4867_v22, %v4917_v61  ;;  %v11638_v18 = vrot.slane %v9631_v32, 4  ;;  %v4696_v62 = vpop.permute.xlu2 %4695 }
 0x6f2   : > { %v5263_v14 = vrot.slane %v4891_v46, 4  ;;  %v9804_v25 = vsel %vm4903_vm4, %v4891_v46, %v5265_v29  ;;  %v11636_v46 = vld [vmem:[#allocation49_spill] sm:$0xff]  ;;  %v4916_v20 = vsel %vm4903_vm4, %v4915_v58, %v9660_v13 }
 0x6f3   : > { %v4170_v45 = vadd.f32 %v11637_v15, %v11636_v46  ;;  %v5466_v2 = vsel %vm4903_vm4, %v4865_v1, %v11638_v18  ;;  %v5575_v61 = vrot.slane %v4866_v21, 4  ;;  %v6727_v46 = vmov 1934713408  }
 0x6f4   : > { %v9823_v35 = vsel %vm4903_vm4, %v5263_v14, %v9409_v12  ;;  %v4926_v14 = vperm.slane %v4918_v23, %v9713_v9  ;;  %v9856_v58 = vperm.slane %v5466_v2, %v9713_v9  ;;  %v4956_v15 = vunpack.c.l.s4 %v6727_v46 }
 0x6f5   : > { %v4688_v29 = vpop.permute.xlu1 %4687  ;;  %v4868_v22 = vadd.f32 %v4756_v19, %v4170_v45  ;;  %v11640_v18 = vrot.slane %v9658_v43, 4 }
 0x6f6   : > { %v4778_v12 = vsel %vm4733_vm3, %v9668_v26, %v4688_v29  ;;  %v9838_v27 = vpop.permute.xlu0 %4697  ;;  %v5464_v26 = vsel %vm4903_vm4, %v5463_v6, %v9631_v32  ;;  %v5301_v32 = vrot.slane %v9816_v31, 4  ;;  %v11643_v6 = vrot.slane %v9696_v51, 4 }
 0x6f7   : > { %v4890_v34 = vadd.f32 %v4778_v12, %v4192_v5  ;;  %v4922_v5 = vperm.slane %v4916_v20, %v9713_v9  ;;  %v9867_v23 = vperm.slane %v5464_v26, %v9713_v9  ;;  %v5576_v12 = vsel %vm4903_vm4, %v5575_v61, %v9658_v43 }
 0x6f8   : > { %v5578_v2 = vsel %vm4903_vm4, %v4866_v21, %v11640_v18  ;;  %v5027_v20 = vrot.slane %v4868_v22, 4  ;;  %v5030_v13 = vsel %vm4903_vm4, %v4868_v22, %v11643_v6  ;;  %v4194_v26 = vadd.f32 %v9771_v38, %v9388_v0 }
 0x6f9   : > { %v5151_v29 = vrot.slane %v4890_v34, 4  ;;  %v9852_v1 = vsel %vm4903_vm4, %v4890_v34, %v5153_v42  ;;  %11639 = vst [vmem:[#allocation82_spill] sm:$0xff] %v9867_v23  ;;  %v11641_v42 = vld [vmem:[#allocation58_spill] sm:$0xff]  ;;  %v11642_v34 = vld [vmem:[#allocation56_spill] sm:$0xff]  ;;  %v4951_v61 = vrot.slane %v4922_v5, 4  ;;  %v9883_v21 = vunpack.c.0.s8 %v4956_v15 }
 0x6fa   : > { %v4171_v46 = vadd.f32 %v11642_v34, %v11641_v42  ;;  %v9886_v18 = vperm.slane %v5576_v12, %v9713_v9  ;;  %v9889_v42 = vperm.slane %v5578_v2, %v9713_v9  ;;  %v5377_v22 = vrot.slane %v9443_v56, 4 }
 0x6fb   : > { %v9864_v45 = vsel %vm4903_vm4, %v5151_v29, %v9375_v10  ;;  %v4963_v10 = vrot.slane %v4926_v14, 4  ;;  %v5028_v38 = vsel %vm4903_vm4, %v5027_v20, %v9696_v51  ;;  %v5038_v34 = vperm.slane %v5030_v13, %v9713_v9  ;;  %v11648_v51 = vld [vmem:[#allocation101_spill] sm:$0xff] }
 0x6fc   : > { %11644 = vst [vmem:[#allocation83_spill] sm:$0xff] %v9886_v18  ;;  %v11646_v12 = vrot.slane %v9706_v53, 4  ;;  %v4757_v13 = vsel %vm4733_vm3, %v11648_v51, %v9275_v55  ;;  %v5489_v51 = vrot.slane %v9427_v63, 4 }
 0x6fd   : > { %v4694_v29 = vpop.permute.xlu1 %4693  ;;  %v5075_v55 = vrot.slane %v5038_v34, 4 }
 0x6fe   : > { %v4780_v43 = vsel %vm4733_vm3, %v4694_v29, %v4696_v62  ;;  %v4077_v39 = vpop.permute.xlu0 %4076  ;;  %v11645_v62 = vrot.slane %v9753_v50, 4  ;;  %v11647_v29 = vld [vmem:[#allocation97_spill] sm:$0xff] }
 0x6ff   : > { %v4892_v6 = vadd.f32 %v4780_v43, %v4194_v26  ;;  %v5254_v2 = vsel %vm4903_vm4, %v11647_v29, %v11646_v12  ;;  %v4964_v26 = vsel %vm4903_vm4, %v4963_v10, %v9753_v50  ;;  %v5251_v20 = vrot.slane %v11647_v29, 4  ;;  %v4702_v50 = vpop.permute.xlu2 %4701 }
 0x700   : > { %v4966_v15 = vsel %vm4903_vm4, %v4926_v14, %v11645_v62  ;;  %v4954_v14 = vsel %vm4903_vm4, %v4922_v5, %v4953_v49  ;;  %v4952_v43 = vsel %vm4903_vm4, %v4951_v61, %v9766_v44  ;;  %v5262_v12 = vperm.slane %v5254_v2, %v9713_v9 }
 0x701   : > { %v5375_v40 = vrot.slane %v4892_v6, 4  ;;  %v9904_v19 = vsel %vm4903_vm4, %v4892_v6, %v5377_v22  ;;  %v5034_v6 = vperm.slane %v5028_v38, %v9713_v9  ;;  %v9926_v29 = vperm.slane %v4966_v15, %v9883_v21 }
 0x702   : > { %v9929_v49 = vperm.slane %v4964_v26, %v9883_v21  ;;  %v4869_v44 = vadd.f32 %v4757_v13, %v4171_v46  ;;  %v4195_v5 = vadd.f32 %v9783_v33, %v9404_v37  ;;  %v9934_v38 = vperm.slane %v4954_v14, %v9883_v21 }
 0x703   : > { %v9922_v10 = vsel %vm4903_vm4, %v5375_v40, %v9443_v56  ;;  %v9937_v56 = vperm.slane %v4952_v43, %v9883_v21  ;;  %v5252_v40 = vsel %vm4903_vm4, %v5251_v20, %v9706_v53  ;;  %v4196_v2 = vadd.f32 %v4077_v39, %v9421_v57 }
 0x704   : > { %v11650_v46 = vrot.slane %v9742_v41, 4  ;;  %v5063_v33 = vrot.slane %v5034_v6, 4  ;;  %v5299_v43 = vrot.slane %v5262_v12, 4  ;;  %v5601_v22 = vrot.slane %v9454_v52, 4 }
 0x705   : > { %v4700_v61 = vpop.permute.xlu1 %4699  ;;  %11649 = vst [vmem:[#allocation125_spill] sm:$0xff] %v9937_v56  ;;  %v5139_v20 = vrot.slane %v4869_v44, 4  ;;  %v9953_v57 = vperm.slane %v5252_v40, %v9713_v9 }
 0x706   : > { %v4781_v15 = vsel %vm4733_vm3, %v9838_v27, %v4700_v61  ;;  %v4704_v26 = vpop.permute.xlu0 %4703  ;;  %v5078_v37 = vsel %vm4903_vm4, %v5038_v34, %v11650_v46  ;;  %v5076_v27 = vsel %vm4903_vm4, %v5075_v55, %v9742_v41  ;;  %v11651_v61 = vrot.slane %v9698_v4, 4 }
 0x707   : > { %v4893_v13 = vadd.f32 %v4781_v15, %v4195_v5  ;;  %v4782_v14 = vsel %vm4733_vm3, %v4702_v50, %v4704_v26  ;;  %v4776_v50 = vsel %vm4733_vm3, %v9568_v8, %v9625_v48  ;;  %v4190_v41 = vadd.f32 %v9579_v36, %v9332_v47  ;;  %v9969_v55 = vpop.permute.xlu2 %4080 }
 0x708   : > { %v4894_v53 = vadd.f32 %v4782_v14, %v4196_v2  ;;  %v5142_v5 = vsel %vm4903_vm4, %v4869_v44, %v11651_v61  ;;  %v11652_v26 = vrot.slane %v9747_v59, 4  ;;  %v5064_v8 = vsel %vm4903_vm4, %v5063_v33, %v9747_v59 }
 0x709   : > { %v5487_v39 = vrot.slane %v4893_v13, 4  ;;  %v9956_v34 = vsel %vm4903_vm4, %v4893_v13, %v5489_v51  ;;  %v5302_v47 = vsel %vm4903_vm4, %v5262_v12, %v5301_v32  ;;  %v5140_v36 = vsel %vm4903_vm4, %v5139_v20, %v9698_v4 }
 0x70a   : > { %v5599_v15 = vrot.slane %v4894_v53, 4  ;;  %v9965_v2 = vsel %vm4903_vm4, %v4894_v53, %v5601_v22  ;;  %v5066_v44 = vsel %vm4903_vm4, %v5034_v6, %v11652_v26  ;;  %v5013_v22 = vrot.slane %v9926_v29, 4 }
 0x70b   : > { %v9973_v40 = vsel %vm4903_vm4, %v5487_v39, %v9427_v63  ;;  %v5300_v63 = vsel %vm4903_vm4, %v5299_v43, %v9816_v31  ;;  %v5150_v6 = vperm.slane %v5142_v5, %v9713_v9  ;;  %v4888_v46 = vadd.f32 %v4776_v50, %v4190_v41 }
 0x70c   : > { %v9982_v48 = vsel %vm4903_vm4, %v5599_v15, %v9454_v52  ;;  %v11653_v33 = vrot.slane %v9826_v16, 4  ;;  %v9998_v51 = vperm.slane %v5078_v37, %v9883_v21  ;;  %v10001_v32 = vperm.slane %v5076_v27, %v9883_v21 }
 0x70d   : > { %v4079_v59 = vpop.permute.xlu1 %4078  ;;  %v10004_v31 = vperm.slane %v5066_v44, %v9883_v21  ;;  %v10007_v4 = vperm.slane %v5064_v8, %v9883_v21  ;;  %v5009_v12 = vrot.slane %v9929_v49, 4  ;;  %v5005_v13 = vrot.slane %v9934_v38, 4 }
 0x70e   : > { %v5290_v52 = vsel %vm4903_vm4, %v9953_v57, %v11653_v33  ;;  %v10013_v43 = vperm.slane %v5302_v47, %v9883_v21  ;;  %v5146_v37 = vperm.slane %v5140_v36, %v9713_v9  ;;  %v11654_v53 = vrot.slane %v9715_v54, 4 }
 0x70f   : > { %v10021_v20 = vperm.slane %v5300_v63, %v9883_v21  ;;  %v10024_v39 = vperm.slane %v5290_v52, %v9883_v21  ;;  %v5187_v61 = vrot.slane %v5150_v6, 4  ;;  %v5363_v5 = vrot.slane %v9301_v28, 4 }
 0x710   : > { %v5366_v27 = vsel %vm4903_vm4, %v9301_v28, %v11654_v53  ;;  %v4929_v50 = vrot.slane %v9344_v7, 4  ;;  %v4927_v15 = vrot.slane %v4888_v46, 4  ;;  %v5175_v28 = vrot.slane %v5146_v37, 4 }
 0x711   : > { %v5374_v63 = vperm.slane %v5366_v27, %v9713_v9  ;;  %v11655_v52 = vrot.slane %v9810_v60, 4  ;;  %v5364_v8 = vsel %vm4903_vm4, %v5363_v5, %v9715_v54  ;;  %v4708_v27 = vpop.permute.xlu2 %4707  ;;  %v5188_v33 = vsel %vm4903_vm4, %v5187_v61, %v9810_v60 }
 0x712   : > { %v4930_v36 = vsel %vm4903_vm4, %v4888_v46, %v4929_v50  ;;  %v4928_v47 = vsel %vm4903_vm4, %v4927_v15, %v9344_v7  ;;  %v4197_v46 = vadd.f32 %v4079_v59, %v9461_v11  ;;  %v5475_v44 = vrot.slane %v9317_v3, 4  ;;  %v11658_v15 = vld [vmem:[#allocation68_spill] sm:$0xff] }
 0x713   : > { %v5190_v53 = vsel %vm4903_vm4, %v5150_v6, %v11655_v52  ;;  %v11656_v6 = vld [vmem:[#allocation119_spill] sm:$0xff]  ;;  %v4938_v41 = vperm.slane %v4930_v36, %v9713_v9  ;;  %v5411_v7 = vrot.slane %v5374_v63, 4  ;;  %v4941_v11 = vrot.slane %v11658_v15, 4 }
 0x714   : > { %v11657_v52 = vrot.slane %v11656_v6, 4  ;;  %v10059_v14 = vperm.slane %v5190_v53, %v9883_v21  ;;  %v4934_v60 = vperm.slane %v4928_v47, %v9713_v9  ;;  %v10063_v61 = vperm.slane %v5188_v33, %v9883_v21  ;;  %v11660_v33 = vld [vmem:[#allocation65_spill] sm:$0xff] }
 0x715   : > { %v4706_v50 = vpop.permute.xlu1 %4705  ;;  %v5476_v47 = vsel %vm4903_vm4, %v5475_v44, %v11656_v6  ;;  %v4989_v62 = vrot.slane %v4938_v41, 4 }
 0x716   : > { %v5478_v26 = vsel %vm4903_vm4, %v9317_v3, %v11657_v52  ;;  %v4783_v54 = vsel %vm4733_vm3, %v4706_v50, %v4708_v27  ;;  %v10055_v5 = vpop.permute.xlu0 %4709  ;;  %v11659_v3 = vrot.slane %v9807_v30, 4  ;;  %v5176_v27 = vsel %vm4903_vm4, %v5175_v28, %v9807_v30 }
 0x717   : > { %v4895_v59 = vadd.f32 %v4783_v54, %v4197_v46  ;;  %v10071_v50 = vperm.slane %v5364_v8, %v9713_v9  ;;  %v5486_v46 = vperm.slane %v5478_v26, %v9713_v9  ;;  %v5587_v54 = vrot.slane %v11660_v33, 4 }
 0x718   : > { %v5178_v36 = vsel %vm4903_vm4, %v5146_v37, %v11659_v3  ;;  %v11661_v8 = vrot.slane %v9813_v24, 4  ;;  %v5412_v28 = vsel %vm4903_vm4, %v5411_v7, %v9813_v24  ;;  %v10092_v3 = vperm.slane %v5476_v47, %v9713_v9 }
 0x719   : > { %v4939_v52 = vrot.slane %v4895_v59, 4  ;;  %v4942_v53 = vsel %vm4903_vm4, %v4895_v59, %v4941_v11  ;;  %v10082_v30 = vperm.slane %v5178_v36, %v9883_v21  ;;  %v4977_v11 = vrot.slane %v4934_v60, 4 }
 0x71a   : > { %v4950_v0 = vperm.slane %v4942_v53, %v9713_v9  ;;  %v5414_v26 = vsel %vm4903_vm4, %v5374_v63, %v11661_v8  ;;  %11662 = vst [vmem:[#allocation122_spill] sm:$0xff] %v10092_v3 }
 0x71b   : > { %v4940_v37 = vsel %vm4903_vm4, %v4939_v52, %v11658_v15  ;;  %v5523_v15 = vrot.slane %v5486_v46, 4  ;;  %v11663_v52 = vld [vmem:[#allocation116_spill] sm:$0xff] }
 0x71c   : > { %v4946_v44 = vperm.slane %v4940_v37, %v9713_v9  ;;  %v4987_v6 = vrot.slane %v4950_v0, 4  ;;  %v4990_v59 = vsel %vm4903_vm4, %v4950_v0, %v4989_v62  ;;  %v11664_v36 = vrot.slane %v11663_v52, 4 }
 0x71d   : > { %v4998_v63 = vperm.slane %v4990_v59, %v9883_v21  ;;  %v5588_v24 = vsel %vm4903_vm4, %v5587_v54, %v11663_v52  ;;  %v11665_v59 = vrot.slane %v9819_v17, 4 }
 0x71e   : > { %v5590_v53 = vsel %vm4903_vm4, %v11660_v33, %v11664_v36  ;;  %v4975_v7 = vrot.slane %v4946_v44, 4  ;;  %v4083_v8 = vpop.permute.xlu0 %4082  ;;  %v4988_v37 = vsel %vm4903_vm4, %v4987_v6, %v4938_v41  ;;  %v4978_v0 = vsel %vm4903_vm4, %v4946_v44, %v4977_v11  ;;  %v4714_v36 = vpop.permute.xlu2 %4713 }
 0x71f   : > { %v5014_v62 = vsel %vm4903_vm4, %v4998_v63, %v5013_v22  ;;  %v10107_v47 = vperm.slane %v4988_v37, %v9883_v21  ;;  %v4986_v33 = vperm.slane %v4978_v0, %v9883_v21  ;;  %v5402_v54 = vsel %vm4903_vm4, %v10071_v50, %v11665_v59 }
 0x720   : > { %v5598_v52 = vperm.slane %v5590_v53, %v9713_v9  ;;  %5712 = vrot.lane.b32.xlu0 %v5014_v62, %s6725_s27  ;;  %v4976_v41 = vsel %vm4903_vm4, %v4975_v7, %v4934_v60  ;;  %v10118_v11 = vperm.slane %v5176_v27, %v9883_v21  ;;  %v10121_v22 = vperm.slane %v5414_v26, %v9883_v21 }
 0x721   : > { %v5010_v44 = vsel %vm4903_vm4, %v10107_v47, %v5009_v12  ;;  %v5006_v6 = vsel %vm4903_vm4, %v4986_v33, %v5005_v13  ;;  %v10131_v53 = vperm.slane %v5412_v28, %v9883_v21  ;;  %v5524_v60 = vsel %vm4903_vm4, %v5523_v15, %v9856_v58 }
 0x722   : > { %v10136_v27 = vperm.slane %v5588_v24, %v9713_v9  ;;  %5704 = vrot.lane.b32.xlu1 %v5010_v44, %s6728_s28  ;;  %5696 = vrot.lane.b32.xlu2 %v5006_v6, %s6729_s29  ;;  %v10142_v26 = vperm.slane %v5402_v54, %v9883_v21  ;;  %v11667_v13 = vrot.slane %v9867_v23, 4  ;;  %v10149_v15 = vperm.slane %v4976_v41, %v9883_v21 }
 0x723   : > { %v11669_v37 = vrot.slane %v9856_v58, 4  ;;  %v5635_v62 = vrot.slane %v5598_v52, 4  ;;  %v10159_v44 = vperm.slane %v5524_v60, %v9883_v21  ;;  %v5011_v41 = vrot.slane %v4998_v63, 4  ;;  %v11670_v58 = vld [vmem:[#allocation66_spill] sm:$0xff] }
 0x724   : > { %11666 = vst [vmem:[#allocation85_spill] sm:$0xff] %v10136_v27  ;;  %v5514_v28 = vsel %vm4903_vm4, %v10092_v3, %v11667_v13  ;;  %v5003_v13 = vrot.slane %v4986_v33, 4  ;;  %v4199_v12 = vadd.f32 %v4083_v8, %v11670_v58  ;;  %v11671_v60 = vrot.slane %v9886_v18, 4 }
 0x725   : > { %11668 = vst [vmem:[#allocation86_spill] sm:$0xff] %v10149_v15  ;;  %v5526_v0 = vsel %vm4903_vm4, %v5486_v46, %v11669_v37  ;;  %v10161_v6 = vpop.permute.xlu1 %4084  ;;  %v10165_v7 = vperm.slane %v5514_v28, %v9883_v21  ;;  %v5162_v63 = vperm.slane %v9852_v1, %v9713_v9  ;;  %v11672_v33 = vrot.slane %v9937_v56, 4  ;;  %v11674_v37 = vld [vmem:[#allocation71_spill] sm:$0xff] }
 0x726   : > { %v4716_v46 = vpop.permute.xlu0 %4715  ;;  %v10170_v59 = vperm.slane %v5526_v0, %v9883_v21  ;;  %v10176_v54 = vsel %vm4903_vm4, %v10136_v27, %v11671_v60  ;;  %v11673_v58 = vrot.slane %v9889_v42, 4  ;;  %v5165_v24 = vrot.slane %v11674_v37, 4 }
 0x727   : > { %v5002_v8 = vsel %vm4903_vm4, %v10149_v15, %v11672_v33  ;;  %v4785_v28 = vsel %vm4733_vm3, %v4714_v36, %v4716_v46  ;;  %v5158_v60 = vperm.slane %v9864_v45, %v9713_v9  ;;  %v5012_v33 = vsel %vm4903_vm4, %v5011_v41, %v9926_v29  ;;  %v11675_v41 = vld [vmem:[#allocation107_spill] sm:$0xff] }
 0x728   : > { %v5638_v0 = vsel %vm4903_vm4, %v5598_v52, %v11673_v58  ;;  %5688 = vrot.lane.b32.xlu0 %v5002_v8, %s6730_s30  ;;  %v4897_v1 = vadd.f32 %v4785_v28, %v4199_v12  ;;  %v5004_v36 = vsel %vm4903_vm4, %v5003_v13, %v9934_v38  ;;  %v10200_v52 = vsel %vm4903_vm4, %v5635_v62, %v9889_v42  ;;  %v10202_v58 = vpop.permute.xlu2 %4086  ;;  %v11676_v28 = vld [vmem:[#allocation110_spill] sm:$0xff]  ;;  %v11677_v46 = vld [vmem:[#allocation79_spill] sm:$0xff]  ;;  %v11679_v62 = vld [vmem:[#allocation80_spill] sm:$0xff] }
 0x729   : > { %v5007_v29 = vrot.slane %v10107_v47, 4  ;;  %v10209_v38 = vperm.slane %v5638_v0, %v9883_v21  ;;  %v5053_v13 = vrot.slane %v11675_v41, 4  ;;  %v5213_v8 = vrot.slane %v5162_v63, 4  ;;  %v11678_v47 = vld [vmem:[#allocation63_spill] sm:$0xff] }
 0x72a   : > { %5708 = vrot.lane.b32.xlu2 %v5012_v33, %s6724_s25  ;;  %5692 = vrot.lane.b32.xlu1 %v5004_v36, %s6731_s3  ;;  %v5163_v45 = vrot.slane %v4897_v1, 4  ;;  %v5166_v12 = vsel %vm4903_vm4, %v4897_v1, %v5165_v24  ;;  %v5277_v33 = vrot.slane %v11676_v28, 4  ;;  %v5050_v36 = vperm.slane %v11677_v46, %v9713_v9 }
 0x72b   : > { %v5174_v42 = vperm.slane %v5166_v12, %v9713_v9  ;;  %v5201_v56 = vrot.slane %v5158_v60, 4  ;;  %v4198_v0 = vadd.f32 %v9969_v55, %v11678_v47  ;;  %v5046_v27 = vperm.slane %v11679_v62, %v9713_v9 }
 0x72c   : > { %v5164_v24 = vsel %vm4903_vm4, %v5163_v45, %v11674_v37  ;;  %v5008_v46 = vsel %vm4903_vm4, %v5007_v29, %v9929_v49  ;;  %v5101_v62 = vrot.slane %v5050_v36, 4 }
 0x72d   : > { %v4712_v1 = vpop.permute.xlu1 %4711  ;;  %v5170_v15 = vperm.slane %v5164_v24, %v9713_v9  ;;  %v5211_v18 = vrot.slane %v5174_v42, 4  ;;  %v5214_v12 = vsel %vm4903_vm4, %v5174_v42, %v5213_v8  ;;  %v11680_v8 = vrot.slane %v10059_v14, 4 }
 0x72e   : > { %v4784_v23 = vsel %vm4733_vm3, %v10055_v5, %v4712_v1  ;;  %v10229_v3 = vpop.permute.xlu0 %4721  ;;  %v5222_v37 = vperm.slane %v5214_v12, %v9883_v21  ;;  %v11682_v1 = vrot.slane %v10082_v30, 4 }
 0x72f   : > { %v4896_v55 = vadd.f32 %v4784_v23, %v4198_v0  ;;  %v5199_v45 = vrot.slane %v5170_v15, 4  ;;  %v5212_v24 = vsel %vm4903_vm4, %v5211_v18, %v5162_v63  ;;  %v5202_v47 = vsel %vm4903_vm4, %v5170_v15, %v5201_v56 }
 0x730   : > { %5700 = vrot.lane.b32.xlu0 %v5008_v46, %s6732_s4  ;;  %v10238_v5 = vsel %vm4903_vm4, %v5222_v37, %v11680_v8  ;;  %v5218_v49 = vperm.slane %v5212_v24, %v9883_v21  ;;  %v5210_v29 = vperm.slane %v5202_v47, %v9883_v21  ;;  %v5235_v42 = vrot.slane %v5222_v37, 4 }
 0x731   : > { %v5051_v23 = vrot.slane %v4896_v55, 4  ;;  %v5054_v0 = vsel %vm4903_vm4, %v4896_v55, %v5053_v13  ;;  %v10244_v18 = vsel %vm4903_vm4, %v5199_v45, %v5158_v60  ;;  %v11681_v15 = vrot.slane %v10063_v61, 4  ;;  %v4720_v45 = vpop.permute.xlu2 %4719 }
 0x732   : > { %v5062_v56 = vperm.slane %v5054_v0, %v9713_v9  ;;  %v10255_v12 = vsel %vm4903_vm4, %v5210_v29, %v11682_v1  ;;  %v5227_v46 = vrot.slane %v5210_v29, 4  ;;  %v5089_v37 = vrot.slane %v5046_v27, 4 }
 0x733   : > { %v10250_v63 = vsel %vm4903_vm4, %v5218_v49, %v11681_v15  ;;  %v5052_v13 = vsel %vm4903_vm4, %v5051_v23, %v11675_v41  ;;  %v10261_v60 = vsel %vm4903_vm4, %v5235_v42, %v10059_v14  ;;  %v5231_v55 = vrot.slane %v5218_v49, 4  ;;  %v11683_v15 = vld [vmem:[#allocation104_spill] sm:$0xff] }
 0x734   : > { %v5058_v24 = vperm.slane %v5052_v13, %v9713_v9  ;;  %v5099_v47 = vrot.slane %v5062_v56, 4  ;;  %v5102_v8 = vsel %vm4903_vm4, %v5062_v56, %v5101_v62  ;;  %v10267_v0 = vsel %vm4903_vm4, %v5227_v46, %v10082_v30 }
 0x735   : > { %v5274_v29 = vperm.slane %v9804_v25, %v9713_v9  ;;  %v4200_v41 = vadd.f32 %v10161_v6, %v11683_v15  ;;  %v4718_v23 = vpop.permute.xlu1 %4717  ;;  %v5110_v14 = vperm.slane %v5102_v8, %v9883_v21  ;;  %v10276_v49 = vsel %vm4903_vm4, %v5231_v55, %v10063_v61  ;;  %v11685_v15 = vld [vmem:[#allocation74_spill] sm:$0xff] }
 0x736   : > { %v5087_v42 = vrot.slane %v5058_v24, 4  ;;  %v4786_v62 = vsel %vm4733_vm3, %v4718_v23, %v4720_v45  ;;  %v5100_v56 = vsel %vm4903_vm4, %v5099_v47, %v5050_v36  ;;  %v5090_v30 = vsel %vm4903_vm4, %v5058_v24, %v5089_v37  ;;  %v4089_v1 = vpop.permute.xlu0 %4088 }
 0x737   : > { %v4898_v46 = vadd.f32 %v4786_v62, %v4200_v41  ;;  %v11684_v25 = vrot.slane %v9998_v51, 4  ;;  %v5106_v13 = vperm.slane %v5100_v56, %v9883_v21  ;;  %v5098_v8 = vperm.slane %v5090_v30, %v9883_v21  ;;  %v11688_v56 = vld [vmem:[#allocation76_spill] sm:$0xff] }
 0x738   : > { %v5270_v55 = vperm.slane %v9823_v35, %v9713_v9  ;;  %v5088_v36 = vsel %vm4903_vm4, %v5087_v42, %v5046_v27  ;;  %v5123_v37 = vrot.slane %v5110_v14, 4  ;;  %v11686_v47 = vrot.slane %v10001_v32, 4 }
 0x739   : > { %v5126_v6 = vsel %vm4903_vm4, %v5110_v14, %v11684_v25  ;;  %v5275_v45 = vrot.slane %v4898_v46, 4  ;;  %v5278_v24 = vsel %vm4903_vm4, %v4898_v46, %v5277_v33  ;;  %v11687_v23 = vrot.slane %v10004_v31, 4 }
 0x73a   : > { %5740 = vrot.lane.b32.xlu1 %v5126_v6, %s6725_s27  ;;  %v5122_v41 = vsel %vm4903_vm4, %v5106_v13, %v11686_v47  ;;  %v5501_v30 = vrot.slane %v11688_v56, 4  ;;  %v5286_v35 = vperm.slane %v5278_v24, %v9713_v9  ;;  %v5124_v27 = vsel %vm4903_vm4, %v5123_v37, %v9998_v51 }
 0x73b   : > { %v5118_v62 = vsel %vm4903_vm4, %v5098_v8, %v11687_v23  ;;  %5732 = vrot.lane.b32.xlu2 %v5122_v41, %s6728_s28  ;;  %v5115_v33 = vrot.slane %v5098_v8, 4  ;;  %v5325_v14 = vrot.slane %v5274_v29, 4  ;;  %v5276_v42 = vsel %vm4903_vm4, %v5275_v45, %v11676_v28  ;;  %v11689_v45 = vld [vmem:[#allocation73_spill] sm:$0xff] }
 0x73c   : > { %5724 = vrot.lane.b32.xlu0 %v5118_v62, %s6729_s29  ;;  %v10307_v46 = vperm.slane %v5088_v36, %v9883_v21  ;;  %v5119_v25 = vrot.slane %v5106_v13, 4  ;;  %v5313_v6 = vrot.slane %v5270_v55, 4  ;;  %v5282_v47 = vperm.slane %v5276_v42, %v9713_v9  ;;  %v4726_v36 = vpop.permute.xlu2 %4725 }
 0x73d   : > { %v5323_v24 = vrot.slane %v5286_v35, 4  ;;  %v5116_v41 = vsel %vm4903_vm4, %v5115_v33, %v10004_v31  ;;  %v5494_v23 = vperm.slane %v9973_v40, %v9713_v9  ;;  %v5498_v51 = vperm.slane %v9956_v34, %v9713_v9  ;;  %v10316_v8 = vpop.permute.xlu1 %4090 }
 0x73e   : > { %v5120_v28 = vsel %vm4903_vm4, %v5119_v25, %v10001_v32  ;;  %v5326_v13 = vsel %vm4903_vm4, %v5286_v35, %v5325_v14  ;;  %v5311_v37 = vrot.slane %v5282_v47, 4  ;;  %v4202_v62 = vadd.f32 %v4089_v1, %v11689_v45  ;;  %v4728_v42 = vpop.permute.xlu0 %4727 }
 0x73f   : > { %v5334_v31 = vperm.slane %v5326_v13, %v9883_v21  ;;  %v5324_v33 = vsel %vm4903_vm4, %v5323_v24, %v5274_v29  ;;  %v11690_v40 = vrot.slane %v10007_v4, 4  ;;  %v4788_v61 = vsel %vm4733_vm3, %v4726_v36, %v4728_v42 }
 0x740   : > { %v5330_v32 = vperm.slane %v5324_v33, %v9883_v21  ;;  %v5314_v35 = vsel %vm4903_vm4, %v5282_v47, %v5313_v6  ;;  %v4900_v14 = vadd.f32 %v4788_v61, %v4202_v62  ;;  %v11691_v1 = vrot.slane %v10013_v43, 4 }
 0x741   : > { %v5114_v34 = vsel %vm4903_vm4, %v10307_v46, %v11690_v40  ;;  %v10338_v29 = vsel %vm4903_vm4, %v5311_v37, %v5270_v55  ;;  %v5322_v24 = vperm.slane %v5314_v35, %v9883_v21  ;;  %v10343_v13 = vperm.slane %v9904_v19, %v9713_v9 }
 0x742   : > { %5716 = vrot.lane.b32.xlu1 %v5114_v34, %s6730_s30  ;;  %v10335_v25 = vsel %vm4903_vm4, %v5334_v31, %v11691_v1  ;;  %v11692_v36 = vrot.slane %v10021_v20, 4  ;;  %v5343_v61 = vrot.slane %v5330_v32, 4  ;;  %v5347_v47 = vrot.slane %v5334_v31, 4 }
 0x743   : > { %5720 = vrot.lane.b32.xlu2 %v5116_v41, %s6731_s3  ;;  %v5499_v45 = vrot.slane %v4900_v14, 4  ;;  %v5502_v55 = vsel %vm4903_vm4, %v4900_v14, %v5501_v30  ;;  %v11693_v37 = vrot.slane %v10024_v39, 4  ;;  %v5339_v19 = vrot.slane %v5322_v24, 4 }
 0x744   : > { %v10348_v6 = vsel %vm4903_vm4, %v5330_v32, %v11692_v36  ;;  %5736 = vrot.lane.b32.xlu0 %v5124_v27, %s6724_s25  ;;  %v5549_v42 = vrot.slane %v5498_v51, 4  ;;  %v5510_v33 = vperm.slane %v5502_v55, %v9713_v9  ;;  %v10361_v40 = vsel %vm4903_vm4, %v5343_v61, %v10021_v20  ;;  %v11694_v32 = vld [vmem:[#allocation70_spill] sm:$0xff] }
 0x745   : > { %v10356_v62 = vsel %vm4903_vm4, %v5322_v24, %v11693_v37  ;;  %v10365_v27 = vsel %vm4903_vm4, %v5347_v47, %v10013_v43  ;;  %v5382_v30 = vperm.slane %v9922_v10, %v9713_v9  ;;  %v5537_v41 = vrot.slane %v5494_v23, 4  ;;  %v4724_v20 = vpop.permute.xlu1 %4723  ;;  %v11695_v24 = vld [vmem:[#allocation77_spill] sm:$0xff] }
 0x746   : > { %v5500_v31 = vsel %vm4903_vm4, %v5499_v45, %v11688_v56  ;;  %v10373_v34 = vsel %vm4903_vm4, %v5339_v19, %v10024_v39  ;;  %v4201_v35 = vadd.f32 %v10202_v58, %v11694_v32  ;;  %v5547_v1 = vrot.slane %v5510_v33, 4 }
 0x747   : > { %v5506_v14 = vperm.slane %v5500_v31, %v9713_v9  ;;  %v5550_v43 = vsel %vm4903_vm4, %v5510_v33, %v5549_v42  ;;  %v5613_v36 = vrot.slane %v11695_v24, 4  ;;  %v5437_v10 = vrot.slane %v10343_v13, 4 }
 0x748   : > { %v4787_v56 = vsel %vm4733_vm3, %v10229_v3, %v4724_v20  ;;  %v5558_v61 = vperm.slane %v5550_v43, %v9883_v21  ;;  %v5548_v45 = vsel %vm4903_vm4, %v5547_v1, %v5498_v51  ;;  %v11696_v42 = vrot.slane %v10170_v59, 4 }
 0x749   : > { %v4899_v39 = vadd.f32 %v4787_v56, %v4201_v35  ;;  %v5535_v47 = vrot.slane %v5506_v14, 4  ;;  %v5538_v58 = vsel %vm4903_vm4, %v5506_v14, %v5537_v41  ;;  %v5554_v55 = vperm.slane %v5548_v45, %v9883_v21 }
 0x74a   : > { %5728 = vrot.lane.b32.xlu1 %v5120_v28, %s6732_s4  ;;  %v5546_v37 = vperm.slane %v5538_v58, %v9883_v21  ;;  %v5571_v19 = vrot.slane %v5558_v61, 4  ;;  %v10392_v33 = vsel %vm4903_vm4, %v5558_v61, %v11696_v42  ;;  %v5425_v3 = vrot.slane %v5382_v30, 4  ;;  %v4732_v58 = vpop.permute.xlu2 %4731 }
 0x74b   : > { %v5387_v31 = vrot.slane %v4899_v39, 4  ;;  %v11697_v32 = vrot.slane %v11685_v15, 4  ;;  %v10398_v41 = vsel %vm4903_vm4, %v5535_v47, %v5494_v23  ;;  %5768 = vrot.lane.b32.xlu2 %v10238_v5, %s6725_s27  ;;  %v11698_v35 = vrot.slane %v10159_v44, 4 }
 0x74c   : > { %5760 = vrot.lane.b32.xlu0 %v10250_v63, %s6728_s28  ;;  %v11699_v14 = vrot.slane %v10165_v7, 4  ;;  %v5567_v23 = vrot.slane %v5554_v55, 4  ;;  %v10419_v5 = vperm.slane %v10244_v18, %v9883_v21  ;;  %v10423_v63 = vsel %vm4903_vm4, %v5571_v19, %v10170_v59  ;;  %v11700_v18 = vld [vmem:[#allocation113_spill] sm:$0xff] }
 0x74d   : > { %v5390_v51 = vsel %vm4903_vm4, %v4899_v39, %v11697_v32  ;;  %v10408_v20 = vsel %vm4903_vm4, %v5554_v55, %v11698_v35  ;;  %v5388_v43 = vsel %vm4903_vm4, %v5387_v31, %v11685_v15  ;;  %v5563_v56 = vrot.slane %v5546_v37, 4  ;;  %v4730_v42 = vpop.permute.xlu1 %4729 }
 0x74e   : > { %v5398_v28 = vperm.slane %v5390_v51, %v9713_v9  ;;  %v10413_v1 = vsel %vm4903_vm4, %v5546_v37, %v11699_v14  ;;  %v5394_v61 = vperm.slane %v5388_v43, %v9713_v9  ;;  %v10429_v45 = vsel %vm4903_vm4, %v5567_v23, %v10159_v44 }
 0x74f   : > { %v5610_v15 = vperm.slane %v9965_v2, %v9713_v9  ;;  %v4203_v55 = vadd.f32 %v10316_v8, %v11700_v18  ;;  %v10438_v37 = vsel %vm4903_vm4, %v5563_v56, %v10165_v7  ;;  %v11701_v32 = vrot.slane %v10121_v22, 4 }
 0x750   : > { %v5435_v39 = vrot.slane %v5398_v28, 4  ;;  %v5438_v47 = vsel %vm4903_vm4, %v5398_v28, %v5437_v10  ;;  %v5423_v19 = vrot.slane %v5394_v61, 4  ;;  %v4789_v10 = vsel %vm4733_vm3, %v4730_v42, %v4732_v58 }
 0x751   : > { %v5446_v59 = vperm.slane %v5438_v47, %v9883_v21  ;;  %v5426_v31 = vsel %vm4903_vm4, %v5394_v61, %v5425_v3  ;;  %v4901_v2 = vadd.f32 %v4789_v10, %v4203_v55  ;;  %v5606_v7 = vperm.slane %v9982_v48, %v9713_v9 }
 0x752   : > { %v5436_v44 = vsel %vm4903_vm4, %v5435_v39, %v10343_v13  ;;  %v5434_v28 = vperm.slane %v5426_v31, %v9883_v21  ;;  %5752 = vrot.lane.b32.xlu1 %v10255_v12, %s6729_s29  ;;  %v11702_v13 = vrot.slane %v10118_v11, 4  ;;  %v10460_v35 = vsel %vm4903_vm4, %v5423_v19, %v5382_v30 }
 0x753   : > { %v10447_v8 = vsel %vm4903_vm4, %v5446_v59, %v11701_v32  ;;  %v5442_v51 = vperm.slane %v5436_v44, %v9883_v21  ;;  %v5459_v14 = vrot.slane %v5446_v59, 4  ;;  %v5611_v23 = vrot.slane %v4901_v2, 4 }
 0x754   : > { %v5226_v3 = vsel %vm4903_vm4, %v10419_v5, %v11702_v13  ;;  %v5614_v43 = vsel %vm4903_vm4, %v4901_v2, %v5613_v36  ;;  %v11703_v56 = vrot.slane %v10131_v53, 4  ;;  %v11704_v48 = vrot.slane %v10142_v26, 4  ;;  %5748 = vrot.lane.b32.xlu0 %v10267_v0, %s6731_s3 }
 0x755   : > { %v5622_v39 = vperm.slane %v5614_v43, %v9713_v9  ;;  %5744 = vrot.lane.b32.xlu2 %v5226_v3, %s6730_s30  ;;  %v10479_v30 = vsel %vm4903_vm4, %v5459_v14, %v10121_v22  ;;  %v5451_v36 = vrot.slane %v5434_v28, 4  ;;  %v5634_v47 = vperm.slane %v10176_v54, %v9883_v21 }
 0x756   : > { %v10466_v61 = vsel %vm4903_vm4, %v5442_v51, %v11703_v56  ;;  %v10471_v12 = vsel %vm4903_vm4, %v5434_v28, %v11704_v48  ;;  %v5661_v58 = vrot.slane %v5610_v15, 4  ;;  %v5612_v18 = vsel %vm4903_vm4, %v5611_v23, %v11695_v24  ;;  %v261_v48 = vld [vmem:[%s6899_s26 + $0x280] sm:$0xff]  ;;  %s6666_s26 = smul.u32 168, %s11717_s9 }
 0x757   : > { %v5455_v55 = vrot.slane %v5442_v51, 4  ;;  %v5642_v42 = vperm.slane %v10200_v52, %v9883_v21  ;;  %v5649_v59 = vrot.slane %v5606_v7, 4  ;;  %v5618_v0 = vperm.slane %v5612_v18, %v9713_v9 }
 0x758   : > { %v5659_v19 = vrot.slane %v5622_v39, 4  ;;  %v5452_v22 = vsel %vm4903_vm4, %v5451_v36, %v10142_v26  ;;  %v5662_v54 = vsel %vm4903_vm4, %v5622_v39, %v5661_v58  ;;  %v5685_v44 = vrot.slane %v10209_v38, 4  ;;  %s10618_s9 = scalar_lea.vmem %s10736_s2, %s6666_s26 }
 0x759   : > { %v5456_v10 = vsel %vm4903_vm4, %v5455_v55, %v10131_v53  ;;  %v5647_v31 = vrot.slane %v5618_v0, 4  ;;  %v5650_v24 = vsel %vm4903_vm4, %v5618_v0, %v5649_v59  ;;  %v5670_v52 = vperm.slane %v5662_v54, %v9883_v21  ;;  %v11708_v59 = vld [vmem:[#allocation85_spill] sm:$0xff] }
 0x75a   : > { %v5660_v2 = vsel %vm4903_vm4, %v5659_v19, %v5610_v15  ;;  %v11705_v9 = vrot.slane %v9953_v57, 4  ;;  %v5658_v26 = vperm.slane %v5650_v24, %v9883_v21  ;;  %v5677_v51 = vrot.slane %v5634_v47, 4  ;;  %5764 = vrot.lane.b32.xlu1 %v10261_v60, %s6724_s25 }
 0x75b   : > { %v5666_v53 = vperm.slane %v5660_v2, %v9883_v21  ;;  %v10506_v28 = vsel %vm4903_vm4, %v5647_v31, %v5606_v7  ;;  %v5681_v13 = vrot.slane %v5642_v42, 4  ;;  %v5683_v15 = vrot.slane %v5670_v52, 4 }
 0x75c   : > { %v5288_v32 = vsel %vm4903_vm4, %v11705_v9, %v9826_v16  ;;  %v10509_v3 = vsel %vm4903_vm4, %v5670_v52, %v5685_v44  ;;  %v5675_v57 = vrot.slane %v5658_v26, 4  ;;  %v10512_v16 = vsel %vm4903_vm4, %v5658_v26, %v5677_v51  ;;  %5796 = vrot.lane.b32.xlu0 %v10335_v25, %s6725_s27  ;;  %v11710_v9 = vld [vmem:[#allocation86_spill] sm:$0xff]  ;;  %v11711_v26 = vld [vmem:[#allocation125_spill] sm:$0xff] }
 0x75d   : > { %v5679_v14 = vrot.slane %v5666_v53, 4  ;;  %5756 = vrot.lane.b32.xlu2 %v10276_v49, %s6732_s4  ;;  %v10519_v60 = vsel %vm4903_vm4, %v5666_v53, %v5681_v13  ;;  %v10523_v7 = vsel %vm4903_vm4, %v5683_v15, %v10209_v38  ;;  %v10526_v23 = vperm.slane %v5288_v32, %v9883_v21 }
 0x75e   : > { %v5676_v43 = vsel %vm4903_vm4, %v5675_v57, %v5634_v47  ;;  %v10534_v25 = vperm.slane %v10338_v29, %v9883_v21  ;;  %v422_v39 = vunpack.c.l.bf16 %v261_v48  ;;  %v423_v36 = vunpack.c.h.bf16 %v261_v48 }
 0x75f   : > { %v10530_v56 = vsel %vm4903_vm4, %v5679_v14, %v5642_v42  ;;  %v5337_v49 = vrot.slane %v10526_v23, 4  ;;  %v5623_v0 = vrot.slane %v11708_v59, 4  ;;  %v10596_v19 = vperm.slane %v10398_v41, %v9883_v21 }
 0x760   : > { %v584_v47 = vmax.f32 %v422_v39, 0.0  ;;  %v585_v58 = vmax.f32 %v423_v36, 0.0  ;;  %v10613_v54 = vperm.slane %v10506_v28, %v9883_v21  ;;  %v4999_v32 = vrot.slane %v11710_v9, 4 }
 0x761   : > { %v5338_v38 = vsel %vm4903_vm4, %v10534_v25, %v5337_v49  ;;  %v5111_v48 = vrot.slane %v10307_v46, 4 }
 0x762   : > { %5788 = vrot.lane.b32.xlu1 %v10348_v6, %s6728_s28  ;;  %v666_v29 = vpack.c.bf16 %v585_v58, %v584_v47  ;;  %v5399_v6 = vrot.slane %v10071_v50, 4  ;;  %v5000_v51 = vsel %vm4903_vm4, %v4999_v32, %v11711_v26 }
 0x764   : > { %5772 = vrot.lane.b32.xlu0 %v5338_v38, %s6730_s30  ;;  %v2828_v18 = vunpack.c.h.b16 %v666_v29  ;;  %v2827_v55 = vunpack.c.l.b16 %v666_v29 }
 0x765   : > { %5780 = vrot.lane.b32.xlu2 %v10356_v62, %s6729_s29 }
 0x766   : > { %v2838_v42 = vpack.c.b16 %v2828_v18, %v2828_v18  ;;  %v2837_v62 = vpack.c.b16 %v2827_v55, %v2827_v55 }
 0x768   : > { %6557 = vmatmul.msk.bf16.gmra.mxu3 %vm1130_vm0, %v2838_v42  ;;  %6590 = vmatmul.msk.bf16.gmra.mxu2 %vm1130_vm0, %v2838_v42 }
 0x769   : > { %3147 = vmatmul.bf16.gmra.mxu1 %v2837_v62  ;;  %3491 = vmatmul.bf16.gmra.mxu0 %v2837_v62 }
 0x76a   : > { %5776 = vrot.lane.b32.xlu1 %v10373_v34, %s6731_s3  ;;  %v5400_v34 = vsel %vm4903_vm4, %v5399_v6, %v9819_v17 }
 0x76b   : > { %v10559_v50 = vperm.slane %v5400_v34, %v9883_v21  ;;  %v5223_v34 = vrot.slane %v10419_v5, 4 }
 0x76c   : > { %5784 = vrot.lane.b32.xlu0 %v10361_v40, %s6732_s4  ;;  %v10567_v40 = vperm.slane %v10460_v35, %v9883_v21  ;;  %v11706_v35 = vld [vmem:[#allocation122_spill] sm:$0xff] }
 0x76d   : > { %5792 = vrot.lane.b32.xlu2 %v10365_v27, %s6724_s25  ;;  %v5449_v27 = vrot.slane %v10559_v50, 4 }
 0x76f   : > { %v5450_v17 = vsel %vm4903_vm4, %v10567_v40, %v5449_v27 }
 0x772   : > { %5824 = vrot.lane.b32.xlu1 %v10447_v8, %s6725_s27 }
 0x774   : > { %5808 = vrot.lane.b32.xlu0 %v10471_v12, %s6729_s29  ;;  %v11707_v12 = vld [vmem:[#allocation82_spill] sm:$0xff] }
 0x775   : > { %5816 = vrot.lane.b32.xlu2 %v10466_v61, %s6728_s28  ;;  %v5511_v61 = vrot.slane %v11706_v35, 4 }
 0x77a   : > { %5800 = vrot.lane.b32.xlu1 %v5450_v17, %s6730_s30  ;;  %v5224_v17 = vsel %vm4903_vm4, %v5223_v34, %v10118_v11 }
 0x77c   : > { %5820 = vrot.lane.b32.xlu0 %v10479_v30, %s6724_s25  ;;  %v5697_v8 = vpop.permute.xlu2 %5696  ;;  %v5512_v30 = vsel %vm4903_vm4, %v5511_v61, %v11707_v12 }
 0x77d   : > { %5804 = vrot.lane.b32.xlu2 %v5452_v22, %s6731_s3 }
 0x782   : > { %5812 = vrot.lane.b32.xlu1 %v5456_v10, %s6732_s4 }
 0x784   : > { %5836 = vrot.lane.b32.xlu0 %v10413_v1, %s6729_s29  ;;  %v5709_v1 = vpop.permute.xlu2 %5708 }
 0x785   : > { %5844 = vrot.lane.b32.xlu2 %v10408_v20, %s6728_s28  ;;  %v10592_v20 = vperm.slane %v5512_v30, %v9883_v21 }
 0x787   : > { %v5561_v10 = vrot.slane %v10592_v20, 4 }
 0x78a   : > { %5840 = vrot.lane.b32.xlu1 %v10429_v45, %s6732_s4  ;;  %v11709_v45 = vld [vmem:[#allocation83_spill] sm:$0xff] }
 0x78b   : > { %v5624_v22 = vsel %vm4903_vm4, %v5623_v0, %v11709_v45 }
 0x78c   : > { %5848 = vrot.lane.b32.xlu0 %v10423_v63, %s6724_s25  ;;  %v5562_v63 = vsel %vm4903_vm4, %v10596_v19, %v5561_v10 }
 0x78d   : > { %5832 = vrot.lane.b32.xlu2 %v10438_v37, %s6731_s3  ;;  %v10606_v37 = vperm.slane %v5624_v22, %v9883_v21 }
 0x78f   : > { %v5673_v2 = vrot.slane %v10606_v37, 4 }
 0x791   : > { %v5674_v21 = vsel %vm4903_vm4, %v10613_v54, %v5673_v2 }
 0x792   : > { %5860 = vrot.lane.b32.xlu1 %v5676_v43, %s6731_s3  ;;  %v5713_v41 = vpop.permute.xlu0 %5712 }
 0x794   : > { %5828 = vrot.lane.b32.xlu0 %v5562_v63, %s6730_s30  ;;  %v5705_v44 = vpop.permute.xlu1 %5704 }
 0x795   : > { %5864 = vrot.lane.b32.xlu2 %v10512_v16, %s6729_s29  ;;  %v5733_v31 = vpop.permute.xlu2 %5732  ;;  %v5892_v24 = vsel %vm4733_vm3, %v5705_v44, %v5709_v1 }
 0x796   : > { %v5894_v52 = vsel %vm5893_vm5, %v5892_v24, %v5713_v41  ;;  %v5335_v24 = vrot.slane %v10534_v25, 4 }
 0x797   : > { %5939 = vst [vmem:[%s10618_s9 + $0x10] sm:$0xff] %v5894_v52 }
 0x798   : > { %v5336_v2 = vsel %vm4903_vm4, %v5335_v24, %v10526_v23 }
 0x79a   : > { %5856 = vrot.lane.b32.xlu1 %v5674_v21, %s6730_s30  ;;  %v5689_v53 = vpop.permute.xlu0 %5688 }
 0x79b   : > { %v5884_v28 = vsel %vm5883_vm6, %v5000_v51, %v5689_v53 }
 0x79c   : > { %5872 = vrot.lane.b32.xlu0 %v10519_v60, %s6728_s28  ;;  %v5693_v13 = vpop.permute.xlu1 %5692 }
 0x79d   : > { %5868 = vrot.lane.b32.xlu2 %v10530_v56, %s6732_s4  ;;  %v5721_v15 = vpop.permute.xlu2 %5720  ;;  %v5886_v57 = vsel %vm5885_vm7, %v5884_v28, %v5693_v13  ;;  %v5888_v16 = vsel %vm5887_vm8, %v5693_v13, %v5697_v8 }
 0x79e   : > { %5937 = vst [vmem:[%s10618_s9] sm:$0xff] %v5886_v57 }
 0x7a2   : > { %5876 = vrot.lane.b32.xlu1 %v10523_v7, %s6724_s25  ;;  %v5701_v14 = vpop.permute.xlu0 %5700 }
 0x7a3   : > { %v5889_v60 = vsel %vm1130_vm0, %v5888_v16, %v5701_v14 }
 0x7a4   : > { %5880 = vrot.lane.b32.xlu0 %v10509_v3, %s6725_s27  ;;  %v5891_v43 = vsel %vm5890_vm9, %v5889_v60, %v5705_v44 }
 0x7a5   : > { %5852 = vrot.lane.b32.xlu2 %v10392_v33, %s6725_s27  ;;  %v5769_v56 = vpop.permute.xlu2 %5768  ;;  %5938 = vst [vmem:[%s10618_s9 + $0x8] sm:$0xff] %v5891_v43  ;;  %v5112_v33 = vsel %vm4903_vm4, %v5111_v48, %v10007_v4 }
 0x7ac   : > { %v5741_v49 = vpop.permute.xlu1 %5740 }
 0x7ae   : > { %v5725_v38 = vpop.permute.xlu0 %5724 }
 0x7af   : > { %v5745_v7 = vpop.permute.xlu2 %5744  ;;  %v5897_v55 = vsel %vm5887_vm8, %v5721_v15, %v5725_v38 }
 0x7b0   : > { %v5902_v8 = vsel %vm5883_vm6, %v5224_v17, %v5745_v7 }
 0x7b4   : > { %v5717_v39 = vpop.permute.xlu1 %5716 }
 0x7b5   : > { %v5895_v3 = vsel %vm5883_vm6, %v5112_v33, %v5717_v39 }
 0x7b6   : > { %v5896_v36 = vsel %vm5885_vm7, %v5895_v3, %v5721_v15  ;;  %v5737_v58 = vpop.permute.xlu0 %5736  ;;  %v5447_v15 = vrot.slane %v10567_v40, 4 }
 0x7b7   : > { %v5757_v47 = vpop.permute.xlu2 %5756  ;;  %5940 = vst [vmem:[%s10618_s9 + $0x18] sm:$0xff] %v5896_v36  ;;  %v5900_v29 = vsel %vm4733_vm3, %v5733_v31, %v5737_v58 }
 0x7b8   : > { %v5901_v18 = vsel %vm5893_vm5, %v5900_v29, %v5741_v49  ;;  %v5448_v16 = vsel %vm4903_vm4, %v5447_v15, %v10559_v50 }
 0x7b9   : > { %5942 = vst [vmem:[%s10618_s9 + $0x28] sm:$0xff] %v5901_v18 }
 0x7bc   : > { %v5729_v46 = vpop.permute.xlu1 %5728 }
 0x7bd   : > { %v5898_v6 = vsel %vm1130_vm0, %v5897_v55, %v5729_v46 }
 0x7be   : > { %v5899_v4 = vsel %vm5890_vm9, %v5898_v6, %v5733_v31  ;;  %v5761_v62 = vpop.permute.xlu0 %5760 }
 0x7bf   : > { %v5781_v42 = vpop.permute.xlu2 %5780  ;;  %5941 = vst [vmem:[%s10618_s9 + $0x20] sm:$0xff] %v5899_v4 }
 0x7c4   : > { %v5753_v27 = vpop.permute.xlu1 %5752 }
 0x7c6   : > { %v5749_v61 = vpop.permute.xlu0 %5748 }
 0x7c7   : > { %v5793_v35 = vpop.permute.xlu2 %5792  ;;  %v5903_v12 = vsel %vm5885_vm7, %v5902_v8, %v5749_v61  ;;  %v5904_v30 = vsel %vm5887_vm8, %v5749_v61, %v5753_v27 }
 0x7c8   : > { %v5905_v59 = vsel %vm1130_vm0, %v5904_v30, %v5757_v47  ;;  %5943 = vst [vmem:[%s10618_s9 + $0x30] sm:$0xff] %v5903_v12 }
 0x7c9   : > { %v5906_v0 = vsel %vm5890_vm9, %v5905_v59, %v5761_v62 }
 0x7ca   : > { %5944 = vst [vmem:[%s10618_s9 + $0x38] sm:$0xff] %v5906_v0 }
 0x7cc   : > { %v5765_v5 = vpop.permute.xlu1 %5764 }
 0x7cd   : > { %v5907_v1 = vsel %vm4733_vm3, %v5761_v62, %v5765_v5  ;;  %v5671_v5 = vrot.slane %v10613_v54, 4 }
 0x7ce   : > { %v5908_v11 = vsel %vm5893_vm5, %v5907_v1, %v5769_v56  ;;  %v5797_v22 = vpop.permute.xlu0 %5796 }
 0x7cf   : > { %v5817_v45 = vpop.permute.xlu2 %5816  ;;  %5945 = vst [vmem:[%s10618_s9 + $0x40] sm:$0xff] %v5908_v11  ;;  %v5672_v11 = vsel %vm4903_vm4, %v5671_v5, %v10606_v37 }
 0x7d4   : > { %v5789_v10 = vpop.permute.xlu1 %5788 }
 0x7d5   : > { %v5914_v63 = vsel %vm4733_vm3, %v5789_v10, %v5793_v35  ;;  %v5559_v35 = vrot.slane %v10596_v19, 4 }
 0x7d6   : > { %v5915_v41 = vsel %vm5893_vm5, %v5914_v63, %v5797_v22  ;;  %v5773_v31 = vpop.permute.xlu0 %5772 }
 0x7d7   : > { %v5805_v44 = vpop.permute.xlu2 %5804  ;;  %5948 = vst [vmem:[%s10618_s9 + $0x58] sm:$0xff] %v5915_v41  ;;  %v5909_v52 = vsel %vm5883_vm6, %v5336_v2, %v5773_v31  ;;  %v5560_v12 = vsel %vm4903_vm4, %v5559_v35, %v10592_v20 }
 0x7dc   : > { %v5777_v9 = vpop.permute.xlu1 %5776 }
 0x7dd   : > { %v5910_v32 = vsel %vm5885_vm7, %v5909_v52, %v5777_v9  ;;  %v5911_v21 = vsel %vm5887_vm8, %v5777_v9, %v5781_v42 }
 0x7de   : > { %5946 = vst [vmem:[%s10618_s9 + $0x48] sm:$0xff] %v5910_v32  ;;  %v5785_v51 = vpop.permute.xlu0 %5784 }
 0x7df   : > { %v5845_v26 = vpop.permute.xlu2 %5844  ;;  %v5912_v53 = vsel %vm1130_vm0, %v5911_v21, %v5785_v51 }
 0x7e0   : > { %v5913_v28 = vsel %vm5890_vm9, %v5912_v53, %v5789_v10 }
 0x7e1   : > { %5947 = vst [vmem:[%s10618_s9 + $0x50] sm:$0xff] %v5913_v28 }
 0x7e4   : > { %v5825_v25 = vpop.permute.xlu1 %5824 }
 0x7e6   : > { %v5809_v23 = vpop.permute.xlu0 %5808  ;;  %v3148_v14 = vpop.f32.mrf.mxu1 }
 0x7e7   : > { %v5833_v13 = vpop.permute.xlu2 %5832  ;;  %v3492_v43 = vpop.f32.mrf.mxu0  ;;  %v5918_v33 = vsel %vm5887_vm8, %v5805_v44, %v5809_v23 }
 0x7eb   : > { %v3320_v40 = vpop.f32.mrf.mxu3  ;;  %v3664_v39 = vpop.f32.mrf.mxu2 }
 0x7ec   : > { %v5801_v57 = vpop.permute.xlu1 %5800 }
 0x7ed   : > { %v5916_v60 = vsel %vm5883_vm6, %v5448_v16, %v5801_v57 }
 0x7ee   : > { %v5917_v56 = vsel %vm5885_vm7, %v5916_v60, %v5805_v44  ;;  %v5821_v7 = vpop.permute.xlu0 %5820  ;;  %v3149_v3 = vpop.f32.mrf.mxu1 }
 0x7ef   : > { %v5865_v49 = vpop.permute.xlu2 %5864  ;;  %5949 = vst [vmem:[%s10618_s9 + $0x60] sm:$0xff] %v5917_v56  ;;  %v5921_v38 = vsel %vm4733_vm3, %v5817_v45, %v5821_v7  ;;  %v3493_v47 = vpop.f32.mrf.mxu0 }
 0x7f0   : > { %v5922_v48 = vsel %vm5893_vm5, %v5921_v38, %v5825_v25 }
 0x7f1   : > { %5951 = vst [vmem:[%s10618_s9 + $0x70] sm:$0xff] %v5922_v48 }
 0x7f3   : > { %v3321_v55 = vpop.f32.mrf.mxu3  ;;  %v3665_v46 = vpop.f32.mrf.mxu2 }
 0x7f4   : > { %v5813_v50 = vpop.permute.xlu1 %5812 }
 0x7f5   : > { %v5919_v36 = vsel %vm1130_vm0, %v5918_v33, %v5813_v50 }
 0x7f6   : > { %v5920_v58 = vsel %vm5890_vm9, %v5919_v36, %v5817_v45  ;;  %v5837_v18 = vpop.permute.xlu0 %5836 }
 0x7f7   : > { %v5869_v29 = vpop.permute.xlu2 %5868  ;;  %5950 = vst [vmem:[%s10618_s9 + $0x68] sm:$0xff] %v5920_v58  ;;  %v5925_v6 = vsel %vm5887_vm8, %v5833_v13, %v5837_v18 }
 0x7fc   : > { %v5841_v4 = vpop.permute.xlu1 %5840 }
 0x7fd   : > { %v5926_v42 = vsel %vm1130_vm0, %v5925_v6, %v5841_v4 }
 0x7fe   : > { %v5927_v62 = vsel %vm5890_vm9, %v5926_v42, %v5845_v26  ;;  %v5849_v27 = vpop.permute.xlu0 %5848 }
 0x7ff   : > { %v5853_v34 = vpop.permute.xlu2 %5852  ;;  %5953 = vst [vmem:[%s10618_s9 + $0x80] sm:$0xff] %v5927_v62  ;;  %v5928_v17 = vsel %vm4733_vm3, %v5845_v26, %v5849_v27 }
 0x800   : > { %v5929_v8 = vsel %vm5893_vm5, %v5928_v17, %v5853_v34 }
 0x801   : > { %5954 = vst [vmem:[%s10618_s9 + $0x88] sm:$0xff] %v5929_v8 }
 0x804   : > { %v5861_v61 = vpop.permute.xlu1 %5860 }
 0x805   : > { %v5932_v1 = vsel %vm5887_vm8, %v5861_v61, %v5865_v49 }
 0x806   : > { %v5829_v30 = vpop.permute.xlu0 %5828  ;;  %v5933_v20 = vsel %vm1130_vm0, %v5932_v1, %v5869_v29 }
 0x807   : > { %v5923_v59 = vsel %vm5883_vm6, %v5560_v12, %v5829_v30 }
 0x808   : > { %v5924_v0 = vsel %vm5885_vm7, %v5923_v59, %v5833_v13 }
 0x809   : > { %5952 = vst [vmem:[%s10618_s9 + $0x78] sm:$0xff] %v5924_v0 }
 0x80c   : > { %v5857_v19 = vpop.permute.xlu1 %5856 }
 0x80d   : > { %v5930_v45 = vsel %vm5883_vm6, %v5672_v11, %v5857_v19 }
 0x80e   : > { %v5931_v22 = vsel %vm5885_vm7, %v5930_v45, %v5861_v61  ;;  %v5873_v10 = vpop.permute.xlu0 %5872 }
 0x80f   : > { %5955 = vst [vmem:[%s10618_s9 + $0x90] sm:$0xff] %v5931_v22  ;;  %v5934_v63 = vsel %vm5890_vm9, %v5933_v20, %v5873_v10 }
 0x810   : > { %5956 = vst [vmem:[%s10618_s9 + $0x98] sm:$0xff] %v5934_v63 }
 0x814   : > { %v5877_v54 = vpop.permute.xlu1 %5876 }
 0x815   : > { %v5935_v41 = vsel %vm4733_vm3, %v5873_v10, %v5877_v54 }
 0x816   : > { %v5881_v44 = vpop.permute.xlu0 %5880 }
 0x817   : > { %v5936_v31 = vsel %vm5893_vm5, %v5935_v41, %v5881_v44 }
 0x818   : > { %5957 = vst [vmem:[%s10618_s9 + $0xa0] sm:$0xff] %v5936_v31 }
 0x819 PF: > { %s12_s11 = sadd.s32 1, %s6722_s11   ;;  %s11712_s9 = smov %s6718_s10 }
 0x81a   : > { %p9_p5 = scmp.ge.s32.totalorder %s12_s11, 9   ;;  %s11713_s10 = smov %s11715_s12 }
 0x81c   :  { %11 = sbr.rel (!%p9_p5) target bundleno = 2 (0x2), region = 60 }

</bundles_post_ra>
